<compile_context>
chip_gen: v7x
topology: tpu7x:2x2x1
jax: 0.10.0
libtpu: 0.0.40
codegen_flags: <defaults>
</compile_context>

<pallas_src>
import functools
import math

import jax
import jax.numpy as jnp
from jax import lax
from jax.experimental import pallas as pl
from jax.experimental.pallas import tpu as pltpu

_SQRT_HALF = 0.7071067811865476  # 1/sqrt(2) for exact-erf GELU
_LN_EPS = 1e-6


# ------------------------------ Pallas kernel -------------------------------

def _fpn_block_kernel(x_ref, w1_ref, b1_ref, g_ref, be_ref, w2_ref, b2_ref,
                      o_ref):
    """Fused ConvT(k2,s2) -> LayerNorm(C) -> GELU -> ConvT(k2,s2), one row tile.

    x_ref : (P, Cin)          P = rh*W input pixels (bf16), NHWC row-major
    w1_ref: (Cin, 4*C)        columns ordered (di, dj, co)  (1st ConvT sub-pixels)
    w2_ref: (C,   4*C)        columns ordered (dk, dl, co)  (2nd ConvT sub-pixels)
    o_ref : (rh, 4, W, 4*C)   o[h, 2di+dk, w, (2dj+dl)*C + co] = output pixel
                              (4h+2di+dk, 4w+2dj+dl, co) of the 4x-upsampled map
    """
    rh = o_ref.shape[0]
    W = o_ref.shape[2]
    C = g_ref.shape[-1]
    P = x_ref.shape[0]

    # ConvT #1 : one MXU matmul over the packed sub-pixel columns (bf16 x bf16).
    y1 = jnp.dot(x_ref[...], w1_ref[...], preferred_element_type=jnp.float32)
    y1 = y1 + b1_ref[...]                        # (P, 4*C)  f32

    gamma = g_ref[...]                           # (1, C)    f32
    beta = be_ref[...]                           # (1, C)    f32
    inv_c = 1.0 / C

    # Norm2d == LayerNorm over channels (eps=1e-6) + exact-erf GELU per sub-pixel
    # group.  One-pass stats: sum and sum-of-squares issue back-to-back, halving
    # the dependent XLU-reduction chain vs mean -> subtract -> mean(xc^2).
    z_parts = []
    for q in range(4):                           # q = 2*di + dj
        yq = y1[:, q * C:(q + 1) * C]
        s1 = jnp.sum(yq, axis=-1, keepdims=True)
        s2 = jnp.sum(yq * yq, axis=-1, keepdims=True)
        mu = s1 * inv_c
        var = jnp.maximum(s2 * inv_c - mu * mu, 0.0)
        z = (yq - mu) * lax.rsqrt(var + _LN_EPS) * gamma + beta
        # exact-erf GELU (torch.nn.GELU default).
        # TODO(synk): tanh-approx GELU on v5e if the VALU slot saturates.
        z = 0.5 * z * (1.0 + lax.erf(z * _SQRT_HALF))
        z_parts.append(z.astype(w2_ref.dtype))

    # ConvT #2 : ONE batched MXU matmul (4P,C)x(C,4C) instead of four (P,C) dots
    # (no repeated weight pushes / result-FIFO drains).
    zs = jnp.concatenate(z_parts, axis=0)        # (4*P, C)  bf16
    y2 = jnp.dot(zs, w2_ref[...], preferred_element_type=jnp.float32)
    y2 = y2 + b2_ref[...]                        # (4*P, 4*C) f32

    # Depth-to-space folded into the store pattern.  For each output row offset
    # the 4 column groups are concatenated so every store writes a full
    # lane-dense (rh, 1, W, 4C) slab (4 stores instead of 16 C-wide ones).
    for r_off in range(4):                       # r_off = 2*di + dk
        di, dk = r_off // 2, r_off % 2
        cols = []
        for c_off in range(4):                   # c_off = 2*dj + dl
            dj, dl = c_off // 2, c_off % 2
            q = 2 * di + dj
            s = 2 * dk + dl
            cols.append(y2[q * P:(q + 1) * P, s * C:(s + 1) * C])
        row = jnp.concatenate(cols, axis=-1)     # (P, 4*C), ordered by c_off
        o_ref[:, r_off:r_off + 1, :, :] = (
            row.reshape(rh, 1, W, 4 * C).astype(o_ref.dtype))


# ------------------------------ host wrappers --------------------------------

def _pick_row_tile(G, W, target_pixels=512, min_steps=4):
    """Input rows per grid step.

    * rows*W is a multiple of 8 (sublane-aligned block dim),
    * rows*W <= target_pixels (measured tile scaling flattens past ~512),
    * >= min_steps grid steps when possible (>=2 per v7x TensorCore so the
      software pipeline has work to overlap),
    * rows does NOT have to divide G: the grid is cdiv-sized and the last block
      is masked, so realistic shapes (Hp=Wp=14) keep full-size tiles.
    """
    unit = 8 // math.gcd(W, 8)                       # rows so rows*W % 8 == 0
    cap = max(unit, (target_pixels // (unit * W)) * unit)
    cap = min(cap, pl.cdiv(G, unit) * unit)
    rh = cap
    while rh > unit and pl.cdiv(G, rh) < min_steps:
        rh -= unit
    return rh


def _vmem_limit_bytes(P, Cin, C, out_bytes):
    """VMEM need from actual buffer sizes: double-buffered input/output tiles,
    double-buffered weights, f32 in-kernel intermediates (y1, zs, y2); 1.5x
    margin for compiler scratch, clamped to fit v7x's 64 MiB VMEM."""
    bf16, f32 = 2, 4
    in_buf = 2 * P * Cin * bf16
    out_buf = 2 * (4 * P) * (4 * C) * out_bytes
    weights = 2 * ((Cin + C) * (4 * C) * bf16 + (3 * 4 * C + 2 * C) * f32)
    interm = P * 4 * C * f32 + 4 * P * C * bf16 + 4 * P * 4 * C * f32
    total = in_buf + out_buf + weights + interm
    return int(min(max(total * 3 // 2, 24 * 2 ** 20), 40 * 2 ** 20))


def _fpn_block(x2d, G, W, blk, out_dtype):
    """x2d: (G*W, Cin) NHWC-flattened pixels. Returns (4G*4W, Cout) pixels."""
    w1, b1, gamma, beta, w2, b2 = blk
    Cin = x2d.shape[1]
    C = gamma.shape[-1]
    rh = _pick_row_tile(G, W)
    P = rh * W
    out_bytes = jnp.dtype(out_dtype).itemsize

    def _const(shape):
        # Constant operands: fetched once (constant index_map).
        # TODO(synk): pipeline_mode=pl.Buffered(1) to single-buffer these and
        # reclaim VMEM headroom on v7x once that API is validated here.
        return pl.BlockSpec(shape, lambda i: (0,) * len(shape))

    out4 = pl.pallas_call(
        _fpn_block_kernel,
        out_shape=jax.ShapeDtypeStruct((G, 4, W, 4 * C), out_dtype),
        grid_spec=pltpu.PrefetchScalarGridSpec(
            num_scalar_prefetch=0,
            grid=(pl.cdiv(G, rh),),
            in_specs=[
                pl.BlockSpec((P, Cin), lambda i: (i, 0)),
                _const((Cin, 4 * C)),
                _const((1, 4 * C)),
                _const((1, C)),
                _const((1, C)),
                _const((C, 4 * C)),
                _const((1, 4 * C)),
            ],
            out_specs=pl.BlockSpec((rh, 4, W, 4 * C), lambda i: (i, 0, 0, 0)),
        ),
        compiler_params=pltpu.CompilerParams(
            dimension_semantics=("parallel",),
            vmem_limit_bytes=_vmem_limit_bytes(P, Cin, C, out_bytes),
        ),
    )(x2d, w1, b1, gamma, beta, w2, b2)
    # (G, 4, W, 4*C) flattens contiguously to NHWC rows of the (4G, 4W) grid:
    # element ((g*4+r)*W + w)*4C + s*C + c == row (4g+r, 4w+s), channel c.
    # Pure (free) reshape -- no XLA transpose between stages.
    return out4.reshape(4 * G * 4 * W, C)


def conv_transformer_neck_forward(tokens, params, Hp, Wp, drop_cls_token=True,
                                  compute_dtype=jnp.bfloat16, nchw_output=True):
    """tokens: (B, L, embed_dim).  Returns a 1-tuple with
    (B, out_dim, 16*Hp, 16*Wp) f32 when nchw_output=True (PyTorch layout), or
    (B, 16*Hp, 16*Wp, out_dim) f32 when nchw_output=False (skips the big HBM
    layout transpose entirely -- use when the consumer accepts channels-last)."""
    x = tokens
    if drop_cls_token:
        assert x.shape[1] == 1 + Hp * Wp, (x.shape, Hp, Wp)
        x = x[:, 1:, :]
    else:
        assert x.shape[1] == Hp * Wp, (x.shape, Hp, Wp)
    B, _, embed_dim = x.shape
    C = params["fpn1"][2].shape[-1]

    # PyTorch permute(0,2,1).reshape(B, C, Hp, Wp) == NHWC token grid; bf16 input.
    x2d = x.reshape(B * Hp * Wp, embed_dim).astype(compute_dtype)
    # fpn1: (B, Hp, Wp, E) -> (B, 4Hp, 4Wp, C); bf16 intermediate halves HBM bytes.
    x2d = _fpn_block(x2d, B * Hp, Wp, params["fpn1"], compute_dtype)
    # fpn2: -> (B, 16Hp, 16Wp, C).  In the NCHW path the kernel writes bf16 so
    # the dominant final write and the layout transpose move half the bytes
    # (bf16-level precision, upcast to f32 after the transpose).  In the NHWC
    # path write f32 directly (no transpose follows).
    out_dtype = compute_dtype if nchw_output else jnp.float32
    x2d = _fpn_block(x2d, B * 4 * Hp, 4 * Wp, params["fpn2"], out_dtype)

    x = x2d.reshape(B, 16 * Hp, 16 * Wp, C)
    if not nchw_output:
        return (x,)
    # NCHW to match the PyTorch module's output layout.  Writing NCHW from the
    # kernel would need stride-4 lane interleaving (masked stores), so this
    # stays one fused XLA transpose+upcast over the (smaller) bf16 tensor.
    # TODO(synk): pass nchw_output=False if the downstream consumer is NHWC.
    x = jnp.transpose(x, (0, 3, 1, 2)).astype(jnp.float32)
    return (x,)


# ------------------------------ parameters -----------------------------------

def _stack_convT_weight(w):
    """nn.ConvTranspose2d weight (Cin, Cout, 2, 2) -> (Cin, 4*Cout) with column
    order (di, dj, co): y[:, (2*di+dj)*Cout + co] = sum_ci x[:, ci]*w[ci, co, di, dj]."""
    Cin, Cout = w.shape[0], w.shape[1]
    return jnp.transpose(w, (0, 2, 3, 1)).reshape(Cin, 4 * Cout)


def make_params(key, embed_dim, out_dim, compute_dtype=jnp.bfloat16):
    """Deterministic synthetic parameters with the module's shapes."""
    ks = jax.random.split(key, 12)

    def convT(kw, kb, cin, cout):
        w = 0.05 * jax.random.normal(kw, (cin, cout, 2, 2), jnp.float32)
        b = 0.05 * jax.random.normal(kb, (cout,), jnp.float32)
        return (_stack_convT_weight(w).astype(compute_dtype),
                jnp.tile(b, 4).reshape(1, 4 * cout))

    def ln(kg, kb, c):
        gamma = 1.0 + 0.05 * jax.random.normal(kg, (c,), jnp.float32)
        beta = 0.05 * jax.random.normal(kb, (c,), jnp.float32)
        return gamma.reshape(1, c), beta.reshape(1, c)

    w1, b1 = convT(ks[0], ks[1], embed_dim, out_dim)
    g1, be1 = ln(ks[2], ks[3], out_dim)
    w2, b2 = convT(ks[4], ks[5], out_dim, out_dim)
    w3, b3 = convT(ks[6], ks[7], out_dim, out_dim)
    g2, be2 = ln(ks[8], ks[9], out_dim)
    w4, b4 = convT(ks[10], ks[11], out_dim, out_dim)
    return {"fpn1": (w1, b1, g1, be1, w2, b2),
            "fpn2": (w3, b3, g2, be2, w4, b4)}


# --------------------------- plain-JAX reference ------------------------------

def _reference_forward(tokens, params, Hp, Wp, drop_cls_token=True):
    """Plain-JAX reference mirroring the kernel's bf16 rounding points."""
    x = tokens[:, 1:, :] if drop_cls_token else tokens
    B = x.shape[0]
    x = x.reshape(B, Hp, Wp, -1).astype(jnp.bfloat16).astype(jnp.float32)

    def convT(h, ws, bs):
        Bb, H, W, _ = h.shape
        Cout = ws.shape[1] // 4
        y = jnp.einsum("bhwi,io->bhwo", h, ws) + bs[0]
        y = y.reshape(Bb, H, W, 2, 2, Cout)
        y = jnp.transpose(y, (0, 1, 3, 2, 4, 5)).reshape(Bb, 2 * H, 2 * W, Cout)
        return y

    def block(h, blk, round_out):
        w1, b1, g, be, w2, b2 = [a.astype(jnp.float32) for a in blk]
        y = convT(h, w1, b1)
        mu = jnp.mean(y, axis=-1, keepdims=True)
        xc = y - mu
        var = jnp.mean(xc * xc, axis=-1, keepdims=True)
        z = xc * lax.rsqrt(var + _LN_EPS) * g[0] + be[0]
        z = 0.5 * z * (1.0 + lax.erf(z * _SQRT_HALF))
        z = z.astype(jnp.bfloat16).astype(jnp.float32)
        y = convT(z, w2, b2)
        if round_out:
            y = y.astype(jnp.bfloat16).astype(jnp.float32)
        return y

    x = block(x, params["fpn1"], round_out=True)
    # The Pallas fpn2 stage writes bf16 (upcast to f32 after the NCHW permute).
    x = block(x, params["fpn2"], round_out=True)
    return jnp.transpose(x, (0, 3, 1, 2))


# ----------------------------------- main -------------------------------------

if __name__ == "__main__":
    # Small, module-consistent shapes.  output_embed_dim=32 -> 4*C = 128, so the
    # kernel's stores are lane-dense even at test size (production C=256 gives
    # 4C=1024 and C%128==0 for the LayerNorm reductions as well).
    B = 2
    embed_dim = 64
    output_embed_dim = 32
    Hp = Wp = 4
    L = 1 + Hp * Wp  # with cls token (dropped in forward)

    key = jax.random.PRNGKey(0)
    k_tok, k_par = jax.random.split(key)
    tokens = jax.random.normal(k_tok, (B, L, embed_dim), jnp.float32)
    params = make_params(k_par, embed_dim, output_embed_dim)

    fwd = jax.jit(functools.partial(conv_transformer_neck_forward,
                                    Hp=Hp, Wp=Wp, drop_cls_token=True))
    (x,) = jax.block_until_ready(fwd(tokens, params))

    H_out, W_out = 16 * Hp, 16 * Wp
    assert x.shape == (B, output_embed_dim, H_out, W_out), x.shape
    assert x.dtype == jnp.float32, x.dtype
    assert bool(jnp.all(jnp.isfinite(x)))

    # Numerical check against a plain-JAX reference with matching bf16 rounding.
    ref = _reference_forward(tokens, params, Hp, Wp, drop_cls_token=True)
    max_err = float(jnp.max(jnp.abs(x - ref)))
    assert max_err < 3e-2, max_err

    print("KERNEL_OK")
</pallas_src>

<mosaic_0001>
module attributes {stable_mosaic.version = 11 : i64} {
  func.func @_fpn_block_kernel(%arg0: i32, %arg1: memref<8x64xbf16, #tpu.memory_space<vmem>>, %arg2: memref<64x128xbf16, #tpu.memory_space<vmem>>, %arg3: memref<1x128xf32, #tpu.memory_space<vmem>>, %arg4: memref<1x32xf32, #tpu.memory_space<vmem>>, %arg5: memref<1x32xf32, #tpu.memory_space<vmem>>, %arg6: memref<32x128xbf16, #tpu.memory_space<vmem>>, %arg7: memref<1x128xf32, #tpu.memory_space<vmem>>, %arg8: memref<2x4x4x128xbf16, #tpu.memory_space<vmem>>) attributes {dimension_semantics = [#tpu.dimension_semantics<parallel>], iteration_bounds = array<i64: 4>, scalar_prefetch = 0 : i64, scratch_operands = 0 : i64, tpu.core_type = #tpu.core_type<tc>, window_params = [{transform_indices = @transform_0, window_bounds = array<i64: 8, 64>}, {pipeline_mode = #tpu.pipeline_mode<synchronous>, transform_indices = @transform_1, window_bounds = array<i64: 64, 128>}, {pipeline_mode = #tpu.pipeline_mode<synchronous>, transform_indices = @transform_2, window_bounds = array<i64: 1, 128>}, {pipeline_mode = #tpu.pipeline_mode<synchronous>, transform_indices = @transform_3, window_bounds = array<i64: 1, 32>}, {pipeline_mode = #tpu.pipeline_mode<synchronous>, transform_indices = @transform_4, window_bounds = array<i64: 1, 32>}, {pipeline_mode = #tpu.pipeline_mode<synchronous>, transform_indices = @transform_5, window_bounds = array<i64: 32, 128>}, {pipeline_mode = #tpu.pipeline_mode<synchronous>, transform_indices = @transform_6, window_bounds = array<i64: 1, 128>}, {transform_indices = @transform_7, window_bounds = array<i64: 2, 4, 4, 128>}]} {
    %c0 = arith.constant 0 : index
    %c0_0 = arith.constant 0 : index
    %0 = vector.load %arg1[%c0, %c0_0] : memref<8x64xbf16, #tpu.memory_space<vmem>>, vector<8x64xbf16>
    %c0_1 = arith.constant 0 : index
    %c0_2 = arith.constant 0 : index
    %1 = vector.load %arg2[%c0_1, %c0_2] : memref<64x128xbf16, #tpu.memory_space<vmem>>, vector<64x128xbf16>
    %cst = arith.constant dense<0.000000e+00> : vector<8x128xf32>
    %2 = tpu.matmul %0, %1, %cst {dimension_numbers = #tpu.dot_dimension_numbers<[1], [0], [0], [1], [0, 0, 1, 1], [], []>} : vector<8x64xbf16>, vector<64x128xbf16>, vector<8x128xf32> -> vector<8x128xf32>
    %c0_3 = arith.constant 0 : index
    %c0_4 = arith.constant 0 : index
    %3 = vector.load %arg3[%c0_3, %c0_4] : memref<1x128xf32, #tpu.memory_space<vmem>>, vector<1x128xf32>
    %4 = vector.broadcast %3 : vector<1x128xf32> to vector<8x128xf32>
    %5 = arith.addf %2, %4 : vector<8x128xf32>
    %c0_5 = arith.constant 0 : index
    %c0_6 = arith.constant 0 : index
    %6 = vector.load %arg4[%c0_5, %c0_6] : memref<1x32xf32, #tpu.memory_space<vmem>>, vector<1x32xf32>
    %c0_7 = arith.constant 0 : index
    %c0_8 = arith.constant 0 : index
    %7 = vector.load %arg5[%c0_7, %c0_8] : memref<1x32xf32, #tpu.memory_space<vmem>>, vector<1x32xf32>
    %8 = vector.extract_strided_slice %5 {offsets = [0, 0], sizes = [8, 32], strides = [1, 1]} : vector<8x128xf32> to vector<8x32xf32>
    %cst_9 = arith.constant dense<0.000000e+00> : vector<8xf32>
    %9 = vector.multi_reduction <add>, %8, %cst_9 [1] : vector<8x32xf32> to vector<8xf32>
    %10 = vector.shape_cast %9 : vector<8xf32> to vector<8x1xf32>
    %11 = arith.mulf %8, %8 : vector<8x32xf32>
    %cst_10 = arith.constant dense<0.000000e+00> : vector<8xf32>
    %12 = vector.multi_reduction <add>, %11, %cst_10 [1] : vector<8x32xf32> to vector<8xf32>
    %13 = vector.shape_cast %12 : vector<8xf32> to vector<8x1xf32>
    %cst_11 = arith.constant 3.125000e-02 : f32
    %14 = vector.broadcast %cst_11 : f32 to vector<8x1xf32>
    %15 = arith.mulf %10, %14 : vector<8x1xf32>
    %cst_12 = arith.constant 3.125000e-02 : f32
    %16 = vector.broadcast %cst_12 : f32 to vector<8x1xf32>
    %17 = arith.mulf %13, %16 : vector<8x1xf32>
    %18 = arith.mulf %15, %15 : vector<8x1xf32>
    %19 = arith.subf %17, %18 : vector<8x1xf32>
    %cst_13 = arith.constant 0.000000e+00 : f32
    %20 = vector.broadcast %cst_13 : f32 to vector<8x1xf32>
    %21 = arith.maximumf %19, %20 : vector<8x1xf32>
    %22 = vector.broadcast %15 : vector<8x1xf32> to vector<8x32xf32>
    %23 = arith.subf %8, %22 : vector<8x32xf32>
    %cst_14 = arith.constant 9.99999997E-7 : f32
    %24 = vector.broadcast %cst_14 : f32 to vector<8x1xf32>
    %25 = arith.addf %21, %24 : vector<8x1xf32>
    %26 = math.rsqrt %25 : vector<8x1xf32>
    %27 = vector.broadcast %26 : vector<8x1xf32> to vector<8x32xf32>
    %28 = arith.mulf %23, %27 : vector<8x32xf32>
    %29 = vector.broadcast %6 : vector<1x32xf32> to vector<8x32xf32>
    %30 = arith.mulf %28, %29 : vector<8x32xf32>
    %31 = vector.broadcast %7 : vector<1x32xf32> to vector<8x32xf32>
    %32 = arith.addf %30, %31 : vector<8x32xf32>
    %cst_15 = arith.constant 5.000000e-01 : f32
    %33 = vector.broadcast %cst_15 : f32 to vector<8x32xf32>
    %34 = arith.mulf %33, %32 : vector<8x32xf32>
    %cst_16 = arith.constant 0.707106769 : f32
    %35 = vector.broadcast %cst_16 : f32 to vector<8x32xf32>
    %36 = arith.mulf %32, %35 : vector<8x32xf32>
    %37 = math.erf %36 : vector<8x32xf32>
    %cst_17 = arith.constant 1.000000e+00 : f32
    %38 = vector.broadcast %cst_17 : f32 to vector<8x32xf32>
    %39 = arith.addf %38, %37 : vector<8x32xf32>
    %40 = arith.mulf %34, %39 : vector<8x32xf32>
    %41 = arith.truncf %40 : vector<8x32xf32> to vector<8x32xbf16>
    %42 = vector.extract_strided_slice %5 {offsets = [0, 32], sizes = [8, 32], strides = [1, 1]} : vector<8x128xf32> to vector<8x32xf32>
    %cst_18 = arith.constant dense<0.000000e+00> : vector<8xf32>
    %43 = vector.multi_reduction <add>, %42, %cst_18 [1] : vector<8x32xf32> to vector<8xf32>
    %44 = vector.shape_cast %43 : vector<8xf32> to vector<8x1xf32>
    %45 = arith.mulf %42, %42 : vector<8x32xf32>
    %cst_19 = arith.constant dense<0.000000e+00> : vector<8xf32>
    %46 = vector.multi_reduction <add>, %45, %cst_19 [1] : vector<8x32xf32> to vector<8xf32>
    %47 = vector.shape_cast %46 : vector<8xf32> to vector<8x1xf32>
    %cst_20 = arith.constant 3.125000e-02 : f32
    %48 = vector.broadcast %cst_20 : f32 to vector<8x1xf32>
    %49 = arith.mulf %44, %48 : vector<8x1xf32>
    %cst_21 = arith.constant 3.125000e-02 : f32
    %50 = vector.broadcast %cst_21 : f32 to vector<8x1xf32>
    %51 = arith.mulf %47, %50 : vector<8x1xf32>
    %52 = arith.mulf %49, %49 : vector<8x1xf32>
    %53 = arith.subf %51, %52 : vector<8x1xf32>
    %cst_22 = arith.constant 0.000000e+00 : f32
    %54 = vector.broadcast %cst_22 : f32 to vector<8x1xf32>
    %55 = arith.maximumf %53, %54 : vector<8x1xf32>
    %56 = vector.broadcast %49 : vector<8x1xf32> to vector<8x32xf32>
    %57 = arith.subf %42, %56 : vector<8x32xf32>
    %cst_23 = arith.constant 9.99999997E-7 : f32
    %58 = vector.broadcast %cst_23 : f32 to vector<8x1xf32>
    %59 = arith.addf %55, %58 : vector<8x1xf32>
    %60 = math.rsqrt %59 : vector<8x1xf32>
    %61 = vector.broadcast %60 : vector<8x1xf32> to vector<8x32xf32>
    %62 = arith.mulf %57, %61 : vector<8x32xf32>
    %63 = vector.broadcast %6 : vector<1x32xf32> to vector<8x32xf32>
    %64 = arith.mulf %62, %63 : vector<8x32xf32>
    %65 = vector.broadcast %7 : vector<1x32xf32> to vector<8x32xf32>
    %66 = arith.addf %64, %65 : vector<8x32xf32>
    %cst_24 = arith.constant 5.000000e-01 : f32
    %67 = vector.broadcast %cst_24 : f32 to vector<8x32xf32>
    %68 = arith.mulf %67, %66 : vector<8x32xf32>
    %cst_25 = arith.constant 0.707106769 : f32
    %69 = vector.broadcast %cst_25 : f32 to vector<8x32xf32>
    %70 = arith.mulf %66, %69 : vector<8x32xf32>
    %71 = math.erf %70 : vector<8x32xf32>
    %cst_26 = arith.constant 1.000000e+00 : f32
    %72 = vector.broadcast %cst_26 : f32 to vector<8x32xf32>
    %73 = arith.addf %72, %71 : vector<8x32xf32>
    %74 = arith.mulf %68, %73 : vector<8x32xf32>
    %75 = arith.truncf %74 : vector<8x32xf32> to vector<8x32xbf16>
    %76 = vector.extract_strided_slice %5 {offsets = [0, 64], sizes = [8, 32], strides = [1, 1]} : vector<8x128xf32> to vector<8x32xf32>
    %cst_27 = arith.constant dense<0.000000e+00> : vector<8xf32>
    %77 = vector.multi_reduction <add>, %76, %cst_27 [1] : vector<8x32xf32> to vector<8xf32>
    %78 = vector.shape_cast %77 : vector<8xf32> to vector<8x1xf32>
    %79 = arith.mulf %76, %76 : vector<8x32xf32>
    %cst_28 = arith.constant dense<0.000000e+00> : vector<8xf32>
    %80 = vector.multi_reduction <add>, %79, %cst_28 [1] : vector<8x32xf32> to vector<8xf32>
    %81 = vector.shape_cast %80 : vector<8xf32> to vector<8x1xf32>
    %cst_29 = arith.constant 3.125000e-02 : f32
    %82 = vector.broadcast %cst_29 : f32 to vector<8x1xf32>
    %83 = arith.mulf %78, %82 : vector<8x1xf32>
    %cst_30 = arith.constant 3.125000e-02 : f32
    %84 = vector.broadcast %cst_30 : f32 to vector<8x1xf32>
    %85 = arith.mulf %81, %84 : vector<8x1xf32>
    %86 = arith.mulf %83, %83 : vector<8x1xf32>
    %87 = arith.subf %85, %86 : vector<8x1xf32>
    %cst_31 = arith.constant 0.000000e+00 : f32
    %88 = vector.broadcast %cst_31 : f32 to vector<8x1xf32>
    %89 = arith.maximumf %87, %88 : vector<8x1xf32>
    %90 = vector.broadcast %83 : vector<8x1xf32> to vector<8x32xf32>
    %91 = arith.subf %76, %90 : vector<8x32xf32>
    %cst_32 = arith.constant 9.99999997E-7 : f32
    %92 = vector.broadcast %cst_32 : f32 to vector<8x1xf32>
    %93 = arith.addf %89, %92 : vector<8x1xf32>
    %94 = math.rsqrt %93 : vector<8x1xf32>
    %95 = vector.broadcast %94 : vector<8x1xf32> to vector<8x32xf32>
    %96 = arith.mulf %91, %95 : vector<8x32xf32>
    %97 = vector.broadcast %6 : vector<1x32xf32> to vector<8x32xf32>
    %98 = arith.mulf %96, %97 : vector<8x32xf32>
    %99 = vector.broadcast %7 : vector<1x32xf32> to vector<8x32xf32>
    %100 = arith.addf %98, %99 : vector<8x32xf32>
    %cst_33 = arith.constant 5.000000e-01 : f32
    %101 = vector.broadcast %cst_33 : f32 to vector<8x32xf32>
    %102 = arith.mulf %101, %100 : vector<8x32xf32>
    %cst_34 = arith.constant 0.707106769 : f32
    %103 = vector.broadcast %cst_34 : f32 to vector<8x32xf32>
    %104 = arith.mulf %100, %103 : vector<8x32xf32>
    %105 = math.erf %104 : vector<8x32xf32>
    %cst_35 = arith.constant 1.000000e+00 : f32
    %106 = vector.broadcast %cst_35 : f32 to vector<8x32xf32>
    %107 = arith.addf %106, %105 : vector<8x32xf32>
    %108 = arith.mulf %102, %107 : vector<8x32xf32>
    %109 = arith.truncf %108 : vector<8x32xf32> to vector<8x32xbf16>
    %110 = vector.extract_strided_slice %5 {offsets = [0, 96], sizes = [8, 32], strides = [1, 1]} : vector<8x128xf32> to vector<8x32xf32>
    %cst_36 = arith.constant dense<0.000000e+00> : vector<8xf32>
    %111 = vector.multi_reduction <add>, %110, %cst_36 [1] : vector<8x32xf32> to vector<8xf32>
    %112 = vector.shape_cast %111 : vector<8xf32> to vector<8x1xf32>
    %113 = arith.mulf %110, %110 : vector<8x32xf32>
    %cst_37 = arith.constant dense<0.000000e+00> : vector<8xf32>
    %114 = vector.multi_reduction <add>, %113, %cst_37 [1] : vector<8x32xf32> to vector<8xf32>
    %115 = vector.shape_cast %114 : vector<8xf32> to vector<8x1xf32>
    %cst_38 = arith.constant 3.125000e-02 : f32
    %116 = vector.broadcast %cst_38 : f32 to vector<8x1xf32>
    %117 = arith.mulf %112, %116 : vector<8x1xf32>
    %cst_39 = arith.constant 3.125000e-02 : f32
    %118 = vector.broadcast %cst_39 : f32 to vector<8x1xf32>
    %119 = arith.mulf %115, %118 : vector<8x1xf32>
    %120 = arith.mulf %117, %117 : vector<8x1xf32>
    %121 = arith.subf %119, %120 : vector<8x1xf32>
    %cst_40 = arith.constant 0.000000e+00 : f32
    %122 = vector.broadcast %cst_40 : f32 to vector<8x1xf32>
    %123 = arith.maximumf %121, %122 : vector<8x1xf32>
    %124 = vector.broadcast %117 : vector<8x1xf32> to vector<8x32xf32>
    %125 = arith.subf %110, %124 : vector<8x32xf32>
    %cst_41 = arith.constant 9.99999997E-7 : f32
    %126 = vector.broadcast %cst_41 : f32 to vector<8x1xf32>
    %127 = arith.addf %123, %126 : vector<8x1xf32>
    %128 = math.rsqrt %127 : vector<8x1xf32>
    %129 = vector.broadcast %128 : vector<8x1xf32> to vector<8x32xf32>
    %130 = arith.mulf %125, %129 : vector<8x32xf32>
    %131 = vector.broadcast %6 : vector<1x32xf32> to vector<8x32xf32>
    %132 = arith.mulf %130, %131 : vector<8x32xf32>
    %133 = vector.broadcast %7 : vector<1x32xf32> to vector<8x32xf32>
    %134 = arith.addf %132, %133 : vector<8x32xf32>
    %cst_42 = arith.constant 5.000000e-01 : f32
    %135 = vector.broadcast %cst_42 : f32 to vector<8x32xf32>
    %136 = arith.mulf %135, %134 : vector<8x32xf32>
    %cst_43 = arith.constant 0.707106769 : f32
    %137 = vector.broadcast %cst_43 : f32 to vector<8x32xf32>
    %138 = arith.mulf %134, %137 : vector<8x32xf32>
    %139 = math.erf %138 : vector<8x32xf32>
    %cst_44 = arith.constant 1.000000e+00 : f32
    %140 = vector.broadcast %cst_44 : f32 to vector<8x32xf32>
    %141 = arith.addf %140, %139 : vector<8x32xf32>
    %142 = arith.mulf %136, %141 : vector<8x32xf32>
    %143 = arith.truncf %142 : vector<8x32xf32> to vector<8x32xbf16>
    %144 = tpu.concatenate %41, %75, %109, %143 in 0 : vector<8x32xbf16>, vector<8x32xbf16>, vector<8x32xbf16>, vector<8x32xbf16> -> vector<32x32xbf16>
    %c0_45 = arith.constant 0 : index
    %c0_46 = arith.constant 0 : index
    %145 = vector.load %arg6[%c0_45, %c0_46] : memref<32x128xbf16, #tpu.memory_space<vmem>>, vector<32x128xbf16>
    %cst_47 = arith.constant dense<0.000000e+00> : vector<32x128xf32>
    %146 = tpu.matmul %144, %145, %cst_47 {dimension_numbers = #tpu.dot_dimension_numbers<[1], [0], [0], [1], [0, 0, 1, 1], [], []>} : vector<32x32xbf16>, vector<32x128xbf16>, vector<32x128xf32> -> vector<32x128xf32>
    %c0_48 = arith.constant 0 : index
    %c0_49 = arith.constant 0 : index
    %147 = vector.load %arg7[%c0_48, %c0_49] : memref<1x128xf32, #tpu.memory_space<vmem>>, vector<1x128xf32>
    %148 = vector.broadcast %147 : vector<1x128xf32> to vector<32x128xf32>
    %149 = arith.addf %146, %148 : vector<32x128xf32>
    %150 = vector.extract_strided_slice %149 {offsets = [0, 0], sizes = [8, 32], strides = [1, 1]} : vector<32x128xf32> to vector<8x32xf32>
    %151 = vector.extract_strided_slice %149 {offsets = [0, 32], sizes = [8, 32], strides = [1, 1]} : vector<32x128xf32> to vector<8x32xf32>
    %152 = vector.extract_strided_slice %149 {offsets = [8, 0], sizes = [8, 32], strides = [1, 1]} : vector<32x128xf32> to vector<8x32xf32>
    %153 = vector.extract_strided_slice %149 {offsets = [8, 32], sizes = [8, 32], strides = [1, 1]} : vector<32x128xf32> to vector<8x32xf32>
    %154 = tpu.concatenate %150, %151, %152, %153 in 1 : vector<8x32xf32>, vector<8x32xf32>, vector<8x32xf32>, vector<8x32xf32> -> vector<8x128xf32>
    %155 = vector.shape_cast %154 : vector<8x128xf32> to vector<2x1x4x128xf32>
    %156 = arith.truncf %155 : vector<2x1x4x128xf32> to vector<2x1x4x128xbf16>
    %c0_50 = arith.constant 0 : index
    %c0_51 = arith.constant 0 : index
    %c0_52 = arith.constant 0 : index
    %c0_53 = arith.constant 0 : index
    %157 = vector.load %arg8[%c0_50, %c0_51, %c0_52, %c0_53] : memref<2x4x4x128xbf16, #tpu.memory_space<vmem>>, vector<2x1x4x128xbf16>
    tpu.vector_store %arg8[%c0_50, %c0_51, %c0_52, %c0_53], %156 {strides = array<i32>} : memref<2x4x4x128xbf16, #tpu.memory_space<vmem>>, vector<2x1x4x128xbf16>,
    %158 = vector.extract_strided_slice %149 {offsets = [0, 64], sizes = [8, 32], strides = [1, 1]} : vector<32x128xf32> to vector<8x32xf32>
    %159 = vector.extract_strided_slice %149 {offsets = [0, 96], sizes = [8, 32], strides = [1, 1]} : vector<32x128xf32> to vector<8x32xf32>
    %160 = vector.extract_strided_slice %149 {offsets = [8, 64], sizes = [8, 32], strides = [1, 1]} : vector<32x128xf32> to vector<8x32xf32>
    %161 = vector.extract_strided_slice %149 {offsets = [8, 96], sizes = [8, 32], strides = [1, 1]} : vector<32x128xf32> to vector<8x32xf32>
    %162 = tpu.concatenate %158, %159, %160, %161 in 1 : vector<8x32xf32>, vector<8x32xf32>, vector<8x32xf32>, vector<8x32xf32> -> vector<8x128xf32>
    %163 = vector.shape_cast %162 : vector<8x128xf32> to vector<2x1x4x128xf32>
    %164 = arith.truncf %163 : vector<2x1x4x128xf32> to vector<2x1x4x128xbf16>
    %c0_54 = arith.constant 0 : index
    %c1 = arith.constant 1 : index
    %c0_55 = arith.constant 0 : index
    %c0_56 = arith.constant 0 : index
    %165 = vector.load %arg8[%c0_54, %c1, %c0_55, %c0_56] : memref<2x4x4x128xbf16, #tpu.memory_space<vmem>>, vector<2x1x4x128xbf16>
    tpu.vector_store %arg8[%c0_54, %c1, %c0_55, %c0_56], %164 {strides = array<i32>} : memref<2x4x4x128xbf16, #tpu.memory_space<vmem>>, vector<2x1x4x128xbf16>,
    %166 = vector.extract_strided_slice %149 {offsets = [16, 0], sizes = [8, 32], strides = [1, 1]} : vector<32x128xf32> to vector<8x32xf32>
    %167 = vector.extract_strided_slice %149 {offsets = [16, 32], sizes = [8, 32], strides = [1, 1]} : vector<32x128xf32> to vector<8x32xf32>
    %168 = vector.extract_strided_slice %149 {offsets = [24, 0], sizes = [8, 32], strides = [1, 1]} : vector<32x128xf32> to vector<8x32xf32>
    %169 = vector.extract_strided_slice %149 {offsets = [24, 32], sizes = [8, 32], strides = [1, 1]} : vector<32x128xf32> to vector<8x32xf32>
    %170 = tpu.concatenate %166, %167, %168, %169 in 1 : vector<8x32xf32>, vector<8x32xf32>, vector<8x32xf32>, vector<8x32xf32> -> vector<8x128xf32>
    %171 = vector.shape_cast %170 : vector<8x128xf32> to vector<2x1x4x128xf32>
    %172 = arith.truncf %171 : vector<2x1x4x128xf32> to vector<2x1x4x128xbf16>
    %c0_57 = arith.constant 0 : index
    %c2 = arith.constant 2 : index
    %c0_58 = arith.constant 0 : index
    %c0_59 = arith.constant 0 : index
    %173 = vector.load %arg8[%c0_57, %c2, %c0_58, %c0_59] : memref<2x4x4x128xbf16, #tpu.memory_space<vmem>>, vector<2x1x4x128xbf16>
    tpu.vector_store %arg8[%c0_57, %c2, %c0_58, %c0_59], %172 {strides = array<i32>} : memref<2x4x4x128xbf16, #tpu.memory_space<vmem>>, vector<2x1x4x128xbf16>,
    %174 = vector.extract_strided_slice %149 {offsets = [16, 64], sizes = [8, 32], strides = [1, 1]} : vector<32x128xf32> to vector<8x32xf32>
    %175 = vector.extract_strided_slice %149 {offsets = [16, 96], sizes = [8, 32], strides = [1, 1]} : vector<32x128xf32> to vector<8x32xf32>
    %176 = vector.extract_strided_slice %149 {offsets = [24, 64], sizes = [8, 32], strides = [1, 1]} : vector<32x128xf32> to vector<8x32xf32>
    %177 = vector.extract_strided_slice %149 {offsets = [24, 96], sizes = [8, 32], strides = [1, 1]} : vector<32x128xf32> to vector<8x32xf32>
    %178 = tpu.concatenate %174, %175, %176, %177 in 1 : vector<8x32xf32>, vector<8x32xf32>, vector<8x32xf32>, vector<8x32xf32> -> vector<8x128xf32>
    %179 = vector.shape_cast %178 : vector<8x128xf32> to vector<2x1x4x128xf32>
    %180 = arith.truncf %179 : vector<2x1x4x128xf32> to vector<2x1x4x128xbf16>
    %c0_60 = arith.constant 0 : index
    %c3 = arith.constant 3 : index
    %c0_61 = arith.constant 0 : index
    %c0_62 = arith.constant 0 : index
    %181 = vector.load %arg8[%c0_60, %c3, %c0_61, %c0_62] : memref<2x4x4x128xbf16, #tpu.memory_space<vmem>>, vector<2x1x4x128xbf16>
    tpu.vector_store %arg8[%c0_60, %c3, %c0_61, %c0_62], %180 {strides = array<i32>} : memref<2x4x4x128xbf16, #tpu.memory_space<vmem>>, vector<2x1x4x128xbf16>,
    return
  }
  func.func @transform_0(%arg0: i32) -> (i32, i32) {
    %c0_i32 = arith.constant 0 : i32
    %c0_i32_0 = arith.constant 0 : i32
    return %arg0, %c0_i32 : i32, i32
  }
  func.func @transform_1(%arg0: i32) -> (i32, i32) {
    %c0_i32 = arith.constant 0 : i32
    %c0_i32_0 = arith.constant 0 : i32
    %c0_i32_1 = arith.constant 0 : i32
    return %c0_i32, %c0_i32_0 : i32, i32
  }
  func.func @transform_2(%arg0: i32) -> (i32, i32) {
    %c0_i32 = arith.constant 0 : i32
    %c0_i32_0 = arith.constant 0 : i32
    %c0_i32_1 = arith.constant 0 : i32
    return %c0_i32, %c0_i32_0 : i32, i32
  }
  func.func @transform_3(%arg0: i32) -> (i32, i32) {
    %c0_i32 = arith.constant 0 : i32
    %c0_i32_0 = arith.constant 0 : i32
    %c0_i32_1 = arith.constant 0 : i32
    return %c0_i32, %c0_i32_0 : i32, i32
  }
  func.func @transform_4(%arg0: i32) -> (i32, i32) {
    %c0_i32 = arith.constant 0 : i32
    %c0_i32_0 = arith.constant 0 : i32
    %c0_i32_1 = arith.constant 0 : i32
    return %c0_i32, %c0_i32_0 : i32, i32
  }
  func.func @transform_5(%arg0: i32) -> (i32, i32) {
    %c0_i32 = arith.constant 0 : i32
    %c0_i32_0 = arith.constant 0 : i32
    %c0_i32_1 = arith.constant 0 : i32
    return %c0_i32, %c0_i32_0 : i32, i32
  }
  func.func @transform_6(%arg0: i32) -> (i32, i32) {
    %c0_i32 = arith.constant 0 : i32
    %c0_i32_0 = arith.constant 0 : i32
    %c0_i32_1 = arith.constant 0 : i32
    return %c0_i32, %c0_i32_0 : i32, i32
  }
  func.func @transform_7(%arg0: i32) -> (i32, i32, i32, i32) {
    %c0_i32 = arith.constant 0 : i32
    %c0_i32_0 = arith.constant 0 : i32
    %c0_i32_1 = arith.constant 0 : i32
    %c0_i32_2 = arith.constant 0 : i32
    return %arg0, %c0_i32, %c0_i32_0, %c0_i32_1 : i32, i32, i32, i32
  }
}

module attributes {stable_mosaic.version = 11 : i64} {
  func.func @_fpn_block_kernel(%arg0: i32, %arg1: memref<160x32xbf16, #tpu.memory_space<vmem>>, %arg2: memref<32x128xbf16, #tpu.memory_space<vmem>>, %arg3: memref<1x128xf32, #tpu.memory_space<vmem>>, %arg4: memref<1x32xf32, #tpu.memory_space<vmem>>, %arg5: memref<1x32xf32, #tpu.memory_space<vmem>>, %arg6: memref<32x128xbf16, #tpu.memory_space<vmem>>, %arg7: memref<1x128xf32, #tpu.memory_space<vmem>>, %arg8: memref<10x4x16x128xbf16, #tpu.memory_space<vmem>>) attributes {dimension_semantics = [#tpu.dimension_semantics<parallel>], iteration_bounds = array<i64: 4>, scalar_prefetch = 0 : i64, scratch_operands = 0 : i64, tpu.core_type = #tpu.core_type<tc>, window_params = [{transform_indices = @transform_0, window_bounds = array<i64: 160, 32>}, {pipeline_mode = #tpu.pipeline_mode<synchronous>, transform_indices = @transform_1, window_bounds = array<i64: 32, 128>}, {pipeline_mode = #tpu.pipeline_mode<synchronous>, transform_indices = @transform_2, window_bounds = array<i64: 1, 128>}, {pipeline_mode = #tpu.pipeline_mode<synchronous>, transform_indices = @transform_3, window_bounds = array<i64: 1, 32>}, {pipeline_mode = #tpu.pipeline_mode<synchronous>, transform_indices = @transform_4, window_bounds = array<i64: 1, 32>}, {pipeline_mode = #tpu.pipeline_mode<synchronous>, transform_indices = @transform_5, window_bounds = array<i64: 32, 128>}, {pipeline_mode = #tpu.pipeline_mode<synchronous>, transform_indices = @transform_6, window_bounds = array<i64: 1, 128>}, {transform_indices = @transform_7, window_bounds = array<i64: 10, 4, 16, 128>}]} {
    %c0 = arith.constant 0 : index
    %c0_0 = arith.constant 0 : index
    %0 = vector.load %arg1[%c0, %c0_0] : memref<160x32xbf16, #tpu.memory_space<vmem>>, vector<160x32xbf16>
    %c0_1 = arith.constant 0 : index
    %c0_2 = arith.constant 0 : index
    %1 = vector.load %arg2[%c0_1, %c0_2] : memref<32x128xbf16, #tpu.memory_space<vmem>>, vector<32x128xbf16>
    %cst = arith.constant dense<0.000000e+00> : vector<160x128xf32>
    %2 = tpu.matmul %0, %1, %cst {dimension_numbers = #tpu.dot_dimension_numbers<[1], [0], [0], [1], [0, 0, 1, 1], [], []>} : vector<160x32xbf16>, vector<32x128xbf16>, vector<160x128xf32> -> vector<160x128xf32>
    %c0_3 = arith.constant 0 : index
    %c0_4 = arith.constant 0 : index
    %3 = vector.load %arg3[%c0_3, %c0_4] : memref<1x128xf32, #tpu.memory_space<vmem>>, vector<1x128xf32>
    %4 = vector.broadcast %3 : vector<1x128xf32> to vector<160x128xf32>
    %5 = arith.addf %2, %4 : vector<160x128xf32>
    %c0_5 = arith.constant 0 : index
    %c0_6 = arith.constant 0 : index
    %6 = vector.load %arg4[%c0_5, %c0_6] : memref<1x32xf32, #tpu.memory_space<vmem>>, vector<1x32xf32>
    %c0_7 = arith.constant 0 : index
    %c0_8 = arith.constant 0 : index
    %7 = vector.load %arg5[%c0_7, %c0_8] : memref<1x32xf32, #tpu.memory_space<vmem>>, vector<1x32xf32>
    %8 = vector.extract_strided_slice %5 {offsets = [0, 0], sizes = [160, 32], strides = [1, 1]} : vector<160x128xf32> to vector<160x32xf32>
    %cst_9 = arith.constant dense<0.000000e+00> : vector<160xf32>
    %9 = vector.multi_reduction <add>, %8, %cst_9 [1] : vector<160x32xf32> to vector<160xf32>
    %10 = vector.shape_cast %9 : vector<160xf32> to vector<160x1xf32>
    %11 = arith.mulf %8, %8 : vector<160x32xf32>
    %cst_10 = arith.constant dense<0.000000e+00> : vector<160xf32>
    %12 = vector.multi_reduction <add>, %11, %cst_10 [1] : vector<160x32xf32> to vector<160xf32>
    %13 = vector.shape_cast %12 : vector<160xf32> to vector<160x1xf32>
    %cst_11 = arith.constant 3.125000e-02 : f32
    %14 = vector.broadcast %cst_11 : f32 to vector<160x1xf32>
    %15 = arith.mulf %10, %14 : vector<160x1xf32>
    %cst_12 = arith.constant 3.125000e-02 : f32
    %16 = vector.broadcast %cst_12 : f32 to vector<160x1xf32>
    %17 = arith.mulf %13, %16 : vector<160x1xf32>
    %18 = arith.mulf %15, %15 : vector<160x1xf32>
    %19 = arith.subf %17, %18 : vector<160x1xf32>
    %cst_13 = arith.constant 0.000000e+00 : f32
    %20 = vector.broadcast %cst_13 : f32 to vector<160x1xf32>
    %21 = arith.maximumf %19, %20 : vector<160x1xf32>
    %22 = vector.broadcast %15 : vector<160x1xf32> to vector<160x32xf32>
    %23 = arith.subf %8, %22 : vector<160x32xf32>
    %cst_14 = arith.constant 9.99999997E-7 : f32
    %24 = vector.broadcast %cst_14 : f32 to vector<160x1xf32>
    %25 = arith.addf %21, %24 : vector<160x1xf32>
    %26 = math.rsqrt %25 : vector<160x1xf32>
    %27 = vector.broadcast %26 : vector<160x1xf32> to vector<160x32xf32>
    %28 = arith.mulf %23, %27 : vector<160x32xf32>
    %29 = vector.broadcast %6 : vector<1x32xf32> to vector<160x32xf32>
    %30 = arith.mulf %28, %29 : vector<160x32xf32>
    %31 = vector.broadcast %7 : vector<1x32xf32> to vector<160x32xf32>
    %32 = arith.addf %30, %31 : vector<160x32xf32>
    %cst_15 = arith.constant 5.000000e-01 : f32
    %33 = vector.broadcast %cst_15 : f32 to vector<160x32xf32>
    %34 = arith.mulf %33, %32 : vector<160x32xf32>
    %cst_16 = arith.constant 0.707106769 : f32
    %35 = vector.broadcast %cst_16 : f32 to vector<160x32xf32>
    %36 = arith.mulf %32, %35 : vector<160x32xf32>
    %37 = math.erf %36 : vector<160x32xf32>
    %cst_17 = arith.constant 1.000000e+00 : f32
    %38 = vector.broadcast %cst_17 : f32 to vector<160x32xf32>
    %39 = arith.addf %38, %37 : vector<160x32xf32>
    %40 = arith.mulf %34, %39 : vector<160x32xf32>
    %41 = arith.truncf %40 : vector<160x32xf32> to vector<160x32xbf16>
    %42 = vector.extract_strided_slice %5 {offsets = [0, 32], sizes = [160, 32], strides = [1, 1]} : vector<160x128xf32> to vector<160x32xf32>
    %cst_18 = arith.constant dense<0.000000e+00> : vector<160xf32>
    %43 = vector.multi_reduction <add>, %42, %cst_18 [1] : vector<160x32xf32> to vector<160xf32>
    %44 = vector.shape_cast %43 : vector<160xf32> to vector<160x1xf32>
    %45 = arith.mulf %42, %42 : vector<160x32xf32>
    %cst_19 = arith.constant dense<0.000000e+00> : vector<160xf32>
    %46 = vector.multi_reduction <add>, %45, %cst_19 [1] : vector<160x32xf32> to vector<160xf32>
    %47 = vector.shape_cast %46 : vector<160xf32> to vector<160x1xf32>
    %cst_20 = arith.constant 3.125000e-02 : f32
    %48 = vector.broadcast %cst_20 : f32 to vector<160x1xf32>
    %49 = arith.mulf %44, %48 : vector<160x1xf32>
    %cst_21 = arith.constant 3.125000e-02 : f32
    %50 = vector.broadcast %cst_21 : f32 to vector<160x1xf32>
    %51 = arith.mulf %47, %50 : vector<160x1xf32>
    %52 = arith.mulf %49, %49 : vector<160x1xf32>
    %53 = arith.subf %51, %52 : vector<160x1xf32>
    %cst_22 = arith.constant 0.000000e+00 : f32
    %54 = vector.broadcast %cst_22 : f32 to vector<160x1xf32>
    %55 = arith.maximumf %53, %54 : vector<160x1xf32>
    %56 = vector.broadcast %49 : vector<160x1xf32> to vector<160x32xf32>
    %57 = arith.subf %42, %56 : vector<160x32xf32>
    %cst_23 = arith.constant 9.99999997E-7 : f32
    %58 = vector.broadcast %cst_23 : f32 to vector<160x1xf32>
    %59 = arith.addf %55, %58 : vector<160x1xf32>
    %60 = math.rsqrt %59 : vector<160x1xf32>
    %61 = vector.broadcast %60 : vector<160x1xf32> to vector<160x32xf32>
    %62 = arith.mulf %57, %61 : vector<160x32xf32>
    %63 = vector.broadcast %6 : vector<1x32xf32> to vector<160x32xf32>
    %64 = arith.mulf %62, %63 : vector<160x32xf32>
    %65 = vector.broadcast %7 : vector<1x32xf32> to vector<160x32xf32>
    %66 = arith.addf %64, %65 : vector<160x32xf32>
    %cst_24 = arith.constant 5.000000e-01 : f32
    %67 = vector.broadcast %cst_24 : f32 to vector<160x32xf32>
    %68 = arith.mulf %67, %66 : vector<160x32xf32>
    %cst_25 = arith.constant 0.707106769 : f32
    %69 = vector.broadcast %cst_25 : f32 to vector<160x32xf32>
    %70 = arith.mulf %66, %69 : vector<160x32xf32>
    %71 = math.erf %70 : vector<160x32xf32>
    %cst_26 = arith.constant 1.000000e+00 : f32
    %72 = vector.broadcast %cst_26 : f32 to vector<160x32xf32>
    %73 = arith.addf %72, %71 : vector<160x32xf32>
    %74 = arith.mulf %68, %73 : vector<160x32xf32>
    %75 = arith.truncf %74 : vector<160x32xf32> to vector<160x32xbf16>
    %76 = vector.extract_strided_slice %5 {offsets = [0, 64], sizes = [160, 32], strides = [1, 1]} : vector<160x128xf32> to vector<160x32xf32>
    %cst_27 = arith.constant dense<0.000000e+00> : vector<160xf32>
    %77 = vector.multi_reduction <add>, %76, %cst_27 [1] : vector<160x32xf32> to vector<160xf32>
    %78 = vector.shape_cast %77 : vector<160xf32> to vector<160x1xf32>
    %79 = arith.mulf %76, %76 : vector<160x32xf32>
    %cst_28 = arith.constant dense<0.000000e+00> : vector<160xf32>
    %80 = vector.multi_reduction <add>, %79, %cst_28 [1] : vector<160x32xf32> to vector<160xf32>
    %81 = vector.shape_cast %80 : vector<160xf32> to vector<160x1xf32>
    %cst_29 = arith.constant 3.125000e-02 : f32
    %82 = vector.broadcast %cst_29 : f32 to vector<160x1xf32>
    %83 = arith.mulf %78, %82 : vector<160x1xf32>
    %cst_30 = arith.constant 3.125000e-02 : f32
    %84 = vector.broadcast %cst_30 : f32 to vector<160x1xf32>
    %85 = arith.mulf %81, %84 : vector<160x1xf32>
    %86 = arith.mulf %83, %83 : vector<160x1xf32>
    %87 = arith.subf %85, %86 : vector<160x1xf32>
    %cst_31 = arith.constant 0.000000e+00 : f32
    %88 = vector.broadcast %cst_31 : f32 to vector<160x1xf32>
    %89 = arith.maximumf %87, %88 : vector<160x1xf32>
    %90 = vector.broadcast %83 : vector<160x1xf32> to vector<160x32xf32>
    %91 = arith.subf %76, %90 : vector<160x32xf32>
    %cst_32 = arith.constant 9.99999997E-7 : f32
    %92 = vector.broadcast %cst_32 : f32 to vector<160x1xf32>
    %93 = arith.addf %89, %92 : vector<160x1xf32>
    %94 = math.rsqrt %93 : vector<160x1xf32>
    %95 = vector.broadcast %94 : vector<160x1xf32> to vector<160x32xf32>
    %96 = arith.mulf %91, %95 : vector<160x32xf32>
    %97 = vector.broadcast %6 : vector<1x32xf32> to vector<160x32xf32>
    %98 = arith.mulf %96, %97 : vector<160x32xf32>
    %99 = vector.broadcast %7 : vector<1x32xf32> to vector<160x32xf32>
    %100 = arith.addf %98, %99 : vector<160x32xf32>
    %cst_33 = arith.constant 5.000000e-01 : f32
    %101 = vector.broadcast %cst_33 : f32 to vector<160x32xf32>
    %102 = arith.mulf %101, %100 : vector<160x32xf32>
    %cst_34 = arith.constant 0.707106769 : f32
    %103 = vector.broadcast %cst_34 : f32 to vector<160x32xf32>
    %104 = arith.mulf %100, %103 : vector<160x32xf32>
    %105 = math.erf %104 : vector<160x32xf32>
    %cst_35 = arith.constant 1.000000e+00 : f32
    %106 = vector.broadcast %cst_35 : f32 to vector<160x32xf32>
    %107 = arith.addf %106, %105 : vector<160x32xf32>
    %108 = arith.mulf %102, %107 : vector<160x32xf32>
    %109 = arith.truncf %108 : vector<160x32xf32> to vector<160x32xbf16>
    %110 = vector.extract_strided_slice %5 {offsets = [0, 96], sizes = [160, 32], strides = [1, 1]} : vector<160x128xf32> to vector<160x32xf32>
    %cst_36 = arith.constant dense<0.000000e+00> : vector<160xf32>
    %111 = vector.multi_reduction <add>, %110, %cst_36 [1] : vector<160x32xf32> to vector<160xf32>
    %112 = vector.shape_cast %111 : vector<160xf32> to vector<160x1xf32>
    %113 = arith.mulf %110, %110 : vector<160x32xf32>
    %cst_37 = arith.constant dense<0.000000e+00> : vector<160xf32>
    %114 = vector.multi_reduction <add>, %113, %cst_37 [1] : vector<160x32xf32> to vector<160xf32>
    %115 = vector.shape_cast %114 : vector<160xf32> to vector<160x1xf32>
    %cst_38 = arith.constant 3.125000e-02 : f32
    %116 = vector.broadcast %cst_38 : f32 to vector<160x1xf32>
    %117 = arith.mulf %112, %116 : vector<160x1xf32>
    %cst_39 = arith.constant 3.125000e-02 : f32
    %118 = vector.broadcast %cst_39 : f32 to vector<160x1xf32>
    %119 = arith.mulf %115, %118 : vector<160x1xf32>
    %120 = arith.mulf %117, %117 : vector<160x1xf32>
    %121 = arith.subf %119, %120 : vector<160x1xf32>
    %cst_40 = arith.constant 0.000000e+00 : f32
    %122 = vector.broadcast %cst_40 : f32 to vector<160x1xf32>
    %123 = arith.maximumf %121, %122 : vector<160x1xf32>
    %124 = vector.broadcast %117 : vector<160x1xf32> to vector<160x32xf32>
    %125 = arith.subf %110, %124 : vector<160x32xf32>
    %cst_41 = arith.constant 9.99999997E-7 : f32
    %126 = vector.broadcast %cst_41 : f32 to vector<160x1xf32>
    %127 = arith.addf %123, %126 : vector<160x1xf32>
    %128 = math.rsqrt %127 : vector<160x1xf32>
    %129 = vector.broadcast %128 : vector<160x1xf32> to vector<160x32xf32>
    %130 = arith.mulf %125, %129 : vector<160x32xf32>
    %131 = vector.broadcast %6 : vector<1x32xf32> to vector<160x32xf32>
    %132 = arith.mulf %130, %131 : vector<160x32xf32>
    %133 = vector.broadcast %7 : vector<1x32xf32> to vector<160x32xf32>
    %134 = arith.addf %132, %133 : vector<160x32xf32>
    %cst_42 = arith.constant 5.000000e-01 : f32
    %135 = vector.broadcast %cst_42 : f32 to vector<160x32xf32>
    %136 = arith.mulf %135, %134 : vector<160x32xf32>
    %cst_43 = arith.constant 0.707106769 : f32
    %137 = vector.broadcast %cst_43 : f32 to vector<160x32xf32>
    %138 = arith.mulf %134, %137 : vector<160x32xf32>
    %139 = math.erf %138 : vector<160x32xf32>
    %cst_44 = arith.constant 1.000000e+00 : f32
    %140 = vector.broadcast %cst_44 : f32 to vector<160x32xf32>
    %141 = arith.addf %140, %139 : vector<160x32xf32>
    %142 = arith.mulf %136, %141 : vector<160x32xf32>
    %143 = arith.truncf %142 : vector<160x32xf32> to vector<160x32xbf16>
    %144 = tpu.concatenate %41, %75, %109, %143 in 0 : vector<160x32xbf16>, vector<160x32xbf16>, vector<160x32xbf16>, vector<160x32xbf16> -> vector<640x32xbf16>
    %c0_45 = arith.constant 0 : index
    %c0_46 = arith.constant 0 : index
    %145 = vector.load %arg6[%c0_45, %c0_46] : memref<32x128xbf16, #tpu.memory_space<vmem>>, vector<32x128xbf16>
    %cst_47 = arith.constant dense<0.000000e+00> : vector<640x128xf32>
    %146 = tpu.matmul %144, %145, %cst_47 {dimension_numbers = #tpu.dot_dimension_numbers<[1], [0], [0], [1], [0, 0, 1, 1], [], []>} : vector<640x32xbf16>, vector<32x128xbf16>, vector<640x128xf32> -> vector<640x128xf32>
    %c0_48 = arith.constant 0 : index
    %c0_49 = arith.constant 0 : index
    %147 = vector.load %arg7[%c0_48, %c0_49] : memref<1x128xf32, #tpu.memory_space<vmem>>, vector<1x128xf32>
    %148 = vector.broadcast %147 : vector<1x128xf32> to vector<640x128xf32>
    %149 = arith.addf %146, %148 : vector<640x128xf32>
    %150 = vector.extract_strided_slice %149 {offsets = [0, 0], sizes = [160, 32], strides = [1, 1]} : vector<640x128xf32> to vector<160x32xf32>
    %151 = vector.extract_strided_slice %149 {offsets = [0, 32], sizes = [160, 32], strides = [1, 1]} : vector<640x128xf32> to vector<160x32xf32>
    %152 = vector.extract_strided_slice %149 {offsets = [160, 0], sizes = [160, 32], strides = [1, 1]} : vector<640x128xf32> to vector<160x32xf32>
    %153 = vector.extract_strided_slice %149 {offsets = [160, 32], sizes = [160, 32], strides = [1, 1]} : vector<640x128xf32> to vector<160x32xf32>
    %154 = tpu.concatenate %150, %151, %152, %153 in 1 : vector<160x32xf32>, vector<160x32xf32>, vector<160x32xf32>, vector<160x32xf32> -> vector<160x128xf32>
    %155 = vector.shape_cast %154 : vector<160x128xf32> to vector<10x1x16x128xf32>
    %156 = arith.truncf %155 : vector<10x1x16x128xf32> to vector<10x1x16x128xbf16>
    %c0_50 = arith.constant 0 : index
    %c0_51 = arith.constant 0 : index
    %c0_52 = arith.constant 0 : index
    %c0_53 = arith.constant 0 : index
    %157 = vector.load %arg8[%c0_50, %c0_51, %c0_52, %c0_53] : memref<10x4x16x128xbf16, #tpu.memory_space<vmem>>, vector<10x1x16x128xbf16>
    tpu.vector_store %arg8[%c0_50, %c0_51, %c0_52, %c0_53], %156 {strides = array<i32>} : memref<10x4x16x128xbf16, #tpu.memory_space<vmem>>, vector<10x1x16x128xbf16>,
    %158 = vector.extract_strided_slice %149 {offsets = [0, 64], sizes = [160, 32], strides = [1, 1]} : vector<640x128xf32> to vector<160x32xf32>
    %159 = vector.extract_strided_slice %149 {offsets = [0, 96], sizes = [160, 32], strides = [1, 1]} : vector<640x128xf32> to vector<160x32xf32>
    %160 = vector.extract_strided_slice %149 {offsets = [160, 64], sizes = [160, 32], strides = [1, 1]} : vector<640x128xf32> to vector<160x32xf32>
    %161 = vector.extract_strided_slice %149 {offsets = [160, 96], sizes = [160, 32], strides = [1, 1]} : vector<640x128xf32> to vector<160x32xf32>
    %162 = tpu.concatenate %158, %159, %160, %161 in 1 : vector<160x32xf32>, vector<160x32xf32>, vector<160x32xf32>, vector<160x32xf32> -> vector<160x128xf32>
    %163 = vector.shape_cast %162 : vector<160x128xf32> to vector<10x1x16x128xf32>
    %164 = arith.truncf %163 : vector<10x1x16x128xf32> to vector<10x1x16x128xbf16>
    %c0_54 = arith.constant 0 : index
    %c1 = arith.constant 1 : index
    %c0_55 = arith.constant 0 : index
    %c0_56 = arith.constant 0 : index
    %165 = vector.load %arg8[%c0_54, %c1, %c0_55, %c0_56] : memref<10x4x16x128xbf16, #tpu.memory_space<vmem>>, vector<10x1x16x128xbf16>
    tpu.vector_store %arg8[%c0_54, %c1, %c0_55, %c0_56], %164 {strides = array<i32>} : memref<10x4x16x128xbf16, #tpu.memory_space<vmem>>, vector<10x1x16x128xbf16>,
    %166 = vector.extract_strided_slice %149 {offsets = [320, 0], sizes = [160, 32], strides = [1, 1]} : vector<640x128xf32> to vector<160x32xf32>
    %167 = vector.extract_strided_slice %149 {offsets = [320, 32], sizes = [160, 32], strides = [1, 1]} : vector<640x128xf32> to vector<160x32xf32>
    %168 = vector.extract_strided_slice %149 {offsets = [480, 0], sizes = [160, 32], strides = [1, 1]} : vector<640x128xf32> to vector<160x32xf32>
    %169 = vector.extract_strided_slice %149 {offsets = [480, 32], sizes = [160, 32], strides = [1, 1]} : vector<640x128xf32> to vector<160x32xf32>
    %170 = tpu.concatenate %166, %167, %168, %169 in 1 : vector<160x32xf32>, vector<160x32xf32>, vector<160x32xf32>, vector<160x32xf32> -> vector<160x128xf32>
    %171 = vector.shape_cast %170 : vector<160x128xf32> to vector<10x1x16x128xf32>
    %172 = arith.truncf %171 : vector<10x1x16x128xf32> to vector<10x1x16x128xbf16>
    %c0_57 = arith.constant 0 : index
    %c2 = arith.constant 2 : index
    %c0_58 = arith.constant 0 : index
    %c0_59 = arith.constant 0 : index
    %173 = vector.load %arg8[%c0_57, %c2, %c0_58, %c0_59] : memref<10x4x16x128xbf16, #tpu.memory_space<vmem>>, vector<10x1x16x128xbf16>
    tpu.vector_store %arg8[%c0_57, %c2, %c0_58, %c0_59], %172 {strides = array<i32>} : memref<10x4x16x128xbf16, #tpu.memory_space<vmem>>, vector<10x1x16x128xbf16>,
    %174 = vector.extract_strided_slice %149 {offsets = [320, 64], sizes = [160, 32], strides = [1, 1]} : vector<640x128xf32> to vector<160x32xf32>
    %175 = vector.extract_strided_slice %149 {offsets = [320, 96], sizes = [160, 32], strides = [1, 1]} : vector<640x128xf32> to vector<160x32xf32>
    %176 = vector.extract_strided_slice %149 {offsets = [480, 64], sizes = [160, 32], strides = [1, 1]} : vector<640x128xf32> to vector<160x32xf32>
    %177 = vector.extract_strided_slice %149 {offsets = [480, 96], sizes = [160, 32], strides = [1, 1]} : vector<640x128xf32> to vector<160x32xf32>
    %178 = tpu.concatenate %174, %175, %176, %177 in 1 : vector<160x32xf32>, vector<160x32xf32>, vector<160x32xf32>, vector<160x32xf32> -> vector<160x128xf32>
    %179 = vector.shape_cast %178 : vector<160x128xf32> to vector<10x1x16x128xf32>
    %180 = arith.truncf %179 : vector<10x1x16x128xf32> to vector<10x1x16x128xbf16>
    %c0_60 = arith.constant 0 : index
    %c3 = arith.constant 3 : index
    %c0_61 = arith.constant 0 : index
    %c0_62 = arith.constant 0 : index
    %181 = vector.load %arg8[%c0_60, %c3, %c0_61, %c0_62] : memref<10x4x16x128xbf16, #tpu.memory_space<vmem>>, vector<10x1x16x128xbf16>
    tpu.vector_store %arg8[%c0_60, %c3, %c0_61, %c0_62], %180 {strides = array<i32>} : memref<10x4x16x128xbf16, #tpu.memory_space<vmem>>, vector<10x1x16x128xbf16>,
    return
  }
  func.func @transform_0(%arg0: i32) -> (i32, i32) {
    %c0_i32 = arith.constant 0 : i32
    %c0_i32_0 = arith.constant 0 : i32
    return %arg0, %c0_i32 : i32, i32
  }
  func.func @transform_1(%arg0: i32) -> (i32, i32) {
    %c0_i32 = arith.constant 0 : i32
    %c0_i32_0 = arith.constant 0 : i32
    %c0_i32_1 = arith.constant 0 : i32
    return %c0_i32, %c0_i32_0 : i32, i32
  }
  func.func @transform_2(%arg0: i32) -> (i32, i32) {
    %c0_i32 = arith.constant 0 : i32
    %c0_i32_0 = arith.constant 0 : i32
    %c0_i32_1 = arith.constant 0 : i32
    return %c0_i32, %c0_i32_0 : i32, i32
  }
  func.func @transform_3(%arg0: i32) -> (i32, i32) {
    %c0_i32 = arith.constant 0 : i32
    %c0_i32_0 = arith.constant 0 : i32
    %c0_i32_1 = arith.constant 0 : i32
    return %c0_i32, %c0_i32_0 : i32, i32
  }
  func.func @transform_4(%arg0: i32) -> (i32, i32) {
    %c0_i32 = arith.constant 0 : i32
    %c0_i32_0 = arith.constant 0 : i32
    %c0_i32_1 = arith.constant 0 : i32
    return %c0_i32, %c0_i32_0 : i32, i32
  }
  func.func @transform_5(%arg0: i32) -> (i32, i32) {
    %c0_i32 = arith.constant 0 : i32
    %c0_i32_0 = arith.constant 0 : i32
    %c0_i32_1 = arith.constant 0 : i32
    return %c0_i32, %c0_i32_0 : i32, i32
  }
  func.func @transform_6(%arg0: i32) -> (i32, i32) {
    %c0_i32 = arith.constant 0 : i32
    %c0_i32_0 = arith.constant 0 : i32
    %c0_i32_1 = arith.constant 0 : i32
    return %c0_i32, %c0_i32_0 : i32, i32
  }
  func.func @transform_7(%arg0: i32) -> (i32, i32, i32, i32) {
    %c0_i32 = arith.constant 0 : i32
    %c0_i32_0 = arith.constant 0 : i32
    %c0_i32_1 = arith.constant 0 : i32
    %c0_i32_2 = arith.constant 0 : i32
    return %arg0, %c0_i32, %c0_i32_0, %c0_i32_1 : i32, i32, i32, i32
  }
}

</mosaic_0001>

<bundles_post_ra>
// kernel: conv_transformer_neck_forward.2
= control target key start
LH: loop header
LB: loop body
LE: loop exit
PB: predicated region body
PF: predicated region fallthrough
CT: control target
= control target key end

     0   :  { %12 = vsyncpa [#allocation3], 0  ;;  %s1534_s0 = inlined_call_operand.vmem [shape: bf16[32,64], index: 0, kind: input, shape index: {}]   ;;  %s1535_s1 = inlined_call_operand.hbm [shape: bf16[64,128], index: 1, kind: input, shape index: {}]   ;;  %s1536_s2 = inlined_call_operand.hbm [shape: f32[1,128], index: 2, kind: input, shape index: {}]   ;;  %s1537_s3 = inlined_call_operand.hbm [shape: f32[1,32], index: 3, kind: input, shape index: {}]   ;;  %s1538_s4 = inlined_call_operand.hbm [shape: f32[1,32], index: 4, kind: input, shape index: {}]   ;;  %s1539_s5 = inlined_call_operand.hbm [shape: bf16[32,128], index: 5, kind: input, shape index: {}]   ;;  %s1540_s6 = inlined_call_operand.hbm [shape: f32[1,128], index: 6, kind: input, shape index: {}]   ;;  %s1541_s7 = inlined_call_operand.vmem [shape: bf16[8,4,4,128], index: 7, kind: output, shape index: {}]  }
   0x1   :  { %13 = vsyncpa [#allocation5], 0 }
   0x2   :  { %14 = vsyncpa [#allocation8], 0 }
   0x3   :  { %15 = vsyncpa [#allocation11], 0  ;;  %s1273_s24 = smov 0  }
   0x4 LB: > { %s1220_s25 = smov [#allocation4]   ;;  %s1279_s27 = sadd.s32 4294967295, %s1218_s24   ;;  %s1218_s24 = sphi %s1273_s24, %s21_s24  }
   0x5   : > { %s230_s26 = sshll.u32 %s1220_s25, 4  ;;  %p860_p0 = scmp.ge.s32.totalorder %s1218_s24, 1  ;;  %s1284_s26 = int_to_ptr.vmem [resolvable:$true] %s230_s26 }
   0x6   : > { %p204_p1 = scmp.lt.s32.totalorder %s1218_s24, 5  ;;  %p1542_p2 = scmp.eq.s32.totalorder %s1279_s27, 0 }
   0x7   : > { %s1221_s29 = smov [#allocation7]   ;;  %s1222_s8 = smov [#allocation2]  }
   0x8   : > { %p1286_p3 = pnand %p860_p0, %p204_p1  ;;  %s252_s30 = sshll.u32 %s1221_s29, 4  ;;  %s1292_s30 = int_to_ptr.vmem [resolvable:$true] %s252_s30 }
   0x9   : > { %s216_s9 = sshll.u32 %s1222_s8, 4  ;;  %s1223_s11 = smov [#allocation6]   ;;  %s1300_s9 = int_to_ptr.vmem [resolvable:$true] %s216_s9 }
   0xa   : > { %s1544_s28 = scalar_select %p1286_p3, 1, 0 }
   0xb   : > { %p954_p4 = pneg %p1286_p3  ;;  %s1302_s12 = sshll.u32 %s1223_s11, 4  ;;  %s242_s12 = int_to_ptr.vmem [resolvable:$true] %s1302_s12 }
   0xc   : > { %s1028_s15 = scalar_lea.hbm %s1536_s2, 16 }
   0xd   : > { %p1296_p5 = pnand %p1542_p2, %p954_p4  ;;  %p1029_p6 = scmp.ne.s32.totalorder %s1536_s2, %s1028_s15 }
   0xe   : > { %p1035_p10 = scmp.lt.u32.totalorder %s1028_s15, %s1536_s2 }
   0xf   : > { %p1312_p7 = pneg %p1296_p5 }
  0x11   : > { %p1031_p8 = pnand %p1312_p7, %p1029_p6 }
  0x13   : > { %p1032_p9 = pneg %p1031_p8 }
  0x15   : > { %p1037_p11 = pnand %p1035_p10, %p1032_p9 }
  0x17   : > { %1040 = shalt.err (!%p1037_p11)
}
  0x18   : > { %s1041_s21 = scalar_lea.vmem %s1284_s26, 16  ;;  %s1048_s22 = scalar_lea.vmem %s1284_s26, 32 }
  0x19   : > { %p1042_p12 = scmp.ne.s32.totalorder %s1284_s26, %s1041_s21  ;;  %p1049_p1 = scmp.lt.s32.totalorder %s1284_s26, %s1284_s26 }
  0x1a   : > { %p1050_p4 = scmp.lt.s32.totalorder %s1048_s22, %s1041_s21 }
  0x1b   : > { %p1044_p13 = pnand %p1042_p12, %p1312_p7 }
  0x1c   : > { %p1051_p6 = por %p1050_p4, %p1049_p1 }
  0x1d   : > { %p1045_p0 = pneg %p1044_p13 }
  0x1f   : > { %p1052_p8 = pnand %p1051_p6, %p1045_p0 }
  0x21   : > { %1055 = shalt.err (!%p1052_p8)
}
  0x22   : > { %960 = dma.hbm_to_vmem [thread:$0]  (!%p1296_p5), %s1536_s2, 16, %s1284_s26, [#allocation5]  }
  0x23   : > { %s1056_s11 = scalar_lea.hbm %s1538_s4, 16 }
  0x24   : > { %p1057_p9 = scmp.ne.s32.totalorder %s1538_s4, %s1056_s11  ;;  %p1063_p12 = scmp.lt.u32.totalorder %s1056_s11, %s1538_s4 }
  0x26   : > { %p1059_p10 = pnand %p1057_p9, %p1312_p7 }
  0x28   : > { %p1060_p11 = pneg %p1059_p10 }
  0x2a   : > { %p1065_p13 = pnand %p1063_p12, %p1060_p11 }
  0x2c   : > { %1068 = shalt.err (!%p1065_p13)
}
  0x2d   : > { %s1069_s26 = scalar_lea.vmem %s1292_s30, 16  ;;  %s1076_s17 = scalar_lea.vmem %s1292_s30, 32 }
  0x2e   : > { %p1070_p0 = scmp.ne.s32.totalorder %s1292_s30, %s1069_s26  ;;  %p1077_p6 = scmp.lt.s32.totalorder %s1292_s30, %s1292_s30 }
  0x2f   : > { %p1078_p8 = scmp.lt.s32.totalorder %s1076_s17, %s1069_s26 }
  0x30   : > { %p1072_p1 = pnand %p1070_p0, %p1312_p7 }
  0x31   : > { %p1079_p9 = por %p1078_p8, %p1077_p6 }
  0x32   : > { %p1073_p4 = pneg %p1072_p1 }
  0x34   : > { %p1080_p10 = pnand %p1079_p9, %p1073_p4 }
  0x36   : > { %1083 = shalt.err (!%p1080_p10)
}
  0x37   : > { %966 = dma.hbm_to_vmem [thread:$0]  (!%p1296_p5), %s1538_s4, 16, %s1292_s30, [#allocation8]  }
  0x38   : > { %s1084_s23 = scalar_lea.hbm %s1535_s1, 512 }
  0x39   : > { %p1085_p11 = scmp.ne.s32.totalorder %s1535_s1, %s1084_s23  ;;  %p1091_p0 = scmp.lt.u32.totalorder %s1084_s23, %s1535_s1 }
  0x3b   : > { %p1087_p12 = pnand %p1085_p11, %p1312_p7 }
  0x3d   : > { %p1088_p13 = pneg %p1087_p12 }
  0x3f   : > { %p1093_p1 = pnand %p1091_p0, %p1088_p13 }
  0x41   : > { %1096 = shalt.err (!%p1093_p1)
}
  0x42   : > { %s1097_s30 = scalar_lea.vmem %s1300_s9, 512  ;;  %p1105_p9 = scmp.lt.s32.totalorder %s1300_s9, %s1300_s9 }
  0x43   : > { %p1098_p4 = scmp.ne.s32.totalorder %s1300_s9, %s1097_s30  ;;  %p1106_p10 = scmp.lt.s32.totalorder %s1097_s30, %s1097_s30 }
  0x45   : > { %p1100_p6 = pnand %p1098_p4, %p1312_p7  ;;  %p1107_p11 = por %p1106_p10, %p1105_p9 }
  0x47   : > { %p1101_p8 = pneg %p1100_p6 }
  0x49   : > { %p1108_p12 = pnand %p1107_p11, %p1101_p8 }
  0x4b   : > { %1111 = shalt.err (!%p1108_p12)
}
  0x4c   : > { %s1224_s13 = smov 64   ;;  %s1225_s14 = smov 4  }
  0x4d   : > { %957 = dma.hbm_to_vmem [thread:$0]  (!%p1296_p5), %s1535_s1, 512, %s1300_s9, [#allocation3], %s1224_s13, %s1224_s13, %s1225_s14  }
  0x4e   : > { %s1112_s19 = scalar_lea.hbm %s1537_s3, 16 }
  0x4f   : > { %p1113_p13 = scmp.ne.s32.totalorder %s1537_s3, %s1112_s19  ;;  %p1119_p4 = scmp.lt.u32.totalorder %s1112_s19, %s1537_s3 }
  0x51   : > { %p1115_p0 = pnand %p1113_p13, %p1312_p7 }
  0x53   : > { %p1116_p1 = pneg %p1115_p0 }
  0x55   : > { %p1121_p6 = pnand %p1119_p4, %p1116_p1 }
  0x57   : > { %1124 = shalt.err (!%p1121_p6)
}
  0x58   : > { %s1125_s25 = scalar_lea.vmem %s242_s12, 16  ;;  %s1132_s9 = scalar_lea.vmem %s242_s12, 32 }
  0x59   : > { %p1126_p8 = scmp.ne.s32.totalorder %s242_s12, %s1125_s25  ;;  %p1133_p11 = scmp.lt.s32.totalorder %s242_s12, %s242_s12 }
  0x5a   : > { %p1134_p12 = scmp.lt.s32.totalorder %s1132_s9, %s1125_s25 }
  0x5b   : > { %p1128_p9 = pnand %p1126_p8, %p1312_p7 }
  0x5c   : > { %p1135_p2 = por %p1134_p12, %p1133_p11 }
  0x5d   : > { %p1129_p10 = pneg %p1128_p9 }
  0x5f   : > { %p1136_p3 = pnand %p1135_p2, %p1129_p10 }
  0x61   : > { %1139 = shalt.err (!%p1136_p3)
}
  0x62   : > { %963 = dma.hbm_to_vmem [thread:$0]  (!%p1296_p5), %s1537_s3, 16, %s242_s12, [#allocation5]  }
  0x63   : > { %s1226_s11 = smov [#allocation9]   ;;  %s1227_s15 = smov [#allocation10]  }
  0x64   : > { %s262_s30 = sshll.u32 %s1226_s11, 4  ;;  %s276_s16 = sshll.u32 %s1227_s15, 4  ;;  %s263_s30 = int_to_ptr.vmem [resolvable:$true] %s262_s30  ;;  %s277_s16 = int_to_ptr.vmem [resolvable:$true] %s276_s16 }
  0x65   : > { %s1140_s19 = scalar_lea.hbm %s1539_s5, 256 }
  0x66   : > { %p1141_p2 = scmp.ne.s32.totalorder %s1539_s5, %s1140_s19  ;;  %p1147_p0 = scmp.lt.u32.totalorder %s1140_s19, %s1539_s5 }
  0x68   : > { %p1143_p3 = pnand %p1141_p2, %p1312_p7 }
  0x6a   : > { %p1144_p13 = pneg %p1143_p3 }
  0x6c   : > { %p1149_p1 = pnand %p1147_p0, %p1144_p13 }
  0x6e   : > { %1152 = shalt.err (!%p1149_p1)
}
  0x6f   : > { %s1153_s12 = scalar_lea.vmem %s263_s30, 256  ;;  %p1161_p9 = scmp.lt.s32.totalorder %s263_s30, %s263_s30 }
  0x70   : > { %p1154_p4 = scmp.ne.s32.totalorder %s263_s30, %s1153_s12  ;;  %p1162_p10 = scmp.lt.s32.totalorder %s1153_s12, %s1153_s12 }
  0x72   : > { %p1156_p6 = pnand %p1154_p4, %p1312_p7  ;;  %p1163_p11 = por %p1162_p10, %p1161_p9 }
  0x74   : > { %p1157_p8 = pneg %p1156_p6 }
  0x76   : > { %p1164_p12 = pnand %p1163_p11, %p1157_p8 }
  0x78   : > { %1167 = shalt.err (!%p1164_p12)
}
  0x79   : > { %969 = dma.hbm_to_vmem [thread:$0]  (!%p1296_p5), %s1539_s5, 256, %s263_s30, [#allocation8], %s1224_s13, %s1224_s13, %s1225_s14  }
  0x7a   : > { %s1168_s11 = scalar_lea.hbm %s1540_s6, 16 }
  0x7b   : > { %p1169_p2 = scmp.ne.s32.totalorder %s1540_s6, %s1168_s11  ;;  %p1175_p0 = scmp.lt.u32.totalorder %s1168_s11, %s1540_s6 }
  0x7d   : > { %p1171_p3 = pnand %p1169_p2, %p1312_p7 }
  0x7f   : > { %p1172_p13 = pneg %p1171_p3 }
  0x81   : > { %p1177_p1 = pnand %p1175_p0, %p1172_p13 }
  0x83   : > { %1180 = shalt.err (!%p1177_p1)
}
  0x84   : > { %s1181_s20 = scalar_lea.vmem %s277_s16, 16  ;;  %s1188_s13 = scalar_lea.vmem %s277_s16, 32 }
  0x85   : > { %p1182_p4 = scmp.ne.s32.totalorder %s277_s16, %s1181_s20  ;;  %p1189_p9 = scmp.lt.s32.totalorder %s277_s16, %s277_s16 }
  0x86   : > { %p1190_p10 = scmp.lt.s32.totalorder %s1188_s13, %s1181_s20 }
  0x87   : > { %p1184_p6 = pnand %p1182_p4, %p1312_p7 }
  0x88   : > { %p1191_p11 = por %p1190_p10, %p1189_p9 }
  0x89   : > { %p1185_p8 = pneg %p1184_p6 }
  0x8b   : > { %p1192_p12 = pnand %p1191_p11, %p1185_p8 }
  0x8d   : > { %1195 = shalt.err (!%p1192_p12)
}
  0x8e   : > { %972 = dma.hbm_to_vmem [thread:$0]  (!%p1296_p5), %s1540_s6, 16, %s277_s16, [#allocation11]  }
  0x8f   : > { %p1547_p2 = scmp.ne.s32.totalorder %s1544_s28, 0 }
  0x90   : > { %p1548_p3 = scmp.eq.s32.totalorder (!%p1547_p2), %s1279_s27, 0 }
  0x91   : > { %296 = sbr.rel (%p1547_p2) target bundleno = 1170 (0x492), region = 48 }
  0x98   : > { %1201 = dma.done.wait (%p1548_p3), [#allocation3], 512   ;;  %p1549_p7 = pmov %p1548_p3 }
  0x99   : > { %p1550_p13 = pmov %p1548_p3 }
  0x9a   : > { %1203 = vsyncadd (%p1549_p7), [#allocation3], 4294966784 }
  0x9b   : > { %1205 = dma.done.wait (%p1550_p13), [#allocation5], 32   ;;  %p1551_p0 = pmov %p1548_p3 }
  0x9d   : > { %1207 = vsyncadd (%p1551_p0), [#allocation5], 4294967264  ;;  %p1552_p1 = pmov %p1551_p0 }
  0x9e   : > { %p1553_p5 = pmov %p1551_p0 }
  0x9f   : > { %1209 = dma.done.wait (%p1552_p1), [#allocation8], 272  }
  0xa0   : > { %1211 = vsyncadd (%p1553_p5), [#allocation8], 4294967024  ;;  %p1554_p4 = pmov %p1551_p0 }
  0xa1   : > { %p1555_p6 = pmov %p1551_p0 }
  0xa2   : > { %1213 = dma.done.wait (%p1554_p4), [#allocation11], 16  }
  0xa3   : > { %1215 = vsyncadd (%p1555_p6), [#allocation11], 4294967280  ;;  %v1228_v0 = vmov 0.0   ;;  %vm1229_vm0 = vmmov 0   ;;  %v1006_v1 = vld [vmem:[#allocation2] sm:$0xff]   ;;  %p348_p8 = scmp.lt.s32.totalorder %s1279_s27, 3 }
  0xa4   : > { %910 = vmatprep.subr.bf16.mxu0 %v1228_v0  ;;  %918 = vmatprep.mubr.msk.bf16.mxu0 %vm1229_vm0, %v1228_v0  ;;  %v1007_v2 = vld [vmem:[#allocation2 + $0x8] sm:$0xff]   ;;  %v1008_v3 = vld [vmem:[#allocation2 + $0x10] sm:$0xff]   ;;  %v1009_v4 = vld [vmem:[#allocation2 + $0x18] sm:$0xff]   ;;  %vm400_vm1 = vcmask 523264   ;;  %s1230_s22 = smov 64   ;;  %s1231_s23 = smov 96  }
  0xa5   : > { %911 = vmatpush3.bf16.msra.mxu0 %v1006_v1  ;;  %s349_s28 = scalar_select %p348_p8, %s1279_s27, 3  ;;  %v879_v6 = vld [vmem:[#allocation4] ss:$0 sm:$0xff]  ;;  %v1479_v13 = vld [vmem:[#allocation6] ss:$0 sm:$0xff]  ;;  %vm446_vm2 = vcmask 261120  }
  0xa6   : > { %912 = vmatprep.subr.bf16.mxu0 %v1228_v0  ;;  %s1232_s12 = smov 32   ;;  %v1489_v26 = vld [vmem:[#allocation7] ss:$0 sm:$0xff]  ;;  %v1010_v29 = vld [vmem:[#allocation9] sm:$0xff]   ;;  %vm601_vm3 = vcmask 1043456   ;;  %s876_s25 = sshll.u32 %s1279_s27, 1 }
  0xa7   : > { %s875_s10 = sshll.u32 %s349_s28, 2  ;;  %922 = vmatprep.subr.bf16.mxu1 %v1010_v29  ;;  %p353_p9 = scmp.lt.s32.totalorder %s876_s25, 7  ;;  %vm689_vm4 = vcmask 785408  }
  0xa8   : > { %s351_s21 = scalar_lea.vmem %s1534_s0, %s875_s10  ;;  %923 = vmatpush3.bf16.msra.mxu1 %v1010_v29 }
  0xa9   : > { %913 = vmatpush3.bf16.msra.mxu0 %v1007_v2  ;;  %v360_v5 = vld [vmem:[%s351_s21] sm:$0xf]  ;;  %s1557_s25 = smov (!%p353_p9, %s876_s25), 7 }
  0xaa   : > { %914 = vmatprep.subr.bf16.mxu0 %v1228_v0  ;;  %s900_s9 = sshll.u32 %s1557_s25, 3 }
  0xab   : > { %s357_s11 = scalar_lea.vmem %s1541_s7, %s900_s9 }
  0xad   : > { %915 = vmatpush3.bf16.msra.mxu0 %v1008_v3 }
  0xae   : > { %916 = vmatprep.subr.bf16.mxu0 %v1228_v0 }
  0xb1   : > { %917 = vmatpush3.bf16.msra.mxu0 %v1009_v4 }
  0xb4   : > { %919 = vmatmul.mubr.msk.bf16.vlgmr.msra.gmra.mrb[0].mxu0 %vm400_vm1, %v360_v5 }
 0x187   : > { %v438_v7 = vpop.f32.mrb[0].mxu0 }
 0x188   : > { %v1466_v8 = vadd.f32 %v879_v6, %v438_v7  ;;  %v920_v9 = vpop.f32.mrb[1].mxu0 }
 0x189   : > { %v441_v10 = vpop.f32.mrb[2].mxu0 }
 0x18a   : > { %520 = vrot.lane.b32.xlu1 %v1466_v8, %s1230_s22  ;;  %484 = vrot.lane.b32.xlu0 %v1466_v8, %s1231_s23  ;;  %v921_v11 = vpop.f32.mrb[3].mxu0  ;;  %v450_v12 = vmul.f32 %v1466_v8, %v1466_v8  ;;  %v447_v28 = vsel %vm446_vm2, %v1466_v8, 0.0 }
 0x18c   : > { %v451_v27 = vsel %vm446_vm2, %v450_v12, 0.0 }
 0x18e   : > { %555 = vrot.lane.b32.xlu0 %v1466_v8, %s1232_s12  ;;  %491 = vrot.lane.b32.xlu1 %v450_v12, %s1231_s23 }
 0x192   : > { %561 = vrot.lane.b32.xlu0 %v450_v12, %s1232_s12  ;;  %526 = vrot.lane.b32.xlu1 %v450_v12, %s1230_s22 }
 0x196   : > { %506 = vrot.lane.b32.xlu1 %v1479_v13, %s1232_s12 }
 0x1fc   : > { %v521_v14 = vpop.permute.xlu1 %520  ;;  %v485_v15 = vpop.permute.xlu0 %484 }
 0x1fd   : > { %v487_v16 = vsel %vm446_vm2, %v485_v15, 0.0  ;;  %v523_v19 = vsel %vm446_vm2, %v521_v14, 0.0 }
 0x1fe   : > { %488 = vadd.xlane.f32.xlu0 %v487_v16  ;;  %v1011_v16 = vld [vmem:[#allocation9 + $0x8] sm:$0xff]  }
 0x1ff   : > { %924 = vmatprep.subr.bf16.mxu1 %v1011_v16 }
 0x200   : > { %v556_v17 = vpop.permute.xlu0 %555  ;;  %v492_v18 = vpop.permute.xlu1 %491  ;;  %925 = vmatpush3.bf16.msra.mxu1 %v1011_v16 }
 0x201   : > { %v558_v20 = vsel %vm446_vm2, %v556_v17, 0.0  ;;  %v494_v23 = vsel %vm446_vm2, %v492_v18, 0.0 }
 0x202   : > { %524 = vadd.xlane.f32.xlu0 %v523_v19  ;;  %559 = vadd.xlane.f32.xlu1 %v558_v20 }
 0x204   : > { %v562_v21 = vpop.permute.xlu0 %561  ;;  %v527_v24 = vpop.permute.xlu1 %526 }
 0x205   : > { %v564_v22 = vsel %vm446_vm2, %v562_v21, 0.0  ;;  %v529_v25 = vsel %vm446_vm2, %v527_v24, 0.0 }
 0x206   : > { %565 = vadd.xlane.f32.xlu1 %v564_v22  ;;  %495 = vadd.xlane.f32.xlu0 %v494_v23 }
 0x208   : > { %v507_v30 = vpop.permute.xlu1 %506 }
 0x20a   : > { %530 = vadd.xlane.f32.xlu0 %v529_v25 }
 0x217   : > { %510 = vrot.lane.b32.xlu1 %v1489_v26, %s1232_s12 }
 0x21b   : > { %541 = vrot.lane.b32.xlu1 %v1479_v13, %s1230_s22 }
 0x21f   : > { %545 = vrot.lane.b32.xlu1 %v1489_v26, %s1230_s22 }
 0x220   : > { %576 = vrot.lane.b32.xlu0 %v1479_v13, %s1231_s23 }
 0x224   : > { %580 = vrot.lane.b32.xlu0 %v1489_v26, %s1231_s23 }
 0x243   : > { %452 = vadd.xlane.f32.xlu1 %v451_v27  ;;  %448 = vadd.xlane.f32.xlu0 %v447_v28 }
 0x28b   : > { %v489_v31 = vpop.xlane.xlu0 %488 }
 0x28c   : > { %v497_v32 = vmul.f32 0.03125, %v489_v31 }
 0x28e   : > { %v499_v36 = vmul.f32 %v497_v32, %v497_v32  ;;  %v502_v57 = vsub.f32 %v1466_v8, %v497_v32 }
 0x28f   : > { %v525_v33 = vpop.xlane.xlu0 %524  ;;  %v560_v34 = vpop.xlane.xlu1 %559 }
 0x290   : > { %v567_v35 = vmul.f32 0.03125, %v560_v34  ;;  %v532_v39 = vmul.f32 0.03125, %v525_v33 }
 0x292   : > { %v569_v40 = vmul.f32 %v567_v35, %v567_v35  ;;  %v534_v46 = vmul.f32 %v532_v39, %v532_v39  ;;  %v572_v59 = vsub.f32 %v1466_v8, %v567_v35  ;;  %v537_v0 = vsub.f32 %v1466_v8, %v532_v39 }
 0x293   : > { %v496_v37 = vpop.xlane.xlu0 %495  ;;  %v566_v38 = vpop.xlane.xlu1 %565 }
 0x294   : > { %v498_v41 = vmul.f32 0.03125, %v496_v37  ;;  %v568_v42 = vmul.f32 0.03125, %v566_v38 }
 0x296   : > { %v500_v43 = vsub.f32 %v498_v41, %v499_v36  ;;  %v570_v44 = vsub.f32 %v568_v42, %v569_v40 }
 0x297   : > { %v531_v45 = vpop.xlane.xlu0 %530  ;;  %v511_v55 = vpop.permute.xlu1 %510 }
 0x298   : > { %v501_v47 = vmax.f32 %v500_v43, 0.0  ;;  %v571_v48 = vmax.f32 %v570_v44, 0.0  ;;  %v533_v49 = vmul.f32 0.03125, %v531_v45 }
 0x29a   : > { %v503_v50 = vadd.f32 1e-06, %v501_v47  ;;  %v573_v51 = vadd.f32 1e-06, %v571_v48  ;;  %v535_v52 = vsub.f32 %v533_v49, %v534_v46 }
 0x29b   : > { %v577_v56 = vpop.permute.xlu0 %576  ;;  %v542_v60 = vpop.permute.xlu1 %541 }
 0x29c   : > { %1012 = vrsqrt.f32 %v503_v50  ;;  %v536_v53 = vmax.f32 %v535_v52, 0.0 }
 0x29d   : > { %1014 = vrsqrt.f32 %v573_v51 }
 0x29e   : > { %v538_v54 = vadd.f32 1e-06, %v536_v53 }
 0x29f   : > { %v581_v2 = vpop.permute.xlu0 %580  ;;  %v546_v9 = vpop.permute.xlu1 %545 }
 0x2a0   : > { %1016 = vrsqrt.f32 %v538_v54 }
 0x2a6   : > { %v1013_v58 = vpop.eup %1012 }
 0x2a7   : > { %v1015_v61 = vpop.eup %1014  ;;  %v505_v62 = vmul.f32 %v1013_v58, %v502_v57 }
 0x2a8   : > { %v575_v63 = vmul.f32 %v1015_v61, %v572_v59 }
 0x2a9   : > { %v509_v1 = vmul.f32 %v507_v30, %v505_v62 }
 0x2aa   : > { %v1017_v3 = vpop.eup %1016  ;;  %v579_v4 = vmul.f32 %v577_v56, %v575_v63 }
 0x2ab   : > { %v513_v5 = vadd.f32 %v511_v55, %v509_v1  ;;  %v540_v6 = vmul.f32 %v1017_v3, %v537_v0 }
 0x2ac   : > { %v583_v7 = vadd.f32 %v581_v2, %v579_v4 }
 0x2ad   : > { %v515_v10 = vmul.f32 0.70710677, %v513_v5  ;;  %v544_v11 = vmul.f32 %v542_v60, %v540_v6  ;;  %v514_v19 = vmul.f32 0.5, %v513_v5 }
 0x2ae   : > { %v585_v12 = vmul.f32 0.70710677, %v583_v7  ;;  %v584_v21 = vmul.f32 0.5, %v583_v7 }
 0x2af   : > { %1018 = verf.f32 %v515_v10  ;;  %v548_v14 = vadd.f32 %v546_v9, %v544_v11 }
 0x2b0   : > { %1020 = verf.f32 %v585_v12 }
 0x2b1   : > { %v550_v15 = vmul.f32 0.70710677, %v548_v14  ;;  %v549_v27 = vmul.f32 0.5, %v548_v14 }
 0x2b3   : > { %1022 = verf.f32 %v550_v15 }
 0x2b9   : > { %v1019_v17 = vpop.eup %1018 }
 0x2ba   : > { %v1021_v18 = vpop.eup %1020  ;;  %v517_v20 = vadd.f32 1.0, %v1019_v17 }
 0x2bb   : > { %v587_v22 = vadd.f32 1.0, %v1021_v18 }
 0x2bc   : > { %v518_v23 = vmul.f32 %v517_v20, %v514_v19 }
 0x2bd   : > { %v1023_v24 = vpop.eup %1022  ;;  %v588_v25 = vmul.f32 %v587_v22, %v584_v21 }
 0x2be   : > { %v552_v28 = vadd.f32 1.0, %v1023_v24  ;;  %v519_v29 = vpack.c.bf16 %v518_v23, %v518_v23 }
 0x2bf   : > { %v589_v32 = vpack.c.bf16 %v588_v25, %v588_v25 }
 0x2c0   : > { %v591_v30 = vrot.slane %v519_v29, 4  ;;  %v553_v31 = vmul.f32 %v552_v28, %v549_v27 }
 0x2c1   : > { %v598_v34 = vrot.slane %v589_v32, 4 }
 0x2c2   : > { %592 = vrot.lane.b32.xlu0 %v591_v30, %s1231_s23  ;;  %v554_v33 = vpack.c.bf16 %v553_v31, %v553_v31 }
 0x2c4   : > { %595 = vrot.lane.b32.xlu1 %v554_v33, %s1230_s22 }
 0x2c6   : > { %599 = vrot.lane.b32.xlu0 %v598_v34, %s1232_s12 }
 0x2d0   : > { %v449_v35 = vpop.xlane.xlu0 %448  ;;  %v453_v37 = vpop.xlane.xlu1 %452 }
 0x2d1   : > { %v454_v36 = vmul.f32 0.03125, %v449_v35  ;;  %v455_v39 = vmul.f32 0.03125, %v453_v37 }
 0x2d3   : > { %v456_v38 = vmul.f32 %v454_v36, %v454_v36  ;;  %v459_v44 = vsub.f32 %v1466_v8, %v454_v36 }
 0x2d5   : > { %v457_v40 = vsub.f32 %v455_v39, %v456_v38 }
 0x2d7   : > { %v458_v41 = vmax.f32 %v457_v40, 0.0 }
 0x2d9   : > { %v460_v42 = vadd.f32 1e-06, %v458_v41 }
 0x2db   : > { %1024 = vrsqrt.f32 %v460_v42 }
 0x2e5   : > { %v1025_v43 = vpop.eup %1024 }
 0x2e6   : > { %v462_v45 = vmul.f32 %v1025_v43, %v459_v44 }
 0x2e8   : > { %v469_v46 = vmul.f32 %v1479_v13, %v462_v45  ;;  %v887_v13 = vld [vmem:[#allocation10] ss:$0 sm:$0xff] }
 0x2ea   : > { %v476_v47 = vadd.f32 %v1489_v26, %v469_v46 }
 0x2ec   : > { %v478_v48 = vmul.f32 0.70710677, %v476_v47  ;;  %v477_v51 = vmul.f32 0.5, %v476_v47 }
 0x2ee   : > { %1026 = verf.f32 %v478_v48 }
 0x2f8   : > { %v1027_v49 = vpop.eup %1026 }
 0x2f9   : > { %v480_v50 = vadd.f32 1.0, %v1027_v49 }
 0x2fb   : > { %v481_v52 = vmul.f32 %v480_v50, %v477_v51 }
 0x2fd   : > { %v482_v53 = vpack.c.bf16 %v481_v52, %v481_v52 }
 0x334   : > { %v593_v54 = vpop.permute.xlu0 %592 }
 0x335   : > { %v604_v55 = vsel %vm601_vm3, %v482_v53, %v593_v54 }
 0x336   : > { %926 = vmatprep.mubr.msk.bf16.mxu1 %vm446_vm2, %v604_v55  ;;  %v596_v56 = vpop.permute.xlu1 %595 }
 0x338   : > { %v600_v57 = vpop.permute.xlu0 %599 }
 0x339   : > { %v607_v8 = vsel %vm601_vm3, %v596_v56, %v600_v57 }
 0x33a   : > { %927 = vmatmul.mubr.msk.bf16.vlgmr.msra.gmra.mrb[0].mxu1 %vm446_vm2, %v607_v8 }
 0x40d   : > { %v928_v26 = vpop.f32.mrb[0].mxu1 }
 0x40e   : > { %v669_v58 = vpop.f32.mrb[1].mxu1  ;;  %v678_v63 = vadd.f32 %v928_v26, %v887_v13 }
 0x40f   : > { %v670_v59 = vadd.f32 %v887_v13, %v669_v58  ;;  %v929_v60 = vpop.f32.mrb[2].mxu1 }
 0x410   : > { %v672_v61 = vpop.f32.mrb[3].mxu1  ;;  %v681_v0 = vadd.f32 %v929_v60, %v887_v13 }
 0x411   : > { %v673_v62 = vadd.f32 %v887_v13, %v672_v61  ;;  %699 = vrot.lane.b32.xlu0 %v670_v59, %s1230_s22 }
 0x413   : > { %685 = vrot.lane.b32.xlu1 %v673_v62, %s1230_s22 }
 0x415   : > { %727 = vrot.lane.b32.xlu0 %v678_v63, %s1230_s22 }
 0x417   : > { %713 = vrot.lane.b32.xlu1 %v681_v0, %s1230_s22 }
 0x483   : > { %v700_v1 = vpop.permute.xlu0 %699 }
 0x484   : > { %v702_v2 = vsel %vm400_vm1, %v700_v1, %v673_v62 }
 0x485   : > { %v703_v3 = vsel %vm689_vm4, %v702_v2, %v673_v62  ;;  %v686_v4 = vpop.permute.xlu1 %685 }
 0x486   : > { %v705_v5 = vcombine.high %v703_v3, %v703_v3  ;;  %v707_v6 = vpack.c.bf16 %v703_v3, %v703_v3  ;;  %v688_v7 = vsel %vm400_vm1, %v670_v59, %v686_v4 }
 0x487   : > { %v690_v9 = vsel %vm689_vm4, %v688_v7, %v686_v4  ;;  %v728_v10 = vpop.permute.xlu0 %727 }
 0x488   : > { %v708_v11 = vpack.c.bf16 %v705_v5, %v705_v5  ;;  %892 = vst [vmem:[%s357_s11 + $0x2] sm:$0x3] %v707_v6  ;;  %v692_v12 = vcombine.high %v690_v9, %v690_v9  ;;  %v694_v14 = vpack.c.bf16 %v690_v9, %v690_v9  ;;  %v730_v15 = vsel %vm400_vm1, %v728_v10, %v681_v0 }
 0x489   : > { %v731_v16 = vsel %vm689_vm4, %v730_v15, %v681_v0  ;;  %v714_v17 = vpop.permute.xlu1 %713 }
 0x48a   : > { %893 = vst [vmem:[%s357_s11 + $0xa] sm:$0x3] %v708_v11  ;;  %v695_v18 = vpack.c.bf16 %v692_v12, %v692_v12  ;;  %696 = vst [vmem:[%s357_s11] sm:$0x3] %v694_v14  ;;  %v733_v19 = vcombine.high %v731_v16, %v731_v16  ;;  %v735_v20 = vpack.c.bf16 %v731_v16, %v731_v16 }
 0x48b   : > { %v716_v21 = vsel %vm400_vm1, %v678_v63, %v714_v17 }
 0x48c   : > { %v717_v22 = vsel %vm689_vm4, %v716_v21, %v714_v17  ;;  %697 = vst [vmem:[%s357_s11 + $0x8] sm:$0x3] %v695_v18  ;;  %v736_v23 = vpack.c.bf16 %v733_v19, %v733_v19  ;;  %896 = vst [vmem:[%s357_s11 + $0x6] sm:$0x3] %v735_v20 }
 0x48d   : > { %v719_v24 = vcombine.high %v717_v22, %v717_v22  ;;  %v721_v25 = vpack.c.bf16 %v717_v22, %v717_v22 }
 0x48e   : > { %897 = vst [vmem:[%s357_s11 + $0xe] sm:$0x3] %v736_v23 }
 0x48f   : > { %v722_v27 = vpack.c.bf16 %v719_v24, %v719_v24  ;;  %894 = vst [vmem:[%s357_s11 + $0x4] sm:$0x3] %v721_v25 }
 0x491   : > { %895 = vst [vmem:[%s357_s11 + $0xc] sm:$0x3] %v722_v27 }
 0x492 PF: > { %s21_s24 = sadd.s32 1, %s1218_s24  }
 0x493   : > { %p18_p10 = scmp.ge.s32.totalorder %s21_s24, 6  }
 0x495   :  { %20 = sbr.rel (!%p18_p10) target bundleno = 4 (0x4), region = 106 }
 0x49c   :  { %764 = vsyncpa [#allocation3], 1 }
 0x49d   :  { %766 = vsyncpa [#allocation3 + $0x1], 1 }
 0x49e   :  { %767 = vsyncpa [#allocation5], 1 }
 0x49f   :  { %768 = vsyncpa [#allocation8], 1 }
 0x4a0   :  { %769 = vsyncpa [#allocation11], 1 }

// kernel: conv_transformer_neck_forward.3
= control target key start
LH: loop header
LB: loop body
LE: loop exit
PB: predicated region body
PF: predicated region fallthrough
CT: control target
= control target key end

     0   :  { %s10010_s0 = inlined_call_operand.vmem [shape: bf16[512,32], index: 0, kind: input, shape index: {}]   ;;  %s10011_s1 = inlined_call_operand.hbm [shape: bf16[32,128], index: 1, kind: input, shape index: {}]   ;;  %s10012_s2 = inlined_call_operand.hbm [shape: f32[1,128], index: 2, kind: input, shape index: {}]   ;;  %s10013_s3 = inlined_call_operand.hbm [shape: f32[1,32], index: 3, kind: input, shape index: {}]   ;;  %s10014_s4 = inlined_call_operand.hbm [shape: f32[1,32], index: 4, kind: input, shape index: {}]   ;;  %s10015_s5 = inlined_call_operand.hbm [shape: bf16[32,128], index: 5, kind: input, shape index: {}]   ;;  %s10016_s6 = inlined_call_operand.hbm [shape: f32[1,128], index: 6, kind: input, shape index: {}]   ;;  %s10017_s7 = inlined_call_operand.vmem [shape: bf16[32,4,16,128], index: 7, kind: output, shape index: {}]  }
   0x1   :  { %10162 = sst [smem:[#allocation90_spill]] %s10012_s2 }
   0x2   :  { %10163 = sst [smem:[#allocation91_spill]] %s10014_s4 }
   0x3   :  { %12 = vsyncpa [#allocation3], 0 }
   0x4   :  { %13 = vsyncpa [#allocation5], 0 }
   0x5   :  { %14 = vsyncpa [#allocation8], 0 }
   0x6   :  { %15 = vsyncpa [#allocation11], 0  ;;  %s6625_s24 = smov 0   ;;  %s6627_s25 = smov 0  }
   0x7   :  { %s6629_s26 = smov 0  }
   0x8 LB: > { %s6638_s27 = sadd.s32 4294967295, %s6540_s26   ;;  %s6640_s28 = sadd.s32 1, %s6540_s26   ;;  %s6540_s26 = sphi %s6629_s26, %s10518_s26   ;;  %s6536_s25 = sphi %s6627_s25, %s10517_s25   ;;  %s6532_s24 = sphi %s6625_s24, %s10516_s24  }
   0x9   : > { %s177_s29 = ssub.s32 %s6540_s26, %s6640_s28  ;;  %s180_s30 = sadd.s32 1, %s6536_s25 }
   0xa   : > { %p178_p0 = scmp.eq.s32.totalorder %s177_s29, 0  ;;  %p190_p1 = scmp.ne.s32.totalorder %s6536_s25, %s6532_s24 }
   0xb   : > { %p191_p2 = scmp.eq.s32.totalorder %s6638_s27, 3  ;;  %p4874_p3 = scmp.ge.s32.totalorder %s6540_s26, 1 }
   0xc   : > { %s6648_s8 = scalar_select %p178_p0, %s6536_s25, %s180_s30  }
   0xd   : > { %p6650_p4 = por %p191_p2, %p190_p1  ;;  %p204_p5 = scmp.lt.s32.totalorder %s6540_s26, 5 }
   0xe   : > { %p10018_p6 = scmp.eq.s32.totalorder %s6638_s27, 0  ;;  %s6574_s11 = smov [#allocation4]  }
   0xf   : > { %s10164_s9 = scalar_select %p6650_p4, 1, 0 }
  0x10   : > { %p6655_p7 = pnand %p4874_p3, %p204_p5  ;;  %s230_s12 = sshll.u32 %s6574_s11, 4  ;;  %s231_s12 = int_to_ptr.vmem [resolvable:$true] %s230_s12 }
  0x11   : > { %s6575_s13 = smov [#allocation7]   ;;  %s6576_s16 = smov [#allocation2]  }
  0x12   : > { %s10165_s10 = scalar_select %p6655_p7, 1, 0 }
  0x13   : > { %p5634_p8 = pneg %p6655_p7  ;;  %s252_s14 = sshll.u32 %s6575_s13, 4  ;;  %s6667_s14 = int_to_ptr.vmem [resolvable:$true] %s252_s14 }
  0x14   : > { %s216_s17 = sshll.u32 %s6576_s16, 4  ;;  %s10167_s2 = sld [smem:[#allocation90_spill]]  ;;  %s6669_s17 = int_to_ptr.vmem [resolvable:$true] %s216_s17 }
  0x15   : > { %p6663_p9 = pnand %p10018_p6, %p5634_p8 }
  0x17   : > { %p6679_p11 = pneg %p6663_p9 }
  0x1a   : > { %s6302_s20 = scalar_lea.hbm %s10167_s2, 16 }
  0x1b   : > { %p6303_p10 = scmp.ne.s32.totalorder %s10167_s2, %s6302_s20  ;;  %p6309_p0 = scmp.lt.u32.totalorder %s6302_s20, %s10167_s2 }
  0x1d   : > { %p6305_p12 = pnand %p6679_p11, %p6303_p10 }
  0x1f   : > { %p6306_p13 = pneg %p6305_p12 }
  0x21   : > { %p6311_p1 = pnand %p6309_p0, %p6306_p13 }
  0x23   : > { %6314 = shalt.err (!%p6311_p1)
}
  0x24   : > { %s6315_s30 = scalar_lea.vmem %s231_s12, 16  ;;  %s6322_s11 = scalar_lea.vmem %s231_s12, 32 }
  0x25   : > { %p6316_p2 = scmp.ne.s32.totalorder %s231_s12, %s6315_s30  ;;  %p6323_p8 = scmp.lt.s32.totalorder %s231_s12, %s231_s12 }
  0x26   : > { %p6324_p6 = scmp.lt.s32.totalorder %s6322_s11, %s6315_s30 }
  0x27   : > { %p6318_p3 = pnand %p6316_p2, %p6679_p11 }
  0x28   : > { %p6325_p4 = por %p6324_p6, %p6323_p8 }
  0x29   : > { %p6319_p5 = pneg %p6318_p3 }
  0x2b   : > { %p6326_p7 = pnand %p6325_p4, %p6319_p5 }
  0x2d   : > { %6329 = shalt.err (!%p6326_p7)
}
  0x2e   : > { %5640 = dma.hbm_to_vmem [thread:$0]  (!%p6663_p9), %s10167_s2, 16, %s231_s12, [#allocation5]  }
  0x2f   : > { %s10169_s4 = sld [smem:[#allocation91_spill]] }
  0x35   : > { %s6330_s20 = scalar_lea.hbm %s10169_s4, 16 }
  0x36   : > { %p6331_p10 = scmp.ne.s32.totalorder %s10169_s4, %s6330_s20  ;;  %p6337_p4 = scmp.lt.u32.totalorder %s6330_s20, %s10169_s4 }
  0x38   : > { %p6333_p12 = pnand %p6331_p10, %p6679_p11 }
  0x3a   : > { %p6334_p6 = pneg %p6333_p12 }
  0x3c   : > { %p6339_p7 = pnand %p6337_p4, %p6334_p6 }
  0x3e   : > { %6342 = shalt.err (!%p6339_p7)
}
  0x3f   : > { %s6343_s12 = scalar_lea.vmem %s6667_s14, 16  ;;  %s6350_s30 = scalar_lea.vmem %s6667_s14, 32 }
  0x40   : > { %p6344_p13 = scmp.ne.s32.totalorder %s6667_s14, %s6343_s12  ;;  %p6351_p2 = scmp.lt.s32.totalorder %s6667_s14, %s6667_s14 }
  0x41   : > { %p6352_p3 = scmp.lt.s32.totalorder %s6350_s30, %s6343_s12 }
  0x42   : > { %p6346_p0 = pnand %p6344_p13, %p6679_p11 }
  0x43   : > { %p6353_p5 = por %p6352_p3, %p6351_p2 }
  0x44   : > { %p6347_p1 = pneg %p6346_p0 }
  0x46   : > { %p6354_p8 = pnand %p6353_p5, %p6347_p1 }
  0x48   : > { %6357 = shalt.err (!%p6354_p8)
}
  0x49   : > { %5646 = dma.hbm_to_vmem [thread:$0]  (!%p6663_p9), %s10169_s4, 16, %s6667_s14, [#allocation8]  }
  0x4a   : > { %s6358_s19 = scalar_lea.hbm %s10011_s1, 256 }
  0x4b   : > { %p6359_p10 = scmp.ne.s32.totalorder %s10011_s1, %s6358_s19  ;;  %p6365_p4 = scmp.lt.u32.totalorder %s6358_s19, %s10011_s1 }
  0x4d   : > { %p6361_p12 = pnand %p6359_p10, %p6679_p11 }
  0x4f   : > { %p6362_p6 = pneg %p6361_p12 }
  0x51   : > { %p6367_p7 = pnand %p6365_p4, %p6362_p6 }
  0x53   : > { %6370 = shalt.err (!%p6367_p7)
}
  0x54   : > { %s6371_s14 = scalar_lea.vmem %s6669_s17, 256  ;;  %p6379_p2 = scmp.lt.s32.totalorder %s6669_s17, %s6669_s17 }
  0x55   : > { %p6372_p13 = scmp.ne.s32.totalorder %s6669_s17, %s6371_s14  ;;  %p6380_p3 = scmp.lt.s32.totalorder %s6371_s14, %s6371_s14 }
  0x57   : > { %p6374_p0 = pnand %p6372_p13, %p6679_p11  ;;  %p6381_p5 = por %p6380_p3, %p6379_p2 }
  0x59   : > { %p6375_p1 = pneg %p6374_p0 }
  0x5b   : > { %p6382_p8 = pnand %p6381_p5, %p6375_p1 }
  0x5d   : > { %6385 = shalt.err (!%p6382_p8)
}
  0x5e   : > { %s6577_s29 = smov 64   ;;  %s6578_s12 = smov 4  }
  0x5f   : > { %5637 = dma.hbm_to_vmem [thread:$0]  (!%p6663_p9), %s10011_s1, 256, %s6669_s17, [#allocation3], %s6577_s29, %s6577_s29, %s6578_s12  }
  0x60   : > { %s6579_s13 = smov [#allocation6]   ;;  %s6580_s18 = smov [#allocation9]  }
  0x61   : > { %s241_s16 = sshll.u32 %s6579_s13, 4  ;;  %s262_s19 = sshll.u32 %s6580_s18, 4  ;;  %s242_s16 = int_to_ptr.vmem [resolvable:$true] %s241_s16  ;;  %s263_s19 = int_to_ptr.vmem [resolvable:$true] %s262_s19 }
  0x62   : > { %s6386_s22 = scalar_lea.hbm %s10013_s3, 16 }
  0x63   : > { %p6387_p10 = scmp.ne.s32.totalorder %s10013_s3, %s6386_s22  ;;  %p6393_p4 = scmp.lt.u32.totalorder %s6386_s22, %s10013_s3 }
  0x65   : > { %p6389_p12 = pnand %p6387_p10, %p6679_p11 }
  0x67   : > { %p6390_p6 = pneg %p6389_p12 }
  0x69   : > { %p6395_p7 = pnand %p6393_p4, %p6390_p6 }
  0x6b   : > { %6398 = shalt.err (!%p6395_p7)
}
  0x6c   : > { %s6399_s17 = scalar_lea.vmem %s242_s16, 16  ;;  %s6406_s30 = scalar_lea.vmem %s242_s16, 32 }
  0x6d   : > { %p6400_p13 = scmp.ne.s32.totalorder %s242_s16, %s6399_s17  ;;  %p6407_p2 = scmp.lt.s32.totalorder %s242_s16, %s242_s16 }
  0x6e   : > { %p6408_p3 = scmp.lt.s32.totalorder %s6406_s30, %s6399_s17 }
  0x6f   : > { %p6402_p0 = pnand %p6400_p13, %p6679_p11 }
  0x70   : > { %p6409_p5 = por %p6408_p3, %p6407_p2 }
  0x71   : > { %p6403_p1 = pneg %p6402_p0 }
  0x73   : > { %p6410_p8 = pnand %p6409_p5, %p6403_p1 }
  0x75   : > { %6413 = shalt.err (!%p6410_p8)
}
  0x76   : > { %5643 = dma.hbm_to_vmem [thread:$0]  (!%p6663_p9), %s10013_s3, 16, %s242_s16, [#allocation5]  }
  0x77   : > { %s6414_s18 = scalar_lea.hbm %s10015_s5, 256 }
  0x78   : > { %p6415_p10 = scmp.ne.s32.totalorder %s10015_s5, %s6414_s18  ;;  %p6421_p4 = scmp.lt.u32.totalorder %s6414_s18, %s10015_s5 }
  0x7a   : > { %p6417_p12 = pnand %p6415_p10, %p6679_p11 }
  0x7c   : > { %p6418_p6 = pneg %p6417_p12 }
  0x7e   : > { %p6423_p7 = pnand %p6421_p4, %p6418_p6 }
  0x80   : > { %6426 = shalt.err (!%p6423_p7)
}
  0x81   : > { %s6427_s14 = scalar_lea.vmem %s263_s19, 256  ;;  %p6435_p2 = scmp.lt.s32.totalorder %s263_s19, %s263_s19 }
  0x82   : > { %p6428_p13 = scmp.ne.s32.totalorder %s263_s19, %s6427_s14  ;;  %p6436_p3 = scmp.lt.s32.totalorder %s6427_s14, %s6427_s14 }
  0x84   : > { %p6430_p0 = pnand %p6428_p13, %p6679_p11  ;;  %p6437_p5 = por %p6436_p3, %p6435_p2 }
  0x86   : > { %p6431_p1 = pneg %p6430_p0 }
  0x88   : > { %p6438_p8 = pnand %p6437_p5, %p6431_p1 }
  0x8a   : > { %6441 = shalt.err (!%p6438_p8)
}
  0x8b   : > { %5649 = dma.hbm_to_vmem [thread:$0]  (!%p6663_p9), %s10015_s5, 256, %s263_s19, [#allocation8], %s6577_s29, %s6577_s29, %s6578_s12  }
  0x8c   : > { %s6581_s30 = smov [#allocation10]   ;;  %s6442_s4 = scalar_lea.hbm %s10016_s6, 16 }
  0x8d   : > { %s276_s11 = sshll.u32 %s6581_s30, 4  ;;  %p6443_p10 = scmp.ne.s32.totalorder %s10016_s6, %s6442_s4  ;;  %s277_s11 = int_to_ptr.vmem [resolvable:$true] %s276_s11 }
  0x8e   : > { %p6449_p4 = scmp.lt.u32.totalorder %s6442_s4, %s10016_s6 }
  0x8f   : > { %p6445_p12 = pnand %p6443_p10, %p6679_p11 }
  0x91   : > { %p6446_p6 = pneg %p6445_p12 }
  0x93   : > { %p6451_p7 = pnand %p6449_p4, %p6446_p6 }
  0x95   : > { %6454 = shalt.err (!%p6451_p7)
}
  0x96   : > { %s6455_s29 = scalar_lea.vmem %s277_s11, 16  ;;  %s6462_s12 = scalar_lea.vmem %s277_s11, 32 }
  0x97   : > { %p6456_p13 = scmp.ne.s32.totalorder %s277_s11, %s6455_s29  ;;  %p6463_p2 = scmp.lt.s32.totalorder %s277_s11, %s277_s11 }
  0x98   : > { %p6464_p3 = scmp.lt.s32.totalorder %s6462_s12, %s6455_s29 }
  0x99   : > { %p6458_p0 = pnand %p6456_p13, %p6679_p11 }
  0x9a   : > { %p6465_p5 = por %p6464_p3, %p6463_p2 }
  0x9b   : > { %p6459_p1 = pneg %p6458_p0 }
  0x9d   : > { %p6466_p8 = pnand %p6465_p5, %p6459_p1 }
  0x9f   : > { %6469 = shalt.err (!%p6466_p8)
}
  0xa0   : > { %5652 = dma.hbm_to_vmem [thread:$0]  (!%p6663_p9), %s10016_s6, 16, %s277_s11, [#allocation11]  }
  0xa1   : > { %p10170_p10 = scmp.ne.s32.totalorder %s10165_s10, 0 }
  0xa3   : > { %306 = sbr.rel (%p10170_p10) target bundleno = 2985 (0xba9), region = 48 }
  0xaa   : > { %p10171_p12 = scmp.eq.s32.totalorder %s6638_s27, 0 }
  0xac   : > { %6515 = dma.done.wait (%p10171_p12), [#allocation3], 256   ;;  %p10172_p11 = pmov %p10171_p12 }
  0xae   : > { %6517 = vsyncadd (%p10172_p11), [#allocation3], 4294967040  ;;  %p10173_p6 = pmov %p10172_p11 }
  0xb0   : > { %6519 = dma.done.wait (%p10173_p6), [#allocation5], 32   ;;  %p10174_p4 = pmov %p10173_p6 }
  0xb2   : > { %6521 = vsyncadd (%p10174_p4), [#allocation5], 4294967264  ;;  %p10175_p7 = pmov %p10174_p4 }
  0xb3   : > { %p10176_p9 = pmov %p10174_p4 }
  0xb4   : > { %6523 = dma.done.wait (%p10175_p7), [#allocation8], 272  }
  0xb5   : > { %6525 = vsyncadd (%p10176_p9), [#allocation8], 4294967024  ;;  %p10177_p13 = pmov %p10174_p4 }
  0xb6   : > { %p10178_p0 = pmov %p10174_p4 }
  0xb7   : > { %6527 = dma.done.wait (%p10177_p13), [#allocation11], 16  }
  0xb8   : > { %6529 = vsyncadd (%p10178_p0), [#allocation11], 4294967280  ;;  %s361_s10 = smul.u32 20, %s6638_s27  ;;  %v5964_v0 = vld [vmem:[#allocation2] sm:$0xff]   ;;  %v5965_v1 = vld [vmem:[#allocation2 + $0x8] sm:$0xff]   ;;  %vm476_vm0 = vcmask 261120  }
  0xb9   : > { %5497 = vmatprep.subr.bf16.mxu0 %v5964_v0  ;;  %v6830_v5 = vld [vmem:[#allocation7] ss:$0 sm:$0xff]  ;;  %v6832_v6 = vld [vmem:[#allocation6] ss:$0 sm:$0xff]  ;;  %s6582_s17 = smov 32   ;;  %s6583_s30 = smov 64  }
  0xba   : > { %p366_p1 = scmp.lt.s32.totalorder %s361_s10, 63  ;;  %5498 = vmatpush3.bf16.msra.mxu0 %v5964_v0  ;;  %1587 = vrot.lane.b32.xlu1 %v6830_v5, %s6582_s17  ;;  %v6844_v10 = vld [vmem:[#allocation4] ss:$0 sm:$0xff]  ;;  %s6584_s11 = smov 96   ;;  %v5976_v47 = vld [vmem:[#allocation9] sm:$0xff]   ;;  %v5977_v49 = vld [vmem:[#allocation9 + $0x8] sm:$0xff]  }
  0xbb   : > { %5499 = vmatprep.subr.bf16.mxu0 %v5965_v1  ;;  %1564 = vrot.lane.b32.xlu0 %v6832_v6, %s6582_s17  ;;  %s358_s13 = sand.u32 1, %s6532_s24   ;;  %vm3538_vm1 = vcmask 523264   ;;  %vm3559_vm2 = vcmask 785408   ;;  %p10512_p2 = scmp.ne.s32.totalorder %s10164_s9, 0 }
  0xbc   : > { %s10520_s10 = smov (!%p366_p1, %s361_s10), 63  ;;  %5605 = vmatprep.subr.bf16.mxu1 %v5976_v47  ;;  %s5609_s2 = smul.u32 320, %s358_s13 }
  0xbd   : > { %s4889_s15 = sshll.u32 %s10520_s10, 2  ;;  %5607 = vmatpush3.bf16.msra.mxu1 %v5976_v47  ;;  %s4350_s4 = smul.u32 (%p10512_p2), 10, %s6638_s27 }
  0xbe   : > { %s6824_s16 = scalar_lea.vmem %s10010_s0, %s4889_s15  ;;  %5500 = vmatpush3.bf16.msra.mxu0 %v5965_v1  ;;  %5606 = vmatprep.subr.bf16.mxu1 %v5977_v49  ;;  %s9498_s24 = scalar_lea.vmem [#allocation12], %s5609_s2  }
  0xbf   : > { %v5966_v2 = vld [vmem:[%s6824_s16] sm:$0xff]   ;;  %v5967_v3 = vld [vmem:[%s6824_s16 + $0x8] sm:$0xff]   ;;  %v5968_v4 = vld [vmem:[%s6824_s16 + $0x10] sm:$0xff]   ;;  %5521 = vmatprep.subr.bf16.mxu0 %v5976_v47  ;;  %s5442_s18 = smul.u32 (%p10512_p2), 320, %s6638_s27  ;;  %s4351_s20 = ssub.s32 (%p10512_p2), 32, %s4350_s4 }
  0xc0   : > { %5501 = vmatprep.mubr.msk.bf16.mxu0 %vm476_vm0, %v5966_v2  ;;  %v5969_v7 = vld [vmem:[%s6824_s16 + $0x18] sm:$0xff]   ;;  %v5970_v8 = vld [vmem:[%s6824_s16 + $0x20] sm:$0xff]   ;;  %v5971_v9 = vld [vmem:[%s6824_s16 + $0x28] sm:$0xff]   ;;  %p4352_p3 = scmp.lt.s32.totalorder (%p10512_p2), %s4351_s20, 10 }
  0xc1   : > { %5502 = vmatmul.mubr.msk.bf16.vlgmr.msra.gmra.mrb[0].mxu0 %vm476_vm0, %v5967_v3  ;;  %v5972_v39 = vld [vmem:[%s6824_s16 + $0x30] sm:$0xff]   ;;  %v5973_v41 = vld [vmem:[%s6824_s16 + $0x38] sm:$0xff]   ;;  %v5974_v45 = vld [vmem:[%s6824_s16 + $0x40] sm:$0xff]   ;;  %5608 = vmatpush3.bf16.msra.mxu1 %v5977_v49  ;;  %s9815_s29 = scalar_lea.vmem (%p10512_p2), %s10017_s7, %s5442_s18  }
  0xc2   : > { %5505 = vmatprep.mubr.msk.bf16.mxu0 %vm476_vm0, %v5968_v4  ;;  %v5975_v46 = vld [vmem:[%s6824_s16 + $0x48] sm:$0xff]   ;;  %5522 = vmatpush3.bf16.msra.mxu0 %v5976_v47 }
  0xc3   : > { %5523 = vmatprep.subr.bf16.mxu0 %v5977_v49 }
  0xc6   : > { %5524 = vmatpush3.bf16.msra.mxu0 %v5977_v49 }
  0xc9   : > { %5506 = vmatmul.mubr.msk.bf16.gmra.mrb[4].mxu0 %vm476_vm0, %v5969_v7 }
  0xca   : > { %5509 = vmatprep.mubr.msk.bf16.mxu0 %vm476_vm0, %v5970_v8 }
  0xd1   : > { %5510 = vmatmul.mubr.msk.bf16.gmra.mrb[8].mxu0 %vm476_vm0, %v5971_v9 }
  0xd2   : > { %5513 = vmatprep.mubr.msk.bf16.mxu0 %vm476_vm0, %v5972_v39 }
  0xd9   : > { %5514 = vmatmul.mubr.msk.bf16.gmra.mrb[12].mxu0 %vm476_vm0, %v5973_v41 }
  0xda   : > { %5517 = vmatprep.mubr.msk.bf16.mxu0 %vm476_vm0, %v5974_v45 }
  0xe1   : > { %5518 = vmatmul.mubr.msk.bf16.gmra.mrb[16].mxu0 %vm476_vm0, %v5975_v46 }
 0x12c   : > { %v6961_v50 = vpop.permute.xlu1 %1587 }
 0x12d   : > { %10191 = vst [vmem:[#allocation29_spill] sm:$0xff] %v6961_v50  ;;  %v6984_v58 = vpop.permute.xlu0 %1564 }
 0x12e   : > { %10194 = vst [vmem:[#allocation32_spill] sm:$0xff] %v6984_v58 }
 0x194   : > { %v5503_v11 = vpop.f32.mrb[0].mxu0 }
 0x195   : > { %v6849_v12 = vadd.f32 %v5503_v11, %v6844_v10  ;;  %v541_v13 = vpop.f32.mrb[1].mxu0 }
 0x196   : > { %v5504_v14 = vpop.f32.mrb[2].mxu0  ;;  %v6856_v16 = vadd.f32 %v6844_v10, %v541_v13 }
 0x197   : > { %10179 = vst [vmem:[#allocation17_spill] sm:$0xff] %v6849_v12  ;;  %1724 = vrot.lane.b32.xlu0 %v6849_v12, %s6583_s30  ;;  %1128 = vrot.lane.b32.xlu1 %v6849_v12, %s6584_s11  ;;  %v544_v15 = vpop.f32.mrb[3].mxu0  ;;  %v6864_v19 = vmul.f32 %v6849_v12, %v6849_v12  ;;  %v628_v21 = vsel %vm476_vm0, %v6849_v12, 0.0  ;;  %v6873_v23 = vadd.f32 %v5504_v14, %v6844_v10 }
 0x198   : > { %10180 = vst [vmem:[#allocation18_spill] sm:$0xff] %v6856_v16  ;;  %v622_v18 = vsel %vm476_vm0, %v6856_v16, 0.0  ;;  %v6879_v24 = vmul.f32 %v6856_v16, %v6856_v16  ;;  %v6888_v25 = vadd.f32 %v6844_v10, %v544_v15 }
 0x199   : > { %10181 = vst [vmem:[#allocation19_spill] sm:$0xff] %v6864_v19  ;;  %v708_v22 = vsel %vm476_vm0, %v6864_v19, 0.0  ;;  %10182 = vst [vmem:[#allocation20_spill] sm:$0xff] %v6873_v23  ;;  %v631_v30 = vsel %vm476_vm0, %v6873_v23, 0.0  ;;  %v6909_v32 = vmul.f32 %v6873_v23, %v6873_v23 }
 0x19a   : > { %10183 = vst [vmem:[#allocation21_spill] sm:$0xff] %v6879_v24  ;;  %10184 = vst [vmem:[#allocation22_spill] sm:$0xff] %v6888_v25  ;;  %v625_v28 = vsel %vm476_vm0, %v6888_v25, 0.0  ;;  %v702_v29 = vsel %vm476_vm0, %v6879_v24, 0.0  ;;  %v6924_v36 = vmul.f32 %v6888_v25, %v6888_v25 }
 0x19b   : > { %1124 = vrot.lane.b32.xlu0 %v6856_v16, %s6584_s11  ;;  %10186 = vst [vmem:[#allocation24_spill] sm:$0xff] %v6909_v32  ;;  %v711_v34 = vsel %vm476_vm0, %v6909_v32, 0.0 }
 0x19c   : > { %v5507_v17 = vpop.f32.mrb[4].mxu0  ;;  %10188 = vst [vmem:[#allocation26_spill] sm:$0xff] %v6924_v36  ;;  %v705_v40 = vsel %vm476_vm0, %v6924_v36, 0.0 }
 0x19d   : > { %v557_v20 = vpop.f32.mrb[5].mxu0  ;;  %v6897_v31 = vadd.f32 %v5507_v17, %v6844_v10 }
 0x19e   : > { %v5508_v26 = vpop.f32.mrb[6].mxu0  ;;  %v6918_v35 = vadd.f32 %v6844_v10, %v557_v20 }
 0x19f   : > { %v560_v27 = vpop.f32.mrb[7].mxu0  ;;  %10185 = vst [vmem:[#allocation23_spill] sm:$0xff] %v6897_v31  ;;  %v640_v33 = vsel %vm476_vm0, %v6897_v31, 0.0  ;;  %v6942_v42 = vmul.f32 %v6897_v31, %v6897_v31  ;;  %v6945_v43 = vadd.f32 %v5508_v26, %v6844_v10 }
 0x1a0   : > { %10187 = vst [vmem:[#allocation25_spill] sm:$0xff] %v6918_v35  ;;  %v634_v37 = vsel %vm476_vm0, %v6918_v35, 0.0  ;;  %v6969_v54 = vmul.f32 %v6918_v35, %v6918_v35  ;;  %v6976_v56 = vadd.f32 %v6844_v10, %v560_v27 }
 0x1a1   : > { %10189 = vst [vmem:[#allocation27_spill] sm:$0xff] %v6942_v42  ;;  %10190 = vst [vmem:[#allocation28_spill] sm:$0xff] %v6945_v43  ;;  %v720_v48 = vsel %vm476_vm0, %v6942_v42, 0.0  ;;  %v643_v51 = vsel %vm476_vm0, %v6945_v43, 0.0 }
 0x1a2   : > { %10192 = vst [vmem:[#allocation30_spill] sm:$0xff] %v6969_v54  ;;  %10193 = vst [vmem:[#allocation31_spill] sm:$0xff] %v6976_v56  ;;  %v714_v4 = vsel %vm476_vm0, %v6969_v54, 0.0  ;;  %v637_v14 = vsel %vm476_vm0, %v6976_v56, 0.0 }
 0x1a4   : > { %v6932_v38 = vpop.f32.mrb[8].mxu0 }
 0x1a5   : > { %v6953_v44 = vpop.f32.mrb[9].mxu0  ;;  %v7012_v26 = vadd.f32 %v6932_v38, %v6844_v10  ;;  %v7020_v38 = vmul.f32 %v6945_v43, %v6945_v43 }
 0x1a6   : > { %v6994_v63 = vpop.f32.mrb[10].mxu0 }
 0x1a7   : > { %v6996_v0 = vpop.f32.mrb[11].mxu0  ;;  %10198 = vst [vmem:[#allocation36_spill] sm:$0xff] %v7012_v26 }
 0x1ba   : > { %623 = vadd.xlane.f32.xlu0 %v622_v18 }
 0x1bb   : > { %629 = vadd.xlane.f32.xlu1 %v628_v21 }
 0x1be   : > { %709 = vadd.xlane.f32.xlu0 %v708_v22 }
 0x1cc   : > { %1720 = vrot.lane.b32.xlu1 %v6856_v16, %s6583_s30 }
 0x1d0   : > { %1130 = vrot.lane.b32.xlu1 %v6873_v23, %s6584_s11 }
 0x1d4   : > { %1268 = vrot.lane.b32.xlu1 %v6864_v19, %s6584_s11  ;;  %1264 = vrot.lane.b32.xlu0 %v6879_v24, %s6584_s11 }
 0x1d8   : > { %1726 = vrot.lane.b32.xlu1 %v6873_v23, %s6583_s30 }
 0x1f3   : > { %626 = vadd.xlane.f32.xlu0 %v625_v28 }
 0x1f7   : > { %703 = vadd.xlane.f32.xlu0 %v702_v29 }
 0x1fc   : > { %632 = vadd.xlane.f32.xlu1 %v631_v30 }
 0x209   : > { %v6965_v52 = vpop.permute.xlu1 %1128  ;;  %v6988_v60 = vpop.permute.xlu0 %1724 }
 0x20a   : > { %10195 = vst [vmem:[#allocation33_spill] sm:$0xff] %v6988_v60 }
 0x20d   : > { %1126 = vrot.lane.b32.xlu1 %v6888_v25, %s6584_s11  ;;  %1136 = vrot.lane.b32.xlu0 %v6897_v31, %s6584_s11  ;;  %v6992_v62 = vpop.permute.xlu0 %1124 }
 0x211   : > { %1722 = vrot.lane.b32.xlu1 %v6888_v25, %s6583_s30  ;;  %1732 = vrot.lane.b32.xlu0 %v6897_v31, %s6583_s30 }
 0x215   : > { %1270 = vrot.lane.b32.xlu1 %v6909_v32, %s6584_s11 }
 0x230   : > { %641 = vadd.xlane.f32.xlu0 %v640_v33 }
 0x239   : > { %712 = vadd.xlane.f32.xlu1 %v711_v34 }
 0x246   : > { %1132 = vrot.lane.b32.xlu0 %v6918_v35, %s6584_s11 }
 0x247   : > { %v624_v2 = vpop.xlane.xlu0 %623 }
 0x248   : > { %v630_v53 = vpop.xlane.xlu1 %629  ;;  %v762_v21 = vmul.f32 0.03125, %v624_v2 }
 0x249   : > { %v764_v17 = vmul.f32 0.03125, %v630_v53 }
 0x24a   : > { %1266 = vrot.lane.b32.xlu1 %v6924_v36, %s6584_s11  ;;  %1728 = vrot.lane.b32.xlu0 %v6918_v35, %s6583_s30  ;;  %v802_v33 = vmul.f32 %v762_v21, %v762_v21 }
 0x24b   : > { %v710_v7 = vpop.xlane.xlu0 %709  ;;  %v804_v28 = vmul.f32 %v764_v17, %v764_v17 }
 0x24c   : > { %v6973_v55 = vpop.permute.xlu1 %1720  ;;  %v784_v29 = vmul.f32 0.03125, %v710_v7 }
 0x24e   : > { %v824_v39 = vsub.f32 %v784_v29, %v804_v28  ;;  %v864_v28 = vsub.f32 %v6849_v12, %v764_v17 }
 0x24f   : > { %v7004_v9 = vpop.permute.xlu0 %1264 }
 0x250   : > { %v6980_v57 = vpop.permute.xlu1 %1130  ;;  %v844_v45 = vmax.f32 %v824_v39, 0.0 }
 0x254   : > { %v6986_v59 = vpop.permute.xlu1 %1268 }
 0x258   : > { %v6990_v61 = vpop.permute.xlu1 %1726 }
 0x259   : > { %10196 = vst [vmem:[#allocation34_spill] sm:$0xff] %v6990_v61 }
 0x269   : > { %635 = vadd.xlane.f32.xlu0 %v634_v37 }
 0x26e   : > { %706 = vadd.xlane.f32.xlu1 %v705_v40 }
 0x27f   : > { %1138 = vrot.lane.b32.xlu1 %v6945_v43, %s6584_s11  ;;  %1276 = vrot.lane.b32.xlu0 %v6942_v42, %s6584_s11 }
 0x280   : > { %v627_v11 = vpop.xlane.xlu0 %626 }
 0x283   : > { %1734 = vrot.lane.b32.xlu1 %v6945_v43, %s6583_s30 }
 0x284   : > { %v704_v18 = vpop.xlane.xlu0 %703 }
 0x285   : > { %v782_v27 = vmul.f32 0.03125, %v704_v18 }
 0x287   : > { %v822_v37 = vsub.f32 %v782_v27, %v802_v33  ;;  %v862_v27 = vsub.f32 %v6856_v16, %v762_v21 }
 0x289   : > { %v633_v1 = vpop.xlane.xlu1 %632  ;;  %v842_v41 = vmax.f32 %v822_v37, 0.0 }
 0x28a   : > { %v765_v20 = vmul.f32 0.03125, %v633_v1 }
 0x28b   : > { %v882_v47 = vadd.f32 1e-06, %v842_v41 }
 0x28c   : > { %v805_v30 = vmul.f32 %v765_v20, %v765_v20 }
 0x28d   : > { %v6998_v3 = vpop.permute.xlu1 %1126 }
 0x291   : > { %v7002_v8 = vpop.permute.xlu1 %1722 }
 0x292   : > { %10197 = vst [vmem:[#allocation35_spill] sm:$0xff] %v7002_v8 }
 0x295   : > { %v7006_v13 = vpop.permute.xlu1 %1270 }
 0x29e   : > { %721 = vadd.xlane.f32.xlu0 %v720_v48  ;;  %v884_v48 = vadd.f32 1e-06, %v844_v45 }
 0x2a7   : > { %644 = vadd.xlane.f32.xlu1 %v643_v51  ;;  %v763_v51 = vmul.f32 0.03125, %v627_v11 }
 0x2a9   : > { %v803_v1 = vmul.f32 %v763_v51, %v763_v51  ;;  %v863_v41 = vsub.f32 %v6888_v25, %v763_v51 }
 0x2b4   : > { %1272 = vrot.lane.b32.xlu0 %v6969_v54, %s6584_s11 }
 0x2b8   : > { %1134 = vrot.lane.b32.xlu1 %v6976_v56, %s6584_s11 }
 0x2bc   : > { %1730 = vrot.lane.b32.xlu1 %v6976_v56, %s6583_s30 }
 0x2c6   : > { %v713_v15 = vpop.xlane.xlu1 %712 }
 0x2c7   : > { %v785_v22 = vmul.f32 0.03125, %v713_v15  ;;  %v865_v15 = vsub.f32 %v6873_v23, %v765_v20  ;;  %v652_v20 = vsel %vm476_vm0, %v7012_v26, 0.0 }
 0x2c9   : > { %v825_v34 = vsub.f32 %v785_v22, %v805_v30 }
 0x2ca   : > { %v7024_v49 = vpop.permute.xlu1 %1266 }
 0x2cb   : > { %v845_v40 = vmax.f32 %v825_v34, 0.0 }
 0x2cd   : > { %v885_v46 = vadd.f32 1e-06, %v845_v40 }
 0x2cf   : > { %5978 = vrsqrt.f32 %v885_v46 }
 0x2d0   : > { %5980 = vrsqrt.f32 %v882_v47 }
 0x2d1   : > { %5982 = vrsqrt.f32 %v884_v48 }
 0x2d3   : > { %715 = vadd.xlane.f32.xlu0 %v714_v4 }
 0x2d9   : > { %v5979_v7 = vpop.eup %5978 }
 0x2da   : > { %v925_v29 = vmul.f32 %v5979_v7, %v865_v15 }
 0x2dc   : > { %v951_v11 = vmul.f32 %v6832_v6, %v925_v29 }
 0x2de   : > { %v977_v40 = vadd.f32 %v6830_v5, %v951_v11 }
 0x2e0   : > { %638 = vadd.xlane.f32.xlu1 %v637_v14  ;;  %v5981_v14 = vpop.eup %5980  ;;  %v1017_v46 = vmul.f32 0.70710677, %v977_v40  ;;  %v997_v29 = vmul.f32 0.5, %v977_v40 }
 0x2e1   : > { %v5983_v22 = vpop.eup %5982  ;;  %v922_v33 = vmul.f32 %v5981_v14, %v862_v27 }
 0x2e2   : > { %v924_v34 = vmul.f32 %v5983_v22, %v864_v28 }
 0x2e3   : > { %v948_v37 = vmul.f32 %v6832_v6, %v922_v33 }
 0x2e4   : > { %v950_v39 = vmul.f32 %v6832_v6, %v924_v34 }
 0x2e5   : > { %v974_v21 = vadd.f32 %v6830_v5, %v948_v37 }
 0x2e6   : > { %v976_v17 = vadd.f32 %v6830_v5, %v950_v39 }
 0x2e7   : > { %v1014_v48 = vmul.f32 0.70710677, %v974_v21  ;;  %v994_v33 = vmul.f32 0.5, %v974_v21 }
 0x2e8   : > { %v996_v37 = vmul.f32 0.5, %v976_v17 }
 0x2e9   : > { %1144 = vrot.lane.b32.xlu0 %v7012_v26, %s6584_s11 }
 0x2ed   : > { %1740 = vrot.lane.b32.xlu0 %v7012_v26, %s6583_s30 }
 0x2f1   : > { %1278 = vrot.lane.b32.xlu1 %v7020_v38, %s6584_s11 }
 0x2fb   : > { %v707_v53 = vpop.xlane.xlu1 %706 }
 0x2fc   : > { %v783_v2 = vmul.f32 0.03125, %v707_v53  ;;  %v1016_v53 = vmul.f32 0.70710677, %v976_v17  ;;  %v5515_v17 = vpop.f32.mrb[12].mxu0 }
 0x2fe   : > { %v823_v4 = vsub.f32 %v783_v2, %v803_v1 }
 0x300   : > { %v843_v18 = vmax.f32 %v823_v4, 0.0  ;;  %v723_v4 = vsel %vm476_vm0, %v7020_v38, 0.0 }
 0x302   : > { %v883_v30 = vadd.f32 1e-06, %v843_v18  ;;  %v7044_v18 = vadd.f32 %v6844_v10, %v6953_v44 }
 0x304   : > { %5984 = vrsqrt.f32 %v883_v30  ;;  %v646_v21 = vsel %vm476_vm0, %v7044_v18, 0.0 }
 0x305   : > { %5986 = verf.f32 %v1017_v46 }
 0x306   : > { %5988 = verf.f32 %v1014_v48  ;;  %v7064_v48 = vmul.f32 %v7012_v26, %v7012_v26 }
 0x307   : > { %5990 = verf.f32 %v1016_v53  ;;  %v7068_v53 = vadd.f32 %v6994_v63, %v6844_v10 }
 0x308   : > { %10200 = vst [vmem:[#allocation38_spill] sm:$0xff] %v7064_v48 }
 0x309   : > { %10201 = vst [vmem:[#allocation39_spill] sm:$0xff] %v7068_v53 }
 0x30c   : > { %653 = vadd.xlane.f32.xlu0 %v652_v20  ;;  %v7050_v20 = vmul.f32 %v6976_v56, %v6976_v56 }
 0x30e   : > { %v5985_v45 = vpop.eup %5984  ;;  %10199 = vst [vmem:[#allocation37_spill] sm:$0xff] %v7050_v20 }
 0x30f   : > { %v923_v47 = vmul.f32 %v5985_v45, %v863_v41  ;;  %v5987_v14 = vpop.eup %5986 }
 0x310   : > { %v5989_v51 = vpop.eup %5988  ;;  %v1057_v22 = vadd.f32 1.0, %v5987_v14 }
 0x311   : > { %v949_v1 = vmul.f32 %v6832_v6, %v923_v47  ;;  %v5991_v15 = vpop.eup %5990  ;;  %v1054_v27 = vadd.f32 1.0, %v5989_v51  ;;  %v717_v47 = vsel %vm476_vm0, %v7050_v20, 0.0 }
 0x312   : > { %v1056_v30 = vadd.f32 1.0, %v5991_v15  ;;  %v1077_v39 = vmul.f32 %v1057_v22, %v997_v29  ;;  %v732_v15 = vsel %vm476_vm0, %v7064_v48, 0.0  ;;  %v655_v22 = vsel %vm476_vm0, %v7068_v53, 0.0 }
 0x313   : > { %v975_v2 = vadd.f32 %v6830_v5, %v949_v1  ;;  %v1074_v41 = vmul.f32 %v1054_v27, %v994_v33  ;;  %v7076_v1 = vpop.f32.mrb[13].mxu0  ;;  %v7096_v27 = vmul.f32 %v7044_v18, %v7044_v18  ;;  %v7104_v29 = vadd.f32 %v6844_v10, %v6996_v0  ;;  %v7112_v33 = vpop.permute.xlu1 %1138 }
 0x314   : > { %v1076_v45 = vmul.f32 %v1056_v30, %v996_v37 }
 0x315   : > { %724 = vadd.xlane.f32.xlu1 %v723_v4  ;;  %v1015_v7 = vmul.f32 0.70710677, %v975_v2  ;;  %v995_v34 = vmul.f32 0.5, %v975_v2  ;;  %v7078_v2 = vpop.f32.mrb[14].mxu0  ;;  %10202 = vst [vmem:[#allocation40_spill] sm:$0xff] %v7096_v27  ;;  %10203 = vst [vmem:[#allocation41_spill] sm:$0xff] %v7104_v29 }
 0x316   : > { %v1095_v46 = vpack.c.bf16 %v1077_v39, %v1076_v45  ;;  %v7080_v4 = vpop.f32.mrb[15].mxu0  ;;  %v726_v45 = vsel %vm476_vm0, %v7096_v27, 0.0  ;;  %v649_v50 = vsel %vm476_vm0, %v7104_v29, 0.0 }
 0x317   : > { %5992 = verf.f32 %v1015_v7  ;;  %v7082_v7 = vpop.f32.mrb[16].mxu0 }
 0x318   : > { %v7084_v14 = vpop.f32.mrb[17].mxu0 }
 0x319   : > { %v7086_v63 = vpop.f32.mrb[18].mxu0 }
 0x31a   : > { %v7088_v51 = vpop.f32.mrb[19].mxu0 }
 0x321   : > { %v5993_v28 = vpop.eup %5992 }
 0x322   : > { %1140 = vrot.lane.b32.xlu0 %v7044_v18, %s6584_s11  ;;  %v1055_v11 = vadd.f32 1.0, %v5993_v28  ;;  %v7100_v28 = vpop.permute.xlu0 %1136 }
 0x324   : > { %v1075_v44 = vmul.f32 %v1055_v11, %v995_v34  ;;  %v7114_v11 = vpop.permute.xlu1 %1734 }
 0x325   : > { %10205 = vst [vmem:[#allocation43_spill] sm:$0xff] %v7114_v11 }
 0x326   : > { %1274 = vrot.lane.b32.xlu1 %v7050_v20, %s6584_s11  ;;  %1736 = vrot.lane.b32.xlu0 %v7044_v18, %s6583_s30  ;;  %v1094_v40 = vpack.c.bf16 %v1075_v44, %v1074_v41  ;;  %v7108_v30 = vpop.permute.xlu0 %1732 }
 0x327   : > { %10204 = vst [vmem:[#allocation42_spill] sm:$0xff] %v7108_v30 }
 0x328   : > { %5525 = vmatprep.mubr.msk.bf16.mxu0 %vm476_vm0, %v1094_v40 }
 0x329   : > { %5526 = vmatmul.mubr.msk.bf16.vlgmr.msra.gmra.mrb[20].mxu0 %vm476_vm0, %v1095_v46 }
 0x32a   : > { %v642_v34 = vpop.xlane.xlu0 %641 }
 0x32b   : > { %v768_v23 = vmul.f32 0.03125, %v642_v34 }
 0x32d   : > { %v808_v8 = vmul.f32 %v768_v23, %v768_v23 }
 0x32e   : > { %v7116_v37 = vpop.permute.xlu0 %1132 }
 0x332   : > { %v7118_v41 = vpop.permute.xlu0 %1728 }
 0x333   : > { %10206 = vst [vmem:[#allocation44_spill] sm:$0xff] %v7118_v41 }
 0x334   : > { %v645_v39 = vpop.xlane.xlu1 %644 }
 0x335   : > { %v769_v30 = vmul.f32 0.03125, %v645_v39 }
 0x336   : > { %v636_v44 = vpop.xlane.xlu0 %635 }
 0x338   : > { %v7120_v0 = vpop.permute.xlu1 %1134 }
 0x33a   : > { %v7126_v46 = vpop.permute.xlu0 %1276 }
 0x33c   : > { %v7124_v40 = vpop.permute.xlu1 %1730 }
 0x33d   : > { %10207 = vst [vmem:[#allocation45_spill] sm:$0xff] %v7124_v40  ;;  %v766_v40 = vmul.f32 0.03125, %v636_v44 }
 0x33f   : > { %v806_v61 = vmul.f32 %v766_v40, %v766_v40 }
 0x345   : > { %647 = vadd.xlane.f32.xlu0 %v646_v21 }
 0x34a   : > { %718 = vadd.xlane.f32.xlu1 %v717_v47  ;;  %v722_v47 = vpop.xlane.xlu0 %721 }
 0x34b   : > { %v788_v25 = vmul.f32 0.03125, %v722_v47  ;;  %v869_v47 = vsub.f32 %v6945_v43, %v769_v30 }
 0x35b   : > { %1146 = vrot.lane.b32.xlu1 %v7068_v53, %s6584_s11  ;;  %1284 = vrot.lane.b32.xlu0 %v7064_v48, %s6584_s11  ;;  %v809_v48 = vmul.f32 %v769_v30, %v769_v30 }
 0x35f   : > { %1742 = vrot.lane.b32.xlu1 %v7068_v53, %s6583_s30 }
 0x36d   : > { %v639_v21 = vpop.xlane.xlu1 %638 }
 0x37a   : > { %733 = vadd.xlane.f32.xlu0 %v732_v15  ;;  %v7128_v15 = vpop.permute.xlu1 %1278 }
 0x383   : > { %656 = vadd.xlane.f32.xlu1 %v655_v22  ;;  %v7130_v22 = vpop.permute.xlu0 %1272 }
 0x387   : > { %v716_v11 = vpop.xlane.xlu0 %715 }
 0x388   : > { %v786_v60 = vmul.f32 0.03125, %v716_v11  ;;  %v7143_v11 = vmul.f32 %v7068_v53, %v7068_v53 }
 0x38a   : > { %v826_v32 = vsub.f32 %v786_v60, %v806_v61  ;;  %10209 = vst [vmem:[#allocation47_spill] sm:$0xff] %v7143_v11  ;;  %v767_v60 = vmul.f32 0.03125, %v639_v21 }
 0x390   : > { %1280 = vrot.lane.b32.xlu0 %v7096_v27, %s6584_s11  ;;  %v866_v27 = vsub.f32 %v6918_v35, %v766_v40 }
 0x394   : > { %1142 = vrot.lane.b32.xlu1 %v7104_v29, %s6584_s11 }
 0x398   : > { %1738 = vrot.lane.b32.xlu1 %v7104_v29, %s6583_s30 }
 0x3a2   : > { %v725_v58 = vpop.xlane.xlu1 %724 }
 0x3a3   : > { %v789_v41 = vmul.f32 0.03125, %v725_v58  ;;  %v846_v58 = vmax.f32 %v826_v32, 0.0 }
 0x3a5   : > { %v829_v20 = vsub.f32 %v789_v41, %v809_v48  ;;  %v886_v48 = vadd.f32 1e-06, %v846_v58  ;;  %v868_v58 = vsub.f32 %v6897_v31, %v768_v23 }
 0x3a7   : > { %v849_v36 = vmax.f32 %v829_v20, 0.0 }
 0x3a9   : > { %v889_v34 = vadd.f32 1e-06, %v849_v36 }
 0x3ab   : > { %5994 = vrsqrt.f32 %v889_v34 }
 0x3ac   : > { %5996 = vrsqrt.f32 %v886_v48 }
 0x3af   : > { %727 = vadd.xlane.f32.xlu0 %v726_v45  ;;  %v7135_v45 = vadd.f32 %v5515_v17, %v6844_v10 }
 0x3b1   : > { %10208 = vst [vmem:[#allocation46_spill] sm:$0xff] %v7135_v45  ;;  %v664_v30 = vsel %vm476_vm0, %v7135_v45, 0.0 }
 0x3b5   : > { %v5995_v41 = vpop.eup %5994 }
 0x3b6   : > { %v5997_v44 = vpop.eup %5996 }
 0x3b7   : > { %v926_v48 = vmul.f32 %v5997_v44, %v866_v27  ;;  %v867_v27 = vsub.f32 %v6976_v56, %v767_v60 }
 0x3bc   : > { %650 = vadd.xlane.f32.xlu1 %v649_v50  ;;  %v828_v50 = vsub.f32 %v788_v25, %v808_v8  ;;  %v7147_v25 = vpop.permute.xlu1 %1274  ;;  %v807_v8 = vmul.f32 %v767_v60, %v767_v60 }
 0x3be   : > { %v848_v17 = vmax.f32 %v828_v50, 0.0 }
 0x3c0   : > { %v888_v39 = vadd.f32 1e-06, %v848_v17  ;;  %v929_v17 = vmul.f32 %v5995_v41, %v869_v47 }
 0x3c2   : > { %5998 = vrsqrt.f32 %v888_v39  ;;  %v955_v21 = vmul.f32 %v6832_v6, %v929_v17  ;;  %v735_v17 = vsel %vm476_vm0, %v7143_v11, 0.0 }
 0x3c5   : > { %1152 = vrot.lane.b32.xlu0 %v7135_v45, %s6584_s11 }
 0x3c9   : > { %1748 = vrot.lane.b32.xlu0 %v7135_v45, %s6583_s30 }
 0x3cc   : > { %v5999_v50 = vpop.eup %5998 }
 0x3cd   : > { %1286 = vrot.lane.b32.xlu1 %v7143_v11, %s6584_s11  ;;  %v928_v39 = vmul.f32 %v5999_v50, %v868_v58 }
 0x3d7   : > { %v719_v61 = vpop.xlane.xlu1 %718 }
 0x3d8   : > { %v787_v32 = vmul.f32 0.03125, %v719_v61  ;;  %v952_v61 = vmul.f32 %v6832_v6, %v926_v48 }
 0x3da   : > { %v827_v20 = vsub.f32 %v787_v32, %v807_v8  ;;  %v954_v8 = vmul.f32 %v6832_v6, %v928_v39  ;;  %v981_v32 = vadd.f32 %v6830_v5, %v955_v21  ;;  %v978_v40 = vadd.f32 %v6830_v5, %v952_v61 }
 0x3db   : > { %v7167_v21 = vadd.f32 %v6844_v10, %v7076_v1 }
 0x3dc   : > { %v847_v36 = vmax.f32 %v827_v20, 0.0  ;;  %v980_v23 = vadd.f32 %v6830_v5, %v954_v8  ;;  %v1021_v41 = vmul.f32 0.70710677, %v981_v32  ;;  %v1018_v47 = vmul.f32 0.70710677, %v978_v40 }
 0x3dd   : > { %10210 = vst [vmem:[#allocation48_spill] sm:$0xff] %v7167_v21 }
 0x3de   : > { %v887_v34 = vadd.f32 1e-06, %v847_v36  ;;  %v1020_v36 = vmul.f32 0.70710677, %v980_v23  ;;  %v1000_v1 = vmul.f32 0.5, %v980_v23  ;;  %v658_v23 = vsel %vm476_vm0, %v7167_v21, 0.0 }
 0x3e0   : > { %6000 = vrsqrt.f32 %v887_v34 }
 0x3e1   : > { %6002 = verf.f32 %v1021_v41  ;;  %v1001_v41 = vmul.f32 0.5, %v981_v32 }
 0x3e2   : > { %6004 = verf.f32 %v1018_v47 }
 0x3e3   : > { %6006 = verf.f32 %v1020_v36  ;;  %v998_v36 = vmul.f32 0.5, %v978_v40 }
 0x3e8   : > { %665 = vadd.xlane.f32.xlu0 %v664_v30 }
 0x3ea   : > { %v6001_v20 = vpop.eup %6000 }
 0x3eb   : > { %v927_v44 = vmul.f32 %v6001_v20, %v867_v27  ;;  %v6003_v48 = vpop.eup %6002 }
 0x3ec   : > { %v6005_v60 = vpop.eup %6004  ;;  %v1061_v61 = vadd.f32 1.0, %v6003_v48 }
 0x3ed   : > { %v953_v50 = vmul.f32 %v6832_v6, %v927_v44  ;;  %v6007_v39 = vpop.eup %6006  ;;  %v1058_v30 = vadd.f32 1.0, %v6005_v60  ;;  %v7181_v60 = vmul.f32 %v7104_v29, %v7104_v29 }
 0x3ee   : > { %v1060_v44 = vadd.f32 1.0, %v6007_v39  ;;  %v1081_v48 = vmul.f32 %v1061_v61, %v1001_v41  ;;  %v7195_v61 = vmul.f32 %v7135_v45, %v7135_v45  ;;  %v7221_v41 = vadd.f32 %v6844_v10, %v7080_v4 }
 0x3ef   : > { %v979_v58 = vadd.f32 %v6830_v5, %v953_v50  ;;  %10215 = vst [vmem:[#allocation53_spill] sm:$0xff] %v7181_v60  ;;  %v729_v39 = vsel %vm476_vm0, %v7181_v60, 0.0 }
 0x3f0   : > { %v1080_v32 = vmul.f32 %v1060_v44, %v1000_v1  ;;  %10218 = vst [vmem:[#allocation56_spill] sm:$0xff] %v7221_v41 }
 0x3f1   : > { %736 = vadd.xlane.f32.xlu1 %v735_v17  ;;  %v1019_v34 = vmul.f32 0.70710677, %v979_v58  ;;  %v999_v50 = vmul.f32 0.5, %v979_v58 }
 0x3f2   : > { %v1097_v58 = vpack.c.bf16 %v1081_v48, %v1080_v32 }
 0x3f3   : > { %6008 = verf.f32 %v1019_v34 }
 0x3fc   : > { %v7169_v8 = vpop.f32.mrb[20].mxu0 }
 0x3fd   : > { %10211 = vst [vmem:[#allocation49_spill] sm:$0xff] %v7169_v8  ;;  %v6009_v27 = vpop.eup %6008  ;;  %v7171_v20 = vpop.f32.mrb[21].mxu0  ;;  %v1078_v8 = vmul.f32 %v1058_v30, %v998_v36  ;;  %v744_v30 = vsel %vm476_vm0, %v7195_v61, 0.0 }
 0x3fe   : > { %10212 = vst [vmem:[#allocation50_spill] sm:$0xff] %v7171_v20  ;;  %1148 = vrot.lane.b32.xlu0 %v7167_v21, %s6584_s11  ;;  %v7175_v47 = vpop.f32.mrb[22].mxu0  ;;  %v1059_v17 = vadd.f32 1.0, %v6009_v27  ;;  %v7229_v36 = vpop.permute.xlu1 %1146 }
 0x3ff   : > { %10213 = vst [vmem:[#allocation51_spill] sm:$0xff] %v7175_v47  ;;  %v7177_v34 = vpop.f32.mrb[23].mxu0 }
 0x400   : > { %10214 = vst [vmem:[#allocation52_spill] sm:$0xff] %v7177_v34  ;;  %v1079_v20 = vmul.f32 %v1059_v17, %v999_v50 }
 0x402   : > { %1282 = vrot.lane.b32.xlu1 %v7181_v60, %s6584_s11  ;;  %1744 = vrot.lane.b32.xlu0 %v7167_v21, %s6583_s30  ;;  %v1096_v40 = vpack.c.bf16 %v1079_v20, %v1078_v8  ;;  %v7199_v8 = vadd.f32 %v7078_v2, %v6844_v10  ;;  %v7213_v2 = vmul.f32 %v7167_v21, %v7167_v21  ;;  %v7217_v20 = vpop.permute.xlu0 %1144  ;;  %v7231_v17 = vpop.permute.xlu1 %1742 }
 0x403   : > { %10220 = vst [vmem:[#allocation58_spill] sm:$0xff] %v7231_v17 }
 0x404   : > { %5529 = vmatprep.mubr.msk.bf16.mxu0 %vm476_vm0, %v1096_v40  ;;  %10216 = vst [vmem:[#allocation54_spill] sm:$0xff] %v7199_v8  ;;  %v667_v27 = vsel %vm476_vm0, %v7199_v8, 0.0  ;;  %10217 = vst [vmem:[#allocation55_spill] sm:$0xff] %v7213_v2 }
 0x405   : > { %5530 = vmatmul.mubr.msk.bf16.gmra.mrb[24].mxu0 %vm476_vm0, %v1097_v58  ;;  %v738_v58 = vsel %vm476_vm0, %v7213_v2, 0.0 }
 0x406   : > { %v7225_v44 = vpop.permute.xlu0 %1740 }
 0x407   : > { %10219 = vst [vmem:[#allocation57_spill] sm:$0xff] %v7225_v44  ;;  %v661_v44 = vsel %vm476_vm0, %v7221_v41, 0.0 }
 0x40a   : > { %v654_v50 = vpop.xlane.xlu0 %653 }
 0x40b   : > { %v772_v11 = vmul.f32 0.03125, %v654_v50 }
 0x40d   : > { %v812_v31 = vmul.f32 %v772_v11, %v772_v11 }
 0x40e   : > { %v7233_v1 = vpop.permute.xlu0 %1140 }
 0x410   : > { %v657_v48 = vpop.xlane.xlu1 %656 }
 0x412   : > { %v7235_v32 = vpop.permute.xlu0 %1736 }
 0x413   : > { %10221 = vst [vmem:[#allocation59_spill] sm:$0xff] %v7235_v32  ;;  %v773_v32 = vmul.f32 0.03125, %v657_v48 }
 0x414   : > { %v7237_v4 = vpop.permute.xlu1 %1142 }
 0x415   : > { %v813_v42 = vmul.f32 %v773_v32, %v773_v32 }
 0x416   : > { %v648_v40 = vpop.xlane.xlu0 %647 }
 0x417   : > { %v770_v56 = vmul.f32 0.03125, %v648_v40 }
 0x419   : > { %v810_v54 = vmul.f32 %v770_v56, %v770_v56 }
 0x421   : > { %659 = vadd.xlane.f32.xlu0 %v658_v23  ;;  %v7241_v23 = vpop.permute.xlu1 %1738 }
 0x422   : > { %10222 = vst [vmem:[#allocation60_spill] sm:$0xff] %v7241_v23 }
 0x426   : > { %730 = vadd.xlane.f32.xlu1 %v729_v39  ;;  %v7243_v39 = vpop.permute.xlu0 %1284 }
 0x437   : > { %1154 = vrot.lane.b32.xlu1 %v7199_v8, %s6584_s11  ;;  %1292 = vrot.lane.b32.xlu0 %v7195_v61, %s6584_s11 }
 0x43b   : > { %1750 = vrot.lane.b32.xlu1 %v7199_v8, %s6583_s30 }
 0x456   : > { %745 = vadd.xlane.f32.xlu0 %v744_v30  ;;  %v651_v30 = vpop.xlane.xlu1 %650 }
 0x45a   : > { %v7245_v34 = vpop.permute.xlu1 %1286 }
 0x45f   : > { %668 = vadd.xlane.f32.xlu1 %v667_v27  ;;  %v734_v27 = vpop.xlane.xlu0 %733 }
 0x460   : > { %v792_v60 = vmul.f32 0.03125, %v734_v27 }
 0x462   : > { %v832_v19 = vsub.f32 %v792_v60, %v812_v31 }
 0x463   : > { %v7247_v47 = vpop.permute.xlu0 %1280 }
 0x464   : > { %v852_v12 = vmax.f32 %v832_v19, 0.0 }
 0x466   : > { %v892_v50 = vadd.f32 1e-06, %v852_v12  ;;  %v872_v12 = vsub.f32 %v7012_v26, %v772_v11 }
 0x467   : > { %v728_v43 = vpop.xlane.xlu0 %727 }
 0x46c   : > { %1288 = vrot.lane.b32.xlu0 %v7213_v2, %s6584_s11  ;;  %v790_v2 = vmul.f32 0.03125, %v728_v43 }
 0x470   : > { %1150 = vrot.lane.b32.xlu1 %v7221_v41, %s6584_s11 }
 0x474   : > { %1746 = vrot.lane.b32.xlu1 %v7221_v41, %s6583_s30 }
 0x47e   : > { %v737_v17 = vpop.xlane.xlu1 %736 }
 0x47f   : > { %v793_v23 = vmul.f32 0.03125, %v737_v17 }
 0x481   : > { %v833_v35 = vsub.f32 %v793_v23, %v813_v42  ;;  %v873_v23 = vsub.f32 %v7068_v53, %v773_v32 }
 0x482   : > { %v7263_v42 = vpop.permute.xlu1 %1282 }
 0x483   : > { %v853_v48 = vmax.f32 %v833_v35, 0.0 }
 0x485   : > { %v893_v17 = vadd.f32 1e-06, %v853_v48  ;;  %v870_v48 = vsub.f32 %v7044_v18, %v770_v56 }
 0x487   : > { %6010 = vrsqrt.f32 %v893_v17 }
 0x48b   : > { %739 = vadd.xlane.f32.xlu0 %v738_v58  ;;  %v7253_v58 = vadd.f32 %v7082_v7, %v6844_v10  ;;  %v7259_v7 = vmul.f32 %v7199_v8, %v7199_v8 }
 0x48d   : > { %10223 = vst [vmem:[#allocation61_spill] sm:$0xff] %v7253_v58  ;;  %10224 = vst [vmem:[#allocation62_spill] sm:$0xff] %v7259_v7 }
 0x498   : > { %662 = vadd.xlane.f32.xlu1 %v661_v44  ;;  %v830_v44 = vsub.f32 %v790_v2, %v810_v54  ;;  %v771_v54 = vmul.f32 0.03125, %v651_v30  ;;  %v6011_v2 = vpop.eup %6010  ;;  %v676_v30 = vsel %vm476_vm0, %v7253_v58, 0.0 }
 0x49a   : > { %v850_v24 = vmax.f32 %v830_v44, 0.0  ;;  %v811_v35 = vmul.f32 %v771_v54, %v771_v54 }
 0x49c   : > { %v890_v43 = vadd.f32 1e-06, %v850_v24  ;;  %v933_v24 = vmul.f32 %v6011_v2, %v873_v23 }
 0x49e   : > { %6012 = vrsqrt.f32 %v890_v43 }
 0x49f   : > { %6014 = vrsqrt.f32 %v892_v50 }
 0x4a1   : > { %1160 = vrot.lane.b32.xlu0 %v7253_v58, %s6584_s11 }
 0x4a8   : > { %v6013_v40 = vpop.eup %6012 }
 0x4a9   : > { %1294 = vrot.lane.b32.xlu1 %v7259_v7, %s6584_s11  ;;  %v6015_v44 = vpop.eup %6014  ;;  %v930_v43 = vmul.f32 %v6013_v40, %v870_v48 }
 0x4aa   : > { %v932_v50 = vmul.f32 %v6015_v44, %v872_v12 }
 0x4ac   : > { %v958_v32 = vmul.f32 %v6832_v6, %v932_v50 }
 0x4ae   : > { %v984_v11 = vadd.f32 %v6830_v5, %v958_v32 }
 0x4b0   : > { %v1024_v44 = vmul.f32 0.70710677, %v984_v11 }
 0x4b3   : > { %v731_v31 = vpop.xlane.xlu1 %730 }
 0x4b4   : > { %v791_v60 = vmul.f32 0.03125, %v731_v31  ;;  %v959_v31 = vmul.f32 %v6832_v6, %v933_v24  ;;  %v747_v24 = vsel %vm476_vm0, %v7259_v7, 0.0 }
 0x4b6   : > { %v831_v19 = vsub.f32 %v791_v60, %v811_v35  ;;  %v956_v35 = vmul.f32 %v6832_v6, %v930_v43  ;;  %v985_v60 = vadd.f32 %v6830_v5, %v959_v31 }
 0x4b8   : > { %v851_v27 = vmax.f32 %v831_v19, 0.0  ;;  %v982_v56 = vadd.f32 %v6830_v5, %v956_v35  ;;  %v871_v19 = vsub.f32 %v7104_v29, %v771_v54  ;;  %v1025_v40 = vmul.f32 0.70710677, %v985_v60 }
 0x4b9   : > { %v7283_v54 = vadd.f32 %v6844_v10, %v7084_v14 }
 0x4ba   : > { %v891_v17 = vadd.f32 1e-06, %v851_v27  ;;  %v1022_v27 = vmul.f32 0.70710677, %v982_v56 }
 0x4bb   : > { %10225 = vst [vmem:[#allocation63_spill] sm:$0xff] %v7283_v54 }
 0x4bc   : > { %6016 = vrsqrt.f32 %v891_v17 }
 0x4bd   : > { %6018 = verf.f32 %v1025_v40  ;;  %v1002_v40 = vmul.f32 0.5, %v982_v56  ;;  %v670_v56 = vsel %vm476_vm0, %v7283_v54, 0.0 }
 0x4be   : > { %6020 = verf.f32 %v1022_v27 }
 0x4bf   : > { %6022 = verf.f32 %v1024_v44 }
 0x4c0   : > { %677 = vadd.xlane.f32.xlu0 %v676_v30 }
 0x4c6   : > { %v6017_v2 = vpop.eup %6016 }
 0x4c7   : > { %v931_v23 = vmul.f32 %v6017_v2, %v871_v19  ;;  %v6019_v43 = vpop.eup %6018  ;;  %v1005_v19 = vmul.f32 0.5, %v985_v60 }
 0x4c8   : > { %v6021_v50 = vpop.eup %6020 }
 0x4c9   : > { %v957_v48 = vmul.f32 %v6832_v6, %v931_v23  ;;  %v6023_v30 = vpop.eup %6022  ;;  %v1065_v6 = vadd.f32 1.0, %v6019_v43  ;;  %v1062_v31 = vadd.f32 1.0, %v6021_v50 }
 0x4ca   : > { %v1064_v2 = vadd.f32 1.0, %v6023_v30 }
 0x4cb   : > { %v983_v12 = vadd.f32 %v6830_v5, %v957_v48  ;;  %v1004_v48 = vmul.f32 0.5, %v984_v11  ;;  %v1082_v43 = vmul.f32 %v1062_v31, %v1002_v40  ;;  %v7343_v40 = vpop.permute.xlu1 %1154 }
 0x4cd   : > { %748 = vadd.xlane.f32.xlu1 %v747_v24  ;;  %v1023_v17 = vmul.f32 0.70710677, %v983_v12  ;;  %v1003_v23 = vmul.f32 0.5, %v983_v12  ;;  %v1085_v24 = vmul.f32 %v1065_v6, %v1005_v19  ;;  %v1084_v60 = vmul.f32 %v1064_v2, %v1004_v48  ;;  %v7337_v19 = vpop.permute.xlu0 %1152 }
 0x4ce   : > { %v7311_v12 = vmul.f32 %v7253_v58, %v7253_v58  ;;  %v7317_v6 = vadd.f32 %v7086_v63, %v6844_v10  ;;  %v7333_v63 = vadd.f32 %v6844_v10, %v7088_v51 }
 0x4cf   : > { %6024 = verf.f32 %v1023_v17  ;;  %v7299_v17 = vmul.f32 %v7221_v41, %v7221_v41 }
 0x4d0   : > { %10230 = vst [vmem:[#allocation68_spill] sm:$0xff] %v7317_v6  ;;  %v756_v31 = vsel %vm476_vm0, %v7311_v12, 0.0  ;;  %10231 = vst [vmem:[#allocation69_spill] sm:$0xff] %v7333_v63 }
 0x4d1   : > { %v741_v11 = vsel %vm476_vm0, %v7299_v17, 0.0  ;;  %v7341_v2 = vpop.permute.xlu0 %1748 }
 0x4d2   : > { %10232 = vst [vmem:[#allocation70_spill] sm:$0xff] %v7341_v2 }
 0x4d6   : > { %1156 = vrot.lane.b32.xlu0 %v7283_v54, %s6584_s11 }
 0x4d8   : > { %v7287_v5 = vpop.f32.mrb[24].mxu0 }
 0x4d9   : > { %10226 = vst [vmem:[#allocation64_spill] sm:$0xff] %v7287_v5  ;;  %v6025_v35 = vpop.eup %6024  ;;  %v7289_v32 = vpop.f32.mrb[25].mxu0  ;;  %v1193_v5 = vsel %vm476_vm0, %v6980_v57, 0.0 }
 0x4da   : > { %10227 = vst [vmem:[#allocation65_spill] sm:$0xff] %v7289_v32  ;;  %1752 = vrot.lane.b32.xlu0 %v7283_v54, %s6583_s30  ;;  %v7293_v14 = vpop.f32.mrb[26].mxu0  ;;  %v1063_v27 = vadd.f32 1.0, %v6025_v35  ;;  %v1099_v32 = vpack.c.bf16 %v1085_v24, %v1084_v60  ;;  %v679_v35 = vsel %vm476_vm0, %v7317_v6, 0.0  ;;  %v1190_v60 = vsel %vm476_vm0, %v6965_v52, 0.0 }
 0x4db   : > { %10228 = vst [vmem:[#allocation66_spill] sm:$0xff] %v7293_v14  ;;  %v7295_v44 = vpop.f32.mrb[27].mxu0 }
 0x4dc   : > { %10229 = vst [vmem:[#allocation67_spill] sm:$0xff] %v7295_v44  ;;  %v1083_v50 = vmul.f32 %v1063_v27, %v1003_v23  ;;  %v666_v23 = vpop.xlane.xlu0 %665  ;;  %v7345_v27 = vpop.permute.xlu1 %1750 }
 0x4dd   : > { %10233 = vst [vmem:[#allocation71_spill] sm:$0xff] %v7345_v27  ;;  %v776_v2 = vmul.f32 0.03125, %v666_v23  ;;  %v1196_v23 = vsel %vm476_vm0, %v7116_v37, 0.0  ;;  %v1214_v37 = vsel %vm476_vm0, %v7217_v20, 0.0 }
 0x4de   : > { %1290 = vrot.lane.b32.xlu1 %v7299_v17, %s6584_s11  ;;  %v1098_v30 = vpack.c.bf16 %v1083_v50, %v1082_v43 }
 0x4df   : > { %v816_v29 = vmul.f32 %v776_v2, %v776_v2 }
 0x4e0   : > { %5533 = vmatprep.mubr.msk.bf16.mxu0 %vm476_vm0, %v1098_v30  ;;  %v7347_v48 = vpop.permute.xlu0 %1148 }
 0x4e1   : > { %5534 = vmatmul.mubr.msk.bf16.gmra.mrb[28].mxu0 %vm476_vm0, %v1099_v32  ;;  %v7327_v32 = vmul.f32 %v7283_v54, %v7283_v54 }
 0x4e3   : > { %v750_v43 = vsel %vm476_vm0, %v7327_v32, 0.0 }
 0x4e4   : > { %v7349_v10 = vpop.permute.xlu0 %1744 }
 0x4e5   : > { %10234 = vst [vmem:[#allocation72_spill] sm:$0xff] %v7349_v10 }
 0x4e8   : > { %v660_v50 = vpop.xlane.xlu0 %659 }
 0x4ec   : > { %v669_v24 = vpop.xlane.xlu1 %668 }
 0x4ed   : > { %v777_v14 = vmul.f32 0.03125, %v669_v24 }
 0x4ef   : > { %v817_v53 = vmul.f32 %v777_v14, %v777_v14 }
 0x4f0   : > { %v7351_v51 = vpop.permute.xlu1 %1150 }
 0x4f4   : > { %v7357_v30 = vpop.permute.xlu1 %1746 }
 0x4f5   : > { %10235 = vst [vmem:[#allocation73_spill] sm:$0xff] %v7357_v30 }
 0x4f9   : > { %671 = vadd.xlane.f32.xlu0 %v670_v56  ;;  %v7359_v56 = vpop.permute.xlu0 %1292 }
 0x502   : > { %742 = vadd.xlane.f32.xlu1 %v741_v11  ;;  %v1184_v11 = vsel %vm476_vm0, %v6992_v62, 0.0 }
 0x50f   : > { %1300 = vrot.lane.b32.xlu0 %v7311_v12, %s6584_s11 }
 0x513   : > { %1162 = vrot.lane.b32.xlu1 %v7317_v6, %s6584_s11 }
 0x52e   : > { %757 = vadd.xlane.f32.xlu0 %v756_v31  ;;  %v663_v31 = vpop.xlane.xlu1 %662 }
 0x532   : > { %v7367_v52 = vpop.permute.xlu1 %1294 }
 0x537   : > { %680 = vadd.xlane.f32.xlu1 %v679_v35  ;;  %v746_v35 = vpop.xlane.xlu0 %745 }
 0x538   : > { %v796_v10 = vmul.f32 0.03125, %v746_v35 }
 0x53a   : > { %v836_v24 = vsub.f32 %v796_v10, %v816_v29  ;;  %v1336_v10 = vsel %vm476_vm0, %v7130_v22, 0.0  ;;  %v877_v22 = vsub.f32 %v7199_v8, %v777_v14  ;;  %v7404_v14 = vld [vmem:[#allocation6] ss:$0 sm:$0xff] }
 0x53b   : > { %v7371_v44 = vpop.permute.xlu0 %1288 }
 0x53c   : > { %v856_v35 = vmax.f32 %v836_v24, 0.0 }
 0x53e   : > { %v896_v29 = vadd.f32 1e-06, %v856_v35  ;;  %v1354_v35 = vsel %vm476_vm0, %v7243_v39, 0.0  ;;  %v1226_v39 = vsel %vm476_vm0, %v7337_v19, 0.0 }
 0x53f   : > { %v740_v27 = vpop.xlane.xlu0 %739 }
 0x540   : > { %v794_v30 = vmul.f32 0.03125, %v740_v27 }
 0x544   : > { %1296 = vrot.lane.b32.xlu0 %v7327_v32, %s6584_s11 }
 0x548   : > { %1158 = vrot.lane.b32.xlu1 %v7333_v63, %s6584_s11 }
 0x54c   : > { %1754 = vrot.lane.b32.xlu1 %v7333_v63, %s6583_s30 }
 0x55a   : > { %v749_v62 = vpop.xlane.xlu1 %748 }
 0x55b   : > { %v797_v57 = vmul.f32 0.03125, %v749_v62 }
 0x55e   : > { %v7391_v62 = vpop.permute.xlu1 %1290 }
 0x563   : > { %751 = vadd.xlane.f32.xlu0 %v750_v43  ;;  %v673_v43 = vsel %vm476_vm0, %v7333_v63, 0.0 }
 0x567   : > { %1191 = vadd.xlane.f32.xlu0 %v1190_v60  ;;  %v1330_v60 = vsel %vm476_vm0, %v6986_v59, 0.0 }
 0x56b   : > { %1185 = vadd.xlane.f32.xlu0 %v1184_v11  ;;  %v1324_v11 = vsel %vm476_vm0, %v7004_v9, 0.0  ;;  %v1202_v9 = vsel %vm476_vm0, %v7100_v28, 0.0  ;;  %v1342_v28 = vsel %vm476_vm0, %v7126_v46, 0.0 }
 0x56f   : > { %1194 = vadd.xlane.f32.xlu0 %v1193_v5  ;;  %v774_v5 = vmul.f32 0.03125, %v660_v50  ;;  %v7381_v50 = vmul.f32 %v7317_v6, %v7317_v6 }
 0x570   : > { %674 = vadd.xlane.f32.xlu1 %v673_v43  ;;  %v1333_v43 = vsel %vm476_vm0, %v7006_v13, 0.0 }
 0x571   : > { %v814_v59 = vmul.f32 %v774_v5, %v774_v5 }
 0x573   : > { %1331 = vadd.xlane.f32.xlu0 %v1330_v60  ;;  %v837_v60 = vsub.f32 %v797_v57, %v817_v53  ;;  %v834_v7 = vsub.f32 %v794_v30, %v814_v59  ;;  %v1208_v59 = vsel %vm476_vm0, %v7233_v1, 0.0 }
 0x575   : > { %v857_v27 = vmax.f32 %v837_v60, 0.0  ;;  %v854_v13 = vmax.f32 %v834_v7, 0.0  ;;  %v775_v7 = vmul.f32 0.03125, %v663_v31  ;;  %v874_v31 = vsub.f32 %v7167_v21, %v774_v5 }
 0x577   : > { %1325 = vadd.xlane.f32.xlu0 %v1324_v11  ;;  %v897_v53 = vadd.f32 1e-06, %v857_v27  ;;  %v894_v30 = vadd.f32 1e-06, %v854_v13  ;;  %v815_v57 = vmul.f32 %v775_v7, %v775_v7  ;;  %v876_v13 = vsub.f32 %v7135_v45, %v776_v2 }
 0x579   : > { %6026 = vrsqrt.f32 %v897_v53 }
 0x57a   : > { %6028 = vrsqrt.f32 %v894_v30  ;;  %v1161_v30 = vpop.permute.xlu0 %1160 }
 0x57b   : > { %1334 = vadd.xlane.f32.xlu0 %v1333_v43  ;;  %6030 = vrsqrt.f32 %v896_v29 }
 0x57f   : > { %1203 = vadd.xlane.f32.xlu0 %v1202_v9 }
 0x581   : > { %1302 = vrot.lane.b32.xlu1 %v7381_v50, %s6584_s11 }
 0x583   : > { %1197 = vadd.xlane.f32.xlu0 %v1196_v23  ;;  %v6027_v60 = vpop.eup %6026 }
 0x584   : > { %v6029_v9 = vpop.eup %6028  ;;  %v937_v20 = vmul.f32 %v6027_v60, %v877_v22  ;;  %v1220_v60 = vsel %vm476_vm0, %v7347_v48, 0.0 }
 0x585   : > { %v6031_v27 = vpop.eup %6030  ;;  %v934_v53 = vmul.f32 %v6029_v9, %v874_v31 }
 0x586   : > { %v936_v1 = vmul.f32 %v6031_v27, %v876_v13  ;;  %v963_v29 = vmul.f32 %v7404_v14, %v937_v20  ;;  %v1366_v13 = vsel %vm476_vm0, %v7359_v56, 0.0 }
 0x587   : > { %1343 = vadd.xlane.f32.xlu0 %v1342_v28  ;;  %v1348_v28 = vsel %vm476_vm0, %v7247_v47, 0.0  ;;  %v960_v2 = vmul.f32 %v7404_v14, %v934_v53  ;;  %v1238_v53 = vsel %vm476_vm0, %v1161_v30, 0.0 }
 0x588   : > { %v962_v5 = vmul.f32 %v7404_v14, %v936_v1 }
 0x58b   : > { %1337 = vadd.xlane.f32.xlu0 %v1336_v10  ;;  %v7409_v10 = vpop.xlane.xlu0 %677 }
 0x58f   : > { %v743_v11 = vpop.xlane.xlu1 %742  ;;  %1215 = vadd.xlane.f32.xlu0 %v1214_v37  ;;  %v7413_v37 = vld [vmem:[#allocation7] ss:$0 sm:$0xff] }
 0x590   : > { %v795_v43 = vmul.f32 0.03125, %v743_v11  ;;  %v989_v11 = vadd.f32 %v7413_v37, %v963_v29  ;;  %v986_v47 = vadd.f32 %v7413_v37, %v960_v2 }
 0x592   : > { %v835_v46 = vsub.f32 %v795_v43, %v815_v57  ;;  %v988_v57 = vadd.f32 %v7413_v37, %v962_v5  ;;  %v875_v43 = vsub.f32 %v7221_v41, %v775_v7  ;;  %v1029_v9 = vmul.f32 0.70710677, %v989_v11 }
 0x593   : > { %1209 = vadd.xlane.f32.xlu0 %v1208_v59  ;;  %v1026_v19 = vmul.f32 0.70710677, %v986_v47  ;;  %v1009_v30 = vmul.f32 0.5, %v989_v11 }
 0x594   : > { %v855_v24 = vmax.f32 %v835_v46, 0.0  ;;  %v1157_v46 = vpop.permute.xlu0 %1156  ;;  %v1028_v27 = vmul.f32 0.70710677, %v988_v57 }
 0x595   : > { %v1232_v29 = vsel %vm476_vm0, %v1157_v46, 0.0 }
 0x596   : > { %v895_v23 = vadd.f32 1e-06, %v855_v24  ;;  %v759_v24 = vsel %vm476_vm0, %v7381_v50, 0.0 }
 0x597   : > { %1355 = vadd.xlane.f32.xlu0 %v1354_v35 }
 0x598   : > { %6032 = vrsqrt.f32 %v895_v23  ;;  %v7426_v7 = vpop.permute.xlu0 %1752  ;;  %v1360_v23 = vsel %vm476_vm0, %v7371_v44, 0.0  ;;  %v7439_v44 = vmul.f32 %v7333_v63, %v7333_v63 }
 0x599   : > { %6034 = verf.f32 %v1029_v9 }
 0x59a   : > { %6036 = verf.f32 %v1026_v19  ;;  %v1006_v19 = vmul.f32 0.5, %v986_v47 }
 0x59b   : > { %1349 = vadd.xlane.f32.xlu0 %v1348_v28  ;;  %6038 = verf.f32 %v1028_v27 }
 0x59c   : > { %v7431_v35 = vpop.xlane.xlu0 %671 }
 0x59f   : > { %1227 = vadd.xlane.f32.xlu0 %v1226_v39 }
 0x5a0   : > { %v1301_v2 = vpop.permute.xlu0 %1300 }
 0x5a1   : > { %v1378_v46 = vsel %vm476_vm0, %v1301_v2, 0.0  ;;  %v1327_v2 = vsel %vm476_vm0, %v7024_v49, 0.0  ;;  %v1217_v49 = vsel %vm476_vm0, %v7229_v36, 0.0  ;;  %v1229_v36 = vsel %vm476_vm0, %v7343_v40, 0.0 }
 0x5a2   : > { %v6033_v59 = vpop.eup %6032 }
 0x5a3   : > { %v935_v22 = vmul.f32 %v6033_v59, %v875_v43  ;;  %1221 = vadd.xlane.f32.xlu0 %v1220_v60  ;;  %v6035_v56 = vpop.eup %6034 }
 0x5a4   : > { %v6037_v1 = vpop.eup %6036  ;;  %v1069_v5 = vadd.f32 1.0, %v6035_v56 }
 0x5a5   : > { %760 = vadd.xlane.f32.xlu1 %v759_v24  ;;  %v961_v31 = vmul.f32 %v7404_v14, %v935_v22  ;;  %v6039_v28 = vpop.eup %6038  ;;  %v1066_v43 = vadd.f32 1.0, %v6037_v1 }
 0x5a6   : > { %v1068_v9 = vadd.f32 1.0, %v6039_v28 }
 0x5a7   : > { %1367 = vadd.xlane.f32.xlu0 %v1366_v13  ;;  %v987_v48 = vadd.f32 %v7413_v37, %v961_v31  ;;  %v1008_v13 = vmul.f32 0.5, %v988_v57  ;;  %v753_v57 = vsel %vm476_vm0, %v7439_v44, 0.0 }
 0x5a9   : > { %v1027_v20 = vmul.f32 0.70710677, %v987_v48  ;;  %v1007_v24 = vmul.f32 0.5, %v987_v48  ;;  %v1088_v56 = vmul.f32 %v1068_v9, %v1008_v13  ;;  %v1187_v48 = vsel %vm476_vm0, %v6998_v3, 0.0  ;;  %v10242_v13 = vld [vmem:[#allocation19_spill] sm:$0xff] }
 0x5aa   : > { %v1339_v3 = vsel %vm476_vm0, %v7147_v25, 0.0  ;;  %v1351_v25 = vsel %vm476_vm0, %v7263_v42, 0.0  ;;  %v1363_v42 = vsel %vm476_vm0, %v7391_v62, 0.0 }
 0x5ab   : > { %1361 = vadd.xlane.f32.xlu0 %v1360_v23  ;;  %6040 = verf.f32 %v1027_v20  ;;  %v1089_v20 = vmul.f32 %v1069_v5, %v1009_v30  ;;  %v1086_v23 = vmul.f32 %v1066_v43, %v1006_v19  ;;  %v1205_v5 = vsel %vm476_vm0, %v7112_v33, 0.0 }
 0x5ac   : > { %v1199_v43 = vsel %vm476_vm0, %v7120_v0, 0.0  ;;  %v1780_v30 = vsel %vm476_vm0, %v6973_v55, 0.0  ;;  %v1211_v33 = vsel %vm476_vm0, %v7237_v4, 0.0  ;;  %v1357_v0 = vsel %vm476_vm0, %v7245_v34, 0.0 }
 0x5ad   : > { %v1101_v28 = vpack.c.bf16 %v1089_v20, %v1088_v56  ;;  %v1223_v55 = vsel %vm476_vm0, %v7351_v51, 0.0  ;;  %v1369_v34 = vsel %vm476_vm0, %v7367_v52, 0.0  ;;  %v10243_v20 = vld [vmem:[#allocation25_spill] sm:$0xff]  ;;  %v10245_v56 = vld [vmem:[#allocation30_spill] sm:$0xff] }
 0x5af   : > { %1239 = vadd.xlane.f32.xlu0 %v1238_v53 }
 0x5b3   : > { %1233 = vadd.xlane.f32.xlu0 %v1232_v29 }
 0x5b4   : > { %v7435_v39 = vpop.f32.mrb[28].mxu0 }
 0x5b5   : > { %10236 = vst [vmem:[#allocation74_spill] sm:$0xff] %v7435_v39  ;;  %v6041_v59 = vpop.eup %6040  ;;  %v7441_v60 = vpop.f32.mrb[29].mxu0 }
 0x5b6   : > { %10237 = vst [vmem:[#allocation75_spill] sm:$0xff] %v7441_v60  ;;  %1298 = vrot.lane.b32.xlu1 %v7439_v44, %s6584_s11  ;;  %v7445_v22 = vpop.f32.mrb[30].mxu0  ;;  %v1067_v27 = vadd.f32 1.0, %v6041_v59  ;;  %v1345_v59 = vsel %vm476_vm0, %v7128_v15, 0.0  ;;  %v1163_v15 = vpop.permute.xlu1 %1162 }
 0x5b7   : > { %10238 = vst [vmem:[#allocation76_spill] sm:$0xff] %v7445_v22  ;;  %v7448_v31 = vpop.f32.mrb[31].mxu0  ;;  %1379 = vadd.xlane.f32.xlu0 %v1378_v46  ;;  %v1241_v51 = vsel %vm476_vm0, %v1163_v15, 0.0 }
 0x5b8   : > { %10239 = vst [vmem:[#allocation77_spill] sm:$0xff] %v7448_v31  ;;  %v1087_v53 = vmul.f32 %v1067_v27, %v1007_v24  ;;  %v10240_v24 = vld [vmem:[#allocation17_spill] sm:$0xff] }
 0x5b9   : > { %v10241_v27 = vld [vmem:[#allocation21_spill] sm:$0xff] }
 0x5ba   : > { %v1100_v11 = vpack.c.bf16 %v1087_v53, %v1086_v23  ;;  %v10244_v23 = vld [vmem:[#allocation23_spill] sm:$0xff] }
 0x5bb   : > { %v7450_v1 = vpop.xlane.xlu0 %757 }
 0x5bc   : > { %5537 = vmatprep.mubr.msk.bf16.mxu0 %vm476_vm0, %v1100_v11 }
 0x5bd   : > { %5538 = vmatmul.mubr.msk.bf16.gmra.mrb[32].mxu0 %vm476_vm0, %v1101_v28 }
 0x5bf   : > { %v1297_v29 = vpop.permute.xlu0 %1296 }
 0x5c0   : > { %v1372_v47 = vsel %vm476_vm0, %v1297_v29, 0.0  ;;  %v10246_v29 = vld [vmem:[#allocation27_spill] sm:$0xff] }
 0x5c1   : > { %1373 = vadd.xlane.f32.xlu0 %v1372_v47  ;;  %v10247_v47 = vld [vmem:[#allocation40_spill] sm:$0xff] }
 0x5c4   : > { %v681_v9 = vpop.xlane.xlu1 %680 }
 0x5c8   : > { %v1159_v46 = vpop.permute.xlu1 %1158 }
 0x5c9   : > { %v1235_v52 = vsel %vm476_vm0, %v1159_v46, 0.0 }
 0x5cc   : > { %v7489_v4 = vpop.permute.xlu1 %1754 }
 0x5d7   : > { %1756 = vrot.lane.b32.xlu0 %v7253_v58, %s6583_s30 }
 0x5da   : > { %754 = vadd.xlane.f32.xlu1 %v753_v57  ;;  %v781_v57 = vmul.f32 0.03125, %v681_v9 }
 0x5de   : > { %1188 = vadd.xlane.f32.xlu1 %v1187_v48 }
 0x5e2   : > { %1328 = vadd.xlane.f32.xlu1 %v1327_v2 }
 0x5e6   : > { %1206 = vadd.xlane.f32.xlu1 %v1205_v5  ;;  %v10248_v5 = vld [vmem:[#allocation26_spill] sm:$0xff] }
 0x5ea   : > { %1200 = vadd.xlane.f32.xlu1 %v1199_v43  ;;  %v778_v43 = vmul.f32 0.03125, %v7431_v35 }
 0x5ee   : > { %1346 = vadd.xlane.f32.xlu1 %v1345_v59 }
 0x5f0   : > { %v752_v48 = vpop.xlane.xlu0 %751 }
 0x5f1   : > { %v798_v59 = vmul.f32 0.03125, %v752_v48 }
 0x5f2   : > { %1340 = vadd.xlane.f32.xlu1 %v1339_v3  ;;  %v780_v3 = vmul.f32 0.03125, %v7409_v10 }
 0x5f6   : > { %1218 = vadd.xlane.f32.xlu1 %v1217_v49  ;;  %1781 = vadd.xlane.f32.xlu0 %v1780_v30  ;;  %v800_v49 = vmul.f32 0.03125, %v7450_v1  ;;  %v821_v30 = vmul.f32 %v781_v57, %v781_v57 }
 0x5fa   : > { %1212 = vadd.xlane.f32.xlu1 %v1211_v33  ;;  %v818_v33 = vmul.f32 %v778_v43, %v778_v43 }
 0x5fd   : > { %v675_v40 = vpop.xlane.xlu1 %674 }
 0x5fe   : > { %1358 = vadd.xlane.f32.xlu1 %v1357_v0  ;;  %v820_v0 = vmul.f32 %v780_v3, %v780_v3 }
 0x600   : > { %v840_v9 = vsub.f32 %v800_v49, %v820_v0 }
 0x601   : > { %v1303_v19 = vpop.permute.xlu1 %1302 }
 0x602   : > { %1352 = vadd.xlane.f32.xlu1 %v1351_v25  ;;  %v1381_v62 = vsel %vm476_vm0, %v1303_v19, 0.0  ;;  %v838_v25 = vsub.f32 %v798_v59, %v818_v33  ;;  %v860_v35 = vmax.f32 %v840_v9, 0.0  ;;  %v779_v19 = vmul.f32 0.03125, %v675_v40 }
 0x603   : > { %v881_v40 = vsub.f32 %v7317_v6, %v781_v57  ;;  %v880_v33 = vsub.f32 %v7253_v58, %v780_v3  ;;  %v10258_v3 = vld [vmem:[#allocation47_spill] sm:$0xff] }
 0x604   : > { %v858_v46 = vmax.f32 %v838_v25, 0.0  ;;  %v900_v1 = vadd.f32 1e-06, %v860_v35 }
 0x606   : > { %1230 = vadd.xlane.f32.xlu1 %v1229_v36  ;;  %v898_v10 = vadd.f32 1e-06, %v858_v46 }
 0x60a   : > { %1224 = vadd.xlane.f32.xlu1 %v1223_v55  ;;  %v10249_v55 = vld [vmem:[#allocation24_spill] sm:$0xff] }
 0x60c   : > { %1854 = vrot.lane.b32.xlu0 %v7020_v38, %s6583_s30 }
 0x60e   : > { %1370 = vadd.xlane.f32.xlu1 %v1369_v34 }
 0x610   : > { %1868 = vrot.lane.b32.xlu0 %v7195_v61, %s6583_s30 }
 0x612   : > { %1364 = vadd.xlane.f32.xlu1 %v1363_v42  ;;  %v10250_v42 = vld [vmem:[#allocation37_spill] sm:$0xff] }
 0x614   : > { %1872 = vrot.lane.b32.xlu0 %v7327_v32, %s6583_s30 }
 0x616   : > { %1242 = vadd.xlane.f32.xlu1 %v1241_v51  ;;  %v10251_v51 = vld [vmem:[#allocation35_spill] sm:$0xff] }
 0x618   : > { %1876 = vrot.lane.b32.xlu0 %v7311_v12, %s6583_s30 }
 0x61a   : > { %1236 = vadd.xlane.f32.xlu1 %v1235_v52  ;;  %v1783_v52 = vsel %vm476_vm0, %v10251_v51, 0.0 }
 0x61c   : > { %2296 = vrot.lane.b32.xlu0 %v6856_v16, %s6582_s17 }
 0x61e   : > { %1382 = vadd.xlane.f32.xlu1 %v1381_v62  ;;  %v10252_v62 = vld [vmem:[#allocation34_spill] sm:$0xff] }
 0x620   : > { %2300 = vrot.lane.b32.xlu0 %v10240_v24, %s6582_s17 }
 0x624   : > { %2416 = vrot.lane.b32.xlu0 %v10241_v27, %s6582_s17 }
 0x628   : > { %2420 = vrot.lane.b32.xlu0 %v10242_v13, %s6582_s17 }
 0x62c   : > { %2304 = vrot.lane.b32.xlu0 %v10243_v20, %s6582_s17 }
 0x630   : > { %2308 = vrot.lane.b32.xlu0 %v10244_v23, %s6582_s17 }
 0x632   : > { %v761_v53 = vpop.xlane.xlu1 %760 }
 0x633   : > { %v801_v2 = vmul.f32 0.03125, %v761_v53  ;;  %v819_v53 = vmul.f32 %v779_v19, %v779_v19 }
 0x634   : > { %2424 = vrot.lane.b32.xlu0 %v10245_v56, %s6582_s17 }
 0x635   : > { %v841_v15 = vsub.f32 %v801_v2, %v821_v30  ;;  %v10254_v30 = vld [vmem:[#allocation53_spill] sm:$0xff] }
 0x636   : > { %v1299_v11 = vpop.permute.xlu1 %1298 }
 0x637   : > { %v1375_v28 = vsel %vm476_vm0, %v1299_v11, 0.0  ;;  %v861_v36 = vmax.f32 %v841_v15, 0.0 }
 0x638   : > { %1376 = vadd.xlane.f32.xlu1 %v1375_v28  ;;  %2428 = vrot.lane.b32.xlu0 %v10246_v29, %s6582_s17 }
 0x639   : > { %v901_v34 = vadd.f32 1e-06, %v861_v36  ;;  %v10256_v36 = vld [vmem:[#allocation38_spill] sm:$0xff] }
 0x63b   : > { %6042 = vrsqrt.f32 %v901_v34 }
 0x63c   : > { %2312 = vrot.lane.b32.xlu0 %v7044_v18, %s6582_s17  ;;  %6044 = vrsqrt.f32 %v898_v10 }
 0x63d   : > { %6046 = vrsqrt.f32 %v900_v1 }
 0x640   : > { %2316 = vrot.lane.b32.xlu0 %v7012_v26, %s6582_s17 }
 0x644   : > { %2432 = vrot.lane.b32.xlu0 %v10247_v47, %s6582_s17 }
 0x645   : > { %v6043_v28 = vpop.eup %6042 }
 0x646   : > { %v6045_v2 = vpop.eup %6044  ;;  %v941_v0 = vmul.f32 %v6043_v28, %v881_v40 }
 0x647   : > { %v6047_v49 = vpop.eup %6046 }
 0x648   : > { %v940_v9 = vmul.f32 %v6047_v49, %v880_v33  ;;  %v967_v57 = vmul.f32 %v7404_v14, %v941_v0 }
 0x649   : > { %1758 = vrot.lane.b32.xlu1 %v7317_v6, %s6583_s30 }
 0x64a   : > { %v966_v35 = vmul.f32 %v7404_v14, %v940_v9  ;;  %v993_v34 = vadd.f32 %v7413_v37, %v967_v57 }
 0x64c   : > { %v992_v51 = vadd.f32 %v7413_v37, %v966_v35  ;;  %v10264_v35 = vld [vmem:[#allocation22_spill] sm:$0xff] }
 0x64d   : > { %1840 = vrot.lane.b32.xlu1 %v10241_v27, %s6583_s30  ;;  %v1789_v27 = vsel %vm476_vm0, %v10252_v62, 0.0  ;;  %v10260_v62 = vld [vmem:[#allocation55_spill] sm:$0xff] }
 0x64e   : > { %v1032_v28 = vmul.f32 0.70710677, %v992_v51 }
 0x651   : > { %1842 = vrot.lane.b32.xlu1 %v10248_v5, %s6583_s30 }
 0x655   : > { %1844 = vrot.lane.b32.xlu1 %v10242_v13, %s6583_s30 }
 0x659   : > { %1846 = vrot.lane.b32.xlu1 %v10249_v55, %s6583_s30 }
 0x65d   : > { %1848 = vrot.lane.b32.xlu1 %v10245_v56, %s6583_s30 }
 0x661   : > { %1850 = vrot.lane.b32.xlu1 %v10250_v42, %s6583_s30 }
 0x663   : > { %1784 = vadd.xlane.f32.xlu0 %v1783_v52  ;;  %v879_v52 = vsub.f32 %v7333_v63, %v779_v19 }
 0x665   : > { %1852 = vrot.lane.b32.xlu1 %v10246_v29, %s6583_s30  ;;  %v878_v29 = vsub.f32 %v7283_v54, %v778_v43 }
 0x667   : > { %v755_v13 = vpop.xlane.xlu1 %754  ;;  %1790 = vadd.xlane.f32.xlu0 %v1789_v27  ;;  %v938_v25 = vmul.f32 %v6045_v2, %v878_v29 }
 0x668   : > { %v799_v56 = vmul.f32 0.03125, %v755_v13  ;;  %v1033_v13 = vmul.f32 0.70710677, %v993_v34 }
 0x669   : > { %1856 = vrot.lane.b32.xlu1 %v10247_v47, %s6583_s30  ;;  %v964_v43 = vmul.f32 %v7404_v14, %v938_v25 }
 0x66a   : > { %v839_v11 = vsub.f32 %v799_v56, %v819_v53 }
 0x66b   : > { %v7550_v48 = vpop.xlane.xlu1 %1188  ;;  %v990_v1 = vadd.f32 %v7413_v37, %v964_v43 }
 0x66c   : > { %10253 = vst [vmem:[#allocation21_spill] sm:$0xff] %v7550_v48  ;;  %v859_v59 = vmax.f32 %v839_v11, 0.0 }
 0x66d   : > { %1858 = vrot.lane.b32.xlu1 %v10254_v30, %s6583_s30  ;;  %v1030_v11 = vmul.f32 0.70710677, %v990_v1 }
 0x66e   : > { %v899_v15 = vadd.f32 1e-06, %v859_v59  ;;  %v10263_v59 = vld [vmem:[#allocation62_spill] sm:$0xff] }
 0x66f   : > { %v7557_v47 = vpop.xlane.xlu1 %1328 }
 0x670   : > { %10255 = vst [vmem:[#allocation19_spill] sm:$0xff] %v7557_v47  ;;  %6048 = vrsqrt.f32 %v899_v15 }
 0x671   : > { %1860 = vrot.lane.b32.xlu1 %v10256_v36, %s6583_s30  ;;  %6050 = verf.f32 %v1033_v13  ;;  %v1010_v13 = vmul.f32 0.5, %v990_v1 }
 0x672   : > { %6052 = verf.f32 %v1030_v11 }
 0x673   : > { %v7562_v46 = vpop.xlane.xlu1 %1206  ;;  %6054 = verf.f32 %v1032_v28  ;;  %v1012_v28 = vmul.f32 0.5, %v992_v51 }
 0x674   : > { %10257 = vst [vmem:[#allocation30_spill] sm:$0xff] %v7562_v46 }
 0x675   : > { %1862 = vrot.lane.b32.xlu1 %v10258_v3, %s6583_s30 }
 0x677   : > { %v7569_v10 = vpop.xlane.xlu1 %1200 }
 0x678   : > { %10259 = vst [vmem:[#allocation27_spill] sm:$0xff] %v7569_v10 }
 0x679   : > { %1864 = vrot.lane.b32.xlu1 %v10260_v62, %s6583_s30 }
 0x67a   : > { %v6049_v27 = vpop.eup %6048 }
 0x67b   : > { %v939_v53 = vmul.f32 %v6049_v27, %v879_v52  ;;  %v7576_v56 = vpop.xlane.xlu1 %1346  ;;  %v6051_v33 = vpop.eup %6050  ;;  %v1013_v52 = vmul.f32 0.5, %v993_v34 }
 0x67c   : > { %10261 = vst [vmem:[#allocation40_spill] sm:$0xff] %v7576_v56  ;;  %v6053_v0 = vpop.eup %6052  ;;  %v1073_v9 = vadd.f32 1.0, %v6051_v33  ;;  %v10266_v33 = vld [vmem:[#allocation20_spill] sm:$0xff] }
 0x67d   : > { %1866 = vrot.lane.b32.xlu1 %v7299_v17, %s6583_s30  ;;  %v965_v2 = vmul.f32 %v7404_v14, %v939_v53  ;;  %v6055_v15 = vpop.eup %6054  ;;  %v1070_v57 = vadd.f32 1.0, %v6053_v0  ;;  %v10286_v56 = vld [vmem:[#allocation44_spill] sm:$0xff] }
 0x67e   : > { %v1072_v27 = vadd.f32 1.0, %v6055_v15  ;;  %v1792_v47 = vsel %vm476_vm0, %v10286_v56, 0.0 }
 0x67f   : > { %v7581_v40 = vpop.xlane.xlu1 %1340  ;;  %v991_v19 = vadd.f32 %v7413_v37, %v965_v2  ;;  %v1093_v2 = vmul.f32 %v1073_v9, %v1013_v52  ;;  %v1090_v60 = vmul.f32 %v1070_v57, %v1010_v13  ;;  %v10270_v9 = vld [vmem:[#allocation31_spill] sm:$0xff] }
 0x680   : > { %10262 = vst [vmem:[#allocation26_spill] sm:$0xff] %v7581_v40  ;;  %v1092_v22 = vmul.f32 %v1072_v27, %v1012_v28  ;;  %v10273_v57 = vld [vmem:[#allocation39_spill] sm:$0xff] }
 0x681   : > { %1870 = vrot.lane.b32.xlu1 %v10263_v59, %s6583_s30  ;;  %v1031_v49 = vmul.f32 0.70710677, %v991_v19  ;;  %v1011_v53 = vmul.f32 0.5, %v991_v19 }
 0x682   : > { %v1103_v19 = vpack.c.bf16 %v1093_v2, %v1092_v22 }
 0x683   : > { %6056 = verf.f32 %v1031_v49  ;;  %v7586_v29 = vpop.xlane.xlu1 %1218 }
 0x685   : > { %1874 = vrot.lane.b32.xlu1 %v7439_v44, %s6583_s30 }
 0x687   : > { %v7592_v25 = vpop.xlane.xlu1 %1212 }
 0x689   : > { %1878 = vrot.lane.b32.xlu1 %v7381_v50, %s6583_s30 }
 0x68b   : > { %v7598_v31 = vpop.xlane.xlu1 %1358 }
 0x68d   : > { %v6057_v43 = vpop.eup %6056  ;;  %2298 = vrot.lane.b32.xlu1 %v10264_v35, %s6582_s17 }
 0x68e   : > { %v1071_v11 = vadd.f32 1.0, %v6057_v43 }
 0x68f   : > { %v7612_v51 = vpop.xlane.xlu1 %1352 }
 0x690   : > { %v7596_v49 = vpop.f32.mrb[32].mxu0  ;;  %v1091_v39 = vmul.f32 %v1071_v11, %v1011_v53  ;;  %v7653_v11 = vpop.xlane.xlu0 %1191 }
 0x691   : > { %10265 = vst [vmem:[#allocation24_spill] sm:$0xff] %v7596_v49  ;;  %2302 = vrot.lane.b32.xlu1 %v10266_v33, %s6582_s17  ;;  %v7602_v0 = vpop.f32.mrb[33].mxu0  ;;  %10274 = vst [vmem:[#allocation53_spill] sm:$0xff] %v7653_v11 }
 0x692   : > { %10267 = vst [vmem:[#allocation37_spill] sm:$0xff] %v7602_v0  ;;  %v7604_v40 = vpop.f32.mrb[34].mxu0  ;;  %v1102_v34 = vpack.c.bf16 %v1091_v39, %v1090_v60  ;;  %v10271_v39 = vld [vmem:[#allocation28_spill] sm:$0xff] }
 0x693   : > { %10268 = vst [vmem:[#allocation35_spill] sm:$0xff] %v7604_v40  ;;  %v7606_v1 = vpop.f32.mrb[35].mxu0  ;;  %v7616_v15 = vpop.xlane.xlu1 %1230 }
 0x694   : > { %10269 = vst [vmem:[#allocation34_spill] sm:$0xff] %v7606_v1  ;;  %5541 = vmatprep.mubr.msk.bf16.mxu0 %vm476_vm0, %v1102_v34  ;;  %v7656_v28 = vpop.xlane.xlu0 %1185 }
 0x695   : > { %2418 = vrot.lane.b32.xlu1 %v10248_v5, %s6582_s17  ;;  %5542 = vmatmul.mubr.msk.bf16.gmra.mrb[36].mxu0 %vm476_vm0, %v1103_v19  ;;  %v10272_v5 = vld [vmem:[#allocation41_spill] sm:$0xff]  ;;  %10275 = vst [vmem:[#allocation38_spill] sm:$0xff] %v7656_v28 }
 0x696   : > { %v10277_v19 = vld [vmem:[#allocation33_spill] sm:$0xff] }
 0x697   : > { %v7622_v60 = vpop.xlane.xlu1 %1224  ;;  %v1786_v0 = vsel %vm476_vm0, %v10277_v19, 0.0 }
 0x698   : > { %v7659_v34 = vpop.xlane.xlu0 %1194 }
 0x699   : > { %2422 = vrot.lane.b32.xlu1 %v10249_v55, %s6582_s17  ;;  %10276 = vst [vmem:[#allocation47_spill] sm:$0xff] %v7659_v34 }
 0x69b   : > { %v7626_v22 = vpop.xlane.xlu1 %1370 }
 0x69c   : > { %v7663_v49 = vpop.xlane.xlu0 %1331 }
 0x69d   : > { %2306 = vrot.lane.b32.xlu1 %v10270_v9, %s6582_s17  ;;  %10278 = vst [vmem:[#allocation55_spill] sm:$0xff] %v7663_v49  ;;  %v10289_v9 = vld [vmem:[#allocation42_spill] sm:$0xff] }
 0x69e   : > { %v1798_v24 = vsel %vm476_vm0, %v10289_v9, 0.0 }
 0x69f   : > { %v7632_v55 = vpop.xlane.xlu1 %1364 }
 0x6a1   : > { %2310 = vrot.lane.b32.xlu1 %v10271_v39, %s6582_s17 }
 0x6a3   : > { %v7636_v43 = vpop.xlane.xlu1 %1242 }
 0x6a5   : > { %2426 = vrot.lane.b32.xlu1 %v10250_v42, %s6582_s17 }
 0x6a7   : > { %v7642_v42 = vpop.xlane.xlu1 %1236 }
 0x6a9   : > { %2430 = vrot.lane.b32.xlu1 %v7020_v38, %s6582_s17 }
 0x6ab   : > { %v7646_v38 = vpop.xlane.xlu1 %1382 }
 0x6ad   : > { %2314 = vrot.lane.b32.xlu1 %v10272_v5, %s6582_s17 }
 0x6b1   : > { %2318 = vrot.lane.b32.xlu1 %v10273_v57, %s6582_s17 }
 0x6b5   : > { %2434 = vrot.lane.b32.xlu1 %v10254_v30, %s6582_s17 }
 0x6b9   : > { %2436 = vrot.lane.b32.xlu1 %v10256_v36, %s6582_s17 }
 0x6bd   : > { %2438 = vrot.lane.b32.xlu1 %v10258_v3, %s6582_s17 }
 0x6c5   : > { %v7648_v52 = vpop.xlane.xlu1 %1376 }
 0x6c9   : > { %v7650_v27 = vpop.permute.xlu1 %1758 }
 0x6cd   : > { %v1841_v13 = vpop.permute.xlu1 %1840 }
 0x6ce   : > { %v1900_v53 = vsel %vm476_vm0, %v1841_v13, 0.0 }
 0x6cf   : > { %1901 = vadd.xlane.f32.xlu0 %v1900_v53 }
 0x6d1   : > { %v1843_v30 = vpop.permute.xlu1 %1842 }
 0x6d2   : > { %v1903_v36 = vsel %vm476_vm0, %v1843_v30, 0.0  ;;  %v7666_v30 = vpop.xlane.xlu0 %1325 }
 0x6d3   : > { %1904 = vadd.xlane.f32.xlu0 %v1903_v36  ;;  %10279 = vst [vmem:[#allocation62_spill] sm:$0xff] %v7666_v30 }
 0x6d5   : > { %v1845_v2 = vpop.permute.xlu1 %1844 }
 0x6d6   : > { %v1906_v3 = vsel %vm476_vm0, %v1845_v2, 0.0  ;;  %v7668_v36 = vpop.xlane.xlu0 %1334 }
 0x6d7   : > { %1907 = vadd.xlane.f32.xlu0 %v1906_v3  ;;  %10280 = vst [vmem:[#allocation33_spill] sm:$0xff] %v7668_v36 }
 0x6d9   : > { %v1847_v13 = vpop.permute.xlu1 %1846 }
 0x6da   : > { %v1909_v53 = vsel %vm476_vm0, %v1847_v13, 0.0  ;;  %v7674_v2 = vpop.xlane.xlu0 %1203 }
 0x6db   : > { %10281 = vst [vmem:[#allocation78_spill] sm:$0xff] %v7674_v2 }
 0x6dd   : > { %v1849_v56 = vpop.permute.xlu1 %1848 }
 0x6de   : > { %v1912_v30 = vsel %vm476_vm0, %v1849_v56, 0.0 }
 0x6e1   : > { %1787 = vadd.xlane.f32.xlu1 %v1786_v0  ;;  %v7680_v0 = vpop.xlane.xlu0 %1197 }
 0x6e2   : > { %10282 = vst [vmem:[#allocation79_spill] sm:$0xff] %v7680_v0  ;;  %v1851_v0 = vpop.permute.xlu1 %1850 }
 0x6e5   : > { %1910 = vadd.xlane.f32.xlu1 %v1909_v53  ;;  %v7686_v3 = vpop.xlane.xlu0 %1343 }
 0x6e6   : > { %10283 = vst [vmem:[#allocation80_spill] sm:$0xff] %v7686_v3  ;;  %v10287_v3 = vld [vmem:[#allocation43_spill] sm:$0xff]  ;;  %v1853_v39 = vpop.permute.xlu1 %1852 }
 0x6e7   : > { %v1801_v36 = vsel %vm476_vm0, %v10287_v3, 0.0  ;;  %v1915_v3 = vsel %vm476_vm0, %v1851_v0, 0.0 }
 0x6e9   : > { %v7688_v19 = vpop.xlane.xlu0 %1337 }
 0x6ea   : > { %10284 = vst [vmem:[#allocation81_spill] sm:$0xff] %v7688_v19 }
 0x6ed   : > { %2320 = vrot.lane.b32.xlu0 %v7167_v21, %s6582_s17  ;;  %v7690_v13 = vpop.xlane.xlu0 %1215 }
 0x6f1   : > { %2326 = vrot.lane.b32.xlu0 %v7199_v8, %s6582_s17  ;;  %v7692_v53 = vpop.xlane.xlu0 %1209  ;;  %v10298_v8 = vld [vmem:[#allocation72_spill] sm:$0xff] }
 0x6f2   : > { %v1816_v5 = vsel %vm476_vm0, %v10298_v8, 0.0 }
 0x6f5   : > { %2442 = vrot.lane.b32.xlu0 %v7299_v17, %s6582_s17  ;;  %v10285_v17 = vld [vmem:[#allocation45_spill] sm:$0xff]  ;;  %v7696_v40 = vpop.xlane.xlu0 %1355 }
 0x6f6   : > { %2322 = vrot.lane.b32.xlu1 %v7221_v41, %s6582_s17  ;;  %v1795_v1 = vsel %vm476_vm0, %v10285_v17, 0.0 }
 0x6f9   : > { %v7698_v10 = vpop.xlane.xlu0 %1349 }
 0x6fa   : > { %2324 = vrot.lane.b32.xlu1 %v7135_v45, %s6582_s17 }
 0x6fe   : > { %2440 = vrot.lane.b32.xlu1 %v10260_v62, %s6582_s17  ;;  %v7702_v62 = vpop.xlane.xlu0 %1227 }
 0x702   : > { %v7704_v46 = vpop.xlane.xlu0 %1221 }
 0x706   : > { %v7708_v19 = vpop.xlane.xlu0 %1367 }
 0x714   : > { %1796 = vadd.xlane.f32.xlu0 %v1795_v1  ;;  %v7712_v1 = vpop.xlane.xlu0 %1361 }
 0x718   : > { %v7714_v17 = vpop.xlane.xlu0 %1239 }
 0x71c   : > { %v7716_v48 = vpop.xlane.xlu0 %1233 }
 0x722   : > { %1793 = vadd.xlane.f32.xlu1 %v1792_v47  ;;  %v7718_v47 = vpop.xlane.xlu0 %1379 }
 0x72a   : > { %2444 = vrot.lane.b32.xlu0 %v7195_v61, %s6582_s17  ;;  %v7722_v61 = vpop.xlane.xlu0 %1373 }
 0x72e   : > { %v7726_v23 = vpop.permute.xlu0 %1756 }
 0x732   : > { %v7728_v20 = vpop.xlane.xlu0 %1781 }
 0x733   : > { %2446 = vrot.lane.b32.xlu1 %v10263_v59, %s6582_s17  ;;  %v1918_v59 = vsel %vm476_vm0, %v1853_v39, 0.0  ;;  %10288 = vst [vmem:[#allocation45_spill] sm:$0xff] %v7728_v20 }
 0x749   : > { %1802 = vadd.xlane.f32.xlu0 %v1801_v36  ;;  %v1855_v36 = vpop.permute.xlu0 %1854 }
 0x74a   : > { %v1921_v33 = vsel %vm476_vm0, %v1855_v36, 0.0  ;;  %v10295_v36 = vld [vmem:[#allocation59_spill] sm:$0xff] }
 0x74d   : > { %1913 = vadd.xlane.f32.xlu0 %v1912_v30 }
 0x751   : > { %1919 = vadd.xlane.f32.xlu0 %v1918_v59 }
 0x757   : > { %1799 = vadd.xlane.f32.xlu1 %v1798_v24  ;;  %v1857_v24 = vpop.permute.xlu1 %1856 }
 0x75b   : > { %1916 = vadd.xlane.f32.xlu1 %v1915_v3  ;;  %v1859_v0 = vpop.permute.xlu1 %1858 }
 0x75f   : > { %1922 = vadd.xlane.f32.xlu1 %v1921_v33  ;;  %v10294_v33 = vld [vmem:[#allocation60_spill] sm:$0xff]  ;;  %v1861_v3 = vpop.permute.xlu1 %1860 }
 0x760   : > { %v1807_v9 = vsel %vm476_vm0, %v10294_v33, 0.0  ;;  %v1930_v28 = vsel %vm476_vm0, %v1861_v3, 0.0 }
 0x767   : > { %2328 = vrot.lane.b32.xlu0 %v7283_v54, %s6582_s17 }
 0x768   : > { %v7736_v39 = vpop.f32.mrb[36].mxu0 }
 0x769   : > { %10290 = vst [vmem:[#allocation44_spill] sm:$0xff] %v7736_v39  ;;  %v7738_v30 = vpop.f32.mrb[37].mxu0  ;;  %v1863_v39 = vpop.permute.xlu1 %1862 }
 0x76a   : > { %10291 = vst [vmem:[#allocation43_spill] sm:$0xff] %v7738_v30  ;;  %v7740_v56 = vpop.f32.mrb[38].mxu0  ;;  %v1804_v30 = vsel %vm476_vm0, %v10295_v36, 0.0 }
 0x76b   : > { %10292 = vst [vmem:[#allocation42_spill] sm:$0xff] %v7740_v56  ;;  %v7742_v59 = vpop.f32.mrb[39].mxu0  ;;  %2334 = vrot.lane.b32.xlu0 %v7317_v6, %s6582_s17  ;;  %v1924_v6 = vsel %vm476_vm0, %v1857_v24, 0.0 }
 0x76c   : > { %10293 = vst [vmem:[#allocation82_spill] sm:$0xff] %v7742_v59 }
 0x76d   : > { %v1865_v56 = vpop.permute.xlu1 %1864 }
 0x76e   : > { %v1936_v3 = vsel %vm476_vm0, %v1865_v56, 0.0  ;;  %v1828_v56 = vsel %vm476_vm0, %v7426_v7, 0.0 }
 0x76f   : > { %2450 = vrot.lane.b32.xlu0 %v7439_v44, %s6582_s17  ;;  %v1869_v44 = vpop.permute.xlu0 %1868 }
 0x770   : > { %2330 = vrot.lane.b32.xlu1 %v7333_v63, %s6582_s17 }
 0x773   : > { %v1873_v59 = vpop.permute.xlu0 %1872 }
 0x774   : > { %2332 = vrot.lane.b32.xlu1 %v7253_v58, %s6582_s17 }
 0x777   : > { %v1877_v35 = vpop.permute.xlu0 %1876 }
 0x778   : > { %2448 = vrot.lane.b32.xlu1 %v7327_v32, %s6582_s17  ;;  %v1867_v32 = vpop.permute.xlu1 %1866 }
 0x77b   : > { %v7762_v33 = vpop.permute.xlu0 %2296 }
 0x77f   : > { %v7764_v16 = vpop.permute.xlu0 %2300 }
 0x783   : > { %v7766_v36 = vpop.permute.xlu0 %2416 }
 0x78e   : > { %1808 = vadd.xlane.f32.xlu0 %v1807_v9  ;;  %v1871_v9 = vpop.permute.xlu1 %1870 }
 0x78f   : > { %v1945_v7 = vsel %vm476_vm0, %v1871_v9, 0.0 }
 0x792   : > { %v1875_v2 = vpop.permute.xlu1 %1874 }
 0x796   : > { %v7768_v49 = vpop.permute.xlu1 %1878 }
 0x79a   : > { %v7772_v20 = vpop.permute.xlu1 %2298 }
 0x79c   : > { %1805 = vadd.xlane.f32.xlu1 %v1804_v30  ;;  %v7770_v30 = vpop.permute.xlu0 %2420 }
 0x7a0   : > { %v7776_v34 = vpop.permute.xlu0 %2304 }
 0x7a4   : > { %2452 = vrot.lane.b32.xlu0 %v7311_v12, %s6582_s17  ;;  %v10296_v12 = vld [vmem:[#allocation58_spill] sm:$0xff]  ;;  %v7782_v11 = vpop.permute.xlu0 %2308 }
 0x7a5   : > { %v1813_v63 = vsel %vm476_vm0, %v10296_v12, 0.0  ;;  %v10299_v12 = vld [vmem:[#allocation57_spill] sm:$0xff] }
 0x7a8   : > { %v7790_v57 = vpop.permute.xlu0 %2424 }
 0x7ac   : > { %v7798_v8 = vpop.permute.xlu0 %2428 }
 0x7ad   : > { %2454 = vrot.lane.b32.xlu1 %v7381_v50, %s6582_s17  ;;  %v7778_v50 = vpop.permute.xlu1 %2302 }
 0x7ae   : > { %10297 = vst [vmem:[#allocation60_spill] sm:$0xff] %v7778_v50 }
 0x7b1   : > { %v7784_v41 = vpop.permute.xlu1 %2418 }
 0x7b5   : > { %v7792_v50 = vpop.permute.xlu1 %2422 }
 0x7b6   : > { %10300 = vst [vmem:[#allocation59_spill] sm:$0xff] %v7792_v50  ;;  %v10302_v50 = vld [vmem:[#allocation73_spill] sm:$0xff] }
 0x7c3   : > { %1814 = vadd.xlane.f32.xlu0 %v1813_v63  ;;  %v1810_v63 = vsel %vm476_vm0, %v10299_v12, 0.0  ;;  %v1933_v12 = vsel %vm476_vm0, %v1863_v39, 0.0  ;;  %v1834_v39 = vsel %vm476_vm0, %v7726_v23, 0.0  ;;  %v1954_v23 = vsel %vm476_vm0, %v1877_v35, 0.0 }
 0x7c7   : > { %1925 = vadd.xlane.f32.xlu0 %v1924_v6  ;;  %v10301_v6 = vld [vmem:[#allocation70_spill] sm:$0xff] }
 0x7c8   : > { %v1822_v24 = vsel %vm476_vm0, %v10301_v6, 0.0  ;;  %v1819_v6 = vsel %vm476_vm0, %v10302_v50, 0.0 }
 0x7cb   : > { %1931 = vadd.xlane.f32.xlu0 %v1930_v28  ;;  %v1927_v28 = vsel %vm476_vm0, %v1859_v0, 0.0 }
 0x7cf   : > { %1817 = vadd.xlane.f32.xlu0 %v1816_v5  ;;  %v7800_v5 = vpop.permute.xlu1 %2306 }
 0x7d1   : > { %1811 = vadd.xlane.f32.xlu1 %v1810_v63  ;;  %v1942_v63 = vsel %vm476_vm0, %v1869_v44, 0.0 }
 0x7d3   : > { %1823 = vadd.xlane.f32.xlu0 %v1822_v24  ;;  %v7806_v24 = vpop.permute.xlu0 %2312  ;;  %v7808_v0 = vpop.permute.xlu1 %2310 }
 0x7d5   : > { %1928 = vadd.xlane.f32.xlu1 %v1927_v28  ;;  %v10303_v28 = vld [vmem:[#allocation71_spill] sm:$0xff] }
 0x7d7   : > { %1937 = vadd.xlane.f32.xlu0 %v1936_v3  ;;  %v1825_v3 = vsel %vm476_vm0, %v10303_v28, 0.0  ;;  %v7816_v44 = vpop.permute.xlu0 %2316  ;;  %v7818_v50 = vpop.permute.xlu1 %2426  ;;  %v1831_v28 = vsel %vm476_vm0, %v7489_v4, 0.0  ;;  %v1957_v4 = vsel %vm476_vm0, %v7768_v49, 0.0  ;;  %v7865_v49 = vmul.f32 0.03125, %v7692_v53 }
 0x7d9   : > { %1934 = vadd.xlane.f32.xlu1 %v1933_v12  ;;  %v1939_v12 = vsel %vm476_vm0, %v1867_v32, 0.0 }
 0x7db   : > { %1943 = vadd.xlane.f32.xlu0 %v1942_v63  ;;  %v1948_v63 = vsel %vm476_vm0, %v1873_v59, 0.0  ;;  %v1837_v59 = vsel %vm476_vm0, %v7650_v27, 0.0 }
 0x7dd   : > { %1820 = vadd.xlane.f32.xlu1 %v1819_v6  ;;  %v7823_v6 = vpop.permute.xlu0 %2432 }
 0x7df   : > { %1829 = vadd.xlane.f32.xlu0 %v1828_v56  ;;  %v7825_v56 = vpop.permute.xlu1 %2430 }
 0x7e1   : > { %1826 = vadd.xlane.f32.xlu1 %v1825_v3  ;;  %v7830_v3 = vpop.xlane.xlu0 %1784 }
 0x7e2   : > { %10304 = vst [vmem:[#allocation58_spill] sm:$0xff] %v7830_v3 }
 0x7e3   : > { %1835 = vadd.xlane.f32.xlu0 %v1834_v39  ;;  %v7832_v32 = vpop.permute.xlu1 %2314  ;;  %v1951_v39 = vsel %vm476_vm0, %v1875_v2, 0.0 }
 0x7e4   : > { %10305 = vst [vmem:[#allocation72_spill] sm:$0xff] %v7832_v32 }
 0x7e5   : > { %1940 = vadd.xlane.f32.xlu1 %v1939_v12  ;;  %v7836_v9 = vpop.xlane.xlu0 %1790 }
 0x7e6   : > { %10306 = vst [vmem:[#allocation57_spill] sm:$0xff] %v7836_v9 }
 0x7e7   : > { %1949 = vadd.xlane.f32.xlu0 %v1948_v63  ;;  %v7839_v12 = vpop.permute.xlu1 %2318 }
 0x7e8   : > { %10307 = vst [vmem:[#allocation70_spill] sm:$0xff] %v7839_v12 }
 0x7e9   : > { %1946 = vadd.xlane.f32.xlu1 %v1945_v7  ;;  %v7841_v35 = vpop.xlane.xlu0 %1901 }
 0x7eb   : > { %1955 = vadd.xlane.f32.xlu0 %v1954_v23  ;;  %v7845_v63 = vpop.permute.xlu1 %2434 }
 0x7ec   : > { %10308 = vst [vmem:[#allocation73_spill] sm:$0xff] %v7845_v63  ;;  %v7884_v63 = vmul.f32 0.03125, %v7704_v46  ;;  %v1420_v46 = vmul.f32 0.03125, %v7722_v61  ;;  %v7910_v61 = vmul.f32 0.03125, %v7592_v25 }
 0x7ed   : > { %1832 = vadd.xlane.f32.xlu1 %v1831_v28  ;;  %v7847_v7 = vpop.xlane.xlu0 %1904  ;;  %v7858_v28 = vmul.f32 0.03125, %v7690_v13  ;;  %v1412_v13 = vmul.f32 0.03125, %v7698_v10 }
 0x7ee   : > { %10309 = vst [vmem:[#allocation71_spill] sm:$0xff] %v7847_v7  ;;  %v7887_v7 = vmul.f32 0.03125, %v7714_v17  ;;  %v1433_v25 = vmul.f32 %v7910_v61, %v7910_v61 }
 0x7ef   : > { %v7851_v27 = vpop.permute.xlu1 %2436 }
 0x7f1   : > { %1838 = vadd.xlane.f32.xlu1 %v1837_v59  ;;  %v7853_v23 = vpop.xlane.xlu0 %1907 }
 0x7f2   : > { %10310 = vst [vmem:[#allocation83_spill] sm:$0xff] %v7853_v23  ;;  %v1418_v23 = vmul.f32 0.03125, %v7708_v19  ;;  %v1416_v19 = vmul.f32 0.03125, %v7712_v1 }
 0x7f3   : > { %v7855_v2 = vpop.permute.xlu1 %2438 }
 0x7f4   : > { %10311 = vst [vmem:[#allocation84_spill] sm:$0xff] %v7855_v2  ;;  %v1434_v2 = vmul.f32 %v7858_v28, %v7858_v28 }
 0x7f5   : > { %1952 = vadd.xlane.f32.xlu1 %v1951_v39  ;;  %v7860_v59 = vpop.permute.xlu0 %2320  ;;  %v1414_v39 = vmul.f32 0.03125, %v7696_v40 }
 0x7f6   : > { %10312 = vst [vmem:[#allocation85_spill] sm:$0xff] %v7860_v59 }
 0x7f7   : > { %v1454_v9 = vsub.f32 %v1414_v39, %v1434_v2  ;;  %v1422_v39 = vmul.f32 0.03125, %v7718_v47  ;;  %v1415_v47 = vmul.f32 0.03125, %v7598_v31 }
 0x7f9   : > { %1958 = vadd.xlane.f32.xlu1 %v1957_v4  ;;  %v7871_v4 = vmul.f32 0.03125, %v7702_v62  ;;  %v7879_v53 = vpop.permute.xlu0 %2326  ;;  %v1474_v2 = vmax.f32 %v1454_v9, 0.0 }
 0x7fa   : > { %10314 = vst [vmem:[#allocation87_spill] sm:$0xff] %v7879_v53  ;;  %v1436_v53 = vmul.f32 %v7884_v63, %v7884_v63 }
 0x7fb   : > { %v1438_v40 = vmul.f32 %v7871_v4, %v7871_v4 }
 0x7fd   : > { %v1458_v10 = vsub.f32 %v1418_v23, %v1438_v40  ;;  %v1442_v23 = vmul.f32 %v7887_v7, %v7887_v7  ;;  %v1514_v40 = vadd.f32 1e-06, %v1474_v2  ;;  %v7922_v2 = vmul.f32 0.03125, %v7616_v15 }
 0x7fe   : > { %v7932_v15 = vmul.f32 0.03125, %v7622_v60 }
 0x7ff   : > { %v1478_v1 = vmax.f32 %v1458_v10, 0.0  ;;  %v1413_v10 = vmul.f32 0.03125, %v7612_v51  ;;  %6058 = vrsqrt.f32 %v1514_v40  ;;  %v1417_v40 = vmul.f32 0.03125, %v7632_v55 }
 0x800   : > { %v1494_v55 = vsub.f32 %v7012_v26, %v7858_v28  ;;  %v10353_v26 = vld [vmem:[#allocation84_spill] sm:$0xff] }
 0x801   : > { %2140 = vrot.lane.b32.xlu0 %v7404_v14, %s6583_s30  ;;  %v7868_v14 = vpop.xlane.xlu1 %1787 }
 0x802   : > { %10313 = vst [vmem:[#allocation86_spill] sm:$0xff] %v7868_v14  ;;  %v7893_v14 = vmul.f32 0.03125, %v7716_v48  ;;  %v1456_v48 = vsub.f32 %v1416_v19, %v1436_v53  ;;  %v1518_v19 = vadd.f32 1e-06, %v1478_v1 }
 0x804   : > { %v1440_v9 = vmul.f32 %v7893_v14, %v7893_v14 }
 0x805   : > { %v7889_v12 = vpop.xlane.xlu1 %1910 }
 0x806   : > { %10315 = vst [vmem:[#allocation88_spill] sm:$0xff] %v7889_v12  ;;  %v1462_v12 = vsub.f32 %v1422_v39, %v1442_v23 }
 0x808   : > { %v1482_v31 = vmax.f32 %v1462_v12, 0.0 }
 0x80a   : > { %2163 = vrot.lane.b32.xlu1 %v7413_v37, %s6583_s30  ;;  %v1432_v37 = vmul.f32 %v7865_v49, %v7865_v49  ;;  %v1522_v12 = vadd.f32 1e-06, %v1482_v31 }
 0x80c   : > { %v1452_v62 = vsub.f32 %v1412_v13, %v1432_v37  ;;  %v7900_v13 = vmul.f32 0.03125, %v7586_v29  ;;  %v7904_v37 = vpop.permute.xlu0 %2442  ;;  %v7912_v29 = vpop.permute.xlu1 %2322 }
 0x80d   : > { %10316 = vst [vmem:[#allocation89_spill] sm:$0xff] %v7904_v37  ;;  %v1476_v37 = vmax.f32 %v1456_v48, 0.0  ;;  %v1439_v48 = vmul.f32 %v7922_v2, %v7922_v2 }
 0x80e   : > { %v1472_v17 = vmax.f32 %v1452_v62, 0.0  ;;  %v1460_v62 = vsub.f32 %v1420_v46, %v1440_v9  ;;  %v1435_v3 = vmul.f32 %v7900_v13, %v7900_v13  ;;  %v1453_v46 = vsub.f32 %v1413_v10, %v1433_v25  ;;  %v6059_v10 = vpop.eup %6058 }
 0x80f   : > { %v1516_v51 = vadd.f32 1e-06, %v1476_v37  ;;  %v1437_v37 = vmul.f32 %v7932_v15, %v7932_v15 }
 0x810   : > { %v1512_v59 = vadd.f32 1e-06, %v1472_v17  ;;  %v7917_v53 = vpop.xlane.xlu0 %1796  ;;  %v1455_v32 = vsub.f32 %v1415_v47, %v1435_v3  ;;  %v1480_v39 = vmax.f32 %v1460_v62, 0.0  ;;  %v1419_v17 = vmul.f32 0.03125, %v7626_v22  ;;  %v7925_v23 = vpop.permute.xlu1 %2324 }
 0x811   : > { %v2359_v3 = vsel %vm476_vm0, %v7772_v20, 0.0  ;;  %v1473_v22 = vmax.f32 %v1453_v46, 0.0  ;;  %v2362_v20 = vsel %vm476_vm0, %v7764_v16, 0.0  ;;  %v1457_v25 = vsub.f32 %v1417_v40, %v1437_v37 }
 0x812   : > { %6060 = vrsqrt.f32 %v1512_v59  ;;  %v1475_v1 = vmax.f32 %v1455_v32, 0.0  ;;  %v1520_v59 = vadd.f32 1e-06, %v1480_v39  ;;  %v1459_v47 = vsub.f32 %v1419_v17, %v1439_v48 }
 0x813   : > { %6062 = vrsqrt.f32 %v1518_v19  ;;  %v1513_v19 = vadd.f32 1e-06, %v1473_v22  ;;  %v2476_v16 = vsel %vm476_vm0, %v7766_v36, 0.0  ;;  %v1477_v48 = vmax.f32 %v1457_v25, 0.0 }
 0x814   : > { %v7934_v9 = vpop.permute.xlu0 %2444  ;;  %6064 = vrsqrt.f32 %v1516_v51  ;;  %v1515_v32 = vadd.f32 1e-06, %v1475_v1  ;;  %v7941_v62 = vpop.permute.xlu1 %2440  ;;  %v1479_v31 = vmax.f32 %v1459_v47, 0.0  ;;  %v1492_v51 = vsub.f32 %v7044_v18, %v7865_v49 }
 0x815   : > { %6066 = vrsqrt.f32 %v1522_v12  ;;  %v1554_v1 = vmul.f32 %v6059_v10, %v1494_v55  ;;  %v7958_v36 = vmul.f32 0.03125, %v7636_v43  ;;  %v2482_v22 = vsel %vm476_vm0, %v7770_v30, 0.0 }
 0x816   : > { %6068 = vrsqrt.f32 %v1520_v59  ;;  %v1519_v12 = vadd.f32 1e-06, %v1479_v31  ;;  %v7963_v40 = vmul.f32 0.03125, %v7642_v42  ;;  %v1496_v43 = vsub.f32 %v7167_v21, %v7884_v63 }
 0x817   : > { %6070 = vrsqrt.f32 %v1515_v32  ;;  %v2356_v32 = vsel %vm476_vm0, %v7762_v33, 0.0  ;;  %v1421_v30 = vmul.f32 0.03125, %v7648_v52  ;;  %v1443_v33 = vmul.f32 %v7958_v36, %v7958_v36 }
 0x818   : > { %v7943_v60 = vpop.xlane.xlu0 %1802  ;;  %v7949_v46 = vpop.xlane.xlu1 %1793  ;;  %6072 = vrsqrt.f32 %v1513_v19  ;;  %v1517_v19 = vadd.f32 1e-06, %v1477_v48  ;;  %v2368_v25 = vsel %vm476_vm0, %v7776_v34, 0.0  ;;  %v1441_v52 = vmul.f32 %v7963_v40, %v7963_v40 }
 0x819   : > { %6074 = vrsqrt.f32 %v1519_v12  ;;  %v10319_v12 = vld [vmem:[#allocation29_spill] sm:$0xff] }
 0x81a   : > { %6076 = vrsqrt.f32 %v1517_v19 }
 0x81c   : > { %v6061_v39 = vpop.eup %6060  ;;  %v7955_v28 = vpop.xlane.xlu0 %1913 }
 0x81d   : > { %v6063_v17 = vpop.eup %6062  ;;  %v1552_v59 = vmul.f32 %v6061_v39, %v1492_v51  ;;  %v7972_v31 = vpop.permute.xlu1 %2446 }
 0x81e   : > { %v6065_v49 = vpop.eup %6064 }
 0x81f   : > { %v6067_v10 = vpop.eup %6066  ;;  %v1556_v63 = vmul.f32 %v6065_v49, %v1496_v43  ;;  %v1461_v49 = vsub.f32 %v1421_v30, %v1441_v52 }
 0x820   : > { %2360 = vadd.xlane.f32.xlu0 %v2359_v3  ;;  %v1498_v3 = vsub.f32 %v7135_v45, %v7871_v4  ;;  %v1423_v4 = vmul.f32 0.03125, %v7646_v38  ;;  %v6069_v42 = vpop.eup %6068  ;;  %v1502_v38 = vsub.f32 %v7253_v58, %v7887_v7  ;;  %v7985_v39 = vpop.xlane.xlu0 %1919 }
 0x822   : > { %v1558_v47 = vmul.f32 %v6063_v17, %v1498_v3  ;;  %v6071_v17 = vpop.eup %6070  ;;  %v1562_v51 = vmul.f32 %v6067_v10, %v1502_v38  ;;  %v10318_v3 = vld [vmem:[#allocation60_spill] sm:$0xff]  ;;  %v2479_v38 = vsel %vm476_vm0, %v7784_v41, 0.0 }
 0x823   : > { %v2365_v34 = vsel %vm476_vm0, %v10318_v3, 0.0  ;;  %v6073_v10 = vpop.eup %6072  ;;  %v10322_v3 = vld [vmem:[#allocation54_spill] sm:$0xff] }
 0x824   : > { %2363 = vadd.xlane.f32.xlu0 %v2362_v20  ;;  %v10317_v20 = vld [vmem:[#allocation32_spill] sm:$0xff] }
 0x825   : > { %v1577_v37 = vmul.f32 %v10317_v20, %v1554_v1  ;;  %v1575_v55 = vmul.f32 %v10317_v20, %v1552_v59  ;;  %v1581_v7 = vmul.f32 %v10317_v20, %v1558_v47  ;;  %v1463_v1 = vsub.f32 %v1423_v4, %v1443_v33 }
 0x826   : > { %v2374_v47 = vsel %vm476_vm0, %v7782_v11, 0.0  ;;  %v1585_v11 = vmul.f32 %v10317_v20, %v1562_v51  ;;  %v1481_v33 = vmax.f32 %v1461_v49, 0.0 }
 0x827   : > { %v7991_v48 = vadd.f32 %v10319_v12, %v1577_v37  ;;  %v8000_v4 = vadd.f32 %v10319_v12, %v1575_v55  ;;  %v8003_v37 = vadd.f32 %v10319_v12, %v1581_v7  ;;  %v1483_v30 = vmax.f32 %v1463_v1, 0.0  ;;  %v6075_v7 = vpop.eup %6074 }
 0x828   : > { %2477 = vadd.xlane.f32.xlu0 %v2476_v16  ;;  %v1500_v16 = vsub.f32 %v7283_v54, %v7893_v14  ;;  %v10320_v14 = vld [vmem:[#allocation39_spill] sm:$0xff]  ;;  %v8030_v49 = vadd.f32 %v10319_v12, %v1585_v11 }
 0x829   : > { %v1640_v55 = vmul.f32 0.70710677, %v7991_v48  ;;  %v1644_v51 = vmul.f32 0.70710677, %v8003_v37 }
 0x82a   : > { %v1560_v59 = vmul.f32 %v6069_v42, %v1500_v16  ;;  %v1579_v42 = vmul.f32 %v10317_v20, %v1556_v63  ;;  %v2488_v63 = vsel %vm476_vm0, %v7790_v57, 0.0 }
 0x82b   : > { %6078 = verf.f32 %v1640_v55 }
 0x82c   : > { %2483 = vadd.xlane.f32.xlu0 %v2482_v22  ;;  %v1495_v22 = vsub.f32 %v10320_v14, %v7900_v13  ;;  %v10321_v13 = vld [vmem:[#allocation41_spill] sm:$0xff]  ;;  %v1583_v16 = vmul.f32 %v10317_v20, %v1560_v59  ;;  %v8023_v1 = vadd.f32 %v10319_v12, %v1579_v42  ;;  %v1523_v59 = vadd.f32 1e-06, %v1483_v30 }
 0x82d   : > { %v1493_v19 = vsub.f32 %v10321_v13, %v7910_v61  ;;  %v1638_v61 = vmul.f32 0.70710677, %v8000_v4  ;;  %v2494_v42 = vsel %vm476_vm0, %v7798_v8, 0.0  ;;  %v2371_v8 = vsel %vm476_vm0, %v7800_v5, 0.0 }
 0x82e   : > { %2357 = vadd.xlane.f32.xlu1 %v2356_v32  ;;  %v7995_v32 = vpop.xlane.xlu1 %1799  ;;  %v1555_v43 = vmul.f32 %v6071_v17, %v1495_v22  ;;  %v10323_v22 = vld [vmem:[#allocation59_spill] sm:$0xff]  ;;  %v1642_v11 = vmul.f32 0.70710677, %v8023_v1 }
 0x82f   : > { %v1553_v52 = vmul.f32 %v6073_v10, %v1493_v19  ;;  %v2485_v57 = vsel %vm476_vm0, %v10323_v22, 0.0  ;;  %v8033_v10 = vadd.f32 %v10319_v12, %v1583_v16  ;;  %6080 = verf.f32 %v1638_v61 }
 0x830   : > { %2369 = vadd.xlane.f32.xlu0 %v2368_v25  ;;  %v8011_v25 = vpop.permute.xlu0 %2328  ;;  %v1578_v41 = vmul.f32 %v10317_v20, %v1555_v43  ;;  %6082 = verf.f32 %v1644_v51  ;;  %v1648_v16 = vmul.f32 0.70710677, %v8030_v49  ;;  %v2377_v51 = vsel %vm476_vm0, %v7808_v0, 0.0 }
 0x831   : > { %v1576_v19 = vmul.f32 %v10317_v20, %v1553_v52  ;;  %6084 = vrsqrt.f32 %v1523_v59 }
 0x832   : > { %2366 = vadd.xlane.f32.xlu1 %v2365_v34  ;;  %v8018_v17 = vpop.xlane.xlu1 %1916  ;;  %v1499_v34 = vsub.f32 %v10322_v3, %v7922_v2  ;;  %v6077_v2 = vpop.eup %6076 }
 0x834   : > { %2375 = vadd.xlane.f32.xlu0 %v2374_v47  ;;  %v1521_v47 = vadd.f32 1e-06, %v1481_v33  ;;  %v1559_v43 = vmul.f32 %v6075_v7, %v1499_v34  ;;  %v8038_v30 = vpop.permute.xlu0 %2334  ;;  %v10324_v33 = vld [vmem:[#allocation56_spill] sm:$0xff]  ;;  %v2380_v7 = vsel %vm476_vm0, %v7806_v24, 0.0  ;;  %v2386_v24 = vsel %vm476_vm0, %v7816_v44, 0.0 }
 0x835   : > { %v1497_v55 = vsub.f32 %v10324_v33, %v7932_v15  ;;  %v8056_v15 = vadd.f32 %v10319_v12, %v1576_v19  ;;  %v10350_v33 = vld [vmem:[#allocation83_spill] sm:$0xff] }
 0x836   : > { %2480 = vadd.xlane.f32.xlu1 %v2479_v38  ;;  %v8041_v38 = vadd.f32 %v10319_v12, %v1578_v41  ;;  %6086 = vrsqrt.f32 %v1521_v47  ;;  %v8049_v52 = vpop.xlane.xlu1 %1922  ;;  %v1582_v41 = vmul.f32 %v10317_v20, %v1559_v43  ;;  %v6079_v47 = vpop.eup %6078  ;;  %v1982_v45 = vmul.f32 0.03125, %v10350_v33 }
 0x837   : > { %v1557_v61 = vmul.f32 %v6077_v2, %v1497_v55  ;;  %6088 = verf.f32 %v1642_v11  ;;  %v1639_v22 = vmul.f32 0.70710677, %v8056_v15  ;;  %v2500_v11 = vsel %vm476_vm0, %v7823_v6, 0.0  ;;  %v10332_v6 = vld [vmem:[#allocation69_spill] sm:$0xff] }
 0x838   : > { %2489 = vadd.xlane.f32.xlu0 %v2488_v63  ;;  %v1646_v63 = vmul.f32 0.70710677, %v8033_v10  ;;  %v1641_v5 = vmul.f32 0.70710677, %v8041_v38  ;;  %6090 = verf.f32 %v1648_v16  ;;  %v8061_v34 = vpop.permute.xlu0 %2450  ;;  %v8066_v59 = vadd.f32 %v10319_v12, %v1582_v41  ;;  %v10329_v41 = vld [vmem:[#allocation68_spill] sm:$0xff] }
 0x839   : > { %v6081_v0 = vpop.eup %6080  ;;  %v2509_v33 = vsel %vm476_vm0, %v10353_v26, 0.0  ;;  %v2518_v26 = vsel %vm476_vm0, %v7934_v9, 0.0  ;;  %v8220_v9 = vmul.f32 0.03125, %v7917_v53  ;;  %v1986_v53 = vmul.f32 0.03125, %v7985_v39 }
 0x83a   : > { %2486 = vadd.xlane.f32.xlu1 %v2485_v57  ;;  %6092 = verf.f32 %v1646_v63  ;;  %v1580_v57 = vmul.f32 %v10317_v20, %v1557_v61  ;;  %v8070_v43 = vpop.permute.xlu1 %2330  ;;  %v6083_v19 = vpop.eup %6082  ;;  %v1645_v55 = vmul.f32 0.70710677, %v8066_v59  ;;  %v10325_v63 = vld [vmem:[#allocation53_spill] sm:$0xff] }
 0x83b   : > { %6094 = verf.f32 %v1641_v5  ;;  %v6085_v44 = vpop.eup %6084  ;;  %v8083_v61 = vmul.f32 0.03125, %v10325_v63  ;;  %v1503_v5 = vsub.f32 %v10329_v41, %v7958_v36  ;;  %v10333_v63 = vld [vmem:[#allocation45_spill] sm:$0xff]  ;;  %v1620_v36 = vmul.f32 0.5, %v7991_v48  ;;  %v10334_v41 = vld [vmem:[#allocation55_spill] sm:$0xff] }
 0x83c   : > { %2495 = vadd.xlane.f32.xlu0 %v2494_v42  ;;  %v2491_v42 = vsel %vm476_vm0, %v7818_v50, 0.0  ;;  %v8074_v2 = vpop.xlane.xlu0 %1808  ;;  %6096 = verf.f32 %v1639_v22  ;;  %v1501_v22 = vsub.f32 %v10332_v6, %v7963_v40  ;;  %v2506_v40 = vsel %vm476_vm0, %v7851_v27, 0.0 }
 0x83d   : > { %10326 = vst [vmem:[#allocation60_spill] sm:$0xff] %v8083_v61  ;;  %v8098_v61 = vmul.f32 0.03125, %v10333_v63  ;;  %6098 = verf.f32 %v1645_v55  ;;  %v8107_v6 = vmul.f32 0.03125, %v10334_v41  ;;  %v1618_v48 = vmul.f32 0.5, %v8000_v4 }
 0x83e   : > { %2372 = vadd.xlane.f32.xlu1 %v2371_v8  ;;  %v8080_v8 = vadd.f32 %v10319_v12, %v1580_v57  ;;  %v2497_v57 = vsel %vm476_vm0, %v7825_v56, 0.0  ;;  %v1624_v63 = vmul.f32 0.5, %v8003_v37  ;;  %v8245_v39 = vmul.f32 0.03125, %v8074_v2 }
 0x83f   : > { %10335 = vst [vmem:[#allocation53_spill] sm:$0xff] %v8107_v6  ;;  %v10341_v6 = vld [vmem:[#allocation85_spill] sm:$0xff] }
 0x840   : > { %2381 = vadd.xlane.f32.xlu0 %v2380_v7  ;;  %v6087_v16 = vpop.eup %6086  ;;  %v10327_v7 = vld [vmem:[#allocation38_spill] sm:$0xff]  ;;  %v1643_v56 = vmul.f32 0.70710677, %v8080_v8 }
 0x841   : > { %v8086_v50 = vmul.f32 0.03125, %v10327_v7  ;;  %v6089_v58 = vpop.eup %6088  ;;  %v1563_v7 = vmul.f32 %v6085_v44, %v1503_v5  ;;  %v1980_v44 = vmul.f32 0.03125, %v7841_v35  ;;  %v8110_v5 = vpop.permute.xlu0 %2452  ;;  %v2000_v35 = vmul.f32 %v8098_v61, %v8098_v61 }
 0x842   : > { %2378 = vadd.xlane.f32.xlu1 %v2377_v51  ;;  %v10330_v51 = vld [vmem:[#allocation47_spill] sm:$0xff]  ;;  %v1682_v4 = vadd.f32 1.0, %v6089_v58  ;;  %6100 = verf.f32 %v1643_v56 }
 0x843   : > { %10328 = vst [vmem:[#allocation41_spill] sm:$0xff] %v8086_v50  ;;  %v8100_v50 = vpop.permute.xlu1 %2332 }
 0x844   : > { %2387 = vadd.xlane.f32.xlu0 %v2386_v24  ;;  %v8091_v24 = vmul.f32 0.03125, %v10330_v51  ;;  %v6091_v51 = vpop.eup %6090 }
 0x845   : > { %v1688_v58 = vadd.f32 1.0, %v6091_v51  ;;  %v2398_v51 = vsel %vm476_vm0, %v7925_v23, 0.0 }
 0x846   : > { %2492 = vadd.xlane.f32.xlu1 %v2491_v42  ;;  %10331 = vst [vmem:[#allocation59_spill] sm:$0xff] %v8091_v24  ;;  %v1680_v42 = vadd.f32 1.0, %v6079_v47  ;;  %v1561_v24 = vmul.f32 %v6087_v16, %v1501_v22  ;;  %v6093_v47 = vpop.eup %6092  ;;  %v10338_v22 = vld [vmem:[#allocation72_spill] sm:$0xff] }
 0x847   : > { %v2383_v27 = vsel %vm476_vm0, %v10338_v22, 0.0  ;;  %v6095_v41 = vpop.eup %6094  ;;  %v2020_v22 = vsub.f32 %v1980_v44, %v2000_v35  ;;  %v8133_v3 = vpop.permute.xlu1 %2448  ;;  %v1628_v35 = vmul.f32 0.5, %v8030_v49 }
 0x848   : > { %2501 = vadd.xlane.f32.xlu0 %v2500_v11  ;;  %v1678_v11 = vadd.f32 1.0, %v6081_v0  ;;  %v10336_v0 = vld [vmem:[#allocation78_spill] sm:$0xff]  ;;  %v8118_v55 = vmul.f32 %v1680_v42, %v1620_v36  ;;  %v1584_v42 = vmul.f32 %v10317_v20, %v1561_v24  ;;  %v1681_v24 = vadd.f32 1.0, %v6095_v41 }
 0x849   : > { %v8114_v16 = vmul.f32 0.03125, %v10336_v0  ;;  %v2392_v0 = vsel %vm476_vm0, %v10341_v6, 0.0  ;;  %v10342_v36 = vld [vmem:[#allocation58_spill] sm:$0xff]  ;;  %v8162_v49 = vmul.f32 %v1688_v58, %v1628_v35  ;;  %v10349_v35 = vld [vmem:[#allocation57_spill] sm:$0xff] }
 0x84a   : > { %2498 = vadd.xlane.f32.xlu1 %v2497_v57  ;;  %v1684_v57 = vadd.f32 1.0, %v6083_v19  ;;  %10339 = vst [vmem:[#allocation47_spill] sm:$0xff] %v8118_v55  ;;  %v8124_v19 = vmul.f32 %v1678_v11, %v1618_v48  ;;  %v8131_v37 = vmul.f32 0.03125, %v10342_v36  ;;  %v6097_v11 = vpop.eup %6096  ;;  %v10343_v48 = vld [vmem:[#allocation86_spill] sm:$0xff]  ;;  %v10345_v36 = vld [vmem:[#allocation71_spill] sm:$0xff] }
 0x84b   : > { %10337 = vst [vmem:[#allocation38_spill] sm:$0xff] %v8114_v16  ;;  %v1622_v16 = vmul.f32 0.5, %v8023_v1  ;;  %v8140_v6 = vmul.f32 0.03125, %v10343_v48  ;;  %v10344_v1 = vld [vmem:[#allocation70_spill] sm:$0xff]  ;;  %v1981_v54 = vmul.f32 0.03125, %v10345_v36  ;;  %v2040_v48 = vmax.f32 %v2020_v22, 0.0 }
 0x84c   : > { %2507 = vadd.xlane.f32.xlu0 %v2506_v40  ;;  %v1586_v40 = vmul.f32 %v10317_v20, %v1563_v7  ;;  %10340 = vst [vmem:[#allocation45_spill] sm:$0xff] %v8124_v19  ;;  %v8137_v7 = vmul.f32 %v1684_v57, %v1624_v63  ;;  %v2389_v56 = vsel %vm476_vm0, %v10344_v1, 0.0  ;;  %v1686_v20 = vadd.f32 1.0, %v6093_v47  ;;  %v10348_v22 = vld [vmem:[#allocation18_spill] sm:$0xff] }
 0x84d   : > { %v8149_v57 = vmul.f32 %v1682_v4, %v1622_v16  ;;  %v1621_v63 = vmul.f32 0.5, %v8041_v38  ;;  %v1626_v47 = vmul.f32 0.5, %v8033_v10  ;;  %v2001_v41 = vmul.f32 %v8131_v37, %v8131_v37  ;;  %v6099_v4 = vpop.eup %6098  ;;  %v10346_v38 = vld [vmem:[#allocation73_spill] sm:$0xff] }
 0x84e   : > { %2384 = vadd.xlane.f32.xlu1 %v2383_v27  ;;  %v8146_v44 = vadd.f32 %v10319_v12, %v1586_v40  ;;  %v1806_v40 = vpop.xlane.xlu1 %1805  ;;  %v1679_v16 = vadd.f32 1.0, %v6097_v11  ;;  %v2002_v23 = vmul.f32 %v8140_v6, %v8140_v6  ;;  %v1619_v11 = vmul.f32 0.5, %v8056_v15  ;;  %v6101_v15 = vpop.eup %6100 }
 0x84f   : > { %v8170_v10 = vmul.f32 %v1686_v20, %v1626_v47 }
 0x850   : > { %2393 = vadd.xlane.f32.xlu0 %v2392_v0  ;;  %v8135_v27 = vpop.xlane.xlu0 %1814  ;;  %v8155_v0 = vadd.f32 %v10319_v12, %v1584_v42  ;;  %v2503_v42 = vsel %vm476_vm0, %v10346_v38, 0.0  ;;  %v1649_v58 = vmul.f32 0.70710677, %v8146_v44  ;;  %v8177_v12 = vmul.f32 0.03125, %v10349_v35  ;;  %v10352_v35 = vld [vmem:[#allocation88_spill] sm:$0xff] }
 0x851   : > { %v8186_v38 = vmul.f32 %v1679_v16, %v1619_v11  ;;  %v1983_v36 = vmul.f32 0.03125, %v10352_v35  ;;  %v8204_v16 = vmul.f32 0.03125, %v7949_v46  ;;  %v1984_v11 = vmul.f32 0.03125, %v7955_v28 }
 0x852   : > { %2390 = vadd.xlane.f32.xlu1 %v2389_v56  ;;  %v8168_v56 = vmul.f32 %v1681_v24, %v1621_v63  ;;  %v2512_v24 = vsel %vm476_vm0, %v7941_v62, 0.0  ;;  %v1647_v20 = vmul.f32 0.70710677, %v8155_v0  ;;  %v2080_v63 = vadd.f32 1e-06, %v2040_v48 }
 0x853   : > { %10351 = vst [vmem:[#allocation78_spill] sm:$0xff] %v8186_v38  ;;  %v8194_v48 = vmul.f32 0.03125, %v7995_v32  ;;  %6102 = verf.f32 %v1649_v58  ;;  %v2395_v46 = vsel %vm476_vm0, %v7912_v29, 0.0  ;;  %v8229_v28 = vmul.f32 0.03125, %v7943_v60 }
 0x854   : > { %2399 = vadd.xlane.f32.xlu0 %v2398_v51  ;;  %v8160_v1 = vpop.xlane.xlu0 %1925  ;;  %10347 = vst [vmem:[#allocation55_spill] sm:$0xff] %v8168_v56  ;;  %v2021_v51 = vsub.f32 %v1981_v54, %v2001_v41  ;;  %v1625_v54 = vmul.f32 0.5, %v8066_v59  ;;  %v1685_v41 = vadd.f32 1.0, %v6099_v4  ;;  %v8199_v59 = vmul.f32 0.5, %v8080_v8 }
 0x855   : > { %6104 = verf.f32 %v1647_v20  ;;  %v8212_v8 = vadd.f32 1.0, %v6101_v15  ;;  %v2006_v20 = vmul.f32 %v8194_v48, %v8194_v48  ;;  %v1985_v15 = vmul.f32 0.03125, %v8018_v17 }
 0x856   : > { %2504 = vadd.xlane.f32.xlu1 %v2503_v42  ;;  %v2022_v42 = vsub.f32 %v1982_v45, %v2002_v23  ;;  %v2041_v21 = vmax.f32 %v2021_v51, 0.0  ;;  %v2003_v45 = vmul.f32 %v8177_v12, %v8177_v12  ;;  %6106 = vrsqrt.f32 %v2080_v63 }
 0x857   : > { %v8208_v4 = vmul.f32 %v1685_v41, %v1625_v54  ;;  %v10354_v54 = vld [vmem:[#allocation87_spill] sm:$0xff]  ;;  %v2005_v23 = vmul.f32 %v8220_v9, %v8220_v9  ;;  %v1988_v17 = vmul.f32 0.03125, %v8160_v1  ;;  %v8261_v1 = vmul.f32 0.03125, %v8135_v27 }
 0x858   : > { %2513 = vadd.xlane.f32.xlu0 %v2512_v24  ;;  %v8183_v47 = vpop.xlane.xlu0 %1931  ;;  %v8196_v24 = vpop.permute.xlu1 %2454  ;;  %v2042_v51 = vmax.f32 %v2022_v42, 0.0  ;;  %v2023_v58 = vsub.f32 %v1983_v36, %v2003_v45  ;;  %v8217_v35 = vadd.f32 1e-06, %v2041_v21  ;;  %v2401_v41 = vsel %vm476_vm0, %v10354_v54, 0.0  ;;  %v10356_v45 = vld [vmem:[#allocation89_spill] sm:$0xff] }
 0x859   : > { %v2004_v36 = vmul.f32 %v8204_v16, %v8204_v16  ;;  %v2404_v21 = vsel %vm476_vm0, %v8011_v25, 0.0  ;;  %v8237_v42 = vmul.f32 0.03125, %v1806_v40  ;;  %v2026_v25 = vsub.f32 %v1986_v53, %v2006_v20 }
 0x85a   : > { %2510 = vadd.xlane.f32.xlu1 %v2509_v33  ;;  %v2043_v54 = vmax.f32 %v2023_v58, 0.0  ;;  %v1990_v62 = vmul.f32 0.03125, %v8183_v47  ;;  %v2524_v47 = vsel %vm476_vm0, %v8133_v3, 0.0  ;;  %6108 = vrsqrt.f32 %v8217_v35 }
 0x85b   : > { %v2024_v60 = vsub.f32 %v1984_v11, %v2004_v36  ;;  %v2025_v11 = vsub.f32 %v1985_v15, %v2005_v23  ;;  %v2008_v2 = vmul.f32 %v8237_v42, %v8237_v42  ;;  %v2046_v38 = vmax.f32 %v2026_v25, 0.0 }
 0x85c   : > { %2519 = vadd.xlane.f32.xlu0 %v2518_v26  ;;  %v1818_v32 = vpop.xlane.xlu0 %1817  ;;  %v2515_v26 = vsel %vm476_vm0, %v10356_v45, 0.0  ;;  %v2009_v23 = vmul.f32 %v8245_v39, %v8245_v39  ;;  %v2011_v25 = vmul.f32 %v8261_v1, %v8261_v1 }
 0x85d   : > { %v8250_v45 = vmul.f32 0.03125, %v1818_v32  ;;  %v8256_v58 = vpop.eup %6102  ;;  %v2044_v36 = vmax.f32 %v2024_v60, 0.0  ;;  %v2028_v15 = vsub.f32 %v1988_v17, %v2008_v2 }
 0x85e   : > { %v1812_v63 = vpop.xlane.xlu1 %1811  ;;  %2396 = vadd.xlane.f32.xlu1 %v2395_v46  ;;  %v2082_v46 = vadd.f32 1e-06, %v2042_v51 }
 0x85f   : > { %v8231_v29 = vmul.f32 0.03125, %v1812_v63  ;;  %v1987_v63 = vmul.f32 0.03125, %v8049_v52  ;;  %v2410_v52 = vsel %vm476_vm0, %v8100_v50, 0.0  ;;  %v8263_v32 = vpop.eup %6104 }
 0x860   : > { %2405 = vadd.xlane.f32.xlu0 %v2404_v21  ;;  %v1824_v33 = vpop.xlane.xlu0 %1823  ;;  %v2007_v21 = vmul.f32 %v8229_v28, %v8229_v28  ;;  %v8266_v50 = vpop.eup %6106  ;;  %6110 = vrsqrt.f32 %v2082_v46 }
 0x861   : > { %10355 = vst [vmem:[#allocation72_spill] sm:$0xff] %v8231_v29  ;;  %v2010_v51 = vmul.f32 %v8231_v29, %v8231_v29  ;;  %v8270_v55 = vmul.f32 0.03125, %v1824_v33  ;;  %v2084_v33 = vadd.f32 1e-06, %v2044_v36  ;;  %v2048_v29 = vmax.f32 %v2028_v15, 0.0 }
 0x862   : > { %v1929_v40 = vpop.xlane.xlu1 %1928  ;;  %2402 = vadd.xlane.f32.xlu1 %v2401_v41  ;;  %v2027_v53 = vsub.f32 %v1987_v63, %v2007_v21  ;;  %v2083_v63 = vadd.f32 1e-06, %v2043_v54  ;;  %v2045_v21 = vmax.f32 %v2025_v11, 0.0  ;;  %v2086_v11 = vadd.f32 1e-06, %v2046_v38 }
 0x863   : > { %v1989_v20 = vmul.f32 0.03125, %v1929_v40  ;;  %v2012_v40 = vmul.f32 %v8250_v45, %v8250_v45  ;;  %v2530_v36 = vsel %vm476_vm0, %v8110_v5, 0.0 }
 0x864   : > { %2411 = vadd.xlane.f32.xlu0 %v2410_v52  ;;  %v1938_v41 = vpop.xlane.xlu0 %1937  ;;  %v2030_v52 = vsub.f32 %v1990_v62, %v2010_v51  ;;  %v2047_v2 = vmax.f32 %v2027_v53, 0.0  ;;  %v2014_v62 = vmul.f32 %v8270_v55, %v8270_v55  ;;  %6112 = vrsqrt.f32 %v2083_v63 }
 0x865   : > { %v1992_v19 = vmul.f32 0.03125, %v1938_v41  ;;  %v2029_v41 = vsub.f32 %v1989_v20, %v2009_v23  ;;  %6114 = vrsqrt.f32 %v2084_v33 }
 0x866   : > { %v1935_v27 = vpop.xlane.xlu1 %1934  ;;  %2516 = vadd.xlane.f32.xlu1 %v2515_v26  ;;  %v2521_v26 = vsel %vm476_vm0, %v7972_v31, 0.0  ;;  %v2050_v20 = vmax.f32 %v2030_v52, 0.0  ;;  %v2087_v15 = vadd.f32 1e-06, %v2047_v2  ;;  %v1629_v52 = vmul.f32 0.5, %v8146_v44 }
 0x867   : > { %v1991_v60 = vmul.f32 0.03125, %v1935_v27  ;;  %v2032_v56 = vsub.f32 %v1992_v19, %v2012_v40  ;;  %v2085_v19 = vadd.f32 1e-06, %v2045_v21  ;;  %v2049_v53 = vmax.f32 %v2029_v41, 0.0 }
 0x868   : > { %2525 = vadd.xlane.f32.xlu0 %v2524_v47  ;;  %v1944_v17 = vpop.xlane.xlu0 %1943  ;;  %v2407_v40 = vsel %vm476_vm0, %v8070_v43, 0.0  ;;  %6116 = vrsqrt.f32 %v2086_v11  ;;  %v2090_v5 = vadd.f32 1e-06, %v2050_v20  ;;  %v8292_v47 = vmul.f32 %v8212_v8, %v8199_v59 }
 0x869   : > { %v2031_v51 = vsub.f32 %v1991_v60, %v2011_v25  ;;  %v1994_v3 = vmul.f32 0.03125, %v1944_v17  ;;  %v2052_v27 = vmax.f32 %v2032_v56, 0.0  ;;  %v2088_v60 = vadd.f32 1e-06, %v2048_v29 }
 0x86a   : > { %v1821_v54 = vpop.xlane.xlu1 %1820  ;;  %2522 = vadd.xlane.f32.xlu1 %v2521_v26  ;;  %6118 = vrsqrt.f32 %v2085_v19  ;;  %v2089_v56 = vadd.f32 1e-06, %v2049_v53  ;;  %v1689_v43 = vadd.f32 1.0, %v8256_v58  ;;  %v2413_v44 = vsel %vm476_vm0, %v8038_v30, 0.0 }
 0x86b   : > { %v2034_v23 = vsub.f32 %v1994_v3, %v2014_v62  ;;  %v2051_v35 = vmax.f32 %v2031_v51, 0.0  ;;  %v8288_v46 = vmul.f32 0.03125, %v1821_v54  ;;  %6120 = vrsqrt.f32 %v2087_v15  ;;  %v6109_v3 = vpop.eup %6108 }
 0x86c   : > { %2531 = vadd.xlane.f32.xlu0 %v2530_v36  ;;  %v1830_v31 = vpop.xlane.xlu0 %1829  ;;  %v2092_v29 = vadd.f32 1e-06, %v2052_v27  ;;  %6122 = vrsqrt.f32 %v2088_v60  ;;  %v1627_v59 = vmul.f32 0.5, %v8155_v0  ;;  %v1687_v8 = vadd.f32 1.0, %v8263_v32  ;;  %v6111_v11 = vpop.eup %6110 }
 0x86d   : > { %v2054_v63 = vmax.f32 %v2034_v23, 0.0  ;;  %v8295_v25 = vmul.f32 0.03125, %v1830_v31  ;;  %v2091_v41 = vadd.f32 1e-06, %v2051_v35  ;;  %6124 = vrsqrt.f32 %v2090_v5 }
 0x86e   : > { %v1827_v38 = vpop.xlane.xlu1 %1826  ;;  %2408 = vadd.xlane.f32.xlu1 %v2407_v40  ;;  %v2013_v33 = vmul.f32 %v8288_v46, %v8288_v46  ;;  %6126 = vrsqrt.f32 %v2089_v56  ;;  %v2527_v51 = vsel %vm476_vm0, %v8061_v34, 0.0  ;;  %v8313_v19 = vmul.f32 %v1689_v43, %v1629_v52  ;;  %v6113_v23 = vpop.eup %6112 }
 0x86f   : > { %v8303_v58 = vmul.f32 0.03125, %v1827_v38  ;;  %v2094_v26 = vadd.f32 1e-06, %v2054_v63  ;;  %6128 = vrsqrt.f32 %v2092_v29  ;;  %v2016_v0 = vmul.f32 %v8295_v25, %v8295_v25  ;;  %v6115_v40 = vpop.eup %6114 }
 0x870   : > { %v1836_v21 = vpop.xlane.xlu0 %1835  ;;  %6130 = vrsqrt.f32 %v2091_v41  ;;  %v8315_v53 = vmul.f32 %v1687_v8, %v1627_v59  ;;  %v2533_v38 = vsel %vm476_vm0, %v8196_v24, 0.0 }
 0x871   : > { %v8305_v62 = vmul.f32 0.03125, %v1836_v21  ;;  %v2015_v34 = vmul.f32 %v8303_v58, %v8303_v58  ;;  %6132 = vrsqrt.f32 %v2094_v26  ;;  %v10359_v26 = vsub.f32 %v10348_v22, %v8098_v61 }
 0x872   : > { %v1941_v17 = vpop.xlane.xlu1 %1940  ;;  %2414 = vadd.xlane.f32.xlu1 %v2413_v44  ;;  %v6117_v5 = vpop.eup %6116  ;;  %v10357_v44 = vld [vmem:[#allocation22_spill] sm:$0xff] }
 0x873   : > { %v1993_v2 = vmul.f32 0.03125, %v1941_v17  ;;  %v2018_v60 = vmul.f32 %v8305_v62, %v8305_v62  ;;  %v2061_v41 = vsub.f32 %v10357_v44, %v8131_v37  ;;  %v10358_v17 = vld [vmem:[#allocation20_spill] sm:$0xff] }
 0x874   : > { %v1950_v30 = vpop.xlane.xlu0 %1949  ;;  %v6119_v29 = vpop.eup %6118  ;;  %v2063_v59 = vsub.f32 %v10358_v17, %v8177_v12  ;;  %v10360_v12 = vld [vmem:[#allocation17_spill] sm:$0xff] }
 0x875   : > { %v2033_v32 = vsub.f32 %v1993_v2, %v2013_v33  ;;  %v1996_v54 = vmul.f32 0.03125, %v1950_v30  ;;  %v6121_v2 = vpop.eup %6120  ;;  %v2120_v30 = vmul.f32 %v8266_v50, %v10359_v26 }
 0x876   : > { %v1947_v20 = vpop.xlane.xlu1 %1946  ;;  %2528 = vadd.xlane.f32.xlu1 %v2527_v51 }
 0x877   : > { %v2053_v31 = vmax.f32 %v2033_v32, 0.0  ;;  %v2036_v15 = vsub.f32 %v1996_v54, %v2016_v0  ;;  %v1995_v27 = vmul.f32 0.03125, %v1947_v20  ;;  %v6123_v32 = vpop.eup %6122  ;;  %v2062_v54 = vsub.f32 %v10360_v12, %v8140_v6  ;;  %v10361_v20 = vld [vmem:[#allocation31_spill] sm:$0xff]  ;;  %v10364_v6 = vld [vmem:[#allocation28_spill] sm:$0xff] }
 0x878   : > { %v1956_v35 = vpop.xlane.xlu0 %1955  ;;  %v2067_v26 = vsub.f32 %v10364_v6, %v8229_v28  ;;  %v10365_v28 = vld [vmem:[#allocation48_spill] sm:$0xff] }
 0x879   : > { %v2093_v56 = vadd.f32 1e-06, %v2053_v31  ;;  %v2056_v63 = vmax.f32 %v2036_v15, 0.0  ;;  %v2035_v21 = vsub.f32 %v1995_v27, %v2015_v34  ;;  %v1998_v43 = vmul.f32 0.03125, %v1956_v35  ;;  %v10362_v31 = vld [vmem:[#allocation25_spill] sm:$0xff]  ;;  %v6125_v27 = vpop.eup %6124  ;;  %v10363_v35 = vld [vmem:[#allocation23_spill] sm:$0xff] }
 0x87a   : > { %v1833_v8 = vpop.xlane.xlu1 %1832  ;;  %2534 = vadd.xlane.f32.xlu1 %v2533_v38  ;;  %v2065_v34 = vsub.f32 %v10361_v20, %v8220_v9  ;;  %v2064_v15 = vsub.f32 %v10362_v31, %v8204_v16  ;;  %v2066_v61 = vsub.f32 %v10363_v35, %v8194_v48  ;;  %v2127_v20 = vmul.f32 %v6121_v2, %v2067_v26  ;;  %v10368_v2 = vld [vmem:[#allocation46_spill] sm:$0xff] }
 0x87b   : > { %v2096_v51 = vadd.f32 1e-06, %v2056_v63  ;;  %v2055_v0 = vmax.f32 %v2035_v21, 0.0  ;;  %v2038_v37 = vsub.f32 %v1998_v43, %v2018_v60  ;;  %6134 = vrsqrt.f32 %v2093_v56  ;;  %v6127_v63 = vpop.eup %6126 }
 0x87c   : > { %v2121_v60 = vmul.f32 %v6109_v3, %v2061_v41  ;;  %v2122_v21 = vmul.f32 %v6111_v11, %v2062_v54  ;;  %v2123_v43 = vmul.f32 %v6113_v23, %v2063_v59  ;;  %v6129_v9 = vpop.eup %6128  ;;  %v2124_v52 = vmul.f32 %v6115_v40, %v2064_v15  ;;  %v10366_v40 = vld [vmem:[#allocation72_spill] sm:$0xff] }
 0x87d   : > { %6136 = vrsqrt.f32 %v2096_v51  ;;  %v2095_v50 = vadd.f32 1e-06, %v2055_v0  ;;  %v2058_v38 = vmax.f32 %v2038_v37, 0.0  ;;  %v2126_v24 = vmul.f32 %v6117_v5, %v2066_v61  ;;  %v6131_v36 = vpop.eup %6130  ;;  %v10367_v5 = vld [vmem:[#allocation36_spill] sm:$0xff] }
 0x87e   : > { %v1839_v33 = vpop.xlane.xlu1 %1838  ;;  %v2125_v16 = vmul.f32 %v6119_v29, %v2065_v34  ;;  %v8347_v56 = vmul.f32 0.03125, %v1833_v8  ;;  %v2069_v48 = vsub.f32 %v10321_v13, %v8245_v39  ;;  %v2068_v3 = vsub.f32 %v7044_v18, %v8237_v42  ;;  %v6133_v59 = vpop.eup %6132  ;;  %v10369_v39 = vld [vmem:[#allocation56_spill] sm:$0xff]  ;;  %v10370_v42 = vld [vmem:[#allocation63_spill] sm:$0xff] }
 0x87f   : > { %v2098_v11 = vadd.f32 1e-06, %v2058_v38  ;;  %v2071_v23 = vsub.f32 %v10320_v14, %v8261_v1  ;;  %v2072_v41 = vsub.f32 %v10365_v28, %v8250_v45  ;;  %v2070_v29 = vsub.f32 %v10367_v5, %v10366_v40  ;;  %v6300_v1 = vld [vmem:[#allocation6] ss:$0 sm:$0xff]  ;;  %v10372_v38 = vld [vmem:[#allocation61_spill] sm:$0xff] }
 0x880   : > { %6138 = vrsqrt.f32 %v2095_v50  ;;  %v2128_v8 = vmul.f32 %v6123_v32, %v2068_v3  ;;  %v2074_v51 = vsub.f32 %v10368_v2, %v8270_v55  ;;  %v2073_v0 = vsub.f32 %v10369_v39, %v8288_v46  ;;  %v10371_v45 = vld [vmem:[#allocation54_spill] sm:$0xff]  ;;  %v8370_v32 = vpop.permute.xlu0 %2140  ;;  %v10374_v2 = vld [vmem:[#allocation55_spill] sm:$0xff] }
 0x881   : > { %v2076_v37 = vsub.f32 %v10370_v42, %v8295_v25  ;;  %v2075_v34 = vsub.f32 %v10371_v45, %v8303_v58  ;;  %v2017_v15 = vmul.f32 %v8347_v56, %v8347_v56  ;;  %v8372_v61 = vmul.f32 0.03125, %v1839_v33  ;;  %v10373_v58 = vld [vmem:[#allocation69_spill] sm:$0xff]  ;;  %v10375_v33 = vld [vmem:[#allocation47_spill] sm:$0xff] }
 0x882   : > { %v1953_v54 = vpop.xlane.xlu1 %1952  ;;  %2716 = vrot.lane.b32.xlu0 %v6300_v1, %s6584_s11  ;;  %v2130_v50 = vmul.f32 %v6125_v27, %v2070_v29  ;;  %v2129_v46 = vmul.f32 %v6127_v63, %v2069_v48  ;;  %v2078_v25 = vsub.f32 %v10372_v38, %v8305_v62  ;;  %6140 = vrsqrt.f32 %v2098_v11 }
 0x883   : > { %v1997_v55 = vmul.f32 0.03125, %v1953_v54  ;;  %v2132_v26 = vmul.f32 %v6129_v9, %v2072_v41  ;;  %v2131_v3 = vmul.f32 %v6131_v36, %v2071_v23  ;;  %v2134_v40 = vmul.f32 %v6133_v59, %v2074_v51  ;;  %v10377_v41 = vld [vmem:[#allocation68_spill] sm:$0xff] }
 0x884   : > { %v2077_v45 = vsub.f32 %v10373_v58, %v8347_v56  ;;  %v10376_v14 = vpack.c.bf16 %v10374_v2, %v10375_v33  ;;  %v2145_v27 = vmul.f32 %v8370_v32, %v2122_v21  ;;  %v2146_v63 = vmul.f32 %v8370_v32, %v2123_v43 }
 0x885   : > { %v2037_v1 = vsub.f32 %v1997_v55, %v2017_v15  ;;  %v6135_v42 = vpop.eup %6134  ;;  %v2143_v62 = vmul.f32 %v8370_v32, %v2120_v30  ;;  %v2019_v36 = vmul.f32 %v8372_v61, %v8372_v61  ;;  %v2144_v23 = vmul.f32 %v8370_v32, %v2121_v60 }
 0x886   : > { %v1959_v39 = vpop.xlane.xlu1 %1958  ;;  %2892 = vrot.lane.b32.xlu0 %v10376_v14, %s6584_s11  ;;  %v2079_v29 = vsub.f32 %v10377_v41, %v8372_v61  ;;  %v2149_v59 = vmul.f32 %v8370_v32, %v2126_v24  ;;  %v2150_v14 = vmul.f32 %v8370_v32, %v2127_v20  ;;  %v2147_v21 = vmul.f32 %v8370_v32, %v2124_v52 }
 0x887   : > { %v6137_v9 = vpop.eup %6136  ;;  %v2057_v48 = vmax.f32 %v2037_v1, 0.0  ;;  %v1999_v11 = vmul.f32 0.03125, %v1959_v39  ;;  %v2148_v30 = vmul.f32 %v8370_v32, %v2125_v16  ;;  %v2153_v51 = vmul.f32 %v8370_v32, %v2130_v50  ;;  %v6301_v1 = vld [vmem:[#allocation7] ss:$0 sm:$0xff] }
 0x888   : > { %v2133_v54 = vmul.f32 %v6135_v42, %v2073_v0  ;;  %v2136_v15 = vmul.f32 %v6137_v9, %v2076_v37  ;;  %v10378_v60 = vpack.c.bf16 %v8208_v4, %v8137_v7  ;;  %v2154_v24 = vmul.f32 %v8370_v32, %v2131_v3 }
 0x889   : > { %v2097_v43 = vadd.f32 1e-06, %v2057_v48  ;;  %v2039_v2 = vsub.f32 %v1999_v11, %v2019_v36  ;;  %v2151_v20 = vmul.f32 %v8370_v32, %v2128_v8  ;;  %v2152_v4 = vmul.f32 %v8370_v32, %v2129_v46  ;;  %v10380_v46 = vld [vmem:[#allocation78_spill] sm:$0xff]  ;;  %v10381_v11 = vld [vmem:[#allocation45_spill] sm:$0xff] }
 0x88a   : > { %v8395_v39 = vpop.permute.xlu1 %2163  ;;  %2896 = vrot.lane.b32.xlu0 %v10378_v60, %s6584_s11  ;;  %v6139_v52 = vpop.eup %6138  ;;  %v2157_v3 = vmul.f32 %v8370_v32, %v2134_v40  ;;  %v2155_v33 = vmul.f32 %v8370_v32, %v2132_v26  ;;  %v2156_v48 = vmul.f32 %v8370_v32, %v2133_v54 }
 0x88b   : > { %6142 = vrsqrt.f32 %v2097_v43  ;;  %v2059_v55 = vmax.f32 %v2039_v2, 0.0  ;;  %2739 = vrot.lane.b32.xlu1 %v6301_v1, %s6584_s11  ;;  %v2168_v16 = vadd.f32 %v8395_v39, %v2145_v27  ;;  %v2169_v0 = vadd.f32 %v8395_v39, %v2146_v63 }
 0x88c   : > { %v2166_v42 = vadd.f32 %v8395_v39, %v2143_v62  ;;  %v2167_v37 = vadd.f32 %v8395_v39, %v2144_v23  ;;  %v2172_v7 = vadd.f32 %v8395_v39, %v2149_v59  ;;  %v6141_v9 = vpop.eup %6140  ;;  %v2135_v36 = vmul.f32 %v6139_v52, %v2075_v34 }
 0x88d   : > { %v2099_v50 = vadd.f32 1e-06, %v2059_v55  ;;  %v2208_v8 = vmul.f32 0.70710677, %v2168_v16  ;;  %v10379_v27 = vpack.c.bf16 %v8313_v19, %v8162_v49  ;;  %v2209_v63 = vmul.f32 0.70710677, %v2169_v0 }
 0x88e   : > { %v2206_v62 = vmul.f32 0.70710677, %v2166_v42  ;;  %v10382_v23 = vpack.c.bf16 %v10380_v46, %v10381_v11  ;;  %v2207_v40 = vmul.f32 0.70710677, %v2167_v37  ;;  %v2173_v26 = vadd.f32 %v8395_v39, %v2150_v14 }
 0x88f   : > { %2900 = vrot.lane.b32.xlu0 %v10379_v27, %s6584_s11  ;;  %6144 = vrsqrt.f32 %v2099_v50  ;;  %v8423_v34 = vmul.f32 %v8370_v32, %v2136_v15  ;;  %v2212_v59 = vmul.f32 0.70710677, %v2172_v7  ;;  %v2170_v49 = vadd.f32 %v8395_v39, %v2147_v21 }
 0x890   : > { %2890 = vrot.lane.b32.xlu1 %v10382_v23, %s6584_s11  ;;  %6146 = verf.f32 %v2208_v8  ;;  %v2171_v19 = vadd.f32 %v8395_v39, %v2148_v30  ;;  %v8427_v43 = vmul.f32 %v6141_v9, %v2078_v25  ;;  %v2213_v2 = vmul.f32 0.70710677, %v2173_v26 }
 0x891   : > { %6148 = verf.f32 %v2209_v63  ;;  %v2176_v54 = vadd.f32 %v8395_v39, %v2153_v51  ;;  %v2188_v60 = vmul.f32 0.5, %v2168_v16  ;;  %v2189_v52 = vmul.f32 0.5, %v2169_v0 }
 0x892   : > { %6150 = verf.f32 %v2206_v62  ;;  %v2210_v55 = vmul.f32 0.70710677, %v2170_v49  ;;  %v10383_v14 = vpack.c.bf16 %v8292_v47, %v8149_v57  ;;  %v2186_v15 = vmul.f32 0.5, %v2166_v42 }
 0x893   : > { %6152 = verf.f32 %v2207_v40  ;;  %v2211_v21 = vmul.f32 0.70710677, %v2171_v19  ;;  %v2177_v30 = vadd.f32 %v8395_v39, %v2154_v24  ;;  %v2216_v25 = vmul.f32 0.70710677, %v2176_v54 }
 0x894   : > { %2894 = vrot.lane.b32.xlu1 %v10383_v14, %s6584_s11  ;;  %6154 = verf.f32 %v2212_v59  ;;  %v2174_v1 = vadd.f32 %v8395_v39, %v2151_v20  ;;  %v2175_v51 = vadd.f32 %v8395_v39, %v2152_v4  ;;  %v2187_v0 = vmul.f32 0.5, %v2167_v37 }
 0x895   : > { %v6143_v16 = vpop.eup %6142  ;;  %6156 = verf.f32 %v2213_v2  ;;  %v2217_v50 = vmul.f32 0.70710677, %v2177_v30  ;;  %v2158_v8 = vmul.f32 %v8370_v32, %v2135_v36  ;;  %v2192_v47 = vmul.f32 0.5, %v2172_v7 }
 0x896   : > { %v2137_v57 = vmul.f32 %v6143_v16, %v2077_v45  ;;  %v2193_v42 = vmul.f32 0.5, %v2173_v26  ;;  %6158 = verf.f32 %v2210_v55  ;;  %v10384_v24 = vpack.c.bf16 %v8315_v53, %v8170_v10 }
 0x897   : > { %6160 = verf.f32 %v2211_v21  ;;  %v2214_v20 = vmul.f32 0.70710677, %v2174_v1  ;;  %v2215_v4 = vmul.f32 0.70710677, %v2175_v51  ;;  %v8446_v37 = vadd.f32 %v8395_v39, %v2157_v3 }
 0x898   : > { %2898 = vrot.lane.b32.xlu1 %v10384_v24, %s6584_s11  ;;  %6162 = verf.f32 %v2216_v25  ;;  %v8449_v9 = vadd.f32 %v8395_v39, %v2158_v8  ;;  %v8452_v56 = vadd.f32 %v8395_v39, %v2155_v33  ;;  %v8455_v45 = vadd.f32 %v8395_v39, %v2156_v48 }
 0x899   : > { %v6145_v7 = vpop.eup %6144  ;;  %v2190_v36 = vmul.f32 0.5, %v2170_v49  ;;  %v2191_v10 = vmul.f32 0.5, %v2171_v19  ;;  %6164 = verf.f32 %v2217_v50  ;;  %v2220_v53 = vmul.f32 0.70710677, %v8446_v37 }
 0x89a   : > { %v6147_v27 = vpop.eup %6146  ;;  %v2196_v63 = vmul.f32 0.5, %v2176_v54  ;;  %6166 = verf.f32 %v2214_v20  ;;  %v2221_v3 = vmul.f32 0.70710677, %v8449_v9  ;;  %v2160_v62 = vmul.f32 %v8370_v32, %v2137_v57 }
 0x89b   : > { %v6149_v46 = vpop.eup %6148  ;;  %v2248_v11 = vadd.f32 1.0, %v6147_v27  ;;  %v2197_v33 = vmul.f32 0.5, %v2177_v30  ;;  %v2194_v23 = vmul.f32 0.5, %v2174_v1  ;;  %6168 = verf.f32 %v2215_v4 }
 0x89c   : > { %v6151_v48 = vpop.eup %6150  ;;  %v2249_v40 = vadd.f32 1.0, %v6149_v46  ;;  %6170 = verf.f32 %v2220_v53  ;;  %v2218_v26 = vmul.f32 0.70710677, %v8452_v56  ;;  %v2219_v59 = vmul.f32 0.70710677, %v8455_v45 }
 0x89d   : > { %v6153_v49 = vpop.eup %6152  ;;  %v2268_v19 = vmul.f32 %v2248_v11, %v2188_v60  ;;  %v2246_v2 = vadd.f32 1.0, %v6151_v48  ;;  %6172 = verf.f32 %v2221_v3  ;;  %v8464_v54 = vadd.f32 %v8395_v39, %v8423_v34 }
 0x89e   : > { %v6155_v55 = vpop.eup %6154  ;;  %v2269_v14 = vmul.f32 %v2249_v40, %v2189_v52  ;;  %v2247_v21 = vadd.f32 1.0, %v6153_v49  ;;  %6174 = verf.f32 %v2218_v26  ;;  %v8467_v30 = vadd.f32 %v8395_v39, %v2160_v62 }
 0x89f   : > { %v6157_v25 = vpop.eup %6156  ;;  %v2139_v1 = vmul.f32 %v6145_v7, %v2079_v29  ;;  %v2266_v16 = vmul.f32 %v2246_v2, %v2186_v15  ;;  %v2252_v60 = vadd.f32 1.0, %v6155_v55  ;;  %6176 = verf.f32 %v2219_v59 }
 0x8a0   : > { %v6159_v50 = vpop.eup %6158  ;;  %v2287_v8 = vpack.c.bf16 %v2269_v14, %v2268_v19  ;;  %v2267_v57 = vmul.f32 %v2247_v21, %v2187_v0  ;;  %v2253_v34 = vadd.f32 1.0, %v6157_v25  ;;  %v2195_v24 = vmul.f32 0.5, %v2175_v51 }
 0x8a1   : > { %v6161_v20 = vpop.eup %6160  ;;  %v2272_v52 = vmul.f32 %v2252_v60, %v2192_v47  ;;  %v2250_v4 = vadd.f32 1.0, %v6159_v50  ;;  %v2222_v53 = vmul.f32 0.70710677, %v8464_v54  ;;  %v2223_v27 = vmul.f32 0.70710677, %v8467_v30 }
 0x8a2   : > { %v6163_v3 = vpop.eup %6162  ;;  %2914 = vrot.lane.b32.xlu0 %v2287_v8, %s6583_s30  ;;  %v2286_v61 = vpack.c.bf16 %v2267_v57, %v2266_v16  ;;  %v2273_v29 = vmul.f32 %v2253_v34, %v2193_v42  ;;  %v2251_v15 = vadd.f32 1.0, %v6161_v20  ;;  %v2161_v7 = vmul.f32 %v8370_v32, %v8427_v43  ;;  %v10385_v20 = vld [vmem:[#allocation60_spill] sm:$0xff] }
 0x8a3   : > { %v6165_v62 = vpop.eup %6164  ;;  %v2270_v0 = vmul.f32 %v2250_v4, %v2190_v36  ;;  %v2256_v46 = vadd.f32 1.0, %v6163_v3  ;;  %6178 = verf.f32 %v2222_v53  ;;  %v2162_v51 = vmul.f32 %v8370_v32, %v2139_v1  ;;  %v10386_v4 = vld [vmem:[#allocation62_spill] sm:$0xff] }
 0x8a4   : > { %v6167_v47 = vpop.eup %6166  ;;  %2912 = vrot.lane.b32.xlu1 %v2286_v61, %s6583_s30  ;;  %v2289_v11 = vpack.c.bf16 %v2273_v29, %v2272_v52  ;;  %v2271_v48 = vmul.f32 %v2251_v15, %v2191_v10  ;;  %v2257_v40 = vadd.f32 1.0, %v6165_v62  ;;  %6180 = verf.f32 %v2223_v27  ;;  %v10387_v27 = vld [vmem:[#allocation33_spill] sm:$0xff]  ;;  %v10389_v62 = vld [vmem:[#allocation59_spill] sm:$0xff] }
 0x8a5   : > { %v6169_v26 = vpop.eup %6168  ;;  %v2276_v59 = vmul.f32 %v2256_v46, %v2196_v63  ;;  %v2254_v42 = vadd.f32 1.0, %v6167_v47  ;;  %v8480_v49 = vadd.f32 %v8395_v39, %v2161_v7  ;;  %v8483_v43 = vadd.f32 %v8395_v39, %v2162_v51  ;;  %v10388_v15 = vld [vmem:[#allocation41_spill] sm:$0xff]  ;;  %v10391_v47 = vld [vmem:[#allocation80_spill] sm:$0xff] }
 0x8a6   : > { %v6171_v36 = vpop.eup %6170  ;;  %2918 = vrot.lane.b32.xlu0 %v2289_v11, %s6583_s30  ;;  %v2288_v32 = vpack.c.bf16 %v2271_v48, %v2270_v0  ;;  %v2277_v19 = vmul.f32 %v2257_v40, %v2197_v33  ;;  %v2255_v2 = vadd.f32 1.0, %v6169_v26  ;;  %v2200_v55 = vmul.f32 0.5, %v8446_v37  ;;  %v10390_v46 = vld [vmem:[#allocation53_spill] sm:$0xff]  ;;  %v10392_v26 = vld [vmem:[#allocation38_spill] sm:$0xff] }
 0x8a7   : > { %v6173_v10 = vpop.eup %6172  ;;  %v2274_v14 = vmul.f32 %v2254_v42, %v2194_v23  ;;  %v2201_v21 = vmul.f32 0.5, %v8449_v9  ;;  %v2260_v63 = vadd.f32 1.0, %v6171_v36  ;;  %v2198_v25 = vmul.f32 0.5, %v8452_v56  ;;  %v10393_v42 = vld [vmem:[#allocation79_spill] sm:$0xff] }
 0x8a8   : > { %v6175_v1 = vpop.eup %6174  ;;  %2916 = vrot.lane.b32.xlu1 %v2288_v32, %s6583_s30  ;;  %v2291_v39 = vpack.c.bf16 %v2277_v19, %v2276_v59  ;;  %v2275_v16 = vmul.f32 %v2255_v2, %v2195_v24  ;;  %v2261_v60 = vadd.f32 1.0, %v6173_v10  ;;  %v2224_v50 = vmul.f32 0.70710677, %v8480_v49  ;;  %v10394_v2 = vld [vmem:[#allocation21_spill] sm:$0xff] }
 0x8a9   : > { %v6177_v8 = vpop.eup %6176  ;;  %v2280_v33 = vmul.f32 %v2260_v63, %v2200_v55  ;;  %v2199_v57 = vmul.f32 0.5, %v8455_v45  ;;  %v2258_v37 = vadd.f32 1.0, %v6175_v1  ;;  %v2225_v23 = vmul.f32 0.70710677, %v8483_v43  ;;  %v10395_v1 = vld [vmem:[#allocation81_spill] sm:$0xff] }
 0x8aa   : > { %2922 = vrot.lane.b32.xlu0 %v2291_v39, %s6583_s30  ;;  %v2290_v9 = vpack.c.bf16 %v2275_v16, %v2274_v14  ;;  %v2281_v34 = vmul.f32 %v2261_v60, %v2201_v21  ;;  %v2259_v56 = vadd.f32 1.0, %v6177_v8  ;;  %6182 = verf.f32 %v2224_v50  ;;  %v10396_v16 = vld [vmem:[#allocation30_spill] sm:$0xff]  ;;  %v10397_v8 = vld [vmem:[#allocation19_spill] sm:$0xff] }
 0x8ab   : > { %v1426_v52 = vmul.f32 %v10385_v20, %v10385_v20  ;;  %v2278_v24 = vmul.f32 %v2258_v37, %v2198_v25  ;;  %6184 = verf.f32 %v2225_v23  ;;  %v1404_v53 = vmul.f32 0.03125, %v10386_v4 }
 0x8ac   : > { %v1407_v3 = vmul.f32 0.03125, %v10387_v27  ;;  %2920 = vrot.lane.b32.xlu1 %v2290_v9, %s6583_s30  ;;  %v2293_v45 = vpack.c.bf16 %v2281_v34, %v2280_v33  ;;  %v2279_v61 = vmul.f32 %v2259_v56, %v2199_v57  ;;  %v1424_v7 = vmul.f32 %v10388_v15, %v10388_v15 }
 0x8ad   : > { %v6179_v29 = vpop.eup %6178  ;;  %v1427_v0 = vmul.f32 %v10389_v62, %v10389_v62  ;;  %v1446_v51 = vsub.f32 %v10390_v46, %v1426_v52  ;;  %v1410_v11 = vmul.f32 0.03125, %v10391_v47  ;;  %v8505_v48 = vpop.xlane.xlu0 %2360  ;;  %v1430_v59 = vmul.f32 %v10392_v26, %v10392_v26 }
 0x8ae   : > { %v6181_v40 = vpop.eup %6180  ;;  %v8510_v36 = vmul.f32 0.03125, %v10393_v42  ;;  %2926 = vrot.lane.b32.xlu0 %v2293_v45, %s6583_s30  ;;  %v2292_v32 = vpack.c.bf16 %v2279_v61, %v2278_v24  ;;  %v2262_v19 = vadd.f32 1.0, %v6179_v29  ;;  %v8514_v55 = vmul.f32 0.03125, %v10394_v2 }
 0x8af   : > { %v2202_v10 = vmul.f32 0.5, %v8464_v54  ;;  %v2203_v14 = vmul.f32 0.5, %v8467_v30  ;;  %v2263_v21 = vadd.f32 1.0, %v6181_v40  ;;  %v1444_v63 = vsub.f32 %v1404_v53, %v1424_v7  ;;  %v10398_v30 = vld [vmem:[#allocation40_spill] sm:$0xff] }
 0x8b0   : > { %v1447_v25 = vsub.f32 %v1407_v3, %v1427_v0  ;;  %v1408_v39 = vmul.f32 0.03125, %v10395_v1  ;;  %v8520_v60 = vmul.f32 0.03125, %v10396_v16  ;;  %2924 = vrot.lane.b32.xlu1 %v2292_v32, %s6583_s30  ;;  %v1450_v50 = vsub.f32 %v1410_v11, %v1430_v59 }
 0x8b1   : > { %v1405_v33 = vmul.f32 0.03125, %v10397_v8  ;;  %v2282_v57 = vmul.f32 %v2262_v19, %v2202_v10  ;;  %v2283_v37 = vmul.f32 %v2263_v21, %v2203_v14  ;;  %v8524_v23 = vpop.xlane.xlu0 %2363  ;;  %v1428_v54 = vmul.f32 %v8510_v36, %v8510_v36 }
 0x8b2   : > { %v1411_v9 = vmul.f32 0.03125, %v10398_v30  ;;  %v1466_v34 = vmax.f32 %v1446_v51, 0.0  ;;  %v1425_v56 = vmul.f32 %v8514_v55, %v8514_v55  ;;  %v1464_v4 = vmax.f32 %v1444_v63, 0.0 }
 0x8b3   : > { %v2294_v52 = vpack.c.bf16 %v2283_v37, %v2282_v57  ;;  %v1448_v53 = vsub.f32 %v1408_v39, %v1428_v54  ;;  %v1431_v27 = vmul.f32 %v8520_v60, %v8520_v60  ;;  %v1467_v45 = vmax.f32 %v1447_v25, 0.0  ;;  %v10400_v57 = vld [vmem:[#allocation26_spill] sm:$0xff] }
 0x8b4   : > { %v6183_v24 = vpop.eup %6182  ;;  %v1470_v61 = vmax.f32 %v1450_v50, 0.0  ;;  %v1445_v29 = vsub.f32 %v1405_v33, %v1425_v56  ;;  %v2204_v51 = vmul.f32 0.5, %v8480_v49  ;;  %v2205_v47 = vmul.f32 0.5, %v8483_v43  ;;  %v10399_v50 = vld [vmem:[#allocation27_spill] sm:$0xff] }
 0x8b5   : > { %v6185_v3 = vpop.eup %6184  ;;  %2928 = vrot.lane.b32.xlu1 %v2294_v52, %s6583_s30  ;;  %v2264_v7 = vadd.f32 1.0, %v6183_v24  ;;  %v8534_v0 = vpop.xlane.xlu0 %2477  ;;  %v1451_v46 = vsub.f32 %v1411_v9, %v1431_v27  ;;  %v1506_v40 = vadd.f32 1e-06, %v1466_v34  ;;  %v1504_v59 = vadd.f32 1e-06, %v1464_v4 }
 0x8b6   : > { %v2265_v11 = vadd.f32 1.0, %v6185_v3  ;;  %v1468_v42 = vmax.f32 %v1448_v53, 0.0  ;;  %v1507_v2 = vadd.f32 1e-06, %v1467_v45  ;;  %v1465_v10 = vmax.f32 %v1445_v29, 0.0 }
 0x8b7   : > { %v2284_v32 = vmul.f32 %v2264_v7, %v2204_v51  ;;  %v1510_v21 = vadd.f32 1e-06, %v1470_v61  ;;  %v1471_v63 = vmax.f32 %v1451_v46, 0.0  ;;  %6186 = vrsqrt.f32 %v1506_v40 }
 0x8b8   : > { %v2285_v19 = vmul.f32 %v2265_v11, %v2205_v47  ;;  %6188 = vrsqrt.f32 %v1504_v59  ;;  %v1508_v39 = vadd.f32 1e-06, %v1468_v42  ;;  %v1505_v49 = vadd.f32 1e-06, %v1465_v10 }
 0x8b9   : > { %v2484_v14 = vpop.xlane.xlu0 %2483  ;;  %6190 = vrsqrt.f32 %v1507_v2  ;;  %v1511_v16 = vadd.f32 1e-06, %v1471_v63  ;;  %v8542_v8 = vmul.f32 0.03125, %v10399_v50  ;;  %v1409_v37 = vmul.f32 0.03125, %v10400_v57 }
 0x8ba   : > { %v2295_v25 = vpack.c.bf16 %v2285_v19, %v2284_v32  ;;  %6192 = vrsqrt.f32 %v1510_v21  ;;  %v1486_v4 = vsub.f32 %v10360_v12, %v10385_v20  ;;  %v1484_v27 = vsub.f32 %v10348_v22, %v10388_v15  ;;  %v10401_v19 = vld [vmem:[#allocation32_spill] sm:$0xff] }
 0x8bb   : > { %v2358_v1 = vpop.xlane.xlu1 %2357  ;;  %6194 = vrsqrt.f32 %v1508_v39  ;;  %v1429_v30 = vmul.f32 %v8542_v8, %v8542_v8  ;;  %v1487_v61 = vsub.f32 %v10358_v17, %v10389_v62  ;;  %v1490_v46 = vsub.f32 %v10363_v35, %v10392_v26 }
 0x8bc   : > { %2930 = vrot.lane.b32.xlu0 %v2295_v25, %s6583_s30  ;;  %6196 = vrsqrt.f32 %v1505_v49  ;;  %v1488_v15 = vsub.f32 %v10362_v31, %v8510_v36  ;;  %v1485_v62 = vsub.f32 %v10357_v44, %v8514_v55  ;;  %v1491_v26 = vsub.f32 %v10364_v6, %v8520_v60 }
 0x8bd   : > { %v8539_v43 = vpop.xlane.xlu0 %2369  ;;  %6198 = vrsqrt.f32 %v1511_v16  ;;  %v1449_v56 = vsub.f32 %v1409_v37, %v1429_v30  ;;  %v8580_v36 = vmul.f32 0.03125, %v8524_v23  ;;  %v2558_v57 = vmul.f32 0.03125, %v2484_v14  ;;  %v10402_v37 = vld [vmem:[#allocation29_spill] sm:$0xff] }
 0x8be   : > { %v8589_v60 = vmul.f32 0.03125, %v2358_v1 }
 0x8bf   : > { %v8544_v33 = vpop.xlane.xlu1 %2366  ;;  %v1469_v51 = vmax.f32 %v1449_v56, 0.0 }
 0x8c1   : > { %v8547_v54 = vpop.xlane.xlu0 %2375  ;;  %v6187_v34 = vpop.eup %6186  ;;  %v1509_v21 = vadd.f32 1e-06, %v1469_v51 }
 0x8c2   : > { %v6189_v24 = vpop.eup %6188  ;;  %v1546_v29 = vmul.f32 %v6187_v34, %v1486_v4 }
 0x8c3   : > { %v8551_v9 = vpop.xlane.xlu1 %2480  ;;  %v6191_v53 = vpop.eup %6190  ;;  %v1544_v7 = vmul.f32 %v6189_v24, %v1484_v27  ;;  %6200 = vrsqrt.f32 %v1509_v21  ;;  %v2578_v24 = vmul.f32 %v8580_v36, %v8580_v36 }
 0x8c4   : > { %v6193_v45 = vpop.eup %6192  ;;  %v1547_v20 = vmul.f32 %v6191_v53, %v1487_v61  ;;  %v1569_v2 = vmul.f32 %v10401_v19, %v1546_v29  ;;  %v2576_v29 = vmul.f32 %v8589_v60, %v8589_v60 }
 0x8c5   : > { %v8553_v52 = vpop.xlane.xlu0 %2489  ;;  %v6195_v11 = vpop.eup %6194  ;;  %v1550_v59 = vmul.f32 %v6193_v45, %v1490_v46  ;;  %v1567_v25 = vmul.f32 %v10401_v19, %v1544_v7  ;;  %v2598_v45 = vsub.f32 %v2558_v57, %v2578_v24 }
 0x8c6   : > { %v6197_v40 = vpop.eup %6196  ;;  %v1548_v10 = vmul.f32 %v6195_v11, %v1488_v15  ;;  %v1570_v49 = vmul.f32 %v10401_v19, %v1547_v20  ;;  %v8587_v30 = vadd.f32 %v10402_v37, %v1569_v2 }
 0x8c7   : > { %v8559_v3 = vpop.xlane.xlu1 %2486  ;;  %v6199_v32 = vpop.eup %6198  ;;  %v1545_v39 = vmul.f32 %v6197_v40, %v1485_v62  ;;  %v1573_v55 = vmul.f32 %v10401_v19, %v1550_v59  ;;  %v8594_v56 = vadd.f32 %v10402_v37, %v1567_v25  ;;  %v2556_v40 = vmul.f32 0.03125, %v8534_v0 }
 0x8c8   : > { %v1551_v16 = vmul.f32 %v6199_v32, %v1491_v26  ;;  %10403 = vst [vmem:[#allocation85_spill] sm:$0xff] %v8587_v30  ;;  %v1571_v23 = vmul.f32 %v10401_v19, %v1548_v10  ;;  %v8601_v14 = vadd.f32 %v10402_v37, %v1570_v49  ;;  %v1632_v61 = vmul.f32 0.70710677, %v8587_v30 }
 0x8c9   : > { %v8565_v47 = vpop.xlane.xlu0 %2495  ;;  %v1568_v4 = vmul.f32 %v10401_v19, %v1545_v39  ;;  %v8605_v1 = vadd.f32 %v10402_v37, %v1573_v55  ;;  %v1630_v46 = vmul.f32 0.70710677, %v8594_v56  ;;  %v8624_v62 = vmul.f32 0.03125, %v8505_v48  ;;  %v10408_v55 = vld [vmem:[#allocation31_spill] sm:$0xff] }
 0x8ca   : > { %10404 = vst [vmem:[#allocation58_spill] sm:$0xff] %v8601_v14  ;;  %v1574_v27 = vmul.f32 %v10401_v19, %v1551_v16  ;;  %v8612_v51 = vadd.f32 %v10402_v37, %v1571_v23  ;;  %v1633_v20 = vmul.f32 0.70710677, %v8601_v14  ;;  %v2618_v2 = vmax.f32 %v2598_v45, 0.0 }
 0x8cb   : > { %v8569_v42 = vpop.xlane.xlu1 %2372  ;;  %10405 = vst [vmem:[#allocation86_spill] sm:$0xff] %v8605_v1  ;;  %v8615_v11 = vadd.f32 %v10402_v37, %v1568_v4  ;;  %v1636_v32 = vmul.f32 0.70710677, %v8605_v1  ;;  %6202 = verf.f32 %v1632_v61  ;;  %v2596_v10 = vsub.f32 %v2556_v40, %v2576_v29 }
 0x8cc   : > { %10406 = vst [vmem:[#allocation70_spill] sm:$0xff] %v8612_v51  ;;  %v8620_v59 = vadd.f32 %v10402_v37, %v1574_v27  ;;  %6204 = verf.f32 %v1630_v46  ;;  %v1634_v21 = vmul.f32 0.70710677, %v8612_v51  ;;  %v2557_v25 = vmul.f32 0.03125, %v8551_v9 }
 0x8cd   : > { %v8576_v63 = vpop.xlane.xlu0 %2381  ;;  %v1631_v0 = vmul.f32 0.70710677, %v8615_v11  ;;  %6206 = verf.f32 %v1633_v20  ;;  %v6201_v39 = vpop.eup %6200  ;;  %v8630_v49 = vmul.f32 0.03125, %v8539_v43  ;;  %v1489_v57 = vsub.f32 %v10408_v55, %v8542_v8 }
 0x8ce   : > { %10407 = vst [vmem:[#allocation71_spill] sm:$0xff] %v8620_v59  ;;  %v1637_v48 = vmul.f32 0.70710677, %v8620_v59  ;;  %6208 = verf.f32 %v1636_v32  ;;  %v2577_v23 = vmul.f32 %v8624_v62, %v8624_v62  ;;  %v2658_v24 = vadd.f32 1e-06, %v2618_v2 }
 0x8cf   : > { %v8583_v50 = vpop.xlane.xlu1 %2378  ;;  %v8638_v9 = vmul.f32 0.03125, %v8544_v33  ;;  %v2616_v4 = vmax.f32 %v2596_v10, 0.0  ;;  %v8641_v27 = vmul.f32 0.03125, %v8547_v54  ;;  %6210 = verf.f32 %v1634_v21 }
 0x8d0   : > { %v8643_v45 = vmul.f32 %v6201_v39, %v1489_v57  ;;  %v2597_v61 = vsub.f32 %v2557_v25, %v2577_v23  ;;  %v2560_v29 = vmul.f32 0.03125, %v8553_v52  ;;  %6212 = verf.f32 %v1631_v0 }
 0x8d1   : > { %v8591_v34 = vpop.xlane.xlu0 %2387  ;;  %v2580_v8 = vmul.f32 %v8630_v49, %v8630_v49  ;;  %v2559_v46 = vmul.f32 0.03125, %v8559_v3  ;;  %v8650_v33 = vmul.f32 0.03125, %v8569_v42  ;;  %6214 = verf.f32 %v1637_v48 }
 0x8d2   : > { %6216 = vrsqrt.f32 %v2658_v24  ;;  %v2579_v54 = vmul.f32 %v8638_v9, %v8638_v9  ;;  %v2562_v40 = vmul.f32 0.03125, %v8565_v47  ;;  %v8656_v32 = vmul.f32 0.03125, %v8576_v63 }
 0x8d3   : > { %v2493_v53 = vpop.xlane.xlu1 %2492  ;;  %v2656_v52 = vadd.f32 1e-06, %v2616_v4  ;;  %v2582_v2 = vmul.f32 %v8641_v27, %v8641_v27  ;;  %v8661_v3 = vmul.f32 0.03125, %v8583_v50  ;;  %v2617_v25 = vmax.f32 %v2597_v61, 0.0 }
 0x8d4   : > { %v2561_v42 = vmul.f32 0.03125, %v2493_v53  ;;  %v2600_v0 = vsub.f32 %v2560_v29, %v2580_v8  ;;  %v8666_v39 = vmul.f32 0.03125, %v8591_v34  ;;  %v2599_v63 = vsub.f32 %v2559_v46, %v2579_v54 }
 0x8d5   : > { %v2502_v7 = vpop.xlane.xlu0 %2501  ;;  %v8663_v21 = vpop.eup %6202  ;;  %v2581_v57 = vmul.f32 %v8650_v33, %v8650_v33  ;;  %v2602_v4 = vsub.f32 %v2562_v40, %v2582_v2  ;;  %v2584_v61 = vmul.f32 %v8656_v32, %v8656_v32  ;;  %v2583_v8 = vmul.f32 %v8661_v3, %v8661_v3 }
 0x8d6   : > { %10409 = vst [vmem:[#allocation73_spill] sm:$0xff] %v8663_v21  ;;  %v2564_v47 = vmul.f32 0.03125, %v2502_v7  ;;  %v8668_v48 = vpop.eup %6204  ;;  %v2620_v1 = vmax.f32 %v2600_v0, 0.0  ;;  %v2586_v40 = vmul.f32 %v8666_v39, %v8666_v39  ;;  %6218 = vrsqrt.f32 %v2656_v52 }
 0x8d7   : > { %v2499_v15 = vpop.xlane.xlu1 %2498  ;;  %v8674_v53 = vpop.eup %6206  ;;  %v2601_v46 = vsub.f32 %v2561_v42, %v2581_v57  ;;  %v2622_v57 = vmax.f32 %v2602_v4, 0.0 }
 0x8d8   : > { %v2563_v23 = vmul.f32 0.03125, %v2499_v15  ;;  %v8680_v7 = vpop.eup %6208  ;;  %v2604_v2 = vsub.f32 %v2564_v47, %v2584_v61  ;;  %v2657_v61 = vadd.f32 1e-06, %v2617_v25 }
 0x8d9   : > { %v2508_v26 = vpop.xlane.xlu0 %2507  ;;  %10410 = vst [vmem:[#allocation18_spill] sm:$0xff] %v8680_v7  ;;  %v8688_v51 = vpop.eup %6210  ;;  %v2662_v25 = vadd.f32 1e-06, %v2622_v57 }
 0x8da   : > { %v2566_v29 = vmul.f32 0.03125, %v2508_v26  ;;  %10412 = vst [vmem:[#allocation83_spill] sm:$0xff] %v8688_v51  ;;  %v2619_v26 = vmax.f32 %v2599_v63, 0.0  ;;  %v2660_v51 = vadd.f32 1e-06, %v2620_v1  ;;  %v2624_v14 = vmax.f32 %v2604_v2, 0.0 }
 0x8db   : > { %v2385_v16 = vpop.xlane.xlu1 %2384  ;;  %6220 = vrsqrt.f32 %v2657_v61 }
 0x8dc   : > { %v8672_v24 = vmul.f32 0.03125, %v2385_v16  ;;  %6222 = vrsqrt.f32 %v2660_v51  ;;  %v2664_v1 = vadd.f32 1e-06, %v2624_v14 }
 0x8dd   : > { %v2394_v43 = vpop.xlane.xlu0 %2393 }
 0x8de   : > { %v8678_v34 = vmul.f32 0.03125, %v2394_v43  ;;  %v2603_v43 = vsub.f32 %v2563_v23, %v2583_v8  ;;  %v2585_v7 = vmul.f32 %v8672_v24, %v8672_v24 }
 0x8df   : > { %v2391_v20 = vpop.xlane.xlu1 %2390 }
 0x8e0   : > { %v8684_v54 = vmul.f32 0.03125, %v2391_v20  ;;  %v8694_v20 = vpop.eup %6212  ;;  %v2588_v0 = vmul.f32 %v8678_v34, %v8678_v34 }
 0x8e1   : > { %v2400_v10 = vpop.xlane.xlu0 %2399  ;;  %v8698_v47 = vpop.eup %6214 }
 0x8e2   : > { %10411 = vst [vmem:[#allocation57_spill] sm:$0xff] %v8684_v54  ;;  %v8692_v30 = vmul.f32 0.03125, %v2400_v10  ;;  %10413 = vst [vmem:[#allocation88_spill] sm:$0xff] %v8698_v47  ;;  %v2587_v63 = vmul.f32 %v8684_v54, %v8684_v54  ;;  %v8702_v10 = vpop.eup %6216 }
 0x8e3   : > { %v2505_v50 = vpop.xlane.xlu1 %2504 }
 0x8e4   : > { %v2565_v15 = vmul.f32 0.03125, %v2505_v50  ;;  %v2606_v50 = vsub.f32 %v2566_v29, %v2586_v40  ;;  %v2659_v29 = vadd.f32 1e-06, %v2619_v26  ;;  %v2623_v40 = vmax.f32 %v2603_v43, 0.0 }
 0x8e5   : > { %v2514_v16 = vpop.xlane.xlu0 %2513 }
 0x8e6   : > { %v2568_v59 = vmul.f32 0.03125, %v2514_v16  ;;  %v2621_v16 = vmax.f32 %v2601_v46, 0.0  ;;  %v2605_v23 = vsub.f32 %v2565_v15, %v2585_v7  ;;  %v2626_v46 = vmax.f32 %v2606_v50, 0.0 }
 0x8e7   : > { %v2511_v42 = vpop.xlane.xlu1 %2510  ;;  %6224 = vrsqrt.f32 %v2659_v29 }
 0x8e8   : > { %v2567_v21 = vmul.f32 0.03125, %v2511_v42  ;;  %v2608_v41 = vsub.f32 %v2568_v59, %v2588_v0  ;;  %v2590_v42 = vmul.f32 %v8692_v30, %v8692_v30  ;;  %v2661_v38 = vadd.f32 1e-06, %v2621_v16 }
 0x8e9   : > { %v2520_v8 = vpop.xlane.xlu0 %2519  ;;  %v2625_v7 = vmax.f32 %v2605_v23, 0.0  ;;  %v2663_v59 = vadd.f32 1e-06, %v2623_v40  ;;  %v1572_v0 = vmul.f32 %v10401_v19, %v8643_v45  ;;  %6226 = vrsqrt.f32 %v2662_v25 }
 0x8ea   : > { %v2570_v4 = vmul.f32 0.03125, %v2520_v8  ;;  %v2607_v58 = vsub.f32 %v2567_v21, %v2587_v63  ;;  %v2628_v2 = vmax.f32 %v2608_v41, 0.0  ;;  %v2666_v21 = vadd.f32 1e-06, %v2626_v46  ;;  %v6219_v8 = vpop.eup %6218 }
 0x8eb   : > { %v2397_v47 = vpop.xlane.xlu1 %2396  ;;  %6228 = vrsqrt.f32 %v2661_v38  ;;  %v2665_v57 = vadd.f32 1e-06, %v2625_v7  ;;  %v6221_v40 = vpop.eup %6220  ;;  %v8727_v25 = vadd.f32 1.0, %v8668_v48  ;;  %v1671_v46 = vadd.f32 1.0, %v8694_v20 }
 0x8ec   : > { %v2610_v15 = vsub.f32 %v2570_v4, %v2590_v42  ;;  %v2627_v26 = vmax.f32 %v2607_v58, 0.0  ;;  %v8708_v52 = vmul.f32 0.03125, %v2397_v47  ;;  %6230 = vrsqrt.f32 %v2664_v1 }
 0x8ed   : > { %v2406_v54 = vpop.xlane.xlu0 %2405  ;;  %v2668_v16 = vadd.f32 1e-06, %v2628_v2  ;;  %6232 = vrsqrt.f32 %v2663_v59  ;;  %v8713_v58 = vadd.f32 %v10402_v37, %v1572_v0  ;;  %v1611_v48 = vmul.f32 0.5, %v8615_v11 }
 0x8ee   : > { %v2630_v50 = vmax.f32 %v2610_v15, 0.0  ;;  %v8710_v51 = vmul.f32 0.03125, %v2406_v54  ;;  %v2667_v41 = vadd.f32 1e-06, %v2627_v26  ;;  %6234 = vrsqrt.f32 %v2666_v21  ;;  %v6223_v15 = vpop.eup %6222 }
 0x8ef   : > { %v2403_v43 = vpop.xlane.xlu1 %2402  ;;  %v2589_v19 = vmul.f32 %v8708_v52, %v8708_v52  ;;  %6236 = vrsqrt.f32 %v2665_v57  ;;  %v8722_v54 = vmul.f32 0.5, %v8594_v56  ;;  %v1635_v7 = vmul.f32 0.70710677, %v8713_v58 }
 0x8f0   : > { %v8717_v45 = vmul.f32 0.03125, %v2403_v43  ;;  %v2670_v47 = vadd.f32 1e-06, %v2630_v50  ;;  %6238 = vrsqrt.f32 %v2668_v16  ;;  %v2592_v37 = vmul.f32 %v8710_v51, %v8710_v51 }
 0x8f1   : > { %v2412_v61 = vpop.xlane.xlu0 %2411  ;;  %6240 = vrsqrt.f32 %v2667_v41  ;;  %v6225_v26 = vpop.eup %6224  ;;  %v8737_v21 = vadd.f32 1.0, %v8674_v53  ;;  %v2636_v53 = vsub.f32 %v10348_v22, %v8589_v60  ;;  %v2644_v22 = vsub.f32 %v7044_v18, %v8656_v32 }
 0x8f2   : > { %v8719_v63 = vmul.f32 0.03125, %v2412_v61  ;;  %v2591_v56 = vmul.f32 %v8717_v45, %v8717_v45  ;;  %6242 = vrsqrt.f32 %v2670_v47  ;;  %v8743_v47 = vmul.f32 %v1671_v46, %v1611_v48 }
 0x8f3   : > { %v2517_v14 = vpop.xlane.xlu1 %2516  ;;  %v6227_v20 = vpop.eup %6226  ;;  %6244 = verf.f32 %v1635_v7  ;;  %v2641_v46 = vsub.f32 %v10408_v55, %v8650_v33  ;;  %v2645_v32 = vsub.f32 %v10321_v13, %v8672_v24  ;;  %v10417_v13 = vld [vmem:[#allocation56_spill] sm:$0xff] }
 0x8f4   : > { %v2569_v38 = vmul.f32 0.03125, %v2517_v14  ;;  %v2594_v43 = vmul.f32 %v8719_v63, %v8719_v63  ;;  %v2637_v14 = vsub.f32 %v10357_v44, %v8624_v62  ;;  %v2639_v44 = vsub.f32 %v10358_v17, %v8638_v9 }
 0x8f5   : > { %v2526_v23 = vpop.xlane.xlu0 %2525  ;;  %v6229_v41 = vpop.eup %6228  ;;  %v2646_v17 = vsub.f32 %v10367_v5, %v8666_v39  ;;  %v10415_v5 = vld [vmem:[#allocation39_spill] sm:$0xff]  ;;  %v2649_v24 = vsub.f32 %v10417_v13, %v8708_v52 }
 0x8f6   : > { %v2609_v4 = vsub.f32 %v2569_v38, %v2589_v19  ;;  %v2572_v29 = vmul.f32 0.03125, %v2526_v23  ;;  %v2638_v19 = vsub.f32 %v10360_v12, %v8580_v36  ;;  %v6231_v11 = vpop.eup %6230  ;;  %v2640_v23 = vsub.f32 %v10362_v31, %v8630_v49 }
 0x8f7   : > { %v2523_v42 = vpop.xlane.xlu1 %2522  ;;  %v2642_v12 = vsub.f32 %v10363_v35, %v8641_v27  ;;  %v2696_v49 = vmul.f32 %v6219_v8, %v2636_v53  ;;  %v2697_v7 = vmul.f32 %v6221_v40, %v2637_v14  ;;  %v2648_v8 = vsub.f32 %v10365_v28, %v8678_v34 }
 0x8f8   : > { %v2629_v1 = vmax.f32 %v2609_v4, 0.0  ;;  %v2612_v2 = vsub.f32 %v2572_v29, %v2592_v37  ;;  %v2571_v59 = vmul.f32 0.03125, %v2523_v42  ;;  %v6233_v29 = vpop.eup %6232  ;;  %v2698_v42 = vmul.f32 %v8702_v10, %v2638_v19  ;;  %v10420_v19 = vld [vmem:[#allocation61_spill] sm:$0xff] }
 0x8f9   : > { %v2532_v0 = vpop.xlane.xlu0 %2531  ;;  %v6235_v62 = vpop.eup %6234  ;;  %v2643_v10 = vsub.f32 %v10364_v6, %v8661_v3  ;;  %v2702_v18 = vmul.f32 %v6227_v20, %v2642_v12  ;;  %v2701_v6 = vmul.f32 %v6229_v41, %v2641_v46  ;;  %v10414_v3 = vld [vmem:[#allocation57_spill] sm:$0xff]  ;;  %v10419_v41 = vld [vmem:[#allocation54_spill] sm:$0xff]  ;;  %v2654_v52 = vsub.f32 %v10420_v19, %v8719_v63 }
 0x8fa   : > { %v2669_v57 = vadd.f32 1e-06, %v2629_v1  ;;  %v2632_v50 = vmax.f32 %v2612_v2, 0.0  ;;  %v2611_v61 = vsub.f32 %v2571_v59, %v2591_v56  ;;  %v2574_v16 = vmul.f32 0.03125, %v2532_v0  ;;  %v6237_v60 = vpop.eup %6236  ;;  %v10416_v2 = vld [vmem:[#allocation46_spill] sm:$0xff] }
 0x8fb   : > { %v2409_v38 = vpop.xlane.xlu1 %2408  ;;  %v6239_v27 = vpop.eup %6238  ;;  %v2700_v56 = vmul.f32 %v6223_v15, %v2640_v23  ;;  %v2699_v1 = vmul.f32 %v6225_v26, %v2639_v44  ;;  %v2647_v39 = vsub.f32 %v10415_v5, %v10414_v3  ;;  %v2650_v40 = vsub.f32 %v10416_v2, %v8692_v30 }
 0x8fc   : > { %v2631_v37 = vmax.f32 %v2611_v61, 0.0  ;;  %v2614_v4 = vsub.f32 %v2574_v16, %v2594_v43  ;;  %v2672_v36 = vadd.f32 1e-06, %v2632_v50  ;;  %6246 = vrsqrt.f32 %v2669_v57  ;;  %v6241_v33 = vpop.eup %6240  ;;  %v10418_v61 = vld [vmem:[#allocation63_spill] sm:$0xff] }
 0x8fd   : > { %v8762_v55 = vmul.f32 0.03125, %v2409_v38  ;;  %v6243_v59 = vpop.eup %6242  ;;  %v2704_v26 = vmul.f32 %v6231_v11, %v2644_v22  ;;  %v2703_v43 = vmul.f32 %v6233_v29, %v2643_v10  ;;  %v2706_v0 = vmul.f32 %v6235_v62, %v2646_v17  ;;  %v8776_v34 = vpop.permute.xlu0 %2716 }
 0x8fe   : > { %v2634_v31 = vmax.f32 %v2614_v4, 0.0  ;;  %v2671_v9 = vadd.f32 1e-06, %v2631_v37  ;;  %6248 = vrsqrt.f32 %v2672_v36  ;;  %v8780_v50 = vpop.eup %6244  ;;  %v2705_v30 = vmul.f32 %v6237_v60, %v2645_v32  ;;  %v10421_v37 = vld [vmem:[#allocation69_spill] sm:$0xff] }
 0x8ff   : > { %v2415_v35 = vpop.xlane.xlu1 %2414  ;;  %v2593_v28 = vmul.f32 %v8762_v55, %v8762_v55  ;;  %v2652_v16 = vsub.f32 %v10418_v61, %v8710_v51  ;;  %v2651_v14 = vsub.f32 %v10419_v41, %v8717_v45  ;;  %v2708_v38 = vmul.f32 %v6239_v27, %v2648_v8 }
 0x900   : > { %v2674_v15 = vadd.f32 1e-06, %v2634_v31  ;;  %6250 = vrsqrt.f32 %v2671_v9  ;;  %v8778_v20 = vmul.f32 0.03125, %v2415_v35  ;;  %v2707_v11 = vmul.f32 %v6241_v33, %v2647_v39 }
 0x901   : > { %v2710_v23 = vmul.f32 %v6243_v59, %v2650_v40  ;;  %v2653_v4 = vsub.f32 %v10421_v37, %v8762_v55  ;;  %v2721_v44 = vmul.f32 %v8776_v34, %v2698_v42  ;;  %v2722_v12 = vmul.f32 %v8776_v34, %v2699_v1  ;;  %v10422_v42 = vld [vmem:[#allocation68_spill] sm:$0xff]  ;;  %v2893_v41 = vpop.permute.xlu0 %2892 }
 0x902   : > { %6252 = vrsqrt.f32 %v2674_v15  ;;  %v2595_v45 = vmul.f32 %v8778_v20, %v8778_v20  ;;  %v2719_v46 = vmul.f32 %v8776_v34, %v2696_v49  ;;  %v2720_v22 = vmul.f32 %v8776_v34, %v2697_v7 }
 0x903   : > { %v2529_v48 = vpop.xlane.xlu1 %2528  ;;  %v2725_v31 = vmul.f32 %v8776_v34, %v2702_v18  ;;  %v2726_v60 = vmul.f32 %v8776_v34, %v2703_v43  ;;  %v2723_v10 = vmul.f32 %v8776_v34, %v2700_v56  ;;  %v2655_v17 = vsub.f32 %v10422_v42, %v8778_v20 }
 0x904   : > { %v2573_v57 = vmul.f32 0.03125, %v2529_v48  ;;  %v2724_v27 = vmul.f32 %v8776_v34, %v2701_v6  ;;  %v2729_v49 = vmul.f32 %v8776_v34, %v2706_v0  ;;  %v2730_v7 = vmul.f32 %v8776_v34, %v2707_v11 }
 0x905   : > { %v2727_v18 = vmul.f32 %v8776_v34, %v2704_v26  ;;  %v2728_v40 = vmul.f32 %v8776_v34, %v2705_v30  ;;  %v2731_v26 = vmul.f32 %v8776_v34, %v2708_v38 }
 0x906   : > { %v2613_v53 = vsub.f32 %v2573_v57, %v2593_v28  ;;  %v6247_v51 = vpop.eup %6246  ;;  %v2733_v28 = vmul.f32 %v8776_v34, %v2710_v23 }
 0x907   : > { %v2535_v29 = vpop.xlane.xlu1 %2534  ;;  %v2709_v33 = vmul.f32 %v6247_v51, %v2649_v24 }
 0x908   : > { %v2633_v36 = vmax.f32 %v2613_v53, 0.0  ;;  %v2575_v62 = vmul.f32 0.03125, %v2535_v29  ;;  %v6249_v1 = vpop.eup %6248 }
 0x909   : > { %v2712_v15 = vmul.f32 %v6249_v1, %v2652_v16  ;;  %v2732_v24 = vmul.f32 %v8776_v34, %v2709_v33  ;;  %v2897_v1 = vpop.permute.xlu0 %2896 }
 0x90a   : > { %v2673_v9 = vadd.f32 1e-06, %v2633_v36  ;;  %v2615_v35 = vsub.f32 %v2575_v62, %v2595_v45  ;;  %v6251_v5 = vpop.eup %6250 }
 0x90b   : > { %v8802_v32 = vpop.permute.xlu1 %2739  ;;  %v2711_v61 = vmul.f32 %v6251_v5, %v2651_v14  ;;  %v2735_v14 = vmul.f32 %v8776_v34, %v2712_v15 }
 0x90c   : > { %6254 = vrsqrt.f32 %v2673_v9  ;;  %v2635_v8 = vmax.f32 %v2615_v35, 0.0  ;;  %v2744_v56 = vadd.f32 %v8802_v32, %v2721_v44  ;;  %v2745_v3 = vadd.f32 %v8802_v32, %v2722_v12  ;;  %v6253_v57 = vpop.eup %6252 }
 0x90d   : > { %v2742_v39 = vadd.f32 %v8802_v32, %v2719_v46  ;;  %v2743_v6 = vadd.f32 %v8802_v32, %v2720_v22  ;;  %v2748_v2 = vadd.f32 %v8802_v32, %v2725_v31  ;;  %v2749_v30 = vadd.f32 %v8802_v32, %v2726_v60 }
 0x90e   : > { %v2675_v59 = vadd.f32 1e-06, %v2635_v8  ;;  %v2784_v43 = vmul.f32 0.70710677, %v2744_v56  ;;  %v2785_v48 = vmul.f32 0.70710677, %v2745_v3  ;;  %v2746_v38 = vadd.f32 %v8802_v32, %v2723_v10 }
 0x90f   : > { %v2891_v0 = vpop.permute.xlu1 %2890  ;;  %v2782_v13 = vmul.f32 0.70710677, %v2742_v39  ;;  %v2783_v11 = vmul.f32 0.70710677, %v2743_v6  ;;  %v2788_v16 = vmul.f32 0.70710677, %v2748_v2  ;;  %v2747_v53 = vadd.f32 %v8802_v32, %v2724_v27 }
 0x910   : > { %6256 = vrsqrt.f32 %v2675_v59  ;;  %5553 = vmatprep.mubr.msk.bf16.mxu1 %vm476_vm0, %v2891_v0  ;;  %v2789_v29 = vmul.f32 0.70710677, %v2749_v30  ;;  %v2752_v23 = vadd.f32 %v8802_v32, %v2729_v49  ;;  %v8826_v44 = vmul.f32 %v6253_v57, %v2654_v52 }
 0x911   : > { %5554 = vmatmul.mubr.msk.bf16.vlgmr.msra.gmra.mrb[0].mxu1 %vm476_vm0, %v2893_v41  ;;  %6258 = verf.f32 %v2784_v43  ;;  %v2764_v51 = vmul.f32 0.5, %v2744_v56  ;;  %v2786_v45 = vmul.f32 0.70710677, %v2746_v38  ;;  %v2765_v36 = vmul.f32 0.5, %v2745_v3 }
 0x912   : > { %6260 = verf.f32 %v2785_v48  ;;  %v2787_v62 = vmul.f32 0.70710677, %v2747_v53  ;;  %v2753_v46 = vadd.f32 %v8802_v32, %v2730_v7  ;;  %v2792_v22 = vmul.f32 0.70710677, %v2752_v23 }
 0x913   : > { %v2895_v12 = vpop.permute.xlu1 %2894  ;;  %6262 = verf.f32 %v2782_v13  ;;  %v8831_v31 = vadd.f32 %v8802_v32, %v2727_v18  ;;  %v8834_v63 = vadd.f32 %v8802_v32, %v2728_v40  ;;  %v2762_v52 = vmul.f32 0.5, %v2742_v39 }
 0x914   : > { %5557 = vmatprep.mubr.msk.bf16.mxu1 %vm476_vm0, %v2895_v12  ;;  %6264 = verf.f32 %v2783_v11  ;;  %v2793_v60 = vmul.f32 0.70710677, %v2753_v46  ;;  %v8837_v10 = vadd.f32 %v8802_v32, %v2731_v26  ;;  %v2763_v35 = vmul.f32 0.5, %v2743_v6 }
 0x915   : > { %6266 = verf.f32 %v2788_v16  ;;  %v2768_v27 = vmul.f32 0.5, %v2748_v2  ;;  %v2790_v33 = vmul.f32 0.70710677, %v8831_v31  ;;  %v2791_v49 = vmul.f32 0.70710677, %v8834_v63 }
 0x916   : > { %v6255_v19 = vpop.eup %6254  ;;  %6268 = verf.f32 %v2789_v29  ;;  %v8845_v7 = vadd.f32 %v8802_v32, %v2732_v24  ;;  %v2769_v8 = vmul.f32 0.5, %v2749_v30  ;;  %v2794_v55 = vmul.f32 0.70710677, %v8837_v10 }
 0x917   : > { %v2713_v9 = vmul.f32 %v6255_v19, %v2653_v4  ;;  %6270 = verf.f32 %v2786_v45  ;;  %v2899_v18 = vpop.permute.xlu1 %2898  ;;  %v2734_v37 = vmul.f32 %v8776_v34, %v2711_v61  ;;  %v2766_v56 = vmul.f32 0.5, %v2746_v38 }
 0x918   : > { %6272 = verf.f32 %v2787_v62  ;;  %v2795_v3 = vmul.f32 0.70710677, %v8845_v7  ;;  %v8853_v5 = vadd.f32 %v8802_v32, %v2733_v28  ;;  %v2767_v6 = vmul.f32 0.5, %v2747_v53 }
 0x919   : > { %5558 = vmatmul.mubr.msk.bf16.gmra.mrb[4].mxu1 %vm476_vm0, %v2897_v1  ;;  %6274 = verf.f32 %v2792_v22  ;;  %v8856_v2 = vadd.f32 %v8802_v32, %v2734_v37  ;;  %v2736_v40 = vmul.f32 %v8776_v34, %v2713_v9  ;;  %v2772_v43 = vmul.f32 0.5, %v2752_v23  ;;  %v2901_v23 = vpop.permute.xlu0 %2900 }
 0x91a   : > { %v6257_v4 = vpop.eup %6256  ;;  %5561 = vmatprep.mubr.msk.bf16.mxu1 %vm476_vm0, %v2899_v18  ;;  %6276 = verf.f32 %v2793_v60  ;;  %v2796_v26 = vmul.f32 0.70710677, %v8853_v5  ;;  %v2773_v13 = vmul.f32 0.5, %v2753_v46  ;;  %v8862_v41 = vadd.f32 %v8802_v32, %v2735_v14 }
 0x91b   : > { %v6259_v39 = vpop.eup %6258  ;;  %6278 = verf.f32 %v2790_v33  ;;  %v2797_v24 = vmul.f32 0.70710677, %v8856_v2  ;;  %v8865_v38 = vadd.f32 %v8802_v32, %v2736_v40  ;;  %v2715_v29 = vmul.f32 %v6257_v4, %v2655_v17  ;;  %v2913_v62 = vpop.permute.xlu1 %2912 }
 0x91c   : > { %v6261_v15 = vpop.eup %6260  ;;  %v2824_v59 = vadd.f32 1.0, %v6259_v39  ;;  %6280 = verf.f32 %v2791_v49  ;;  %v2770_v22 = vmul.f32 0.5, %v8831_v31  ;;  %v2798_v20 = vmul.f32 0.70710677, %v8862_v41 }
 0x91d   : > { %v6263_v0 = vpop.eup %6262  ;;  %v2825_v48 = vadd.f32 1.0, %v6261_v15  ;;  %6282 = verf.f32 %v2794_v55  ;;  %v2799_v42 = vmul.f32 0.70710677, %v8865_v38  ;;  %v2737_v33 = vmul.f32 %v8776_v34, %v8826_v44 }
 0x91e   : > { %v6265_v28 = vpop.eup %6264  ;;  %v2844_v57 = vmul.f32 %v2824_v59, %v2764_v51  ;;  %v2822_v61 = vadd.f32 1.0, %v6263_v0  ;;  %6284 = verf.f32 %v2795_v3 }
 0x91f   : > { %v6267_v11 = vpop.eup %6266  ;;  %v2845_v30 = vmul.f32 %v2825_v48, %v2765_v36  ;;  %v2823_v16 = vadd.f32 1.0, %v6265_v28  ;;  %6286 = verf.f32 %v2796_v26  ;;  %v8881_v15 = vadd.f32 %v8802_v32, %v2737_v33  ;;  %v2915_v48 = vpop.permute.xlu0 %2914 }
 0x920   : > { %v6269_v53 = vpop.eup %6268  ;;  %v2842_v12 = vmul.f32 %v2822_v61, %v2762_v52  ;;  %v2828_v51 = vadd.f32 1.0, %v6267_v11  ;;  %6288 = verf.f32 %v2797_v24  ;;  %v2771_v26 = vmul.f32 0.5, %v8834_v63  ;;  %v2917_v11 = vpop.permute.xlu1 %2916 }
 0x921   : > { %v6271_v45 = vpop.eup %6270  ;;  %v2863_v14 = vpack.c.bf16 %v2845_v30, %v2844_v57  ;;  %v2843_v46 = vmul.f32 %v2823_v16, %v2763_v35  ;;  %5562 = vmatmul.mubr.msk.bf16.gmra.mrb[8].mxu1 %vm476_vm0, %v2901_v23  ;;  %v2829_v36 = vadd.f32 1.0, %v6269_v53  ;;  %6290 = verf.f32 %v2798_v20 }
 0x922   : > { %v6273_v19 = vpop.eup %6272  ;;  %5565 = vmatprep.mubr.msk.bf16.mxu1 %vm476_vm0, %v2913_v62  ;;  %v2848_v60 = vmul.f32 %v2828_v51, %v2768_v27  ;;  %v2826_v9 = vadd.f32 1.0, %v6271_v45  ;;  %v2738_v27 = vmul.f32 %v8776_v34, %v2715_v29  ;;  %6292 = verf.f32 %v2799_v42  ;;  %v10423_v45 = vld [vmem:[#allocation58_spill] sm:$0xff] }
 0x923   : > { %v6275_v17 = vpop.eup %6274  ;;  %2944 = vrot.lane.b32.xlu0 %v2863_v14, %s6582_s17  ;;  %v2862_v52 = vpack.c.bf16 %v2843_v46, %v2842_v12  ;;  %v2849_v1 = vmul.f32 %v2829_v36, %v2769_v8  ;;  %v2827_v35 = vadd.f32 1.0, %v6273_v19  ;;  %v2775_v28 = vmul.f32 0.5, %v8845_v7  ;;  %v10424_v14 = vld [vmem:[#allocation73_spill] sm:$0xff] }
 0x924   : > { %v6277_v49 = vpop.eup %6276  ;;  %v2846_v31 = vmul.f32 %v2826_v9, %v2766_v56  ;;  %v2832_v18 = vadd.f32 1.0, %v6275_v17  ;;  %v8884_v44 = vadd.f32 %v8802_v32, %v2738_v27  ;;  %v2800_v63 = vmul.f32 0.70710677, %v8881_v15  ;;  %v10425_v9 = vld [vmem:[#allocation85_spill] sm:$0xff] }
 0x925   : > { %v6279_v55 = vpop.eup %6278  ;;  %2942 = vrot.lane.b32.xlu1 %v2862_v52, %s6582_s17  ;;  %v2865_v37 = vpack.c.bf16 %v2849_v1, %v2848_v60  ;;  %v2847_v4 = vmul.f32 %v2827_v35, %v2767_v6  ;;  %v2833_v3 = vadd.f32 1.0, %v6277_v49  ;;  %v1613_v62 = vmul.f32 0.5, %v10423_v45  ;;  %v2919_v49 = vpop.permute.xlu0 %2918 }
 0x926   : > { %v6281_v39 = vpop.eup %6280  ;;  %v2852_v40 = vmul.f32 %v2832_v18, %v2772_v43  ;;  %v2830_v8 = vadd.f32 1.0, %v6279_v55  ;;  %v2774_v43 = vmul.f32 0.5, %v8837_v10  ;;  %v2777_v10 = vmul.f32 0.5, %v8856_v2 }
 0x927   : > { %v6283_v56 = vpop.eup %6282  ;;  %2948 = vrot.lane.b32.xlu0 %v2865_v37, %s6582_s17  ;;  %v2864_v34 = vpack.c.bf16 %v2847_v4, %v2846_v31  ;;  %v2853_v59 = vmul.f32 %v2833_v3, %v2773_v13  ;;  %v2831_v0 = vadd.f32 1.0, %v6281_v39  ;;  %v2801_v7 = vmul.f32 0.70710677, %v8884_v44  ;;  %v10427_v37 = vld [vmem:[#allocation88_spill] sm:$0xff]  ;;  %v10428_v39 = vld [vmem:[#allocation70_spill] sm:$0xff] }
 0x928   : > { %v6285_v6 = vpop.eup %6284  ;;  %v2850_v24 = vmul.f32 %v2830_v8, %v2770_v22  ;;  %v2834_v57 = vadd.f32 1.0, %v6283_v56  ;;  %6294 = verf.f32 %v2800_v63  ;;  %v1672_v46 = vadd.f32 1.0, %v10424_v14  ;;  %v10429_v56 = vld [vmem:[#allocation71_spill] sm:$0xff] }
 0x929   : > { %v6287_v61 = vpop.eup %6286  ;;  %2946 = vrot.lane.b32.xlu1 %v2864_v34, %s6582_s17  ;;  %v2867_v32 = vpack.c.bf16 %v2853_v59, %v2852_v40  ;;  %v2851_v30 = vmul.f32 %v2831_v0, %v2771_v26  ;;  %5566 = vmatmul.mubr.msk.bf16.gmra.mrb[12].mxu1 %vm476_vm0, %v2915_v48  ;;  %v2835_v13 = vadd.f32 1.0, %v6285_v6  ;;  %6296 = verf.f32 %v2801_v7  ;;  %v10430_v26 = vld [vmem:[#allocation18_spill] sm:$0xff] }
 0x92a   : > { %v6289_v16 = vpop.eup %6288  ;;  %5569 = vmatprep.mubr.msk.bf16.mxu1 %vm476_vm0, %v2917_v11  ;;  %v2854_v53 = vmul.f32 %v2834_v57, %v2774_v43  ;;  %v2836_v29 = vadd.f32 1.0, %v6287_v61  ;;  %v1690_v2 = vmul.f32 %v8727_v25, %v8722_v54  ;;  %v2776_v22 = vmul.f32 0.5, %v8853_v5  ;;  %v2921_v5 = vpop.permute.xlu1 %2920 }
 0x92b   : > { %2952 = vrot.lane.b32.xlu0 %v2867_v32, %s6582_s17  ;;  %v2866_v23 = vpack.c.bf16 %v2851_v30, %v2850_v24  ;;  %v2855_v12 = vmul.f32 %v2835_v13, %v2775_v28  ;;  %v2837_v51 = vadd.f32 1.0, %v6289_v16  ;;  %v6291_v60 = vpop.eup %6290  ;;  %v1612_v20 = vmul.f32 0.5, %v10425_v9  ;;  %v10431_v24 = vld [vmem:[#allocation86_spill] sm:$0xff]  ;;  %v2923_v30 = vpop.permute.xlu0 %2922 }
 0x92c   : > { %v1693_v42 = vmul.f32 %v8737_v21, %v1613_v62  ;;  %v6293_v17 = vpop.eup %6292  ;;  %v1710_v52 = vpack.c.bf16 %v8743_v47, %v1690_v2  ;;  %v2856_v1 = vmul.f32 %v2836_v29, %v2776_v22  ;;  %v2838_v35 = vadd.f32 1.0, %v6291_v60  ;;  %v10426_v47 = vld [vmem:[#allocation83_spill] sm:$0xff] }
 0x92d   : > { %2950 = vrot.lane.b32.xlu1 %v2866_v23, %s6582_s17  ;;  %v2868_v36 = vpack.c.bf16 %v2855_v12, %v2854_v53  ;;  %v2857_v19 = vmul.f32 %v2837_v51, %v2777_v10  ;;  %v1675_v33 = vadd.f32 1.0, %v8780_v50  ;;  %v1692_v31 = vmul.f32 %v1672_v46, %v1612_v20 }
 0x92e   : > { %v2779_v54 = vmul.f32 0.5, %v8865_v38  ;;  %v2839_v25 = vadd.f32 1.0, %v6293_v17  ;;  %v2778_v21 = vmul.f32 0.5, %v8862_v41  ;;  %v1615_v27 = vmul.f32 0.5, %v8713_v58  ;;  %v2925_v13 = vpop.permute.xlu1 %2924 }
 0x92f   : > { %2954 = vrot.lane.b32.xlu0 %v2868_v36, %s6582_s17  ;;  %v2869_v18 = vpack.c.bf16 %v2857_v19, %v2856_v1  ;;  %v1674_v55 = vadd.f32 1.0, %v10426_v47  ;;  %v1677_v4 = vadd.f32 1.0, %v10427_v37  ;;  %v1711_v38 = vpack.c.bf16 %v1693_v42, %v1692_v31 }
 0x930   : > { %v2859_v50 = vmul.f32 %v2839_v25, %v2779_v54  ;;  %v2858_v3 = vmul.f32 %v2838_v35, %v2778_v21  ;;  %v1614_v40 = vmul.f32 0.5, %v10428_v39  ;;  %v1695_v8 = vmul.f32 %v1675_v33, %v1615_v27 }
 0x931   : > { %2882 = vrot.lane.b32.xlu1 %v1710_v52, %s6584_s11  ;;  %5570 = vmatmul.mubr.msk.bf16.gmra.mrb[16].mxu1 %vm476_vm0, %v2919_v49  ;;  %v1617_v34 = vmul.f32 0.5, %v10429_v56  ;;  %v1676_v0 = vadd.f32 1.0, %v10430_v26  ;;  %v1616_v43 = vmul.f32 0.5, %v10431_v24  ;;  %v2780_v61 = vmul.f32 0.5, %v8881_v15  ;;  %v2927_v15 = vpop.permute.xlu0 %2926 }
 0x932   : > { %5573 = vmatprep.mubr.msk.bf16.mxu1 %vm476_vm0, %v2921_v5  ;;  %v6295_v59 = vpop.eup %6294  ;;  %v2870_v58 = vpack.c.bf16 %v2859_v50, %v2858_v3  ;;  %v1694_v41 = vmul.f32 %v1674_v55, %v1614_v40  ;;  %v2781_v11 = vmul.f32 0.5, %v8884_v44  ;;  %v2929_v44 = vpop.permute.xlu1 %2928 }
 0x933   : > { %2956 = vrot.lane.b32.xlu0 %v2869_v18, %s6582_s17  ;;  %v6297_v6 = vpop.eup %6296  ;;  %v2840_v48 = vadd.f32 1.0, %v6295_v59  ;;  %v1697_v28 = vmul.f32 %v1677_v4, %v1617_v34  ;;  %v1696_v53 = vmul.f32 %v1676_v0, %v1616_v43 }
 0x934   : > { %v1712_v57 = vpack.c.bf16 %v1695_v8, %v1694_v41  ;;  %v2841_v32 = vadd.f32 1.0, %v6297_v6 }
 0x935   : > { %2884 = vrot.lane.b32.xlu1 %v1711_v38, %s6584_s11  ;;  %v2860_v63 = vmul.f32 %v2840_v48, %v2780_v61  ;;  %v1713_v29 = vpack.c.bf16 %v1697_v28, %v1696_v53  ;;  %v2931_v7 = vpop.permute.xlu0 %2930 }
 0x936   : > { %v2861_v16 = vmul.f32 %v2841_v32, %v2781_v11 }
 0x937   : > { %2958 = vrot.lane.b32.xlu0 %v2870_v58, %s6582_s17 }
 0x938   : > { %v2871_v10 = vpack.c.bf16 %v2861_v16, %v2860_v63  ;;  %v9029_v16 = vld [vmem:[#allocation10] ss:$0 sm:$0xff] }
 0x939   : > { %2886 = vrot.lane.b32.xlu1 %v1712_v57, %s6584_s11  ;;  %5574 = vmatmul.mubr.msk.bf16.gmra.mrb[20].mxu1 %vm476_vm0, %v2923_v30 }
 0x93a   : > { %5577 = vmatprep.mubr.msk.bf16.mxu1 %vm476_vm0, %v2925_v13 }
 0x93b   : > { %2960 = vrot.lane.b32.xlu0 %v2871_v10, %s6582_s17 }
 0x93d   : > { %2888 = vrot.lane.b32.xlu1 %v1713_v29, %s6584_s11 }
 0x941   : > { %5578 = vmatmul.mubr.msk.bf16.gmra.mrb[24].mxu1 %vm476_vm0, %v2927_v15 }
 0x942   : > { %5581 = vmatprep.mubr.msk.bf16.mxu1 %vm476_vm0, %v2929_v44 }
 0x949   : > { %5582 = vmatmul.mubr.msk.bf16.gmra.mrb[28].mxu1 %vm476_vm0, %v2931_v7 }
 0x995   : > { %v2945_v23 = vpop.permute.xlu0 %2944 }
 0x997   : > { %v2943_v12 = vpop.permute.xlu1 %2942 }
 0x998   : > { %5585 = vmatprep.mubr.msk.bf16.mxu1 %vm476_vm0, %v2943_v12 }
 0x999   : > { %5586 = vmatmul.mubr.msk.bf16.gmra.mrb[32].mxu1 %vm476_vm0, %v2945_v23  ;;  %v2949_v51 = vpop.permute.xlu0 %2948 }
 0x99b   : > { %v2947_v45 = vpop.permute.xlu1 %2946 }
 0x99c   : > { %5589 = vmatprep.mubr.msk.bf16.mxu1 %vm476_vm0, %v2947_v45 }
 0x99d   : > { %v2953_v14 = vpop.permute.xlu0 %2952 }
 0x99f   : > { %v2951_v62 = vpop.permute.xlu1 %2950 }
 0x9a1   : > { %5590 = vmatmul.mubr.msk.bf16.gmra.mrb[36].mxu1 %vm476_vm0, %v2949_v51  ;;  %v2955_v36 = vpop.permute.xlu0 %2954 }
 0x9a2   : > { %5593 = vmatprep.mubr.msk.bf16.mxu1 %vm476_vm0, %v2951_v62 }
 0x9a3   : > { %v2883_v46 = vpop.permute.xlu1 %2882 }
 0x9a4   : > { %5545 = vmatprep.mubr.msk.bf16.mxu0 %vm476_vm0, %v2883_v46 }
 0x9a5   : > { %v2957_v22 = vpop.permute.xlu0 %2956 }
 0x9a7   : > { %v2885_v2 = vpop.permute.xlu1 %2884 }
 0x9a8   : > { %5546 = vmatmul.mubr.msk.bf16.gmra.mrb[40].mxu0 %vm476_vm0, %v2885_v2 }
 0x9a9   : > { %5594 = vmatmul.mubr.msk.bf16.gmra.mrb[40].mxu1 %vm476_vm0, %v2953_v14  ;;  %v2959_v9 = vpop.permute.xlu0 %2958 }
 0x9aa   : > { %5597 = vmatprep.mubr.msk.bf16.mxu1 %vm476_vm0, %v2955_v36 }
 0x9ab   : > { %v2887_v19 = vpop.permute.xlu1 %2886 }
 0x9ac   : > { %5549 = vmatprep.mubr.msk.bf16.mxu0 %vm476_vm0, %v2887_v19 }
 0x9ad   : > { %v2961_v20 = vpop.permute.xlu0 %2960 }
 0x9af   : > { %v2889_v60 = vpop.permute.xlu1 %2888 }
 0x9b0   : > { %5550 = vmatmul.mubr.msk.bf16.gmra.mrb[44].mxu0 %vm476_vm0, %v2889_v60 }
 0x9b1   : > { %5598 = vmatmul.mubr.msk.bf16.gmra.mrb[44].mxu1 %vm476_vm0, %v2957_v22 }
 0x9b2   : > { %5601 = vmatprep.mubr.msk.bf16.mxu1 %vm476_vm0, %v2959_v9 }
 0x9b9   : > { %5602 = vmatmul.mubr.msk.bf16.gmra.mrb[48].mxu1 %vm476_vm0, %v2961_v20 }
 0x9e4   : > { %v8947_v42 = vpop.f32.mrb[0].mxu1 }
 0x9e5   : > { %v8949_v17 = vpop.f32.mrb[1].mxu1 }
 0x9e6   : > { %v8951_v52 = vpop.f32.mrb[2].mxu1 }
 0x9e7   : > { %v8953_v1 = vpop.f32.mrb[3].mxu1 }
 0x9ec   : > { %v8955_v35 = vpop.f32.mrb[4].mxu1 }
 0x9ed   : > { %v8957_v33 = vpop.f32.mrb[5].mxu1 }
 0x9ee   : > { %v8959_v49 = vpop.f32.mrb[6].mxu1 }
 0x9ef   : > { %v8961_v31 = vpop.f32.mrb[7].mxu1 }
 0x9f4   : > { %v8963_v54 = vpop.f32.mrb[8].mxu1 }
 0x9f5   : > { %v8965_v25 = vpop.f32.mrb[9].mxu1 }
 0x9f6   : > { %v8967_v5 = vpop.f32.mrb[10].mxu1 }
 0x9f7   : > { %v8969_v18 = vpop.f32.mrb[11].mxu1 }
 0x9fc   : > { %v8971_v21 = vpop.f32.mrb[12].mxu1 }
 0x9fd   : > { %v8973_v27 = vpop.f32.mrb[13].mxu1 }
 0x9fe   : > { %v8975_v47 = vpop.f32.mrb[14].mxu1 }
 0x9ff   : > { %v8977_v55 = vpop.f32.mrb[15].mxu1 }
 0xa04   : > { %v8979_v50 = vpop.f32.mrb[16].mxu1 }
 0xa05   : > { %v8981_v37 = vpop.f32.mrb[17].mxu1 }
 0xa06   : > { %v8983_v4 = vpop.f32.mrb[18].mxu1 }
 0xa07   : > { %v8985_v38 = vpop.f32.mrb[19].mxu1 }
 0xa0c   : > { %v8987_v3 = vpop.f32.mrb[20].mxu1 }
 0xa0d   : > { %v8989_v39 = vpop.f32.mrb[21].mxu1 }
 0xa0e   : > { %v8991_v40 = vpop.f32.mrb[22].mxu1 }
 0xa0f   : > { %v8993_v8 = vpop.f32.mrb[23].mxu1 }
 0xa14   : > { %v8995_v56 = vpop.f32.mrb[24].mxu1 }
 0xa15   : > { %v8997_v34 = vpop.f32.mrb[25].mxu1 }
 0xa16   : > { %v8999_v59 = vpop.f32.mrb[26].mxu1 }
 0xa17   : > { %v9001_v58 = vpop.f32.mrb[27].mxu1 }
 0xa1c   : > { %v9003_v41 = vpop.f32.mrb[28].mxu1 }
 0xa1d   : > { %v9005_v26 = vpop.f32.mrb[29].mxu1 }
 0xa1e   : > { %v9007_v0 = vpop.f32.mrb[30].mxu1 }
 0xa1f   : > { %v9009_v6 = vpop.f32.mrb[31].mxu1 }
 0xa6c   : > { %v9011_v48 = vpop.f32.mrb[32].mxu1 }
 0xa6d   : > { %v9013_v24 = vpop.f32.mrb[33].mxu1 }
 0xa6e   : > { %v9015_v43 = vpop.f32.mrb[34].mxu1 }
 0xa6f   : > { %v9017_v28 = vpop.f32.mrb[35].mxu1 }
 0xa74   : > { %v9019_v57 = vpop.f32.mrb[36].mxu1 }
 0xa75   : > { %v9021_v61 = vpop.f32.mrb[37].mxu1 }
 0xa76   : > { %v9023_v11 = vpop.f32.mrb[38].mxu1 }
 0xa77   : > { %v9025_v32 = vpop.f32.mrb[39].mxu1 }
 0xa7b   : > { %v5547_v30 = vpop.f32.mrb[40].mxu0 }
 0xa7c   : > { %v3219_v13 = vpop.f32.mrb[41].mxu0  ;;  %v9027_v63 = vpop.f32.mrb[40].mxu1  ;;  %v9034_v29 = vadd.f32 %v5547_v30, %v9029_v16 }
 0xa7d   : > { %v5548_v53 = vpop.f32.mrb[42].mxu0  ;;  %v9031_v10 = vpop.f32.mrb[41].mxu1  ;;  %v9042_v23 = vadd.f32 %v9029_v16, %v3219_v13 }
 0xa7e   : > { %10432 = vst [vmem:[#allocation84_spill] sm:$0xff] %v9034_v29  ;;  %v9037_v15 = vadd.f32 %v5548_v53, %v9029_v16  ;;  %v3222_v44 = vpop.f32.mrb[43].mxu0  ;;  %v9039_v7 = vpop.f32.mrb[42].mxu1 }
 0xa7f   : > { %10434 = vst [vmem:[#allocation89_spill] sm:$0xff] %v9042_v23  ;;  %v9045_v12 = vadd.f32 %v9029_v16, %v3222_v44  ;;  %v9047_v51 = vpop.f32.mrb[43].mxu1  ;;  %v9077_v44 = vadd.f32 %v8951_v52, %v9029_v16  ;;  %v9094_v52 = vadd.f32 %v9029_v16, %v8949_v17 }
 0xa80   : > { %10433 = vst [vmem:[#allocation87_spill] sm:$0xff] %v9037_v15  ;;  %v5769_v45 = vpack.i.bf16 %v9037_v15, %v9034_v29  ;;  %v10472_v15 = vld [vmem:[#allocation42_spill] sm:$0xff] }
 0xa81   : > { %10435 = vst [vmem:[#allocation22_spill] sm:$0xff] %v9045_v12  ;;  %v5764_v62 = vpack.i.bf16 %v9045_v12, %v9042_v23  ;;  %10440 = vst [vmem:[#allocation28_spill] sm:$0xff] %v9077_v44 }
 0xa82   : > { %5770 = vrot.lane.b32.xlu0 %v5769_v45, %s6583_s30  ;;  %10443 = vst [vmem:[#allocation36_spill] sm:$0xff] %v9094_v52 }
 0xa83   : > { %5765 = vrot.lane.b32.xlu1 %v5764_v62, %s6583_s30  ;;  %v5551_v14 = vpop.f32.mrb[44].mxu0  ;;  %v9083_v62 = vadd.f32 %v9029_v16, %v8953_v1  ;;  %v9101_v1 = vadd.f32 %v8959_v49, %v9029_v16  ;;  %v9122_v49 = vadd.f32 %v9029_v16, %v8957_v33  ;;  %v9141_v33 = vadd.f32 %v8963_v54, %v9029_v16 }
 0xa84   : > { %v3235_v46 = vpop.f32.mrb[45].mxu0  ;;  %v9055_v36 = vpop.f32.mrb[44].mxu1  ;;  %v9060_v19 = vadd.f32 %v5551_v14, %v9029_v16 }
 0xa85   : > { %v5552_v2 = vpop.f32.mrb[46].mxu0  ;;  %v9057_v22 = vpop.f32.mrb[45].mxu1  ;;  %v9068_v30 = vadd.f32 %v9029_v16, %v3235_v46  ;;  %10441 = vst [vmem:[#allocation48_spill] sm:$0xff] %v9083_v62  ;;  %v9089_v46 = vadd.f32 %v8947_v42, %v9029_v16  ;;  %10444 = vst [vmem:[#allocation55_spill] sm:$0xff] %v9101_v1  ;;  %v5784_v42 = vpack.i.bf16 %v9083_v62, %v9094_v52 }
 0xa86   : > { %10436 = vst [vmem:[#allocation20_spill] sm:$0xff] %v9060_v19  ;;  %v9063_v60 = vadd.f32 %v5552_v2, %v9029_v16  ;;  %v3238_v9 = vpop.f32.mrb[47].mxu0  ;;  %v9065_v20 = vpop.f32.mrb[46].mxu1  ;;  %10447 = vst [vmem:[#allocation45_spill] sm:$0xff] %v9122_v49  ;;  %v9131_v62 = vadd.f32 %v8967_v5, %v9029_v16  ;;  %v10452_v5 = vld [vmem:[#allocation51_spill] sm:$0xff] }
 0xa87   : > { %10438 = vst [vmem:[#allocation25_spill] sm:$0xff] %v9068_v30  ;;  %v9071_v13 = vadd.f32 %v9029_v16, %v3238_v9  ;;  %v9073_v53 = vpop.f32.mrb[47].mxu1  ;;  %10442 = vst [vmem:[#allocation72_spill] sm:$0xff] %v9089_v46  ;;  %v5789_v2 = vpack.i.bf16 %v9077_v44, %v9089_v46  ;;  %v10460_v44 = vld [vmem:[#allocation76_spill] sm:$0xff] }
 0xa88   : > { %10437 = vst [vmem:[#allocation17_spill] sm:$0xff] %v9063_v60  ;;  %v5779_v45 = vpack.i.bf16 %v9063_v60, %v9060_v19  ;;  %10448 = vst [vmem:[#allocation60_spill] sm:$0xff] %v9131_v62  ;;  %v10466_v60 = vld [vmem:[#allocation35_spill] sm:$0xff] }
 0xa89   : > { %10439 = vst [vmem:[#allocation23_spill] sm:$0xff] %v9071_v13  ;;  %v5774_v14 = vpack.i.bf16 %v9071_v13, %v9068_v30  ;;  %10450 = vst [vmem:[#allocation33_spill] sm:$0xff] %v9141_v33  ;;  %v9197_v30 = vadd.f32 %v10460_v44, %v9029_v16  ;;  %v9219_v23 = vadd.f32 %v10466_v60, %v9029_v16 }
 0xa8a   : > { %5780 = vrot.lane.b32.xlu0 %v5779_v45, %s6583_s30  ;;  %v9109_v45 = vadd.f32 %v9029_v16, %v8961_v31 }
 0xa8b   : > { %5775 = vrot.lane.b32.xlu1 %v5774_v14, %s6583_s30  ;;  %v9115_v14 = vadd.f32 %v8955_v35, %v9029_v16 }
 0xa8c   : > { %v9103_v9 = vpop.f32.mrb[48].mxu1  ;;  %10445 = vst [vmem:[#allocation47_spill] sm:$0xff] %v9109_v45  ;;  %v5794_v35 = vpack.i.bf16 %v9109_v45, %v9122_v49  ;;  %v10453_v49 = vld [vmem:[#allocation52_spill] sm:$0xff] }
 0xa8d   : > { %v9111_v17 = vpop.f32.mrb[49].mxu1  ;;  %10446 = vst [vmem:[#allocation78_spill] sm:$0xff] %v9115_v14  ;;  %v5799_v31 = vpack.i.bf16 %v9101_v1, %v9115_v14  ;;  %v9151_v14 = vadd.f32 %v10452_v5, %v9029_v16  ;;  %v9157_v45 = vadd.f32 %v9029_v16, %v10453_v49  ;;  %v10456_v49 = vld [vmem:[#allocation66_spill] sm:$0xff] }
 0xa8e   : > { %5790 = vrot.lane.b32.xlu0 %v5789_v2, %s6583_s30  ;;  %v9118_v46 = vpop.f32.mrb[50].mxu1  ;;  %v9137_v2 = vadd.f32 %v9029_v16, %v8969_v18  ;;  %v5809_v18 = vpack.i.bf16 %v9131_v62, %v9141_v33  ;;  %v9175_v62 = vadd.f32 %v10456_v49, %v9029_v16 }
 0xa8f   : > { %5785 = vrot.lane.b32.xlu1 %v5784_v42, %s6583_s30  ;;  %v9125_v52 = vpop.f32.mrb[51].mxu1  ;;  %v9146_v42 = vadd.f32 %v9029_v16, %v8965_v25 }
 0xa90   : > { %10449 = vst [vmem:[#allocation62_spill] sm:$0xff] %v9137_v2 }
 0xa91   : > { %10451 = vst [vmem:[#allocation41_spill] sm:$0xff] %v9146_v42  ;;  %v5804_v54 = vpack.i.bf16 %v9137_v2, %v9146_v42 }
 0xa92   : > { %5800 = vrot.lane.b32.xlu0 %v5799_v31, %s6583_s30  ;;  %v10454_v31 = vld [vmem:[#allocation49_spill] sm:$0xff] }
 0xa93   : > { %5795 = vrot.lane.b32.xlu1 %v5794_v35, %s6583_s30  ;;  %v9163_v25 = vadd.f32 %v10454_v31, %v9029_v16  ;;  %v10455_v35 = vld [vmem:[#allocation50_spill] sm:$0xff]  ;;  %v10457_v31 = vld [vmem:[#allocation67_spill] sm:$0xff] }
 0xa94   : > { %v9168_v5 = vadd.f32 %v9029_v16, %v10455_v35  ;;  %v9181_v2 = vadd.f32 %v9029_v16, %v10457_v31 }
 0xa95   : > { %v5819_v33 = vpack.i.bf16 %v9151_v14, %v9163_v25 }
 0xa96   : > { %5810 = vrot.lane.b32.xlu0 %v5809_v18, %s6583_s30  ;;  %v5814_v42 = vpack.i.bf16 %v9157_v45, %v9168_v5  ;;  %v10458_v18 = vld [vmem:[#allocation64_spill] sm:$0xff] }
 0xa97   : > { %5805 = vrot.lane.b32.xlu1 %v5804_v54, %s6583_s30  ;;  %v9185_v35 = vadd.f32 %v10458_v18, %v9029_v16  ;;  %v10459_v54 = vld [vmem:[#allocation65_spill] sm:$0xff] }
 0xa98   : > { %v9190_v1 = vadd.f32 %v9029_v16, %v10459_v54  ;;  %v10461_v18 = vld [vmem:[#allocation77_spill] sm:$0xff] }
 0xa99   : > { %v5829_v49 = vpack.i.bf16 %v9175_v62, %v9185_v35  ;;  %v9203_v13 = vadd.f32 %v9029_v16, %v10461_v18 }
 0xa9a   : > { %5820 = vrot.lane.b32.xlu0 %v5819_v33, %s6583_s30  ;;  %v5824_v31 = vpack.i.bf16 %v9181_v2, %v9190_v1  ;;  %v10463_v33 = vld [vmem:[#allocation74_spill] sm:$0xff] }
 0xa9b   : > { %5815 = vrot.lane.b32.xlu1 %v5814_v42, %s6583_s30  ;;  %10462 = vst [vmem:[#allocation59_spill] sm:$0xff] %v9203_v13  ;;  %v9207_v54 = vadd.f32 %v10463_v33, %v9029_v16  ;;  %v10464_v42 = vld [vmem:[#allocation75_spill] sm:$0xff]  ;;  %v10467_v33 = vld [vmem:[#allocation34_spill] sm:$0xff] }
 0xa9c   : > { %v9212_v19 = vadd.f32 %v9029_v16, %v10464_v42  ;;  %v9225_v12 = vadd.f32 %v9029_v16, %v10467_v33 }
 0xa9d   : > { %v5839_v44 = vpack.i.bf16 %v9197_v30, %v9207_v54 }
 0xa9e   : > { %5830 = vrot.lane.b32.xlu0 %v5829_v49, %s6583_s30  ;;  %10465 = vst [vmem:[#allocation53_spill] sm:$0xff] %v9212_v19  ;;  %v5834_v18 = vpack.i.bf16 %v9203_v13, %v9212_v19  ;;  %v10468_v49 = vld [vmem:[#allocation24_spill] sm:$0xff]  ;;  %v9241_v19 = vadd.f32 %v10472_v15, %v9029_v16 }
 0xa9f   : > { %5825 = vrot.lane.b32.xlu1 %v5824_v31, %s6583_s30  ;;  %v9229_v42 = vadd.f32 %v10468_v49, %v9029_v16  ;;  %v10470_v31 = vld [vmem:[#allocation37_spill] sm:$0xff]  ;;  %v10473_v49 = vld [vmem:[#allocation82_spill] sm:$0xff] }
 0xaa0   : > { %v9234_v29 = vadd.f32 %v9029_v16, %v10470_v31  ;;  %v9247_v13 = vadd.f32 %v9029_v16, %v10473_v49 }
 0xaa1   : > { %10469 = vst [vmem:[#allocation80_spill] sm:$0xff] %v9229_v42  ;;  %v5849_v60 = vpack.i.bf16 %v9219_v23, %v9229_v42 }
 0xaa2   : > { %5840 = vrot.lane.b32.xlu0 %v5839_v44, %s6583_s30  ;;  %10471 = vst [vmem:[#allocation38_spill] sm:$0xff] %v9234_v29  ;;  %v5844_v33 = vpack.i.bf16 %v9225_v12, %v9234_v29  ;;  %v10474_v44 = vld [vmem:[#allocation44_spill] sm:$0xff]  ;;  %v9263_v29 = vadd.f32 %v9015_v43, %v9029_v16 }
 0xaa3   : > { %5835 = vrot.lane.b32.xlu1 %v5834_v18, %s6583_s30  ;;  %v9251_v31 = vadd.f32 %v10474_v44, %v9029_v16  ;;  %v10475_v18 = vld [vmem:[#allocation43_spill] sm:$0xff]  ;;  %v9269_v44 = vadd.f32 %v9029_v16, %v9017_v28 }
 0xaa4   : > { %v9256_v42 = vadd.f32 %v9029_v16, %v10475_v18  ;;  %v9285_v18 = vadd.f32 %v9023_v11, %v9029_v16 }
 0xaa5   : > { %v5859_v15 = vpack.i.bf16 %v9241_v19, %v9251_v31 }
 0xaa6   : > { %5850 = vrot.lane.b32.xlu0 %v5849_v60, %s6583_s30  ;;  %v5854_v49 = vpack.i.bf16 %v9247_v13, %v9256_v42  ;;  %v9273_v60 = vadd.f32 %v9011_v48, %v9029_v16  ;;  %v9291_v48 = vadd.f32 %v9029_v16, %v9025_v32 }
 0xaa7   : > { %5845 = vrot.lane.b32.xlu1 %v5844_v33, %s6583_s30  ;;  %v9278_v33 = vadd.f32 %v9029_v16, %v9013_v24  ;;  %v9295_v24 = vadd.f32 %v9019_v57, %v9029_v16  ;;  %v9313_v57 = vadd.f32 %v9029_v16, %v9047_v51 }
 0xaa8   : > { %v5869_v43 = vpack.i.bf16 %v9263_v29, %v9273_v60 }
 0xaa9   : > { %v5864_v28 = vpack.i.bf16 %v9269_v44, %v9278_v33  ;;  %v5879_v11 = vpack.i.bf16 %v9285_v18, %v9295_v24 }
 0xaaa   : > { %5860 = vrot.lane.b32.xlu0 %v5859_v15, %s6583_s30  ;;  %v9300_v15 = vadd.f32 %v9029_v16, %v9021_v61  ;;  %v9317_v61 = vadd.f32 %v9027_v63, %v9029_v16  ;;  %v9335_v63 = vadd.f32 %v9029_v16, %v9073_v53 }
 0xaab   : > { %5855 = vrot.lane.b32.xlu1 %v5854_v49, %s6583_s30  ;;  %v9307_v49 = vadd.f32 %v9039_v7, %v9029_v16 }
 0xaac   : > { %v5874_v32 = vpack.i.bf16 %v9291_v48, %v9300_v15  ;;  %10476 = vst [vmem:[#allocation79_spill] sm:$0xff] %v9335_v63 }
 0xaad   : > { %v5889_v7 = vpack.i.bf16 %v9307_v49, %v9317_v61 }
 0xaae   : > { %5870 = vrot.lane.b32.xlu0 %v5869_v43, %s6583_s30  ;;  %v9322_v43 = vadd.f32 %v9029_v16, %v9031_v10  ;;  %v9339_v10 = vadd.f32 %v9055_v36, %v9029_v16  ;;  %v9357_v36 = vadd.f32 %v9029_v16, %v9125_v52 }
 0xaaf   : > { %5865 = vrot.lane.b32.xlu1 %v5864_v28, %s6583_s30  ;;  %v9329_v28 = vadd.f32 %v9065_v20, %v9029_v16 }
 0xab0   : > { %v5884_v51 = vpack.i.bf16 %v9313_v57, %v9322_v43  ;;  %10479 = vst [vmem:[#allocation30_spill] sm:$0xff] %v9357_v36 }
 0xab1   : > { %v5899_v20 = vpack.i.bf16 %v9329_v28, %v9339_v10 }
 0xab2   : > { %5880 = vrot.lane.b32.xlu0 %v5879_v11, %s6583_s30  ;;  %v9344_v11 = vadd.f32 %v9029_v16, %v9057_v22  ;;  %v9361_v22 = vadd.f32 %v9103_v9, %v9029_v16 }
 0xab3   : > { %5875 = vrot.lane.b32.xlu1 %v5874_v32, %s6583_s30  ;;  %v9351_v32 = vadd.f32 %v9118_v46, %v9029_v16  ;;  %v9371_v46 = vadd.f32 %v8975_v47, %v9029_v16  ;;  %v9388_v47 = vadd.f32 %v9029_v16, %v8973_v27  ;;  %v9405_v27 = vadd.f32 %v8979_v50, %v9029_v16 }
 0xab4   : > { %10477 = vst [vmem:[#allocation21_spill] sm:$0xff] %v9344_v11  ;;  %v5894_v53 = vpack.i.bf16 %v9335_v63, %v9344_v11  ;;  %10480 = vst [vmem:[#allocation19_spill] sm:$0xff] %v9361_v22  ;;  %v9423_v50 = vadd.f32 %v9029_v16, %v8993_v8 }
 0xab5   : > { %10478 = vst [vmem:[#allocation81_spill] sm:$0xff] %v9351_v32  ;;  %v5909_v52 = vpack.i.bf16 %v9351_v32, %v9361_v22 }
 0xab6   : > { %5890 = vrot.lane.b32.xlu0 %v5889_v7, %s6583_s30  ;;  %v9366_v7 = vadd.f32 %v9029_v16, %v9111_v17  ;;  %v9383_v17 = vadd.f32 %v8971_v21, %v9029_v16  ;;  %v9401_v21 = vadd.f32 %v9029_v16, %v8985_v38 }
 0xab7   : > { %5885 = vrot.lane.b32.xlu1 %v5884_v51, %s6583_s30  ;;  %v9377_v51 = vadd.f32 %v9029_v16, %v8977_v55  ;;  %v9395_v55 = vadd.f32 %v8983_v4, %v9029_v16 }
 0xab8   : > { %10481 = vst [vmem:[#allocation40_spill] sm:$0xff] %v9366_v7  ;;  %v5904_v9 = vpack.i.bf16 %v9357_v36, %v9366_v7 }
 0xab9   : > { %v5929_v4 = vpack.i.bf16 %v9395_v55, %v9405_v27 }
 0xaba   : > { %5900 = vrot.lane.b32.xlu0 %v5899_v20, %s6583_s30  ;;  %v5919_v20 = vpack.i.bf16 %v9371_v46, %v9383_v17 }
 0xabb   : > { %5895 = vrot.lane.b32.xlu1 %v5894_v53, %s6583_s30  ;;  %v5914_v53 = vpack.i.bf16 %v9377_v51, %v9388_v47 }
 0xabe   : > { %5910 = vrot.lane.b32.xlu0 %v5909_v52, %s6583_s30  ;;  %v9410_v52 = vadd.f32 %v9029_v16, %v8981_v37  ;;  %v9427_v37 = vadd.f32 %v8987_v3, %v9029_v16  ;;  %v9445_v3 = vadd.f32 %v9029_v16, %v9001_v58  ;;  %v9461_v58 = vadd.f32 %v9007_v0, %v9029_v16 }
 0xabf   : > { %5905 = vrot.lane.b32.xlu1 %v5904_v9, %s6583_s30  ;;  %v9417_v9 = vadd.f32 %v8991_v40, %v9029_v16 }
 0xac0   : > { %v5924_v38 = vpack.i.bf16 %v9401_v21, %v9410_v52 }
 0xac1   : > { %v5939_v40 = vpack.i.bf16 %v9417_v9, %v9427_v37 }
 0xac2   : > { %5920 = vrot.lane.b32.xlu0 %v5919_v20, %s6583_s30  ;;  %v9432_v20 = vadd.f32 %v9029_v16, %v8989_v39  ;;  %v9449_v39 = vadd.f32 %v8995_v56, %v9029_v16 }
 0xac3   : > { %5915 = vrot.lane.b32.xlu1 %v5914_v53, %s6583_s30  ;;  %v9439_v53 = vadd.f32 %v8999_v59, %v9029_v16 }
 0xac4   : > { %v5934_v8 = vpack.i.bf16 %v9423_v50, %v9432_v20 }
 0xac5   : > { %v5949_v59 = vpack.i.bf16 %v9439_v53, %v9449_v39 }
 0xac6   : > { %5930 = vrot.lane.b32.xlu0 %v5929_v4, %s6583_s30  ;;  %v9454_v4 = vadd.f32 %v9029_v16, %v8997_v34  ;;  %v9471_v34 = vadd.f32 %v9003_v41, %v9029_v16 }
 0xac7   : > { %5925 = vrot.lane.b32.xlu1 %v5924_v38, %s6583_s30  ;;  %v9467_v38 = vadd.f32 %v9029_v16, %v9009_v6 }
 0xac8   : > { %v5944_v56 = vpack.i.bf16 %v9445_v3, %v9454_v4  ;;  %v5959_v0 = vpack.i.bf16 %v9461_v58, %v9471_v34 }
 0xaca   : > { %5940 = vrot.lane.b32.xlu0 %v5939_v40, %s6583_s30  ;;  %v9476_v40 = vadd.f32 %v9029_v16, %v9005_v26 }
 0xacb   : > { %5935 = vrot.lane.b32.xlu1 %v5934_v8, %s6583_s30 }
 0xacc   : > { %v5954_v8 = vpack.i.bf16 %v9467_v38, %v9476_v40 }
 0xace   : > { %5950 = vrot.lane.b32.xlu0 %v5949_v59, %s6583_s30 }
 0xacf   : > { %5945 = vrot.lane.b32.xlu1 %v5944_v56, %s6583_s30 }
 0xad2   : > { %5960 = vrot.lane.b32.xlu0 %v5959_v0, %s6583_s30 }
 0xad3   : > { %5955 = vrot.lane.b32.xlu1 %v5954_v8, %s6583_s30 }
 0xaf4   : > { %v5771_v41 = vpop.permute.xlu0 %5770 }
 0xaf5   : > { %v5773_v6 = vunpack.i.h.bf16 %v5771_v41  ;;  %v5772_v26 = vunpack.i.l.bf16 %v5771_v41  ;;  %v5766_v16 = vpop.permute.xlu1 %5765 }
 0xaf6   : > { %v5768_v59 = vunpack.i.h.bf16 %v5766_v16  ;;  %v5767_v56 = vunpack.i.l.bf16 %v5766_v16 }
 0xaf7   : > { %v3542_v7 = vsel %vm3538_vm1, %v9151_v14, %v5773_v6  ;;  %v3541_v36 = vsel %vm3538_vm1, %v9163_v25, %v5772_v26 }
 0xaf8   : > { %v3563_v0 = vsel %vm3559_vm2, %v3542_v7, %v5773_v6  ;;  %v3562_v8 = vsel %vm3559_vm2, %v3541_v36, %v5772_v26  ;;  %v3540_v22 = vsel %vm3538_vm1, %v9157_v45, %v5768_v59  ;;  %v3539_v32 = vsel %vm3538_vm1, %v9168_v5, %v5767_v56 }
 0xaf9   : > { %v5211_v41 = vpack.c.bf16 %v3563_v0, %v3562_v8  ;;  %v3561_v11 = vsel %vm3559_vm2, %v3540_v22, %v5768_v59  ;;  %v3560_v16 = vsel %vm3559_vm2, %v3539_v32, %v5767_v56 }
 0xafa   : > { %v5206_v63 = vpack.c.bf16 %v3561_v11, %v3560_v16 }
 0xafb   : > { %5403 = vst [vmem:[%s9498_s24 + $0x20] sm:$0xff] %v5211_v41  }
 0xafc   : > { %5207 = vst [vmem:[%s9498_s24] sm:$0xff] %v5206_v63   ;;  %v5781_v14 = vpop.permute.xlu0 %5780 }
 0xafd   : > { %v5783_v25 = vunpack.i.h.bf16 %v5781_v14  ;;  %v5782_v36 = vunpack.i.l.bf16 %v5781_v14  ;;  %v5776_v7 = vpop.permute.xlu1 %5775 }
 0xafe   : > { %v5778_v45 = vunpack.i.h.bf16 %v5776_v7  ;;  %v5777_v6 = vunpack.i.l.bf16 %v5776_v7  ;;  %v10482_v7 = vld [vmem:[#allocation59_spill] sm:$0xff] }
 0xaff   : > { %v3546_v5 = vsel %vm3538_vm1, %v9175_v62, %v5783_v25  ;;  %v3545_v32 = vsel %vm3538_vm1, %v9185_v35, %v5782_v36 }
 0xb00   : > { %v3567_v11 = vsel %vm3559_vm2, %v3546_v5, %v5783_v25  ;;  %v3566_v22 = vsel %vm3559_vm2, %v3545_v32, %v5782_v36  ;;  %v3544_v63 = vsel %vm3538_vm1, %v9181_v2, %v5778_v45  ;;  %v3543_v26 = vsel %vm3538_vm1, %v9190_v1, %v5777_v6  ;;  %v5791_v59 = vpop.permute.xlu0 %5790 }
 0xb01   : > { %v5221_v56 = vpack.c.bf16 %v3567_v11, %v3566_v22  ;;  %v3565_v0 = vsel %vm3559_vm2, %v3544_v63, %v5778_v45  ;;  %v3564_v62 = vsel %vm3559_vm2, %v3543_v26, %v5777_v6  ;;  %v5793_v8 = vunpack.i.h.bf16 %v5791_v59  ;;  %v5786_v41 = vpop.permute.xlu1 %5785  ;;  %v10483_v6 = vld [vmem:[#allocation53_spill] sm:$0xff] }
 0xb02   : > { %v5216_v35 = vpack.c.bf16 %v3565_v0, %v3564_v62  ;;  %v5792_v16 = vunpack.i.l.bf16 %v5791_v59  ;;  %v5788_v14 = vunpack.i.h.bf16 %v5786_v41  ;;  %v5787_v25 = vunpack.i.l.bf16 %v5786_v41 }
 0xb03   : > { %5405 = vst [vmem:[%s9498_s24 + $0x60] sm:$0xff] %v5221_v56   ;;  %v3550_v36 = vsel %vm3538_vm1, %v9197_v30, %v5793_v8 }
 0xb04   : > { %5404 = vst [vmem:[%s9498_s24 + $0x40] sm:$0xff] %v5216_v35   ;;  %v3571_v2 = vsel %vm3559_vm2, %v3550_v36, %v5793_v8  ;;  %v3549_v1 = vsel %vm3538_vm1, %v9207_v54, %v5792_v16  ;;  %v3548_v45 = vsel %vm3538_vm1, %v10482_v7, %v5788_v14  ;;  %v3547_v5 = vsel %vm3538_vm1, %v10483_v6, %v5787_v25  ;;  %v5801_v32 = vpop.permute.xlu0 %5800  ;;  %v10484_v35 = vld [vmem:[#allocation80_spill] sm:$0xff] }
 0xb05   : > { %v3570_v11 = vsel %vm3559_vm2, %v3549_v1, %v5792_v16  ;;  %v3569_v22 = vsel %vm3559_vm2, %v3548_v45, %v5788_v14  ;;  %v3568_v30 = vsel %vm3559_vm2, %v3547_v5, %v5787_v25  ;;  %v5803_v63 = vunpack.i.h.bf16 %v5801_v32  ;;  %v5796_v26 = vpop.permute.xlu1 %5795  ;;  %v10485_v1 = vld [vmem:[#allocation38_spill] sm:$0xff] }
 0xb06   : > { %v5231_v59 = vpack.c.bf16 %v3571_v2, %v3570_v11  ;;  %v5226_v56 = vpack.c.bf16 %v3569_v22, %v3568_v30  ;;  %v5802_v0 = vunpack.i.l.bf16 %v5801_v32  ;;  %v5798_v54 = vunpack.i.h.bf16 %v5796_v26 }
 0xb07   : > { %v3554_v62 = vsel %vm3538_vm1, %v9219_v23, %v5803_v63  ;;  %v5797_v8 = vunpack.i.l.bf16 %v5796_v26 }
 0xb08   : > { %5407 = vst [vmem:[%s9498_s24 + $0xa0] sm:$0xff] %v5231_v59   ;;  %5406 = vst [vmem:[%s9498_s24 + $0x80] sm:$0xff] %v5226_v56   ;;  %v3575_v41 = vsel %vm3559_vm2, %v3554_v62, %v5803_v63  ;;  %v3553_v16 = vsel %vm3538_vm1, %v10484_v35, %v5802_v0  ;;  %v3552_v14 = vsel %vm3538_vm1, %v9225_v12, %v5798_v54  ;;  %v5811_v25 = vpop.permute.xlu0 %5810 }
 0xb09   : > { %v3574_v36 = vsel %vm3559_vm2, %v3553_v16, %v5802_v0  ;;  %v3573_v2 = vsel %vm3559_vm2, %v3552_v14, %v5798_v54  ;;  %v3551_v23 = vsel %vm3538_vm1, %v10485_v1, %v5797_v8  ;;  %v5813_v7 = vunpack.i.h.bf16 %v5811_v25  ;;  %v5806_v45 = vpop.permute.xlu1 %5805  ;;  %v10487_v1 = vld [vmem:[#allocation84_spill] sm:$0xff] }
 0xb0a   : > { %v5241_v6 = vpack.c.bf16 %v3575_v41, %v3574_v36  ;;  %v3572_v5 = vsel %vm3559_vm2, %v3551_v23, %v5797_v8  ;;  %v5812_v32 = vunpack.i.l.bf16 %v5811_v25  ;;  %v5808_v11 = vunpack.i.h.bf16 %v5806_v45  ;;  %v10486_v25 = vld [vmem:[#allocation87_spill] sm:$0xff] }
 0xb0b   : > { %v5236_v22 = vpack.c.bf16 %v3573_v2, %v3572_v5  ;;  %v3558_v12 = vsel %vm3538_vm1, %v9241_v19, %v5813_v7  ;;  %v5807_v30 = vunpack.i.l.bf16 %v5806_v45 }
 0xb0c   : > { %5409 = vst [vmem:[%s9498_s24 + $0xe0] sm:$0xff] %v5241_v6   ;;  %v3579_v63 = vsel %vm3559_vm2, %v3558_v12, %v5813_v7  ;;  %v3557_v26 = vsel %vm3538_vm1, %v9251_v31, %v5812_v32  ;;  %v3556_v59 = vsel %vm3538_vm1, %v9247_v13, %v5808_v11  ;;  %v5821_v56 = vpop.permute.xlu0 %5820 }
 0xb0d   : > { %5408 = vst [vmem:[%s9498_s24 + $0xc0] sm:$0xff] %v5236_v22   ;;  %v3578_v0 = vsel %vm3559_vm2, %v3557_v26, %v5812_v32  ;;  %v3577_v54 = vsel %vm3559_vm2, %v3556_v59, %v5808_v11  ;;  %v3555_v19 = vsel %vm3538_vm1, %v9256_v42, %v5807_v30  ;;  %v5823_v62 = vunpack.i.h.bf16 %v5821_v56  ;;  %v5816_v8 = vpop.permute.xlu1 %5815  ;;  %v10488_v42 = vld [vmem:[#allocation22_spill] sm:$0xff]  ;;  %v10489_v32 = vld [vmem:[#allocation89_spill] sm:$0xff] }
 0xb0e   : > { %v5251_v41 = vpack.c.bf16 %v3579_v63, %v3578_v0  ;;  %v3576_v35 = vsel %vm3559_vm2, %v3555_v19, %v5807_v30  ;;  %v5822_v31 = vunpack.i.l.bf16 %v5821_v56  ;;  %v5818_v16 = vunpack.i.h.bf16 %v5816_v8  ;;  %v10490_v0 = vld [vmem:[#allocation17_spill] sm:$0xff] }
 0xb0f   : > { %v5246_v14 = vpack.c.bf16 %v3577_v54, %v3576_v35  ;;  %v3763_v13 = vsel %vm3538_vm1, %v5823_v62, %v10486_v25  ;;  %v5817_v36 = vunpack.i.l.bf16 %v5816_v8  ;;  %v10491_v8 = vld [vmem:[#allocation20_spill] sm:$0xff]  ;;  %v10492_v35 = vld [vmem:[#allocation23_spill] sm:$0xff] }
 0xb10   : > { %5411 = vst [vmem:[%s9498_s24 + $0x120] sm:$0xff] %v5251_v41   ;;  %v3783_v2 = vsel %vm3559_vm2, %v3763_v13, %v10486_v25  ;;  %v3762_v23 = vsel %vm3538_vm1, %v5822_v31, %v10487_v1  ;;  %v3761_v7 = vsel %vm3538_vm1, %v5818_v16, %v10488_v42  ;;  %v5831_v45 = vpop.permute.xlu0 %5830  ;;  %v10493_v13 = vld [vmem:[#allocation25_spill] sm:$0xff] }
 0xb11   : > { %5410 = vst [vmem:[%s9498_s24 + $0x100] sm:$0xff] %v5246_v14   ;;  %v3782_v6 = vsel %vm3559_vm2, %v3762_v23, %v10487_v1  ;;  %v3781_v5 = vsel %vm3559_vm2, %v3761_v7, %v10488_v42  ;;  %v3760_v11 = vsel %vm3538_vm1, %v5817_v36, %v10489_v32  ;;  %v5833_v22 = vunpack.i.h.bf16 %v5831_v45  ;;  %v5826_v12 = vpop.permute.xlu1 %5825 }
 0xb12   : > { %v5261_v30 = vpack.c.bf16 %v3783_v2, %v3782_v6  ;;  %v3780_v63 = vsel %vm3559_vm2, %v3760_v11, %v10489_v32  ;;  %v5832_v26 = vunpack.i.l.bf16 %v5831_v45  ;;  %v5828_v59 = vunpack.i.h.bf16 %v5826_v12 }
 0xb13   : > { %v5256_v56 = vpack.c.bf16 %v3781_v5, %v3780_v63  ;;  %v3767_v54 = vsel %vm3538_vm1, %v5833_v22, %v10490_v0  ;;  %v5827_v19 = vunpack.i.l.bf16 %v5826_v12  ;;  %v10494_v5 = vld [vmem:[#allocation28_spill] sm:$0xff] }
 0xb14   : > { %5413 = vst [vmem:[%s9498_s24 + $0x28] sm:$0xff] %v5261_v30   ;;  %v3787_v62 = vsel %vm3559_vm2, %v3767_v54, %v10490_v0  ;;  %v3766_v41 = vsel %vm3538_vm1, %v5832_v26, %v10491_v8  ;;  %v3765_v31 = vsel %vm3538_vm1, %v5828_v59, %v10492_v35  ;;  %v5841_v16 = vpop.permute.xlu0 %5840  ;;  %v10495_v12 = vld [vmem:[#allocation72_spill] sm:$0xff] }
 0xb15   : > { %5412 = vst [vmem:[%s9498_s24 + $0x8] sm:$0xff] %v5256_v56   ;;  %v3786_v14 = vsel %vm3559_vm2, %v3766_v41, %v10491_v8  ;;  %v3785_v25 = vsel %vm3559_vm2, %v3765_v31, %v10492_v35  ;;  %v3764_v36 = vsel %vm3538_vm1, %v5827_v19, %v10493_v13  ;;  %v5843_v2 = vunpack.i.h.bf16 %v5841_v16  ;;  %v5836_v1 = vpop.permute.xlu1 %5835  ;;  %v10496_v63 = vld [vmem:[#allocation48_spill] sm:$0xff] }
 0xb16   : > { %v5271_v23 = vpack.c.bf16 %v3787_v62, %v3786_v14  ;;  %v3784_v42 = vsel %vm3559_vm2, %v3764_v36, %v10493_v13  ;;  %v5842_v7 = vunpack.i.l.bf16 %v5841_v16  ;;  %v5838_v45 = vunpack.i.h.bf16 %v5836_v1  ;;  %v10497_v54 = vld [vmem:[#allocation36_spill] sm:$0xff] }
 0xb17   : > { %v5266_v6 = vpack.c.bf16 %v3785_v25, %v3784_v42  ;;  %v3771_v32 = vsel %vm3538_vm1, %v5843_v2, %v10494_v5  ;;  %v5837_v11 = vunpack.i.l.bf16 %v5836_v1  ;;  %v10498_v25 = vld [vmem:[#allocation55_spill] sm:$0xff]  ;;  %v10499_v1 = vld [vmem:[#allocation78_spill] sm:$0xff] }
 0xb18   : > { %5415 = vst [vmem:[%s9498_s24 + $0x68] sm:$0xff] %v5271_v23   ;;  %v3791_v22 = vsel %vm3559_vm2, %v3771_v32, %v10494_v5  ;;  %v3770_v30 = vsel %vm3538_vm1, %v5842_v7, %v10495_v12  ;;  %v3769_v26 = vsel %vm3538_vm1, %v5838_v45, %v10496_v63  ;;  %v5851_v59 = vpop.permute.xlu0 %5850  ;;  %v10500_v42 = vld [vmem:[#allocation47_spill] sm:$0xff]  ;;  %v10501_v32 = vld [vmem:[#allocation45_spill] sm:$0xff] }
 0xb19   : > { %5414 = vst [vmem:[%s9498_s24 + $0x48] sm:$0xff] %v5266_v6   ;;  %v3790_v56 = vsel %vm3559_vm2, %v3770_v30, %v10495_v12  ;;  %v3789_v0 = vsel %vm3559_vm2, %v3769_v26, %v10496_v63  ;;  %v3768_v19 = vsel %vm3538_vm1, %v5837_v11, %v10497_v54  ;;  %v5853_v62 = vunpack.i.h.bf16 %v5851_v59  ;;  %v5846_v8 = vpop.permute.xlu1 %5845 }
 0xb1a   : > { %v5281_v41 = vpack.c.bf16 %v3791_v22, %v3790_v56  ;;  %v3788_v35 = vsel %vm3559_vm2, %v3768_v19, %v10497_v54  ;;  %v5852_v31 = vunpack.i.l.bf16 %v5851_v59  ;;  %v5848_v16 = vunpack.i.h.bf16 %v5846_v8 }
 0xb1b   : > { %v5276_v14 = vpack.c.bf16 %v3789_v0, %v3788_v35  ;;  %v3775_v13 = vsel %vm3538_vm1, %v5853_v62, %v10498_v25  ;;  %v5847_v36 = vunpack.i.l.bf16 %v5846_v8  ;;  %v10502_v0 = vld [vmem:[#allocation60_spill] sm:$0xff]  ;;  %v10503_v8 = vld [vmem:[#allocation33_spill] sm:$0xff]  ;;  %v10504_v35 = vld [vmem:[#allocation62_spill] sm:$0xff] }
 0xb1c   : > { %5417 = vst [vmem:[%s9498_s24 + $0xa8] sm:$0xff] %v5281_v41   ;;  %v3795_v2 = vsel %vm3559_vm2, %v3775_v13, %v10498_v25  ;;  %v3774_v23 = vsel %vm3538_vm1, %v5852_v31, %v10499_v1  ;;  %v3773_v7 = vsel %vm3538_vm1, %v5848_v16, %v10500_v42  ;;  %v5861_v45 = vpop.permute.xlu0 %5860  ;;  %v10505_v13 = vld [vmem:[#allocation41_spill] sm:$0xff] }
 0xb1d   : > { %5416 = vst [vmem:[%s9498_s24 + $0x88] sm:$0xff] %v5276_v14   ;;  %v3794_v6 = vsel %vm3559_vm2, %v3774_v23, %v10499_v1  ;;  %v3793_v5 = vsel %vm3559_vm2, %v3773_v7, %v10500_v42  ;;  %v3772_v11 = vsel %vm3538_vm1, %v5847_v36, %v10501_v32  ;;  %v5863_v22 = vunpack.i.h.bf16 %v5861_v45  ;;  %v5856_v12 = vpop.permute.xlu1 %5855 }
 0xb1e   : > { %v5291_v30 = vpack.c.bf16 %v3795_v2, %v3794_v6  ;;  %v3792_v63 = vsel %vm3559_vm2, %v3772_v11, %v10501_v32  ;;  %v5862_v26 = vunpack.i.l.bf16 %v5861_v45  ;;  %v5858_v59 = vunpack.i.h.bf16 %v5856_v12 }
 0xb1f   : > { %v5286_v56 = vpack.c.bf16 %v3793_v5, %v3792_v63  ;;  %v3779_v54 = vsel %vm3538_vm1, %v5863_v22, %v10502_v0  ;;  %v5857_v19 = vunpack.i.l.bf16 %v5856_v12 }
 0xb20   : > { %5419 = vst [vmem:[%s9498_s24 + $0xe8] sm:$0xff] %v5291_v30   ;;  %v3799_v62 = vsel %vm3559_vm2, %v3779_v54, %v10502_v0  ;;  %v3778_v41 = vsel %vm3538_vm1, %v5862_v26, %v10503_v8  ;;  %v3777_v31 = vsel %vm3538_vm1, %v5858_v59, %v10504_v35  ;;  %v5871_v16 = vpop.permute.xlu0 %5870 }
 0xb21   : > { %5418 = vst [vmem:[%s9498_s24 + $0xc8] sm:$0xff] %v5286_v56   ;;  %v3798_v14 = vsel %vm3559_vm2, %v3778_v41, %v10503_v8  ;;  %v3797_v25 = vsel %vm3559_vm2, %v3777_v31, %v10504_v35  ;;  %v3776_v36 = vsel %vm3538_vm1, %v5857_v19, %v10505_v13  ;;  %v5873_v2 = vunpack.i.h.bf16 %v5871_v16  ;;  %v5866_v1 = vpop.permute.xlu1 %5865 }
 0xb22   : > { %v5301_v23 = vpack.c.bf16 %v3799_v62, %v3798_v14  ;;  %v3796_v42 = vsel %vm3559_vm2, %v3776_v36, %v10505_v13  ;;  %v5872_v7 = vunpack.i.l.bf16 %v5871_v16  ;;  %v5868_v45 = vunpack.i.h.bf16 %v5866_v1 }
 0xb23   : > { %v5296_v6 = vpack.c.bf16 %v3797_v25, %v3796_v42  ;;  %v3984_v5 = vsel %vm3538_vm1, %v9371_v46, %v5873_v2  ;;  %v5867_v32 = vunpack.i.l.bf16 %v5866_v1 }
 0xb24   : > { %5421 = vst [vmem:[%s9498_s24 + $0x128] sm:$0xff] %v5301_v23   ;;  %v4004_v11 = vsel %vm3559_vm2, %v3984_v5, %v5873_v2  ;;  %v3983_v22 = vsel %vm3538_vm1, %v9383_v17, %v5872_v7  ;;  %v3982_v12 = vsel %vm3538_vm1, %v9377_v51, %v5868_v45  ;;  %v5881_v30 = vpop.permute.xlu0 %5880 }
 0xb25   : > { %5420 = vst [vmem:[%s9498_s24 + $0x108] sm:$0xff] %v5296_v6   ;;  %v4003_v63 = vsel %vm3559_vm2, %v3983_v22, %v5872_v7  ;;  %v4002_v26 = vsel %vm3559_vm2, %v3982_v12, %v5868_v45  ;;  %v3981_v46 = vsel %vm3538_vm1, %v9388_v47, %v5867_v32  ;;  %v5883_v59 = vunpack.i.h.bf16 %v5881_v30  ;;  %v5876_v56 = vpop.permute.xlu1 %5875 }
 0xb26   : > { %v5311_v0 = vpack.c.bf16 %v4004_v11, %v4003_v63  ;;  %v4001_v54 = vsel %vm3559_vm2, %v3981_v46, %v5867_v32  ;;  %v5882_v17 = vunpack.i.l.bf16 %v5881_v30  ;;  %v5878_v19 = vunpack.i.h.bf16 %v5876_v56 }
 0xb27   : > { %v5306_v62 = vpack.c.bf16 %v4002_v26, %v4001_v54  ;;  %v3988_v51 = vsel %vm3538_vm1, %v9395_v55, %v5883_v59  ;;  %v5877_v8 = vunpack.i.l.bf16 %v5876_v56 }
 0xb28   : > { %5423 = vst [vmem:[%s9498_s24 + $0x30] sm:$0xff] %v5311_v0   ;;  %v4008_v41 = vsel %vm3559_vm2, %v3988_v51, %v5883_v59  ;;  %v3987_v35 = vsel %vm3538_vm1, %v9405_v27, %v5882_v17  ;;  %v3986_v47 = vsel %vm3538_vm1, %v9401_v21, %v5878_v19  ;;  %v5891_v31 = vpop.permute.xlu0 %5890 }
 0xb29   : > { %5422 = vst [vmem:[%s9498_s24 + $0x10] sm:$0xff] %v5306_v62   ;;  %v4007_v16 = vsel %vm3559_vm2, %v3987_v35, %v5882_v17  ;;  %v4006_v14 = vsel %vm3559_vm2, %v3986_v47, %v5878_v19  ;;  %v3985_v55 = vsel %vm3538_vm1, %v9410_v52, %v5877_v8  ;;  %v5893_v25 = vunpack.i.h.bf16 %v5891_v31  ;;  %v5886_v13 = vpop.permute.xlu1 %5885 }
 0xb2a   : > { %v5321_v36 = vpack.c.bf16 %v4008_v41, %v4007_v16  ;;  %v4005_v2 = vsel %vm3559_vm2, %v3985_v55, %v5877_v8  ;;  %v5892_v27 = vunpack.i.l.bf16 %v5891_v31  ;;  %v5888_v1 = vunpack.i.h.bf16 %v5886_v13 }
 0xb2b   : > { %v5316_v23 = vpack.c.bf16 %v4006_v14, %v4005_v2  ;;  %v3992_v21 = vsel %vm3538_vm1, %v9417_v9, %v5893_v25  ;;  %v5887_v42 = vunpack.i.l.bf16 %v5886_v13 }
 0xb2c   : > { %5425 = vst [vmem:[%s9498_s24 + $0x70] sm:$0xff] %v5321_v36   ;;  %v4012_v7 = vsel %vm3559_vm2, %v3992_v21, %v5893_v25  ;;  %v3991_v45 = vsel %vm3538_vm1, %v9427_v37, %v5892_v27  ;;  %v3990_v52 = vsel %vm3538_vm1, %v9423_v50, %v5888_v1  ;;  %v5901_v6 = vpop.permute.xlu0 %5900 }
 0xb2d   : > { %5424 = vst [vmem:[%s9498_s24 + $0x50] sm:$0xff] %v5316_v23   ;;  %v4011_v5 = vsel %vm3559_vm2, %v3991_v45, %v5892_v27  ;;  %v4010_v32 = vsel %vm3559_vm2, %v3990_v52, %v5888_v1  ;;  %v3989_v9 = vsel %vm3538_vm1, %v9432_v20, %v5887_v42  ;;  %v5903_v11 = vunpack.i.h.bf16 %v5901_v6  ;;  %v5896_v22 = vpop.permute.xlu1 %5895 }
 0xb2e   : > { %v5331_v12 = vpack.c.bf16 %v4012_v7, %v4011_v5  ;;  %v4009_v30 = vsel %vm3559_vm2, %v3989_v9, %v5887_v42  ;;  %v5902_v37 = vunpack.i.l.bf16 %v5901_v6  ;;  %v5898_v63 = vunpack.i.h.bf16 %v5896_v22 }
 0xb2f   : > { %v5326_v26 = vpack.c.bf16 %v4010_v32, %v4009_v30  ;;  %v3996_v50 = vsel %vm3538_vm1, %v9439_v53, %v5903_v11  ;;  %v5897_v46 = vunpack.i.l.bf16 %v5896_v22 }
 0xb30   : > { %5427 = vst [vmem:[%s9498_s24 + $0xb0] sm:$0xff] %v5331_v12   ;;  %v4016_v59 = vsel %vm3559_vm2, %v3996_v50, %v5903_v11  ;;  %v3995_v56 = vsel %vm3538_vm1, %v9449_v39, %v5902_v37  ;;  %v3994_v20 = vsel %vm3538_vm1, %v9445_v3, %v5898_v63  ;;  %v5911_v0 = vpop.permute.xlu0 %5910 }
 0xb31   : > { %5426 = vst [vmem:[%s9498_s24 + $0x90] sm:$0xff] %v5326_v26   ;;  %v4015_v54 = vsel %vm3559_vm2, %v3995_v56, %v5902_v37  ;;  %v4014_v17 = vsel %vm3559_vm2, %v3994_v20, %v5898_v63  ;;  %v3993_v53 = vsel %vm3538_vm1, %v9454_v4, %v5897_v46  ;;  %v5913_v19 = vunpack.i.h.bf16 %v5911_v0  ;;  %v5906_v62 = vpop.permute.xlu1 %5905 }
 0xb32   : > { %v5341_v51 = vpack.c.bf16 %v4016_v59, %v4015_v54  ;;  %v4013_v8 = vsel %vm3559_vm2, %v3993_v53, %v5897_v46  ;;  %v5912_v39 = vunpack.i.l.bf16 %v5911_v0  ;;  %v5908_v41 = vunpack.i.h.bf16 %v5906_v62 }
 0xb33   : > { %v5336_v35 = vpack.c.bf16 %v4014_v17, %v4013_v8  ;;  %v4000_v3 = vsel %vm3538_vm1, %v9461_v58, %v5913_v19  ;;  %v5907_v47 = vunpack.i.l.bf16 %v5906_v62 }
 0xb34   : > { %5429 = vst [vmem:[%s9498_s24 + $0xf0] sm:$0xff] %v5341_v51   ;;  %v4020_v31 = vsel %vm3559_vm2, %v4000_v3, %v5913_v19  ;;  %v3999_v16 = vsel %vm3538_vm1, %v9471_v34, %v5912_v39  ;;  %v3998_v4 = vsel %vm3538_vm1, %v9467_v38, %v5908_v41  ;;  %v5921_v14 = vpop.permute.xlu0 %5920 }
 0xb35   : > { %5428 = vst [vmem:[%s9498_s24 + $0xd0] sm:$0xff] %v5336_v35   ;;  %v4019_v55 = vsel %vm3559_vm2, %v3999_v16, %v5912_v39  ;;  %v4018_v25 = vsel %vm3559_vm2, %v3998_v4, %v5908_v41  ;;  %v3997_v58 = vsel %vm3538_vm1, %v9476_v40, %v5907_v47  ;;  %v5923_v13 = vunpack.i.h.bf16 %v5921_v14  ;;  %v5916_v36 = vpop.permute.xlu1 %5915 }
 0xb36   : > { %v5351_v2 = vpack.c.bf16 %v4020_v31, %v4019_v55  ;;  %v4017_v27 = vsel %vm3559_vm2, %v3997_v58, %v5907_v47  ;;  %v5922_v34 = vunpack.i.l.bf16 %v5921_v14  ;;  %v5918_v1 = vunpack.i.h.bf16 %v5916_v36 }
 0xb37   : > { %v5346_v23 = vpack.c.bf16 %v4018_v25, %v4017_v27  ;;  %v4205_v38 = vsel %vm3538_vm1, %v5923_v13, %v9263_v29  ;;  %v5917_v21 = vunpack.i.l.bf16 %v5916_v36  ;;  %v10506_v25 = vld [vmem:[#allocation79_spill] sm:$0xff] }
 0xb38   : > { %5431 = vst [vmem:[%s9498_s24 + $0x130] sm:$0xff] %v5351_v2   ;;  %v4225_v42 = vsel %vm3559_vm2, %v4205_v38, %v9263_v29  ;;  %v4204_v7 = vsel %vm3538_vm1, %v5922_v34, %v9273_v60  ;;  %v4203_v40 = vsel %vm3538_vm1, %v5918_v1, %v9269_v44  ;;  %v5931_v45 = vpop.permute.xlu0 %5930  ;;  %v10507_v2 = vld [vmem:[#allocation21_spill] sm:$0xff] }
 0xb39   : > { %5430 = vst [vmem:[%s9498_s24 + $0x110] sm:$0xff] %v5346_v23   ;;  %v4224_v52 = vsel %vm3559_vm2, %v4204_v7, %v9273_v60  ;;  %v4223_v6 = vsel %vm3559_vm2, %v4203_v40, %v9269_v44  ;;  %v4202_v5 = vsel %vm3538_vm1, %v5917_v21, %v9278_v33  ;;  %v5933_v29 = vunpack.i.h.bf16 %v5931_v45  ;;  %v5926_v32 = vpop.permute.xlu1 %5925  ;;  %v10508_v7 = vld [vmem:[#allocation81_spill] sm:$0xff] }
 0xb3a   : > { %v5361_v9 = vpack.c.bf16 %v4225_v42, %v4224_v52  ;;  %v4222_v11 = vsel %vm3559_vm2, %v4202_v5, %v9278_v33  ;;  %v5932_v22 = vunpack.i.l.bf16 %v5931_v45  ;;  %v5928_v12 = vunpack.i.h.bf16 %v5926_v32  ;;  %v10509_v52 = vld [vmem:[#allocation19_spill] sm:$0xff]  ;;  %v10510_v5 = vld [vmem:[#allocation30_spill] sm:$0xff] }
 0xb3b   : > { %v5356_v30 = vpack.c.bf16 %v4223_v6, %v4222_v11  ;;  %v4209_v37 = vsel %vm3538_vm1, %v5933_v29, %v9285_v18  ;;  %v5927_v60 = vunpack.i.l.bf16 %v5926_v32  ;;  %v10511_v11 = vld [vmem:[#allocation40_spill] sm:$0xff] }
 0xb3c   : > { %5433 = vst [vmem:[%s9498_s24 + $0x38] sm:$0xff] %v5361_v9   ;;  %v4229_v44 = vsel %vm3559_vm2, %v4209_v37, %v9285_v18  ;;  %v4208_v63 = vsel %vm3538_vm1, %v5932_v22, %v9295_v24  ;;  %v4207_v26 = vsel %vm3538_vm1, %v5928_v12, %v9291_v48  ;;  %v5941_v50 = vpop.permute.xlu0 %5940 }
 0xb3d   : > { %5432 = vst [vmem:[%s9498_s24 + $0x18] sm:$0xff] %v5356_v30   ;;  %v4228_v33 = vsel %vm3559_vm2, %v4208_v63, %v9295_v24  ;;  %v4227_v46 = vsel %vm3559_vm2, %v4207_v26, %v9291_v48  ;;  %v4206_v59 = vsel %vm3538_vm1, %v5927_v60, %v9300_v15  ;;  %v5943_v18 = vunpack.i.h.bf16 %v5941_v50  ;;  %v5936_v56 = vpop.permute.xlu1 %5935 }
 0xb3e   : > { %v5371_v20 = vpack.c.bf16 %v4229_v44, %v4228_v33  ;;  %v4226_v0 = vsel %vm3559_vm2, %v4206_v59, %v9300_v15  ;;  %v5942_v54 = vunpack.i.l.bf16 %v5941_v50  ;;  %v5938_v17 = vunpack.i.h.bf16 %v5936_v56 }
 0xb3f   : > { %v5366_v53 = vpack.c.bf16 %v4227_v46, %v4226_v0  ;;  %v4213_v19 = vsel %vm3538_vm1, %v5943_v18, %v9307_v49  ;;  %v5937_v24 = vunpack.i.l.bf16 %v5936_v56 }
 0xb40   : > { %5435 = vst [vmem:[%s9498_s24 + $0x78] sm:$0xff] %v5371_v20   ;;  %v4233_v48 = vsel %vm3559_vm2, %v4213_v19, %v9307_v49  ;;  %v4212_v62 = vsel %vm3538_vm1, %v5942_v54, %v9317_v61  ;;  %v4211_v51 = vsel %vm3538_vm1, %v5938_v17, %v9313_v57  ;;  %v5951_v8 = vpop.permute.xlu0 %5950 }
 0xb41   : > { %5434 = vst [vmem:[%s9498_s24 + $0x58] sm:$0xff] %v5366_v53   ;;  %v4232_v15 = vsel %vm3559_vm2, %v4212_v62, %v9317_v61  ;;  %v4231_v39 = vsel %vm3559_vm2, %v4211_v51, %v9313_v57  ;;  %v4210_v41 = vsel %vm3538_vm1, %v5937_v24, %v9322_v43  ;;  %v5953_v49 = vunpack.i.h.bf16 %v5951_v8  ;;  %v5946_v35 = vpop.permute.xlu1 %5945 }
 0xb42   : > { %v5381_v3 = vpack.c.bf16 %v4233_v48, %v4232_v15  ;;  %v4230_v47 = vsel %vm3559_vm2, %v4210_v41, %v9322_v43  ;;  %v5952_v31 = vunpack.i.l.bf16 %v5951_v8  ;;  %v5948_v16 = vunpack.i.h.bf16 %v5946_v35 }
 0xb43   : > { %v5376_v4 = vpack.c.bf16 %v4231_v39, %v4230_v47  ;;  %v4217_v14 = vsel %vm3538_vm1, %v5953_v49, %v9329_v28  ;;  %v5947_v61 = vunpack.i.l.bf16 %v5946_v35 }
 0xb44   : > { %5437 = vst [vmem:[%s9498_s24 + $0xb8] sm:$0xff] %v5381_v3   ;;  %v4237_v57 = vsel %vm3559_vm2, %v4217_v14, %v9329_v28  ;;  %v4216_v55 = vsel %vm3538_vm1, %v5952_v31, %v9339_v10  ;;  %v4215_v58 = vsel %vm3538_vm1, %v5948_v16, %v10506_v25  ;;  %v5961_v13 = vpop.permute.xlu0 %5960 }
 0xb45   : > { %5436 = vst [vmem:[%s9498_s24 + $0x98] sm:$0xff] %v5376_v4   ;;  %v4236_v43 = vsel %vm3559_vm2, %v4216_v55, %v9339_v10  ;;  %v4235_v36 = vsel %vm3559_vm2, %v4215_v58, %v10506_v25  ;;  %v4214_v27 = vsel %vm3538_vm1, %v5947_v61, %v10507_v2  ;;  %v5963_v28 = vunpack.i.h.bf16 %v5961_v13  ;;  %v5956_v34 = vpop.permute.xlu1 %5955 }
 0xb46   : > { %v5391_v1 = vpack.c.bf16 %v4237_v57, %v4236_v43  ;;  %v4234_v23 = vsel %vm3559_vm2, %v4214_v27, %v10507_v2  ;;  %v5962_v38 = vunpack.i.l.bf16 %v5961_v13  ;;  %v5958_v21 = vunpack.i.h.bf16 %v5956_v34 }
 0xb47   : > { %v5386_v42 = vpack.c.bf16 %v4235_v36, %v4234_v23  ;;  %v4221_v10 = vsel %vm3538_vm1, %v5963_v28, %v10508_v7  ;;  %v5957_v40 = vunpack.i.l.bf16 %v5956_v34  ;;  %4349 = sbr.rel (!%p10512_p2) target bundleno = 2985 (0xba9), region = 76 }
 0xb48   : > { %5439 = vst [vmem:[%s9498_s24 + $0xf8] sm:$0xff] %v5391_v1   ;;  %v4241_v45 = vsel %vm3559_vm2, %v4221_v10, %v10508_v7  ;;  %v4220_v6 = vsel %vm3538_vm1, %v5962_v38, %v10509_v52  ;;  %v4219_v29 = vsel %vm3538_vm1, %v5958_v21, %v10510_v5 }
 0xb49   : > { %5438 = vst [vmem:[%s9498_s24 + $0xd8] sm:$0xff] %v5386_v42   ;;  %v4240_v32 = vsel %vm3559_vm2, %v4220_v6, %v10509_v52  ;;  %v4239_v9 = vsel %vm3559_vm2, %v4219_v29, %v10510_v5  ;;  %v4218_v22 = vsel %vm3538_vm1, %v5957_v40, %v10511_v11 }
 0xb4a   : > { %v5401_v12 = vpack.c.bf16 %v4241_v45, %v4240_v32  ;;  %v4238_v30 = vsel %vm3559_vm2, %v4218_v22, %v10511_v11 }
 0xb4b   : > { %v5396_v37 = vpack.c.bf16 %v4239_v9, %v4238_v30 }
 0xb4c   : > { %5441 = vst [vmem:[%s9498_s24 + $0x138] sm:$0xff] %v5401_v12  }
 0xb4d   : > { %5440 = vst [vmem:[%s9498_s24 + $0x118] sm:$0xff] %v5396_v37  }
 0xb4e   : > { %s10522_s20 = smov (!%p4352_p3, %s4351_s20), 10 }
 0xb4f   : > { %s5198_s12 = sshll.u32 %s10522_s20, 9  ;;  %s5104_s19 = sshll.u32 %s10522_s20, 3 }
 0xb50   : > { %p5105_p5 = scmp.eq.s32.totalorder %s5198_s12, 0 }
 0xb51   : > { %s9823_s9 = sshrl.u32 (!%p5105_p5), %s5104_s19, 6 }
 0xb52   : > { %4364 = sbr.rel (%p5105_p5) target bundleno = 2985 (0xba9), region = 80  ;;  %p5106_p8 = scmp.le.s32.totalorder (!%p5105_p5), %s9823_s9, 0 }
 0xb59   : > { %4775 = sbr.rel (%p5106_p8) target bundleno = 2964 (0xb94), region = 156  ;;  %s10513_s27 = smov (!%p5106_p8), %s9815_s29 }
 0xb5a   : > { %s10514_s26 = smov (!%p5106_p8), %s9498_s24  ;;  %s9832_s10 = smov (!%p5106_p8), 0  }
 0xb5b   : > { %s9834_s15 = smov (!%p5106_p8), 0  }
 0xb60 LB: >> { %v4380_v60 = vld [vmem:[%s6548_s26] sm:$0xf]  ;;  %v4382_v44 = vld [vmem:[%s6548_s26 + $0x4] sm:$0xf]  ;;  %v4384_v63 = vld [vmem:[%s6548_s26 + $0x8] sm:$0xf]  ;;  %s6556_s15 = sphi %s9834_s15, %s4374_s15   ;;  %s6552_s10 = sphi %s9832_s10, %s10515_s10   ;;  %s6548_s26 = sphi %s10514_s26, %s4513_s26   ;;  %s6544_s27 = sphi %s10513_s27, %s4514_s27  }
 0xb61   : >> { %4381 = vst [vmem:[%s6544_s27] sm:$0xf] %v4380_v60  ;;  %4383 = vst [vmem:[%s6544_s27 + $0x4] sm:$0xf] %v4382_v44  ;;  %v4386_v26 = vld [vmem:[%s6548_s26 + $0xc] sm:$0xf]  ;;  %s4508_s23 = sadd.s32 1, %s6552_s10 }
 0xb62   : >> { %4385 = vst [vmem:[%s6544_s27 + $0x8] sm:$0xf] %v4384_v63  ;;  %v4388_v50 = vld [vmem:[%s6548_s26 + $0x10] sm:$0xf]  ;;  %v4390_v33 = vld [vmem:[%s6548_s26 + $0x14] sm:$0xf]  ;;  %p4509_p10 = scmp.ge.s32.totalorder %s4508_s23, %s9823_s9 }
 0xb63   : >> { %4387 = vst [vmem:[%s6544_s27 + $0xc] sm:$0xf] %v4386_v26  ;;  %4389 = vst [vmem:[%s6544_s27 + $0x10] sm:$0xf] %v4388_v50  ;;  %v4392_v46 = vld [vmem:[%s6548_s26 + $0x18] sm:$0xf] }
 0xb64   : >> { %4391 = vst [vmem:[%s6544_s27 + $0x14] sm:$0xf] %v4390_v33  ;;  %v4394_v59 = vld [vmem:[%s6548_s26 + $0x1c] sm:$0xf]  ;;  %v4396_v18 = vld [vmem:[%s6548_s26 + $0x20] sm:$0xf] }
 0xb65   : >> { %4393 = vst [vmem:[%s6544_s27 + $0x18] sm:$0xf] %v4392_v46  ;;  %4395 = vst [vmem:[%s6544_s27 + $0x1c] sm:$0xf] %v4394_v59  ;;  %v4398_v56 = vld [vmem:[%s6548_s26 + $0x24] sm:$0xf] }
 0xb66   : >> { %4397 = vst [vmem:[%s6544_s27 + $0x20] sm:$0xf] %v4396_v18  ;;  %v4400_v20 = vld [vmem:[%s6548_s26 + $0x28] sm:$0xf]  ;;  %v4402_v0 = vld [vmem:[%s6548_s26 + $0x2c] sm:$0xf] }
 0xb67   : >> { %4399 = vst [vmem:[%s6544_s27 + $0x24] sm:$0xf] %v4398_v56  ;;  %4401 = vst [vmem:[%s6544_s27 + $0x28] sm:$0xf] %v4400_v20  ;;  %v4404_v54 = vld [vmem:[%s6548_s26 + $0x30] sm:$0xf] }
 0xb68   : >> { %4403 = vst [vmem:[%s6544_s27 + $0x2c] sm:$0xf] %v4402_v0  ;;  %v4406_v17 = vld [vmem:[%s6548_s26 + $0x34] sm:$0xf]  ;;  %v4408_v53 = vld [vmem:[%s6548_s26 + $0x38] sm:$0xf] }
 0xb69   : >> { %4405 = vst [vmem:[%s6544_s27 + $0x30] sm:$0xf] %v4404_v54  ;;  %4407 = vst [vmem:[%s6544_s27 + $0x34] sm:$0xf] %v4406_v17  ;;  %v4410_v19 = vld [vmem:[%s6548_s26 + $0x3c] sm:$0xf] }
 0xb6a   : >> { %4409 = vst [vmem:[%s6544_s27 + $0x38] sm:$0xf] %v4408_v53  ;;  %v4412_v24 = vld [vmem:[%s6548_s26 + $0x40] sm:$0xf]  ;;  %v4414_v48 = vld [vmem:[%s6548_s26 + $0x44] sm:$0xf] }
 0xb6b   : >> { %4411 = vst [vmem:[%s6544_s27 + $0x3c] sm:$0xf] %v4410_v19  ;;  %4413 = vst [vmem:[%s6544_s27 + $0x40] sm:$0xf] %v4412_v24  ;;  %v4416_v62 = vld [vmem:[%s6548_s26 + $0x48] sm:$0xf] }
 0xb6c   : >> { %4415 = vst [vmem:[%s6544_s27 + $0x44] sm:$0xf] %v4414_v48  ;;  %v4418_v51 = vld [vmem:[%s6548_s26 + $0x4c] sm:$0xf]  ;;  %v4420_v8 = vld [vmem:[%s6548_s26 + $0x50] sm:$0xf] }
 0xb6d   : >> { %4417 = vst [vmem:[%s6544_s27 + $0x48] sm:$0xf] %v4416_v62  ;;  %4419 = vst [vmem:[%s6544_s27 + $0x4c] sm:$0xf] %v4418_v51  ;;  %v4422_v15 = vld [vmem:[%s6548_s26 + $0x54] sm:$0xf] }
 0xb6e   : >> { %4421 = vst [vmem:[%s6544_s27 + $0x50] sm:$0xf] %v4420_v8  ;;  %v4424_v39 = vld [vmem:[%s6548_s26 + $0x58] sm:$0xf]  ;;  %v4426_v41 = vld [vmem:[%s6548_s26 + $0x5c] sm:$0xf] }
 0xb6f   : >> { %4423 = vst [vmem:[%s6544_s27 + $0x54] sm:$0xf] %v4422_v15  ;;  %4425 = vst [vmem:[%s6544_s27 + $0x58] sm:$0xf] %v4424_v39  ;;  %v4428_v49 = vld [vmem:[%s6548_s26 + $0x60] sm:$0xf] }
 0xb70   : >> { %4427 = vst [vmem:[%s6544_s27 + $0x5c] sm:$0xf] %v4426_v41  ;;  %v4430_v35 = vld [vmem:[%s6548_s26 + $0x64] sm:$0xf]  ;;  %v4432_v3 = vld [vmem:[%s6548_s26 + $0x68] sm:$0xf] }
 0xb71   : >> { %4429 = vst [vmem:[%s6544_s27 + $0x60] sm:$0xf] %v4428_v49  ;;  %4431 = vst [vmem:[%s6544_s27 + $0x64] sm:$0xf] %v4430_v35  ;;  %v4434_v47 = vld [vmem:[%s6548_s26 + $0x6c] sm:$0xf] }
 0xb72   : >> { %4433 = vst [vmem:[%s6544_s27 + $0x68] sm:$0xf] %v4432_v3  ;;  %v4436_v31 = vld [vmem:[%s6548_s26 + $0x70] sm:$0xf]  ;;  %v4438_v16 = vld [vmem:[%s6548_s26 + $0x74] sm:$0xf] }
 0xb73   : >> { %4435 = vst [vmem:[%s6544_s27 + $0x6c] sm:$0xf] %v4434_v47  ;;  %4437 = vst [vmem:[%s6544_s27 + $0x70] sm:$0xf] %v4436_v31  ;;  %v4440_v4 = vld [vmem:[%s6548_s26 + $0x78] sm:$0xf] }
 0xb74   : >> { %4439 = vst [vmem:[%s6544_s27 + $0x74] sm:$0xf] %v4438_v16  ;;  %v4442_v14 = vld [vmem:[%s6548_s26 + $0x7c] sm:$0xf]  ;;  %v4444_v61 = vld [vmem:[%s6548_s26 + $0x80] sm:$0xf] }
 0xb75   : >> { %4441 = vst [vmem:[%s6544_s27 + $0x78] sm:$0xf] %v4440_v4  ;;  %4443 = vst [vmem:[%s6544_s27 + $0x7c] sm:$0xf] %v4442_v14  ;;  %v4446_v57 = vld [vmem:[%s6548_s26 + $0x84] sm:$0xf] }
 0xb76   : >> { %4445 = vst [vmem:[%s6544_s27 + $0x80] sm:$0xf] %v4444_v61  ;;  %v4448_v55 = vld [vmem:[%s6548_s26 + $0x88] sm:$0xf]  ;;  %v4450_v25 = vld [vmem:[%s6548_s26 + $0x8c] sm:$0xf] }
 0xb77   : >> { %4447 = vst [vmem:[%s6544_s27 + $0x84] sm:$0xf] %v4446_v57  ;;  %4449 = vst [vmem:[%s6544_s27 + $0x88] sm:$0xf] %v4448_v55  ;;  %v4452_v58 = vld [vmem:[%s6548_s26 + $0x90] sm:$0xf] }
 0xb78   : >> { %4451 = vst [vmem:[%s6544_s27 + $0x8c] sm:$0xf] %v4450_v25  ;;  %v4454_v13 = vld [vmem:[%s6548_s26 + $0x94] sm:$0xf]  ;;  %v4456_v43 = vld [vmem:[%s6548_s26 + $0x98] sm:$0xf] }
 0xb79   : >> { %4453 = vst [vmem:[%s6544_s27 + $0x90] sm:$0xf] %v4452_v58  ;;  %4455 = vst [vmem:[%s6544_s27 + $0x94] sm:$0xf] %v4454_v13  ;;  %v4458_v36 = vld [vmem:[%s6548_s26 + $0x9c] sm:$0xf] }
 0xb7a   : >> { %4457 = vst [vmem:[%s6544_s27 + $0x98] sm:$0xf] %v4456_v43  ;;  %v4460_v2 = vld [vmem:[%s6548_s26 + $0xa0] sm:$0xf]  ;;  %v4462_v27 = vld [vmem:[%s6548_s26 + $0xa4] sm:$0xf] }
 0xb7b   : >> { %4459 = vst [vmem:[%s6544_s27 + $0x9c] sm:$0xf] %v4458_v36  ;;  %4461 = vst [vmem:[%s6544_s27 + $0xa0] sm:$0xf] %v4460_v2  ;;  %v4464_v28 = vld [vmem:[%s6548_s26 + $0xa8] sm:$0xf] }
 0xb7c   : >> { %4463 = vst [vmem:[%s6544_s27 + $0xa4] sm:$0xf] %v4462_v27  ;;  %v4466_v34 = vld [vmem:[%s6548_s26 + $0xac] sm:$0xf]  ;;  %v4468_v1 = vld [vmem:[%s6548_s26 + $0xb0] sm:$0xf] }
 0xb7d   : >> { %4465 = vst [vmem:[%s6544_s27 + $0xa8] sm:$0xf] %v4464_v28  ;;  %4467 = vst [vmem:[%s6544_s27 + $0xac] sm:$0xf] %v4466_v34  ;;  %v4470_v23 = vld [vmem:[%s6548_s26 + $0xb4] sm:$0xf] }
 0xb7e   : >> { %4469 = vst [vmem:[%s6544_s27 + $0xb0] sm:$0xf] %v4468_v1  ;;  %v4472_v38 = vld [vmem:[%s6548_s26 + $0xb8] sm:$0xf]  ;;  %v4474_v21 = vld [vmem:[%s6548_s26 + $0xbc] sm:$0xf] }
 0xb7f   : >> { %4471 = vst [vmem:[%s6544_s27 + $0xb4] sm:$0xf] %v4470_v23  ;;  %4473 = vst [vmem:[%s6544_s27 + $0xb8] sm:$0xf] %v4472_v38  ;;  %v4476_v42 = vld [vmem:[%s6548_s26 + $0xc0] sm:$0xf] }
 0xb80   : >> { %4475 = vst [vmem:[%s6544_s27 + $0xbc] sm:$0xf] %v4474_v21  ;;  %v4478_v7 = vld [vmem:[%s6548_s26 + $0xc4] sm:$0xf]  ;;  %v4480_v10 = vld [vmem:[%s6548_s26 + $0xc8] sm:$0xf] }
 0xb81   : >> { %4477 = vst [vmem:[%s6544_s27 + $0xc0] sm:$0xf] %v4476_v42  ;;  %4479 = vst [vmem:[%s6544_s27 + $0xc4] sm:$0xf] %v4478_v7  ;;  %v4482_v40 = vld [vmem:[%s6548_s26 + $0xcc] sm:$0xf] }
 0xb82   : >> { %4481 = vst [vmem:[%s6544_s27 + $0xc8] sm:$0xf] %v4480_v10  ;;  %v4484_v45 = vld [vmem:[%s6548_s26 + $0xd0] sm:$0xf]  ;;  %v4486_v52 = vld [vmem:[%s6548_s26 + $0xd4] sm:$0xf] }
 0xb83   : >> { %4483 = vst [vmem:[%s6544_s27 + $0xcc] sm:$0xf] %v4482_v40  ;;  %4485 = vst [vmem:[%s6544_s27 + $0xd0] sm:$0xf] %v4484_v45  ;;  %v4488_v6 = vld [vmem:[%s6548_s26 + $0xd8] sm:$0xf] }
 0xb84   : >> { %4487 = vst [vmem:[%s6544_s27 + $0xd4] sm:$0xf] %v4486_v52  ;;  %v4490_v5 = vld [vmem:[%s6548_s26 + $0xdc] sm:$0xf]  ;;  %v4492_v29 = vld [vmem:[%s6548_s26 + $0xe0] sm:$0xf] }
 0xb85   : >> { %4489 = vst [vmem:[%s6544_s27 + $0xd8] sm:$0xf] %v4488_v6  ;;  %4491 = vst [vmem:[%s6544_s27 + $0xdc] sm:$0xf] %v4490_v5  ;;  %v4494_v32 = vld [vmem:[%s6548_s26 + $0xe4] sm:$0xf] }
 0xb86   : >> { %4493 = vst [vmem:[%s6544_s27 + $0xe0] sm:$0xf] %v4492_v29  ;;  %v4496_v9 = vld [vmem:[%s6548_s26 + $0xe8] sm:$0xf]  ;;  %v4498_v11 = vld [vmem:[%s6548_s26 + $0xec] sm:$0xf] }
 0xb87   : >> { %4495 = vst [vmem:[%s6544_s27 + $0xe4] sm:$0xf] %v4494_v32  ;;  %4497 = vst [vmem:[%s6544_s27 + $0xe8] sm:$0xf] %v4496_v9  ;;  %v4500_v22 = vld [vmem:[%s6548_s26 + $0xf0] sm:$0xf] }
 0xb88   : >> { %4499 = vst [vmem:[%s6544_s27 + $0xec] sm:$0xf] %v4498_v11  ;;  %v4502_v12 = vld [vmem:[%s6548_s26 + $0xf4] sm:$0xf]  ;;  %v4504_v30 = vld [vmem:[%s6548_s26 + $0xf8] sm:$0xf] }
 0xb89   : >> { %4501 = vst [vmem:[%s6544_s27 + $0xf0] sm:$0xf] %v4500_v22  ;;  %4503 = vst [vmem:[%s6544_s27 + $0xf4] sm:$0xf] %v4502_v12  ;;  %v4506_v37 = vld [vmem:[%s6548_s26 + $0xfc] sm:$0xf] }
 0xb8a   : >> { %4505 = vst [vmem:[%s6544_s27 + $0xf8] sm:$0xf] %v4504_v30  ;;  %4507 = vst [vmem:[%s6544_s27 + $0xfc] sm:$0xf] %v4506_v37  ;;  %s10524_s23 = smov (%p4509_p10, %s4508_s23), 0  ;;  %s4374_s15 = sadd.s32 1, %s6556_s15  }
 0xb8b   : >> { %s5107_s14 = sshll.u32 %s10524_s23, 8  ;;  %p4373_p12 = scmp.ge.s32.totalorder %s4374_s15, %s9823_s9 }
 0xb8c   : >> { %s4513_s26 = scalar_lea.vmem %s9498_s24, %s5107_s14 [#allocation12]   ;;  %s4514_s27 = scalar_lea.vmem %s9815_s29, %s5107_s14  }
 0xb8d   : >> { %s10515_s10 = smov %s10524_s23  ;;  %4376 = sbr.rel (!%p4373_p12) target bundleno = 2912 (0xb60), region = 162 }
 0xb94 PF: > { %s9992_s16 = sand.u32 63, %s5104_s19   ;;  %s5201_s17 = sshll.u32 %s9823_s9, 8 }
 0xb95   : > { %s4519_s30 = scalar_lea.vmem %s9498_s24, %s5201_s17 [#allocation12]   ;;  %s4521_s11 = scalar_lea.vmem %s9815_s29, %s5201_s17  }
 0xb96   : > { %p5112_p11 = scmp.le.s32.totalorder %s9992_s16, 0 }
 0xb97   : > { %s6558_s13 = smov (!%p5112_p11), %s4521_s11   ;;  %s6562_s2 = smov (!%p5112_p11), %s4519_s30  }
 0xb98   : > { %4789 = sbr.rel (%p5112_p11) target bundleno = 2985 (0xba9), region = 167  ;;  %s6566_s4 = smov (!%p5112_p11), 0  }
 0xb99   : > { %s6570_s18 = smov (!%p5112_p11), 0  }
 0xb9f LB: >> { %v4531_v60 = vld [vmem:[%s6564_s2] sm:$0xf]  ;;  %s4533_s20 = sadd.s32 1, %s6568_s4  ;;  %s4525_s18 = sadd.s32 1, %s6572_s18   ;;  %s6572_s18 = sphi %s6570_s18, %s4525_s18   ;;  %s6568_s4 = sphi %s6566_s4, %s6567_s4   ;;  %s6564_s2 = sphi %s6562_s2, %s4538_s2   ;;  %s6560_s13 = sphi %s6558_s13, %s4539_s13  }
 0xba0   : >> { %4532 = vst [vmem:[%s6560_s13] sm:$0xf] %v4531_v60  ;;  %p4534_p6 = scmp.ge.s32.totalorder %s4533_s20, %s9992_s16  ;;  %p4524_p4 = scmp.ge.s32.totalorder %s4525_s18, %s9992_s16 }
 0xba2   : >> { %s10526_s20 = smov (%p4534_p6, %s4533_s20), 0  ;;  %4527 = sbr.rel (!%p4524_p4) target bundleno = 2975 (0xb9f), region = 173 }
 0xba3   : >> { %s5113_s24 = sshll.u32 %s10526_s20, 2  ;;  %s6567_s4 = smov %s10526_s20  }
 0xba4   : >> { %s4538_s2 = scalar_lea.vmem %s4519_s30, %s5113_s24 [#allocation12]   ;;  %s4539_s13 = scalar_lea.vmem %s4521_s11, %s5113_s24  }
 0xba9 PF: > { %p18_p7 = scmp.ge.s32.totalorder %s6640_s28, 6   ;;  %s10516_s24 = smov %s6536_s25 }
 0xbaa   : > { %s10517_s25 = smov %s6648_s8  ;;  %s10518_s26 = smov %s6640_s28 }
 0xbab   :  { %20 = sbr.rel (!%p18_p7) target bundleno = 8 (0x8), region = 184 }
 0xbb2   :  { %4726 = vsyncpa [#allocation3], 1 }
 0xbb3   :  { %4728 = vsyncpa [#allocation3 + $0x1], 1 }
 0xbb4   :  { %4729 = vsyncpa [#allocation5], 1 }
 0xbb5   :  { %4730 = vsyncpa [#allocation8], 1 }
 0xbb6   :  { %4731 = vsyncpa [#allocation11], 1 }

</bundles_post_ra>
